<compile_context>
chip_gen: v5e
topology: v5e:2x2
jax: 0.10.0
libtpu: 0.0.40
codegen_flags: <defaults>
</compile_context>

<pallas_src>
import functools

import jax
import jax.numpy as jnp
from jax.experimental import pallas as pl
from jax.experimental.pallas import tpu as pltpu

_NEG_BIG = -1e30


def _round_up(x, m):
    return ((x + m - 1) // m) * m


# ----------------------------------------------------------------------------- kernel
def _decoder_attn_kernel(
    feat_ref,              # (Bt, Pp, E)  pool dtype (bf16; f32 on v5e)
    att1_ref,              # (Bt, Pp, A)  ew dtype   precomputed enc_att(features)+bias
    emb_ref,               # (Tc, Bt, M)  bf16       embeddings for this time chunk
    h0_ref, c0_ref,        # (Bt, Dp) f32            precomputed initial LSTM state
    w_dat_ref, b_da_ref,   # (Dp, A) bf16, (1, A) f32   attention: decoder projection
    w_fa_ref, b_fa_ref,    # (1, A) ew,    (1, 1) f32   attention: score projection
    w_fbt_ref, b_fb_ref,   # (Dp, E) bf16, (1, E) f32   f_beta gate
    w_iet_ref,             # (M, 4Dp) bf16  LSTM input weights (embedding half)
    w_iat_ref,             # (E, 4Dp) bf16  LSTM input weights (attention half)
    w_hht_ref,             # (Dp, 4Dp) bf16 LSTM hidden weights
    b_g_ref,               # (1, 4Dp) f32   b_ih + b_hh (padded per-gate)
    h_out_ref,             # (Tc, Bt, Dp) bf16  per-step hidden state (fc applied outside)
    alpha_ref,             # (Tc, Bt, Pp) f32   per-step attention weights
    h_sc, c_sc,            # (Bt, Dp) f32 VMEM scratch: LSTM state carried across chunks
    *, time_chunk, p_valid):
    feats = feat_ref[...]                                   # (Bt, Pp, E)
    att1 = att1_ref[...]                                    # (Bt, Pp, A)
    Bt, Pp = feats.shape[0], feats.shape[1]
    Dp = h_sc.shape[-1]
    ew = att1.dtype

    # --- init h, c from the XLA-precomputed h0/c0 (first time chunk only) ------------
    @pl.when(pl.program_id(1) == 0)
    def _():
        h_sc[...] = h0_ref[...]
        c_sc[...] = c0_ref[...]

    # Hoist weight loads out of the unrolled step loop.
    w_dat = w_dat_ref[...]
    b_da = b_da_ref[...]
    w_fa = w_fa_ref[...]
    b_fa = b_fa_ref[...]
    w_fbt = w_fbt_ref[...]
    b_fb = b_fb_ref[...]
    w_iet = w_iet_ref[...]
    w_iat = w_iat_ref[...]
    w_hht = w_hht_ref[...]
    b_g = b_g_ref[...]

    # Static mask for padded pixels (P was padded to a multiple of 128 for lane density).
    if p_valid < Pp:
        pix_pad = jax.lax.broadcasted_iota(jnp.int32, (Bt, Pp), 1) >= p_valid
    else:
        pix_pad = None

    def step(tt, carry):
        h = h_sc[...]                                       # (Bt, Dp) f32
        c = c_sc[...]
        h_b = h.astype(jnp.bfloat16)

        # --- soft attention (encoder projection precomputed outside the kernel) ------
        att2 = (jnp.dot(h_b, w_dat, preferred_element_type=jnp.float32)
                + b_da).astype(ew)                                          # (Bt, A)
        e = jax.nn.relu(att1 + att2[:, None, :])                            # (Bt, Pp, A)
        scores = jnp.sum((e * w_fa).astype(jnp.float32), axis=-1) + b_fa    # (Bt, Pp) f32
        if pix_pad is not None:
            scores = jnp.where(pix_pad, _NEG_BIG, scores)
        scores = scores - jnp.max(scores, axis=-1, keepdims=True)
        expv = jnp.exp(scores)
        denom = jnp.sum(expv, axis=-1, keepdims=True)
        alpha = expv * pl.reciprocal(denom, approx=True)                    # (Bt, Pp) f32

        # attention pooling: VPU multiply + sublane reduce (no per-step MXU weight push)
        aw = jnp.sum(alpha[:, :, None] * feats.astype(jnp.float32), axis=1)  # (Bt, E) f32

        # --- f_beta gate --------------------------------------------------------------
        gate = jax.nn.sigmoid(
            jnp.dot(h_b, w_fbt, preferred_element_type=jnp.float32) + b_fb)
        aw = gate * aw

        # --- LSTMCell (PyTorch gate order i, f, g, o); concat removed via split W_ih ---
        emb_t = emb_ref[tt]                                                 # (Bt, M) bf16
        gates = (jnp.dot(emb_t, w_iet, preferred_element_type=jnp.float32)
                 + jnp.dot(aw.astype(jnp.bfloat16), w_iat,
                           preferred_element_type=jnp.float32)
                 + jnp.dot(h_b, w_hht, preferred_element_type=jnp.float32)
                 + b_g)                                                     # (Bt, 4Dp)
        i_g = jax.nn.sigmoid(gates[:, 0:Dp])
        f_g = jax.nn.sigmoid(gates[:, Dp:2 * Dp])
        g_g = jnp.tanh(gates[:, 2 * Dp:3 * Dp])
        o_g = jax.nn.sigmoid(gates[:, 3 * Dp:4 * Dp])
        c_new = f_g * c + i_g * g_g
        h_new = o_g * jnp.tanh(c_new)

        # raw per-step writes; dead rows / padded steps are masked in the wrapper
        h_out_ref[tt] = h_new.astype(h_out_ref.dtype)
        alpha_ref[tt] = alpha
        h_sc[...] = h_new
        c_sc[...] = c_new
        return carry

    jax.lax.fori_loop(0, time_chunk, step, 0, unroll=True)


# ---------------------------------------------------------------- one-time probes
@functools.lru_cache(maxsize=None)
def _single_buffer_supported():
    """Probe (once) whether pl.Buffered(1) is accepted by the installed Pallas."""
    try:
        def _probe(x_ref, o_ref):
            o_ref[...] = x_ref[...] + 1.0
        x = jnp.zeros((8, 128), jnp.float32)
        fn = pl.pallas_call(
            _probe,
            grid=(2,),
            in_specs=[pl.BlockSpec((8, 128), lambda i: (0, 0),
                                   pipeline_mode=pl.Buffered(1))],
            out_specs=pl.BlockSpec((8, 128), lambda i: (0, 0)),
            out_shape=jax.ShapeDtypeStruct((8, 128), jnp.float32),
        )
        jax.block_until_ready(fn(x))
        return True
    except Exception:
        return False


def _vmem_cap_bytes():
    try:
        return int(pltpu.get_tpu_info().vmem_capacity_bytes)
    except Exception:
        return 64 * 1024 * 1024      # v7x per-TensorCore (the smallest across gens)


# ----------------------------------------------------------------------------- wrapper
def decoder_attn_forward(params, features, captions, caption_lengths, *,
                         time_chunk=16, batch_tiles=None):
    """Pallas implementation of DecoderAttn.forward (eval mode)."""
    kind = jax.devices()[0].device_kind.lower()
    # v5e has no native bf16 VALU/EUP: keep the elementwise score chain in f32 there.
    f32_elementwise = "v5" in kind
    single_buffer = _single_buffer_supported()

    B = features.shape[0]
    if batch_tiles is None:
        two_cores = "v7" in kind or "7x" in kind
        batch_tiles = 2 if (two_cores and B % 2 == 0 and (B // 2) % 8 == 0) else 1
    if B % batch_tiles != 0 or (batch_tiles > 1 and (B // batch_tiles) % 8 != 0):
        batch_tiles = 1

    return _decoder_attn_impl(params, features, captions, caption_lengths,
                              int(time_chunk), int(batch_tiles),
                              bool(f32_elementwise), bool(single_buffer))


@functools.partial(jax.jit, static_argnums=(4, 5, 6, 7))
def _decoder_attn_impl(params, features, captions, caption_lengths,
                       time_chunk, batch_tiles, f32_elementwise, single_buffer):
    hp = jax.lax.Precision.HIGHEST
    bf16 = jnp.bfloat16
    f32 = jnp.float32
    ew = f32 if f32_elementwise else bf16      # elementwise dtype for the score chain
    pool_dtype = f32 if f32_elementwise else bf16

    B = features.shape[0]
    E = params["w_h0"].shape[1]
    D = params["w_h0"].shape[0]
    A = params["w_ea"].shape[0]
    M = params["embedding"].shape[1]
    T = captions.shape[1]

    feats = features.reshape(B, -1, E).astype(f32)        # (B, P, E)
    P = feats.shape[1]

    lengths = caption_lengths.reshape(B)
    order = jnp.argsort(-lengths)                         # descending sort, as in the module
    lengths = lengths[order]
    feats = feats[order]
    caps = captions[order]
    decode_lengths = lengths - 1                          # (B,) device array (no host sync)
    mcl = T - 1                                           # static bound; dead steps masked

    # ---- time-invariant work hoisted out of the recurrence (plain XLA) ---------------
    eo = feats.mean(axis=1)                               # (B, E)
    h0 = jnp.dot(eo, params["w_h0"].T, precision=hp) + params["b_h0"]   # (B, D)
    c0 = jnp.dot(eo, params["w_c0"].T, precision=hp) + params["b_c0"]
    att1 = (jnp.einsum("bpe,ae->bpa", feats, params["w_ea"], precision=hp)
            + params["b_ea"])                             # (B, P, A)

    emb = params["embedding"][caps]                       # (B, T, M)
    emb_tbm = jnp.transpose(emb, (1, 0, 2))[:mcl]         # (mcl, B, M)

    # ---- static padding: lane-dense alpha/scores (P) and aligned gate slices (D) -----
    Pp = _round_up(P, 128)
    Dp = _round_up(D, 128)
    feats_p = jnp.pad(feats, ((0, 0), (0, Pp - P), (0, 0)))
    att1_p = jnp.pad(att1, ((0, 0), (0, Pp - P), (0, 0)))
    h0_p = jnp.pad(h0, ((0, 0), (0, Dp - D)))
    c0_p = jnp.pad(c0, ((0, 0), (0, Dp - D)))

    Tc = max(1, min(time_chunk, mcl))
    n_chunks = pl.cdiv(mcl, Tc)
    T_pad = n_chunks * Tc
    if T_pad > mcl:
        emb_tbm = jnp.pad(emb_tbm, ((0, T_pad - mcl), (0, 0), (0, 0)))

    Bt = B // batch_tiles

    def pad_rows(w, n):                      # zero-pad the input (row) dim of (in, out)
        return jnp.pad(w, ((0, n - w.shape[0]), (0, 0)))

    def pad_gate_cols(w_t):                  # (K, 4D) -> (K, 4Dp), per-gate zero pad
        if Dp == D:
            return w_t
        parts = [jnp.pad(w_t[:, k * D:(k + 1) * D], ((0, 0), (0, Dp - D)))
                 for k in range(4)]
        return jnp.concatenate(parts, axis=1)

    w_ih = params["w_ih"]                    # (4D, M+E)
    weights = [
        pad_rows(params["w_da"].T, Dp).astype(bf16),        # (Dp, A)
        params["b_da"].astype(f32),                         # (1, A)
        params["w_fa"].astype(ew),                          # (1, A)
        params["b_fa"].astype(f32),                         # (1, 1)
        pad_rows(params["w_fb"].T, Dp).astype(bf16),        # (Dp, E)
        params["b_fb"].astype(f32),                         # (1, E)
        pad_gate_cols(w_ih[:, :M].T).astype(bf16),          # (M, 4Dp)
        pad_gate_cols(w_ih[:, M:].T).astype(bf16),          # (E, 4Dp)
        pad_rows(pad_gate_cols(params["w_hh"].T), Dp).astype(bf16),   # (Dp, 4Dp)
        pad_gate_cols(params["b_ih"] + params["b_hh"]).astype(f32),   # (1, 4Dp)
    ]

    feats_k = feats_p.astype(pool_dtype)
    att1_k = att1_p.astype(ew)
    emb_k = emb_tbm.astype(bf16)
    h0_k = h0_p.astype(f32)
    c0_k = c0_p.astype(f32)

    const_kwargs = {"pipeline_mode": pl.Buffered(1)} if single_buffer else {}

    def const_spec(shape):
        n = len(shape)
        return pl.BlockSpec(shape, lambda b, c, n=n: (0,) * n, **const_kwargs)

    def batch_spec(shape):
        n = len(shape)
        return pl.BlockSpec(shape, lambda b, c, n=n: (b,) + (0,) * (n - 1),
                            **const_kwargs)

    in_specs = ([batch_spec((Bt, Pp, E)),
                 batch_spec((Bt, Pp, A)),
                 pl.BlockSpec((Tc, Bt, M), lambda b, c: (c, b, 0)),
                 batch_spec((Bt, Dp)),
                 batch_spec((Bt, Dp))]
                + [const_spec(w.shape) for w in weights])
    out_specs = [pl.BlockSpec((Tc, Bt, Dp), lambda b, c: (c, b, 0)),
                 pl.BlockSpec((Tc, Bt, Pp), lambda b, c: (c, b, 0))]

    # ---- VMEM budget from actual resident blocks, clamped to the chip's capacity -----
    const_bufs = 1 if single_buffer else 2
    isz = lambda dt: jnp.dtype(dt).itemsize
    resident = (const_bufs * (Bt * Pp * E * isz(pool_dtype)
                              + Bt * Pp * A * isz(ew)
                              + 2 * Bt * Dp * 4
                              + sum(int(w.size) * w.dtype.itemsize for w in weights))
                + 2 * (Tc * Bt * M * 2)                       # emb, double-buffered
                + 2 * (Tc * Bt * Dp * 2 + Tc * Bt * Pp * 4)   # outputs, double-buffered
                + 2 * (Bt * Dp * 4))                          # h/c scratch
    vmem_cap = _vmem_cap_bytes()
    vmem_limit = int(min(max(2 * resident, 16 * 1024 * 1024),
                         vmem_cap - 8 * 1024 * 1024))

    grid_spec = pltpu.PrefetchScalarGridSpec(
        num_scalar_prefetch=0,
        grid=(batch_tiles, n_chunks),
        in_specs=in_specs,
        out_specs=out_specs,
        scratch_shapes=[pltpu.VMEM((Bt, Dp), jnp.float32),
                        pltpu.VMEM((Bt, Dp), jnp.float32)],
    )
    h_all, alpha_all = pl.pallas_call(
        functools.partial(_decoder_attn_kernel, time_chunk=Tc, p_valid=P),
        grid_spec=grid_spec,
        out_shape=(jax.ShapeDtypeStruct((T_pad, B, Dp), bf16),
                   jax.ShapeDtypeStruct((T_pad, B, Pp), jnp.float32)),
        compiler_params=pltpu.CompilerParams(
            dimension_semantics=("parallel", "arbitrary"),
            vmem_limit_bytes=vmem_limit),
    )(feats_k, att1_k, emb_k, h0_k, c0_k, *weights)

    h_all = h_all[:mcl, :, :D]                            # (mcl, B, D) bf16
    alpha_all = alpha_all[:mcl, :, :P]                    # (mcl, B, P)

    # Vocab projection as one large matmul outside the recurrence; masking reproduces the
    # PyTorch `[:mask]` writes (lengths sorted descending -> dead rows stay zero).
    preds = (jnp.einsum("tbd,vd->tbv", h_all.astype(f32), params["w_fc"], precision=hp)
             + params["b_fc"])                            # (mcl, B, V)
    live = decode_lengths[None, :] > jnp.arange(mcl)[:, None]   # (mcl, B)
    preds = jnp.where(live[:, :, None], preds, 0.0)
    alpha_all = jnp.where(live[:, :, None], alpha_all, 0.0)

    predictions = jnp.transpose(preds, (1, 0, 2))         # (B, mcl, V)
    alphas = jnp.transpose(alpha_all, (1, 0, 2))          # (B, mcl, P)
    return predictions, caps, decode_lengths, alphas


# --------------------------------------------------------------------------- reference
def reference_forward(params, features, captions, caption_lengths):
    """Pure-JAX reference mirroring the PyTorch forward (eval mode)."""
    hp = jax.lax.Precision.HIGHEST
    dot = lambda a, b: jnp.dot(a, b, precision=hp)

    B = features.shape[0]
    E = params["w_h0"].shape[1]
    feats = features.reshape(B, -1, E)
    lengths = caption_lengths.reshape(B)
    order = jnp.argsort(-lengths)
    lengths = lengths[order]
    feats = feats[order]
    caps = captions[order]
    emb = params["embedding"][caps]
    decode_lengths = lengths - 1
    mcl = captions.shape[1] - 1
    P = feats.shape[1]
    V = params["w_fc"].shape[0]

    eo = feats.mean(axis=1)
    h = dot(eo, params["w_h0"].T) + params["b_h0"]
    c = dot(eo, params["w_c0"].T) + params["b_c0"]
    D = h.shape[-1]

    preds_all = jnp.zeros((B, mcl, V), jnp.float32)
    alphas_all = jnp.zeros((B, mcl, P), jnp.float32)
    for t in range(mcl):
        att1 = jnp.einsum("bpe,ae->bpa", feats, params["w_ea"], precision=hp) + params["b_ea"]
        att2 = dot(h, params["w_da"].T) + params["b_da"]
        e = jnp.maximum(att1 + att2[:, None, :], 0.0)
        scores = jnp.sum(e * params["w_fa"], axis=-1) + params["b_fa"]
        scores = scores - scores.max(-1, keepdims=True)
        ex = jnp.exp(scores)
        alpha = ex / ex.sum(-1, keepdims=True)
        aw = jnp.sum(alpha[:, :, None] * feats, axis=1)
        gate = jax.nn.sigmoid(dot(h, params["w_fb"].T) + params["b_fb"])
        aw = gate * aw
        x = jnp.concatenate([emb[:, t, :], aw], axis=-1)
        gates = (dot(x, params["w_ih"].T) + params["b_ih"]
                 + dot(h, params["w_hh"].T) + params["b_hh"])
        i_g = jax.nn.sigmoid(gates[:, :D])
        f_g = jax.nn.sigmoid(gates[:, D:2 * D])
        g_g = jnp.tanh(gates[:, 2 * D:3 * D])
        o_g = jax.nn.sigmoid(gates[:, 3 * D:])
        c = f_g * c + i_g * g_g
        h = o_g * jnp.tanh(c)
        preds = dot(h, params["w_fc"].T) + params["b_fc"]
        live = (decode_lengths > t)[:, None]
        preds_all = preds_all.at[:, t, :].set(jnp.where(live, preds, 0.0))
        alphas_all = alphas_all.at[:, t, :].set(jnp.where(live, alpha, 0.0))
    return preds_all, caps, decode_lengths, alphas_all


# ------------------------------------------------------------------------------- init
def init_params(key, encoder_size, attn_size, embed_size, decoder_size, vocab_size):
    ks = jax.random.split(key, 19)
    u = lambda k, shape: jax.random.uniform(k, shape, jnp.float32, -0.1, 0.1)
    return dict(
        embedding=u(ks[0], (vocab_size, embed_size)),
        w_h0=u(ks[1], (decoder_size, encoder_size)), b_h0=u(ks[2], (1, decoder_size)),
        w_c0=u(ks[3], (decoder_size, encoder_size)), b_c0=u(ks[4], (1, decoder_size)),
        w_ea=u(ks[5], (attn_size, encoder_size)),    b_ea=u(ks[6], (1, attn_size)),
        w_da=u(ks[7], (attn_size, decoder_size)),    b_da=u(ks[8], (1, attn_size)),
        w_fa=u(ks[9], (1, attn_size)),               b_fa=u(ks[10], (1, 1)),
        w_fb=u(ks[11], (encoder_size, decoder_size)), b_fb=u(ks[12], (1, encoder_size)),
        w_ih=u(ks[13], (4 * decoder_size, embed_size + encoder_size)),
        b_ih=u(ks[14], (1, 4 * decoder_size)),
        w_hh=u(ks[15], (4 * decoder_size, decoder_size)),
        b_hh=u(ks[16], (1, 4 * decoder_size)),
        w_fc=u(ks[17], (vocab_size, decoder_size)),  b_fc=u(ks[18], (1, vocab_size)),
    )


# ------------------------------------------------------------------------------- main
if __name__ == "__main__":
    key = jax.random.PRNGKey(0)
    B, H, W = 2, 4, 4
    encoder_size, attn_size = 32, 32      # config.features_img_size, config.attn_size
    embed_size, decoder_size, vocab_size = 16, 32, 24
    T = 8                                  # max caption length

    kp, kf, kc = jax.random.split(key, 3)
    params = init_params(kp, encoder_size, attn_size, embed_size, decoder_size, vocab_size)

    features = jax.random.normal(kf, (B, H, W, encoder_size), jnp.float32)
    captions = jax.random.randint(kc, (B, T), 0, vocab_size, dtype=jnp.int32)
    caption_lengths = jnp.array([[6], [8]], dtype=jnp.int32)

    # time_chunk=4 with mcl=7 exercises the multi-chunk path + padded-step masking.
    preds, caps_sorted, dec_lens, alphas = decoder_attn_forward(
        params, features, captions, caption_lengths, time_chunk=4, batch_tiles=1)
    jax.block_until_ready(preds)
    jax.block_until_ready(alphas)

    preds_r, caps_r, dec_r, alphas_r = reference_forward(
        params, features, captions, caption_lengths)

    assert preds.shape == preds_r.shape and alphas.shape == alphas_r.shape
    assert jnp.allclose(preds, preds_r, atol=2e-2, rtol=2e-2), "predictions mismatch"
    assert jnp.allclose(alphas, alphas_r, atol=2e-2, rtol=2e-2), "alphas mismatch"
    assert bool(jnp.all(caps_sorted == caps_r))
    assert bool(jnp.all(dec_lens == dec_r))

    print("KERNEL_OK")
</pallas_src>

<mosaic_0001>
module attributes {stable_mosaic.version = 11 : i64} {
  func.func @_probe(%arg0: i32, %arg1: memref<8x128xf32, #tpu.memory_space<vmem>>, %arg2: memref<8x128xf32, #tpu.memory_space<vmem>>) attributes {dimension_semantics = [#tpu.dimension_semantics<arbitrary>], iteration_bounds = array<i64: 2>, scalar_prefetch = 0 : i64, scratch_operands = 0 : i64, tpu.core_type = #tpu.core_type<tc>, window_params = [{pipeline_mode = #tpu.pipeline_mode<synchronous>, transform_indices = @transform_0, window_bounds = array<i64: 8, 128>}, {pipeline_mode = #tpu.pipeline_mode<synchronous>, transform_indices = @transform_1, window_bounds = array<i64: 8, 128>}]} {
    %c0 = arith.constant 0 : index
    %c0_0 = arith.constant 0 : index
    %0 = vector.load %arg1[%c0, %c0_0] : memref<8x128xf32, #tpu.memory_space<vmem>>, vector<8x128xf32>
    %cst = arith.constant 1.000000e+00 : f32
    %1 = vector.broadcast %cst : f32 to vector<8x128xf32>
    %2 = arith.addf %0, %1 : vector<8x128xf32>
    %c0_1 = arith.constant 0 : index
    %c0_2 = arith.constant 0 : index
    %3 = vector.load %arg2[%c0_1, %c0_2] : memref<8x128xf32, #tpu.memory_space<vmem>>, vector<8x128xf32>
    tpu.vector_store %arg2[%c0_1, %c0_2], %2 {strides = array<i32>} : memref<8x128xf32, #tpu.memory_space<vmem>>, vector<8x128xf32>,
    return
  }
  func.func @transform_0(%arg0: i32) -> (i32, i32) {
    %c0_i32 = arith.constant 0 : i32
    %c0_i32_0 = arith.constant 0 : i32
    %c0_i32_1 = arith.constant 0 : i32
    return %c0_i32, %c0_i32_0 : i32, i32
  }
  func.func @transform_1(%arg0: i32) -> (i32, i32) {
    %c0_i32 = arith.constant 0 : i32
    %c0_i32_0 = arith.constant 0 : i32
    %c0_i32_1 = arith.constant 0 : i32
    return %c0_i32, %c0_i32_0 : i32, i32
  }
}

module attributes {stable_mosaic.version = 11 : i64} {
  func.func @_decoder_attn_kernel(%arg0: i32, %arg1: i32, %arg2: memref<2x128x32xbf16, #tpu.memory_space<vmem>>, %arg3: memref<2x128x32xbf16, #tpu.memory_space<vmem>>, %arg4: memref<4x2x16xbf16, #tpu.memory_space<vmem>>, %arg5: memref<2x128xf32, #tpu.memory_space<vmem>>, %arg6: memref<2x128xf32, #tpu.memory_space<vmem>>, %arg7: memref<128x32xbf16, #tpu.memory_space<vmem>>, %arg8: memref<1x32xf32, #tpu.memory_space<vmem>>, %arg9: memref<1x32xbf16, #tpu.memory_space<vmem>>, %arg10: memref<1x1xf32, #tpu.memory_space<vmem>>, %arg11: memref<128x32xbf16, #tpu.memory_space<vmem>>, %arg12: memref<1x32xf32, #tpu.memory_space<vmem>>, %arg13: memref<16x512xbf16, #tpu.memory_space<vmem>>, %arg14: memref<32x512xbf16, #tpu.memory_space<vmem>>, %arg15: memref<128x512xbf16, #tpu.memory_space<vmem>>, %arg16: memref<1x512xf32, #tpu.memory_space<vmem>>, %arg17: memref<4x2x128xbf16, #tpu.memory_space<vmem>>, %arg18: memref<4x2x128xf32, #tpu.memory_space<vmem>>, %arg19: memref<2x128xf32, #tpu.memory_space<vmem>>, %arg20: memref<2x128xf32, #tpu.memory_space<vmem>>) attributes {dimension_semantics = [#tpu.dimension_semantics<parallel>, #tpu.dimension_semantics<arbitrary>], iteration_bounds = array<i64: 1, 2>, scalar_prefetch = 0 : i64, scratch_operands = 2 : i64, tpu.core_type = #tpu.core_type<tc>, window_params = [{transform_indices = @transform_0, window_bounds = array<i64: 2, 128, 32>}, {transform_indices = @transform_1, window_bounds = array<i64: 2, 128, 32>}, {transform_indices = @transform_2, window_bounds = array<i64: 4, 2, 16>}, {transform_indices = @transform_3, window_bounds = array<i64: 2, 128>}, {transform_indices = @transform_4, window_bounds = array<i64: 2, 128>}, {pipeline_mode = #tpu.pipeline_mode<synchronous>, transform_indices = @transform_5, window_bounds = array<i64: 128, 32>}, {pipeline_mode = #tpu.pipeline_mode<synchronous>, transform_indices = @transform_6, window_bounds = array<i64: 1, 32>}, {pipeline_mode = #tpu.pipeline_mode<synchronous>, transform_indices = @transform_7, window_bounds = array<i64: 1, 32>}, {pipeline_mode = #tpu.pipeline_mode<synchronous>, transform_indices = @transform_8, window_bounds = array<i64: 1, 1>}, {pipeline_mode = #tpu.pipeline_mode<synchronous>, transform_indices = @transform_9, window_bounds = array<i64: 128, 32>}, {pipeline_mode = #tpu.pipeline_mode<synchronous>, transform_indices = @transform_10, window_bounds = array<i64: 1, 32>}, {pipeline_mode = #tpu.pipeline_mode<synchronous>, transform_indices = @transform_11, window_bounds = array<i64: 16, 512>}, {pipeline_mode = #tpu.pipeline_mode<synchronous>, transform_indices = @transform_12, window_bounds = array<i64: 32, 512>}, {pipeline_mode = #tpu.pipeline_mode<synchronous>, transform_indices = @transform_13, window_bounds = array<i64: 128, 512>}, {pipeline_mode = #tpu.pipeline_mode<synchronous>, transform_indices = @transform_14, window_bounds = array<i64: 1, 512>}, {transform_indices = @transform_15, window_bounds = array<i64: 4, 2, 128>}, {transform_indices = @transform_16, window_bounds = array<i64: 4, 2, 128>}]} {
    %c0 = arith.constant 0 : index
    %c0_0 = arith.constant 0 : index
    %c0_1 = arith.constant 0 : index
    %0 = vector.load %arg2[%c0, %c0_0, %c0_1] : memref<2x128x32xbf16, #tpu.memory_space<vmem>>, vector<2x128x32xbf16>
    %c0_2 = arith.constant 0 : index
    %c0_3 = arith.constant 0 : index
    %c0_4 = arith.constant 0 : index
    %1 = vector.load %arg3[%c0_2, %c0_3, %c0_4] : memref<2x128x32xbf16, #tpu.memory_space<vmem>>, vector<2x128x32xbf16>
    %c0_i32 = arith.constant 0 : i32
    %2 = arith.cmpi eq, %arg1, %c0_i32 : i32
    %3 = arith.extui %2 : i1 to i32
    %c0_i32_5 = arith.constant 0 : i32
    %4 = arith.cmpi ne, %3, %c0_i32_5 : i32
    scf.if %4 {
      %c0_142 = arith.constant 0 : index
      %c0_143 = arith.constant 0 : index
      %386 = vector.load %arg5[%c0_142, %c0_143] : memref<2x128xf32, #tpu.memory_space<vmem>>, vector<2x128xf32>
      %c0_144 = arith.constant 0 : index
      %c0_145 = arith.constant 0 : index
      %387 = vector.load %arg19[%c0_144, %c0_145] : memref<2x128xf32, #tpu.memory_space<vmem>>, vector<2x128xf32>
      tpu.vector_store %arg19[%c0_144, %c0_145], %386 {strides = array<i32>} : memref<2x128xf32, #tpu.memory_space<vmem>>, vector<2x128xf32>,
      %c0_146 = arith.constant 0 : index
      %c0_147 = arith.constant 0 : index
      %388 = vector.load %arg6[%c0_146, %c0_147] : memref<2x128xf32, #tpu.memory_space<vmem>>, vector<2x128xf32>
      %c0_148 = arith.constant 0 : index
      %c0_149 = arith.constant 0 : index
      %389 = vector.load %arg20[%c0_148, %c0_149] : memref<2x128xf32, #tpu.memory_space<vmem>>, vector<2x128xf32>
      tpu.vector_store %arg20[%c0_148, %c0_149], %388 {strides = array<i32>} : memref<2x128xf32, #tpu.memory_space<vmem>>, vector<2x128xf32>,
    } else {
    }
    %c0_6 = arith.constant 0 : index
    %c0_7 = arith.constant 0 : index
    %5 = vector.load %arg7[%c0_6, %c0_7] : memref<128x32xbf16, #tpu.memory_space<vmem>>, vector<128x32xbf16>
    %c0_8 = arith.constant 0 : index
    %c0_9 = arith.constant 0 : index
    %6 = vector.load %arg8[%c0_8, %c0_9] : memref<1x32xf32, #tpu.memory_space<vmem>>, vector<1x32xf32>
    %c0_10 = arith.constant 0 : index
    %c0_11 = arith.constant 0 : index
    %7 = vector.load %arg9[%c0_10, %c0_11] : memref<1x32xbf16, #tpu.memory_space<vmem>>, vector<1x32xbf16>
    %c0_12 = arith.constant 0 : index
    %c0_13 = arith.constant 0 : index
    %8 = vector.load %arg10[%c0_12, %c0_13] : memref<1x1xf32, #tpu.memory_space<vmem>>, vector<1x1xf32>
    %c0_14 = arith.constant 0 : index
    %c0_15 = arith.constant 0 : index
    %9 = vector.load %arg11[%c0_14, %c0_15] : memref<128x32xbf16, #tpu.memory_space<vmem>>, vector<128x32xbf16>
    %c0_16 = arith.constant 0 : index
    %c0_17 = arith.constant 0 : index
    %10 = vector.load %arg12[%c0_16, %c0_17] : memref<1x32xf32, #tpu.memory_space<vmem>>, vector<1x32xf32>
    %c0_18 = arith.constant 0 : index
    %c0_19 = arith.constant 0 : index
    %11 = vector.load %arg13[%c0_18, %c0_19] : memref<16x512xbf16, #tpu.memory_space<vmem>>, vector<16x512xbf16>
    %c0_20 = arith.constant 0 : index
    %c0_21 = arith.constant 0 : index
    %12 = vector.load %arg14[%c0_20, %c0_21] : memref<32x512xbf16, #tpu.memory_space<vmem>>, vector<32x512xbf16>
    %c0_22 = arith.constant 0 : index
    %c0_23 = arith.constant 0 : index
    %13 = vector.load %arg15[%c0_22, %c0_23] : memref<128x512xbf16, #tpu.memory_space<vmem>>, vector<128x512xbf16>
    %c0_24 = arith.constant 0 : index
    %c0_25 = arith.constant 0 : index
    %14 = vector.load %arg16[%c0_24, %c0_25] : memref<1x512xf32, #tpu.memory_space<vmem>>, vector<1x512xf32>
    %15 = tpu.iota {dimensions = array<i32: 1>} : vector<2x128xi32>
    %c16_i32 = arith.constant 16 : i32
    %16 = vector.broadcast %c16_i32 : i32 to vector<2x128xi32>
    %17 = arith.cmpi sge, %15, %16 : vector<2x128xi32>
    %c0_i32_26 = arith.constant 0 : i32
    %c0_27 = arith.constant 0 : index
    %c0_28 = arith.constant 0 : index
    %18 = vector.load %arg19[%c0_27, %c0_28] : memref<2x128xf32, #tpu.memory_space<vmem>>, vector<2x128xf32>
    %c0_29 = arith.constant 0 : index
    %c0_30 = arith.constant 0 : index
    %19 = vector.load %arg20[%c0_29, %c0_30] : memref<2x128xf32, #tpu.memory_space<vmem>>, vector<2x128xf32>
    %20 = arith.truncf %18 : vector<2x128xf32> to vector<2x128xbf16>
    %cst = arith.constant dense<0.000000e+00> : vector<2x32xf32>
    %21 = tpu.matmul %20, %5, %cst {dimension_numbers = #tpu.dot_dimension_numbers<[1], [0], [0], [1], [0, 0, 1, 1], [], []>} : vector<2x128xbf16>, vector<128x32xbf16>, vector<2x32xf32> -> vector<2x32xf32>
    %22 = vector.broadcast %6 : vector<1x32xf32> to vector<2x32xf32>
    %23 = arith.addf %21, %22 : vector<2x32xf32>
    %24 = arith.truncf %23 : vector<2x32xf32> to vector<2x32xbf16>
    %25 = vector.shape_cast %24 : vector<2x32xbf16> to vector<2x1x32xbf16>
    %26 = vector.broadcast %25 : vector<2x1x32xbf16> to vector<2x128x32xbf16>
    %27 = arith.addf %1, %26 : vector<2x128x32xbf16>
    %cst_31 = arith.constant 0.000000e+00 : bf16
    %28 = vector.broadcast %cst_31 : bf16 to vector<2x128x32xbf16>
    %29 = arith.maximumf %27, %28 : vector<2x128x32xbf16>
    %30 = vector.shape_cast %7 : vector<1x32xbf16> to vector<1x1x32xbf16>
    %31 = vector.broadcast %30 : vector<1x1x32xbf16> to vector<2x128x32xbf16>
    %32 = arith.mulf %29, %31 : vector<2x128x32xbf16>
    %33 = arith.extf %32 : vector<2x128x32xbf16> to vector<2x128x32xf32>
    %cst_32 = arith.constant dense<0.000000e+00> : vector<2x128xf32>
    %34 = vector.multi_reduction <add>, %33, %cst_32 [2] : vector<2x128x32xf32> to vector<2x128xf32>
    %35 = vector.broadcast %8 : vector<1x1xf32> to vector<2x128xf32>
    %36 = arith.addf %34, %35 : vector<2x128xf32>
    %cst_33 = arith.constant -1.000000e+30 : f32
    %37 = vector.broadcast %cst_33 : f32 to vector<2x128xf32>
    %38 = arith.select %17, %37, %36 : vector<2x128xi1>, vector<2x128xf32>
    %cst_34 = arith.constant dense<0xFF800000> : vector<2xf32>
    %39 = vector.multi_reduction <maximumf>, %38, %cst_34 [1] : vector<2x128xf32> to vector<2xf32>
    %40 = vector.shape_cast %39 : vector<2xf32> to vector<2x1xf32>
    %41 = vector.broadcast %40 : vector<2x1xf32> to vector<2x128xf32>
    %42 = arith.subf %38, %41 : vector<2x128xf32>
    %43 = math.exp %42 : vector<2x128xf32>
    %cst_35 = arith.constant dense<0.000000e+00> : vector<2xf32>
    %44 = vector.multi_reduction <add>, %43, %cst_35 [1] : vector<2x128xf32> to vector<2xf32>
    %45 = vector.shape_cast %44 : vector<2xf32> to vector<2x1xf32>
    %46 = tpu.reciprocal %45 {approx = true} : vector<2x1xf32> -> vector<2x1xf32>
    %47 = vector.broadcast %46 : vector<2x1xf32> to vector<2x128xf32>
    %48 = arith.mulf %43, %47 : vector<2x128xf32>
    %49 = vector.shape_cast %48 : vector<2x128xf32> to vector<2x128x1xf32>
    %50 = arith.extf %0 : vector<2x128x32xbf16> to vector<2x128x32xf32>
    %51 = vector.broadcast %49 : vector<2x128x1xf32> to vector<2x128x32xf32>
    %52 = arith.mulf %51, %50 : vector<2x128x32xf32>
    %cst_36 = arith.constant dense<0.000000e+00> : vector<2x32xf32>
    %53 = vector.multi_reduction <add>, %52, %cst_36 [1] : vector<2x128x32xf32> to vector<2x32xf32>
    %cst_37 = arith.constant dense<0.000000e+00> : vector<2x32xf32>
    %54 = tpu.matmul %20, %9, %cst_37 {dimension_numbers = #tpu.dot_dimension_numbers<[1], [0], [0], [1], [0, 0, 1, 1], [], []>} : vector<2x128xbf16>, vector<128x32xbf16>, vector<2x32xf32> -> vector<2x32xf32>
    %55 = vector.broadcast %10 : vector<1x32xf32> to vector<2x32xf32>
    %56 = arith.addf %54, %55 : vector<2x32xf32>
    %57 = arith.negf %56 : vector<2x32xf32>
    %58 = math.exp %57 : vector<2x32xf32>
    %cst_38 = arith.constant 1.000000e+00 : f32
    %59 = vector.broadcast %cst_38 : f32 to vector<2x32xf32>
    %60 = arith.addf %59, %58 : vector<2x32xf32>
    %61 = arith.divf %59, %60 : vector<2x32xf32>
    %62 = arith.mulf %61, %53 : vector<2x32xf32>
    %63 = arith.index_cast %c0_i32_26 : i32 to index
    %c0_39 = arith.constant 0 : index
    %c0_40 = arith.constant 0 : index
    %64 = vector.load %arg4[%63, %c0_39, %c0_40] : memref<4x2x16xbf16, #tpu.memory_space<vmem>>, vector<1x2x16xbf16>
    %65 = vector.shape_cast %64 : vector<1x2x16xbf16> to vector<2x16xbf16>
    %cst_41 = arith.constant dense<0.000000e+00> : vector<2x512xf32>
    %66 = tpu.matmul %65, %11, %cst_41 {dimension_numbers = #tpu.dot_dimension_numbers<[1], [0], [0], [1], [0, 0, 1, 1], [], []>} : vector<2x16xbf16>, vector<16x512xbf16>, vector<2x512xf32> -> vector<2x512xf32>
    %67 = arith.truncf %62 : vector<2x32xf32> to vector<2x32xbf16>
    %cst_42 = arith.constant dense<0.000000e+00> : vector<2x512xf32>
    %68 = tpu.matmul %67, %12, %cst_42 {dimension_numbers = #tpu.dot_dimension_numbers<[1], [0], [0], [1], [0, 0, 1, 1], [], []>} : vector<2x32xbf16>, vector<32x512xbf16>, vector<2x512xf32> -> vector<2x512xf32>
    %69 = arith.addf %66, %68 : vector<2x512xf32>
    %cst_43 = arith.constant dense<0.000000e+00> : vector<2x512xf32>
    %70 = tpu.matmul %20, %13, %cst_43 {dimension_numbers = #tpu.dot_dimension_numbers<[1], [0], [0], [1], [0, 0, 1, 1], [], []>} : vector<2x128xbf16>, vector<128x512xbf16>, vector<2x512xf32> -> vector<2x512xf32>
    %71 = arith.addf %69, %70 : vector<2x512xf32>
    %72 = vector.broadcast %14 : vector<1x512xf32> to vector<2x512xf32>
    %73 = arith.addf %71, %72 : vector<2x512xf32>
    %74 = vector.extract_strided_slice %73 {offsets = [0, 0], sizes = [2, 128], strides = [1, 1]} : vector<2x512xf32> to vector<2x128xf32>
    %75 = arith.negf %74 : vector<2x128xf32>
    %76 = math.exp %75 : vector<2x128xf32>
    %cst_44 = arith.constant 1.000000e+00 : f32
    %77 = vector.broadcast %cst_44 : f32 to vector<2x128xf32>
    %78 = arith.addf %77, %76 : vector<2x128xf32>
    %79 = arith.divf %77, %78 : vector<2x128xf32>
    %80 = vector.extract_strided_slice %73 {offsets = [0, 128], sizes = [2, 128], strides = [1, 1]} : vector<2x512xf32> to vector<2x128xf32>
    %81 = arith.negf %80 : vector<2x128xf32>
    %82 = math.exp %81 : vector<2x128xf32>
    %cst_45 = arith.constant 1.000000e+00 : f32
    %83 = vector.broadcast %cst_45 : f32 to vector<2x128xf32>
    %84 = arith.addf %83, %82 : vector<2x128xf32>
    %85 = arith.divf %83, %84 : vector<2x128xf32>
    %86 = vector.extract_strided_slice %73 {offsets = [0, 256], sizes = [2, 128], strides = [1, 1]} : vector<2x512xf32> to vector<2x128xf32>
    %87 = math.tanh %86 : vector<2x128xf32>
    %88 = vector.extract_strided_slice %73 {offsets = [0, 384], sizes = [2, 128], strides = [1, 1]} : vector<2x512xf32> to vector<2x128xf32>
    %89 = arith.negf %88 : vector<2x128xf32>
    %90 = math.exp %89 : vector<2x128xf32>
    %cst_46 = arith.constant 1.000000e+00 : f32
    %91 = vector.broadcast %cst_46 : f32 to vector<2x128xf32>
    %92 = arith.addf %91, %90 : vector<2x128xf32>
    %93 = arith.divf %91, %92 : vector<2x128xf32>
    %94 = arith.mulf %85, %19 : vector<2x128xf32>
    %95 = arith.mulf %79, %87 : vector<2x128xf32>
    %96 = arith.addf %94, %95 : vector<2x128xf32>
    %97 = math.tanh %96 : vector<2x128xf32>
    %98 = arith.mulf %93, %97 : vector<2x128xf32>
    %99 = arith.truncf %98 : vector<2x128xf32> to vector<2x128xbf16>
    %100 = arith.index_cast %c0_i32_26 : i32 to index
    %c0_47 = arith.constant 0 : index
    %c0_48 = arith.constant 0 : index
    %101 = vector.load %arg17[%100, %c0_47, %c0_48] : memref<4x2x128xbf16, #tpu.memory_space<vmem>>, vector<1x2x128xbf16>
    %102 = vector.shape_cast %101 : vector<1x2x128xbf16> to vector<2x128xbf16>
    %103 = vector.shape_cast %99 : vector<2x128xbf16> to vector<1x2x128xbf16>
    tpu.vector_store %arg17[%100, %c0_47, %c0_48], %103 {strides = array<i32>} : memref<4x2x128xbf16, #tpu.memory_space<vmem>>, vector<1x2x128xbf16>,
    %104 = arith.index_cast %c0_i32_26 : i32 to index
    %c0_49 = arith.constant 0 : index
    %c0_50 = arith.constant 0 : index
    %105 = vector.load %arg18[%104, %c0_49, %c0_50] : memref<4x2x128xf32, #tpu.memory_space<vmem>>, vector<1x2x128xf32>
    %106 = vector.shape_cast %105 : vector<1x2x128xf32> to vector<2x128xf32>
    %107 = vector.shape_cast %48 : vector<2x128xf32> to vector<1x2x128xf32>
    tpu.vector_store %arg18[%104, %c0_49, %c0_50], %107 {strides = array<i32>} : memref<4x2x128xf32, #tpu.memory_space<vmem>>, vector<1x2x128xf32>,
    %c0_51 = arith.constant 0 : index
    %c0_52 = arith.constant 0 : index
    %108 = vector.load %arg19[%c0_51, %c0_52] : memref<2x128xf32, #tpu.memory_space<vmem>>, vector<2x128xf32>
    tpu.vector_store %arg19[%c0_51, %c0_52], %98 {strides = array<i32>} : memref<2x128xf32, #tpu.memory_space<vmem>>, vector<2x128xf32>,
    %c0_53 = arith.constant 0 : index
    %c0_54 = arith.constant 0 : index
    %109 = vector.load %arg20[%c0_53, %c0_54] : memref<2x128xf32, #tpu.memory_space<vmem>>, vector<2x128xf32>
    tpu.vector_store %arg20[%c0_53, %c0_54], %96 {strides = array<i32>} : memref<2x128xf32, #tpu.memory_space<vmem>>, vector<2x128xf32>,
    %c1_i32 = arith.constant 1 : i32
    %c0_55 = arith.constant 0 : index
    %c0_56 = arith.constant 0 : index
    %110 = vector.load %arg19[%c0_55, %c0_56] : memref<2x128xf32, #tpu.memory_space<vmem>>, vector<2x128xf32>
    %c0_57 = arith.constant 0 : index
    %c0_58 = arith.constant 0 : index
    %111 = vector.load %arg20[%c0_57, %c0_58] : memref<2x128xf32, #tpu.memory_space<vmem>>, vector<2x128xf32>
    %112 = arith.truncf %110 : vector<2x128xf32> to vector<2x128xbf16>
    %cst_59 = arith.constant dense<0.000000e+00> : vector<2x32xf32>
    %113 = tpu.matmul %112, %5, %cst_59 {dimension_numbers = #tpu.dot_dimension_numbers<[1], [0], [0], [1], [0, 0, 1, 1], [], []>} : vector<2x128xbf16>, vector<128x32xbf16>, vector<2x32xf32> -> vector<2x32xf32>
    %114 = vector.broadcast %6 : vector<1x32xf32> to vector<2x32xf32>
    %115 = arith.addf %113, %114 : vector<2x32xf32>
    %116 = arith.truncf %115 : vector<2x32xf32> to vector<2x32xbf16>
    %117 = vector.shape_cast %116 : vector<2x32xbf16> to vector<2x1x32xbf16>
    %118 = vector.broadcast %117 : vector<2x1x32xbf16> to vector<2x128x32xbf16>
    %119 = arith.addf %1, %118 : vector<2x128x32xbf16>
    %cst_60 = arith.constant 0.000000e+00 : bf16
    %120 = vector.broadcast %cst_60 : bf16 to vector<2x128x32xbf16>
    %121 = arith.maximumf %119, %120 : vector<2x128x32xbf16>
    %122 = vector.shape_cast %7 : vector<1x32xbf16> to vector<1x1x32xbf16>
    %123 = vector.broadcast %122 : vector<1x1x32xbf16> to vector<2x128x32xbf16>
    %124 = arith.mulf %121, %123 : vector<2x128x32xbf16>
    %125 = arith.extf %124 : vector<2x128x32xbf16> to vector<2x128x32xf32>
    %cst_61 = arith.constant dense<0.000000e+00> : vector<2x128xf32>
    %126 = vector.multi_reduction <add>, %125, %cst_61 [2] : vector<2x128x32xf32> to vector<2x128xf32>
    %127 = vector.broadcast %8 : vector<1x1xf32> to vector<2x128xf32>
    %128 = arith.addf %126, %127 : vector<2x128xf32>
    %cst_62 = arith.constant -1.000000e+30 : f32
    %129 = vector.broadcast %cst_62 : f32 to vector<2x128xf32>
    %130 = arith.select %17, %129, %128 : vector<2x128xi1>, vector<2x128xf32>
    %cst_63 = arith.constant dense<0xFF800000> : vector<2xf32>
    %131 = vector.multi_reduction <maximumf>, %130, %cst_63 [1] : vector<2x128xf32> to vector<2xf32>
    %132 = vector.shape_cast %131 : vector<2xf32> to vector<2x1xf32>
    %133 = vector.broadcast %132 : vector<2x1xf32> to vector<2x128xf32>
    %134 = arith.subf %130, %133 : vector<2x128xf32>
    %135 = math.exp %134 : vector<2x128xf32>
    %cst_64 = arith.constant dense<0.000000e+00> : vector<2xf32>
    %136 = vector.multi_reduction <add>, %135, %cst_64 [1] : vector<2x128xf32> to vector<2xf32>
    %137 = vector.shape_cast %136 : vector<2xf32> to vector<2x1xf32>
    %138 = tpu.reciprocal %137 {approx = true} : vector<2x1xf32> -> vector<2x1xf32>
    %139 = vector.broadcast %138 : vector<2x1xf32> to vector<2x128xf32>
    %140 = arith.mulf %135, %139 : vector<2x128xf32>
    %141 = vector.shape_cast %140 : vector<2x128xf32> to vector<2x128x1xf32>
    %142 = arith.extf %0 : vector<2x128x32xbf16> to vector<2x128x32xf32>
    %143 = vector.broadcast %141 : vector<2x128x1xf32> to vector<2x128x32xf32>
    %144 = arith.mulf %143, %142 : vector<2x128x32xf32>
    %cst_65 = arith.constant dense<0.000000e+00> : vector<2x32xf32>
    %145 = vector.multi_reduction <add>, %144, %cst_65 [1] : vector<2x128x32xf32> to vector<2x32xf32>
    %cst_66 = arith.constant dense<0.000000e+00> : vector<2x32xf32>
    %146 = tpu.matmul %112, %9, %cst_66 {dimension_numbers = #tpu.dot_dimension_numbers<[1], [0], [0], [1], [0, 0, 1, 1], [], []>} : vector<2x128xbf16>, vector<128x32xbf16>, vector<2x32xf32> -> vector<2x32xf32>
    %147 = vector.broadcast %10 : vector<1x32xf32> to vector<2x32xf32>
    %148 = arith.addf %146, %147 : vector<2x32xf32>
    %149 = arith.negf %148 : vector<2x32xf32>
    %150 = math.exp %149 : vector<2x32xf32>
    %cst_67 = arith.constant 1.000000e+00 : f32
    %151 = vector.broadcast %cst_67 : f32 to vector<2x32xf32>
    %152 = arith.addf %151, %150 : vector<2x32xf32>
    %153 = arith.divf %151, %152 : vector<2x32xf32>
    %154 = arith.mulf %153, %145 : vector<2x32xf32>
    %155 = arith.index_cast %c1_i32 : i32 to index
    %c0_68 = arith.constant 0 : index
    %c0_69 = arith.constant 0 : index
    %156 = vector.load %arg4[%155, %c0_68, %c0_69] : memref<4x2x16xbf16, #tpu.memory_space<vmem>>, vector<1x2x16xbf16>
    %157 = vector.shape_cast %156 : vector<1x2x16xbf16> to vector<2x16xbf16>
    %cst_70 = arith.constant dense<0.000000e+00> : vector<2x512xf32>
    %158 = tpu.matmul %157, %11, %cst_70 {dimension_numbers = #tpu.dot_dimension_numbers<[1], [0], [0], [1], [0, 0, 1, 1], [], []>} : vector<2x16xbf16>, vector<16x512xbf16>, vector<2x512xf32> -> vector<2x512xf32>
    %159 = arith.truncf %154 : vector<2x32xf32> to vector<2x32xbf16>
    %cst_71 = arith.constant dense<0.000000e+00> : vector<2x512xf32>
    %160 = tpu.matmul %159, %12, %cst_71 {dimension_numbers = #tpu.dot_dimension_numbers<[1], [0], [0], [1], [0, 0, 1, 1], [], []>} : vector<2x32xbf16>, vector<32x512xbf16>, vector<2x512xf32> -> vector<2x512xf32>
    %161 = arith.addf %158, %160 : vector<2x512xf32>
    %cst_72 = arith.constant dense<0.000000e+00> : vector<2x512xf32>
    %162 = tpu.matmul %112, %13, %cst_72 {dimension_numbers = #tpu.dot_dimension_numbers<[1], [0], [0], [1], [0, 0, 1, 1], [], []>} : vector<2x128xbf16>, vector<128x512xbf16>, vector<2x512xf32> -> vector<2x512xf32>
    %163 = arith.addf %161, %162 : vector<2x512xf32>
    %164 = vector.broadcast %14 : vector<1x512xf32> to vector<2x512xf32>
    %165 = arith.addf %163, %164 : vector<2x512xf32>
    %166 = vector.extract_strided_slice %165 {offsets = [0, 0], sizes = [2, 128], strides = [1, 1]} : vector<2x512xf32> to vector<2x128xf32>
    %167 = arith.negf %166 : vector<2x128xf32>
    %168 = math.exp %167 : vector<2x128xf32>
    %cst_73 = arith.constant 1.000000e+00 : f32
    %169 = vector.broadcast %cst_73 : f32 to vector<2x128xf32>
    %170 = arith.addf %169, %168 : vector<2x128xf32>
    %171 = arith.divf %169, %170 : vector<2x128xf32>
    %172 = vector.extract_strided_slice %165 {offsets = [0, 128], sizes = [2, 128], strides = [1, 1]} : vector<2x512xf32> to vector<2x128xf32>
    %173 = arith.negf %172 : vector<2x128xf32>
    %174 = math.exp %173 : vector<2x128xf32>
    %cst_74 = arith.constant 1.000000e+00 : f32
    %175 = vector.broadcast %cst_74 : f32 to vector<2x128xf32>
    %176 = arith.addf %175, %174 : vector<2x128xf32>
    %177 = arith.divf %175, %176 : vector<2x128xf32>
    %178 = vector.extract_strided_slice %165 {offsets = [0, 256], sizes = [2, 128], strides = [1, 1]} : vector<2x512xf32> to vector<2x128xf32>
    %179 = math.tanh %178 : vector<2x128xf32>
    %180 = vector.extract_strided_slice %165 {offsets = [0, 384], sizes = [2, 128], strides = [1, 1]} : vector<2x512xf32> to vector<2x128xf32>
    %181 = arith.negf %180 : vector<2x128xf32>
    %182 = math.exp %181 : vector<2x128xf32>
    %cst_75 = arith.constant 1.000000e+00 : f32
    %183 = vector.broadcast %cst_75 : f32 to vector<2x128xf32>
    %184 = arith.addf %183, %182 : vector<2x128xf32>
    %185 = arith.divf %183, %184 : vector<2x128xf32>
    %186 = arith.mulf %177, %111 : vector<2x128xf32>
    %187 = arith.mulf %171, %179 : vector<2x128xf32>
    %188 = arith.addf %186, %187 : vector<2x128xf32>
    %189 = math.tanh %188 : vector<2x128xf32>
    %190 = arith.mulf %185, %189 : vector<2x128xf32>
    %191 = arith.truncf %190 : vector<2x128xf32> to vector<2x128xbf16>
    %192 = arith.index_cast %c1_i32 : i32 to index
    %c0_76 = arith.constant 0 : index
    %c0_77 = arith.constant 0 : index
    %193 = vector.load %arg17[%192, %c0_76, %c0_77] : memref<4x2x128xbf16, #tpu.memory_space<vmem>>, vector<1x2x128xbf16>
    %194 = vector.shape_cast %193 : vector<1x2x128xbf16> to vector<2x128xbf16>
    %195 = vector.shape_cast %191 : vector<2x128xbf16> to vector<1x2x128xbf16>
    tpu.vector_store %arg17[%192, %c0_76, %c0_77], %195 {strides = array<i32>} : memref<4x2x128xbf16, #tpu.memory_space<vmem>>, vector<1x2x128xbf16>,
    %196 = arith.index_cast %c1_i32 : i32 to index
    %c0_78 = arith.constant 0 : index
    %c0_79 = arith.constant 0 : index
    %197 = vector.load %arg18[%196, %c0_78, %c0_79] : memref<4x2x128xf32, #tpu.memory_space<vmem>>, vector<1x2x128xf32>
    %198 = vector.shape_cast %197 : vector<1x2x128xf32> to vector<2x128xf32>
    %199 = vector.shape_cast %140 : vector<2x128xf32> to vector<1x2x128xf32>
    tpu.vector_store %arg18[%196, %c0_78, %c0_79], %199 {strides = array<i32>} : memref<4x2x128xf32, #tpu.memory_space<vmem>>, vector<1x2x128xf32>,
    %c0_80 = arith.constant 0 : index
    %c0_81 = arith.constant 0 : index
    %200 = vector.load %arg19[%c0_80, %c0_81] : memref<2x128xf32, #tpu.memory_space<vmem>>, vector<2x128xf32>
    tpu.vector_store %arg19[%c0_80, %c0_81], %190 {strides = array<i32>} : memref<2x128xf32, #tpu.memory_space<vmem>>, vector<2x128xf32>,
    %c0_82 = arith.constant 0 : index
    %c0_83 = arith.constant 0 : index
    %201 = vector.load %arg20[%c0_82, %c0_83] : memref<2x128xf32, #tpu.memory_space<vmem>>, vector<2x128xf32>
    tpu.vector_store %arg20[%c0_82, %c0_83], %188 {strides = array<i32>} : memref<2x128xf32, #tpu.memory_space<vmem>>, vector<2x128xf32>,
    %c2_i32 = arith.constant 2 : i32
    %c0_84 = arith.constant 0 : index
    %c0_85 = arith.constant 0 : index
    %202 = vector.load %arg19[%c0_84, %c0_85] : memref<2x128xf32, #tpu.memory_space<vmem>>, vector<2x128xf32>
    %c0_86 = arith.constant 0 : index
    %c0_87 = arith.constant 0 : index
    %203 = vector.load %arg20[%c0_86, %c0_87] : memref<2x128xf32, #tpu.memory_space<vmem>>, vector<2x128xf32>
    %204 = arith.truncf %202 : vector<2x128xf32> to vector<2x128xbf16>
    %cst_88 = arith.constant dense<0.000000e+00> : vector<2x32xf32>
    %205 = tpu.matmul %204, %5, %cst_88 {dimension_numbers = #tpu.dot_dimension_numbers<[1], [0], [0], [1], [0, 0, 1, 1], [], []>} : vector<2x128xbf16>, vector<128x32xbf16>, vector<2x32xf32> -> vector<2x32xf32>
    %206 = vector.broadcast %6 : vector<1x32xf32> to vector<2x32xf32>
    %207 = arith.addf %205, %206 : vector<2x32xf32>
    %208 = arith.truncf %207 : vector<2x32xf32> to vector<2x32xbf16>
    %209 = vector.shape_cast %208 : vector<2x32xbf16> to vector<2x1x32xbf16>
    %210 = vector.broadcast %209 : vector<2x1x32xbf16> to vector<2x128x32xbf16>
    %211 = arith.addf %1, %210 : vector<2x128x32xbf16>
    %cst_89 = arith.constant 0.000000e+00 : bf16
    %212 = vector.broadcast %cst_89 : bf16 to vector<2x128x32xbf16>
    %213 = arith.maximumf %211, %212 : vector<2x128x32xbf16>
    %214 = vector.shape_cast %7 : vector<1x32xbf16> to vector<1x1x32xbf16>
    %215 = vector.broadcast %214 : vector<1x1x32xbf16> to vector<2x128x32xbf16>
    %216 = arith.mulf %213, %215 : vector<2x128x32xbf16>
    %217 = arith.extf %216 : vector<2x128x32xbf16> to vector<2x128x32xf32>
    %cst_90 = arith.constant dense<0.000000e+00> : vector<2x128xf32>
    %218 = vector.multi_reduction <add>, %217, %cst_90 [2] : vector<2x128x32xf32> to vector<2x128xf32>
    %219 = vector.broadcast %8 : vector<1x1xf32> to vector<2x128xf32>
    %220 = arith.addf %218, %219 : vector<2x128xf32>
    %cst_91 = arith.constant -1.000000e+30 : f32
    %221 = vector.broadcast %cst_91 : f32 to vector<2x128xf32>
    %222 = arith.select %17, %221, %220 : vector<2x128xi1>, vector<2x128xf32>
    %cst_92 = arith.constant dense<0xFF800000> : vector<2xf32>
    %223 = vector.multi_reduction <maximumf>, %222, %cst_92 [1] : vector<2x128xf32> to vector<2xf32>
    %224 = vector.shape_cast %223 : vector<2xf32> to vector<2x1xf32>
    %225 = vector.broadcast %224 : vector<2x1xf32> to vector<2x128xf32>
    %226 = arith.subf %222, %225 : vector<2x128xf32>
    %227 = math.exp %226 : vector<2x128xf32>
    %cst_93 = arith.constant dense<0.000000e+00> : vector<2xf32>
    %228 = vector.multi_reduction <add>, %227, %cst_93 [1] : vector<2x128xf32> to vector<2xf32>
    %229 = vector.shape_cast %228 : vector<2xf32> to vector<2x1xf32>
    %230 = tpu.reciprocal %229 {approx = true} : vector<2x1xf32> -> vector<2x1xf32>
    %231 = vector.broadcast %230 : vector<2x1xf32> to vector<2x128xf32>
    %232 = arith.mulf %227, %231 : vector<2x128xf32>
    %233 = vector.shape_cast %232 : vector<2x128xf32> to vector<2x128x1xf32>
    %234 = arith.extf %0 : vector<2x128x32xbf16> to vector<2x128x32xf32>
    %235 = vector.broadcast %233 : vector<2x128x1xf32> to vector<2x128x32xf32>
    %236 = arith.mulf %235, %234 : vector<2x128x32xf32>
    %cst_94 = arith.constant dense<0.000000e+00> : vector<2x32xf32>
    %237 = vector.multi_reduction <add>, %236, %cst_94 [1] : vector<2x128x32xf32> to vector<2x32xf32>
    %cst_95 = arith.constant dense<0.000000e+00> : vector<2x32xf32>
    %238 = tpu.matmul %204, %9, %cst_95 {dimension_numbers = #tpu.dot_dimension_numbers<[1], [0], [0], [1], [0, 0, 1, 1], [], []>} : vector<2x128xbf16>, vector<128x32xbf16>, vector<2x32xf32> -> vector<2x32xf32>
    %239 = vector.broadcast %10 : vector<1x32xf32> to vector<2x32xf32>
    %240 = arith.addf %238, %239 : vector<2x32xf32>
    %241 = arith.negf %240 : vector<2x32xf32>
    %242 = math.exp %241 : vector<2x32xf32>
    %cst_96 = arith.constant 1.000000e+00 : f32
    %243 = vector.broadcast %cst_96 : f32 to vector<2x32xf32>
    %244 = arith.addf %243, %242 : vector<2x32xf32>
    %245 = arith.divf %243, %244 : vector<2x32xf32>
    %246 = arith.mulf %245, %237 : vector<2x32xf32>
    %247 = arith.index_cast %c2_i32 : i32 to index
    %c0_97 = arith.constant 0 : index
    %c0_98 = arith.constant 0 : index
    %248 = vector.load %arg4[%247, %c0_97, %c0_98] : memref<4x2x16xbf16, #tpu.memory_space<vmem>>, vector<1x2x16xbf16>
    %249 = vector.shape_cast %248 : vector<1x2x16xbf16> to vector<2x16xbf16>
    %cst_99 = arith.constant dense<0.000000e+00> : vector<2x512xf32>
    %250 = tpu.matmul %249, %11, %cst_99 {dimension_numbers = #tpu.dot_dimension_numbers<[1], [0], [0], [1], [0, 0, 1, 1], [], []>} : vector<2x16xbf16>, vector<16x512xbf16>, vector<2x512xf32> -> vector<2x512xf32>
    %251 = arith.truncf %246 : vector<2x32xf32> to vector<2x32xbf16>
    %cst_100 = arith.constant dense<0.000000e+00> : vector<2x512xf32>
    %252 = tpu.matmul %251, %12, %cst_100 {dimension_numbers = #tpu.dot_dimension_numbers<[1], [0], [0], [1], [0, 0, 1, 1], [], []>} : vector<2x32xbf16>, vector<32x512xbf16>, vector<2x512xf32> -> vector<2x512xf32>
    %253 = arith.addf %250, %252 : vector<2x512xf32>
    %cst_101 = arith.constant dense<0.000000e+00> : vector<2x512xf32>
    %254 = tpu.matmul %204, %13, %cst_101 {dimension_numbers = #tpu.dot_dimension_numbers<[1], [0], [0], [1], [0, 0, 1, 1], [], []>} : vector<2x128xbf16>, vector<128x512xbf16>, vector<2x512xf32> -> vector<2x512xf32>
    %255 = arith.addf %253, %254 : vector<2x512xf32>
    %256 = vector.broadcast %14 : vector<1x512xf32> to vector<2x512xf32>
    %257 = arith.addf %255, %256 : vector<2x512xf32>
    %258 = vector.extract_strided_slice %257 {offsets = [0, 0], sizes = [2, 128], strides = [1, 1]} : vector<2x512xf32> to vector<2x128xf32>
    %259 = arith.negf %258 : vector<2x128xf32>
    %260 = math.exp %259 : vector<2x128xf32>
    %cst_102 = arith.constant 1.000000e+00 : f32
    %261 = vector.broadcast %cst_102 : f32 to vector<2x128xf32>
    %262 = arith.addf %261, %260 : vector<2x128xf32>
    %263 = arith.divf %261, %262 : vector<2x128xf32>
    %264 = vector.extract_strided_slice %257 {offsets = [0, 128], sizes = [2, 128], strides = [1, 1]} : vector<2x512xf32> to vector<2x128xf32>
    %265 = arith.negf %264 : vector<2x128xf32>
    %266 = math.exp %265 : vector<2x128xf32>
    %cst_103 = arith.constant 1.000000e+00 : f32
    %267 = vector.broadcast %cst_103 : f32 to vector<2x128xf32>
    %268 = arith.addf %267, %266 : vector<2x128xf32>
    %269 = arith.divf %267, %268 : vector<2x128xf32>
    %270 = vector.extract_strided_slice %257 {offsets = [0, 256], sizes = [2, 128], strides = [1, 1]} : vector<2x512xf32> to vector<2x128xf32>
    %271 = math.tanh %270 : vector<2x128xf32>
    %272 = vector.extract_strided_slice %257 {offsets = [0, 384], sizes = [2, 128], strides = [1, 1]} : vector<2x512xf32> to vector<2x128xf32>
    %273 = arith.negf %272 : vector<2x128xf32>
    %274 = math.exp %273 : vector<2x128xf32>
    %cst_104 = arith.constant 1.000000e+00 : f32
    %275 = vector.broadcast %cst_104 : f32 to vector<2x128xf32>
    %276 = arith.addf %275, %274 : vector<2x128xf32>
    %277 = arith.divf %275, %276 : vector<2x128xf32>
    %278 = arith.mulf %269, %203 : vector<2x128xf32>
    %279 = arith.mulf %263, %271 : vector<2x128xf32>
    %280 = arith.addf %278, %279 : vector<2x128xf32>
    %281 = math.tanh %280 : vector<2x128xf32>
    %282 = arith.mulf %277, %281 : vector<2x128xf32>
    %283 = arith.truncf %282 : vector<2x128xf32> to vector<2x128xbf16>
    %284 = arith.index_cast %c2_i32 : i32 to index
    %c0_105 = arith.constant 0 : index
    %c0_106 = arith.constant 0 : index
    %285 = vector.load %arg17[%284, %c0_105, %c0_106] : memref<4x2x128xbf16, #tpu.memory_space<vmem>>, vector<1x2x128xbf16>
    %286 = vector.shape_cast %285 : vector<1x2x128xbf16> to vector<2x128xbf16>
    %287 = vector.shape_cast %283 : vector<2x128xbf16> to vector<1x2x128xbf16>
    tpu.vector_store %arg17[%284, %c0_105, %c0_106], %287 {strides = array<i32>} : memref<4x2x128xbf16, #tpu.memory_space<vmem>>, vector<1x2x128xbf16>,
    %288 = arith.index_cast %c2_i32 : i32 to index
    %c0_107 = arith.constant 0 : index
    %c0_108 = arith.constant 0 : index
    %289 = vector.load %arg18[%288, %c0_107, %c0_108] : memref<4x2x128xf32, #tpu.memory_space<vmem>>, vector<1x2x128xf32>
    %290 = vector.shape_cast %289 : vector<1x2x128xf32> to vector<2x128xf32>
    %291 = vector.shape_cast %232 : vector<2x128xf32> to vector<1x2x128xf32>
    tpu.vector_store %arg18[%288, %c0_107, %c0_108], %291 {strides = array<i32>} : memref<4x2x128xf32, #tpu.memory_space<vmem>>, vector<1x2x128xf32>,
    %c0_109 = arith.constant 0 : index
    %c0_110 = arith.constant 0 : index
    %292 = vector.load %arg19[%c0_109, %c0_110] : memref<2x128xf32, #tpu.memory_space<vmem>>, vector<2x128xf32>
    tpu.vector_store %arg19[%c0_109, %c0_110], %282 {strides = array<i32>} : memref<2x128xf32, #tpu.memory_space<vmem>>, vector<2x128xf32>,
    %c0_111 = arith.constant 0 : index
    %c0_112 = arith.constant 0 : index
    %293 = vector.load %arg20[%c0_111, %c0_112] : memref<2x128xf32, #tpu.memory_space<vmem>>, vector<2x128xf32>
    tpu.vector_store %arg20[%c0_111, %c0_112], %280 {strides = array<i32>} : memref<2x128xf32, #tpu.memory_space<vmem>>, vector<2x128xf32>,
    %c3_i32 = arith.constant 3 : i32
    %c0_113 = arith.constant 0 : index
    %c0_114 = arith.constant 0 : index
    %294 = vector.load %arg19[%c0_113, %c0_114] : memref<2x128xf32, #tpu.memory_space<vmem>>, vector<2x128xf32>
    %c0_115 = arith.constant 0 : index
    %c0_116 = arith.constant 0 : index
    %295 = vector.load %arg20[%c0_115, %c0_116] : memref<2x128xf32, #tpu.memory_space<vmem>>, vector<2x128xf32>
    %296 = arith.truncf %294 : vector<2x128xf32> to vector<2x128xbf16>
    %cst_117 = arith.constant dense<0.000000e+00> : vector<2x32xf32>
    %297 = tpu.matmul %296, %5, %cst_117 {dimension_numbers = #tpu.dot_dimension_numbers<[1], [0], [0], [1], [0, 0, 1, 1], [], []>} : vector<2x128xbf16>, vector<128x32xbf16>, vector<2x32xf32> -> vector<2x32xf32>
    %298 = vector.broadcast %6 : vector<1x32xf32> to vector<2x32xf32>
    %299 = arith.addf %297, %298 : vector<2x32xf32>
    %300 = arith.truncf %299 : vector<2x32xf32> to vector<2x32xbf16>
    %301 = vector.shape_cast %300 : vector<2x32xbf16> to vector<2x1x32xbf16>
    %302 = vector.broadcast %301 : vector<2x1x32xbf16> to vector<2x128x32xbf16>
    %303 = arith.addf %1, %302 : vector<2x128x32xbf16>
    %cst_118 = arith.constant 0.000000e+00 : bf16
    %304 = vector.broadcast %cst_118 : bf16 to vector<2x128x32xbf16>
    %305 = arith.maximumf %303, %304 : vector<2x128x32xbf16>
    %306 = vector.shape_cast %7 : vector<1x32xbf16> to vector<1x1x32xbf16>
    %307 = vector.broadcast %306 : vector<1x1x32xbf16> to vector<2x128x32xbf16>
    %308 = arith.mulf %305, %307 : vector<2x128x32xbf16>
    %309 = arith.extf %308 : vector<2x128x32xbf16> to vector<2x128x32xf32>
    %cst_119 = arith.constant dense<0.000000e+00> : vector<2x128xf32>
    %310 = vector.multi_reduction <add>, %309, %cst_119 [2] : vector<2x128x32xf32> to vector<2x128xf32>
    %311 = vector.broadcast %8 : vector<1x1xf32> to vector<2x128xf32>
    %312 = arith.addf %310, %311 : vector<2x128xf32>
    %cst_120 = arith.constant -1.000000e+30 : f32
    %313 = vector.broadcast %cst_120 : f32 to vector<2x128xf32>
    %314 = arith.select %17, %313, %312 : vector<2x128xi1>, vector<2x128xf32>
    %cst_121 = arith.constant dense<0xFF800000> : vector<2xf32>
    %315 = vector.multi_reduction <maximumf>, %314, %cst_121 [1] : vector<2x128xf32> to vector<2xf32>
    %316 = vector.shape_cast %315 : vector<2xf32> to vector<2x1xf32>
    %317 = vector.broadcast %316 : vector<2x1xf32> to vector<2x128xf32>
    %318 = arith.subf %314, %317 : vector<2x128xf32>
    %319 = math.exp %318 : vector<2x128xf32>
    %cst_122 = arith.constant dense<0.000000e+00> : vector<2xf32>
    %320 = vector.multi_reduction <add>, %319, %cst_122 [1] : vector<2x128xf32> to vector<2xf32>
    %321 = vector.shape_cast %320 : vector<2xf32> to vector<2x1xf32>
    %322 = tpu.reciprocal %321 {approx = true} : vector<2x1xf32> -> vector<2x1xf32>
    %323 = vector.broadcast %322 : vector<2x1xf32> to vector<2x128xf32>
    %324 = arith.mulf %319, %323 : vector<2x128xf32>
    %325 = vector.shape_cast %324 : vector<2x128xf32> to vector<2x128x1xf32>
    %326 = arith.extf %0 : vector<2x128x32xbf16> to vector<2x128x32xf32>
    %327 = vector.broadcast %325 : vector<2x128x1xf32> to vector<2x128x32xf32>
    %328 = arith.mulf %327, %326 : vector<2x128x32xf32>
    %cst_123 = arith.constant dense<0.000000e+00> : vector<2x32xf32>
    %329 = vector.multi_reduction <add>, %328, %cst_123 [1] : vector<2x128x32xf32> to vector<2x32xf32>
    %cst_124 = arith.constant dense<0.000000e+00> : vector<2x32xf32>
    %330 = tpu.matmul %296, %9, %cst_124 {dimension_numbers = #tpu.dot_dimension_numbers<[1], [0], [0], [1], [0, 0, 1, 1], [], []>} : vector<2x128xbf16>, vector<128x32xbf16>, vector<2x32xf32> -> vector<2x32xf32>
    %331 = vector.broadcast %10 : vector<1x32xf32> to vector<2x32xf32>
    %332 = arith.addf %330, %331 : vector<2x32xf32>
    %333 = arith.negf %332 : vector<2x32xf32>
    %334 = math.exp %333 : vector<2x32xf32>
    %cst_125 = arith.constant 1.000000e+00 : f32
    %335 = vector.broadcast %cst_125 : f32 to vector<2x32xf32>
    %336 = arith.addf %335, %334 : vector<2x32xf32>
    %337 = arith.divf %335, %336 : vector<2x32xf32>
    %338 = arith.mulf %337, %329 : vector<2x32xf32>
    %339 = arith.index_cast %c3_i32 : i32 to index
    %c0_126 = arith.constant 0 : index
    %c0_127 = arith.constant 0 : index
    %340 = vector.load %arg4[%339, %c0_126, %c0_127] : memref<4x2x16xbf16, #tpu.memory_space<vmem>>, vector<1x2x16xbf16>
    %341 = vector.shape_cast %340 : vector<1x2x16xbf16> to vector<2x16xbf16>
    %cst_128 = arith.constant dense<0.000000e+00> : vector<2x512xf32>
    %342 = tpu.matmul %341, %11, %cst_128 {dimension_numbers = #tpu.dot_dimension_numbers<[1], [0], [0], [1], [0, 0, 1, 1], [], []>} : vector<2x16xbf16>, vector<16x512xbf16>, vector<2x512xf32> -> vector<2x512xf32>
    %343 = arith.truncf %338 : vector<2x32xf32> to vector<2x32xbf16>
    %cst_129 = arith.constant dense<0.000000e+00> : vector<2x512xf32>
    %344 = tpu.matmul %343, %12, %cst_129 {dimension_numbers = #tpu.dot_dimension_numbers<[1], [0], [0], [1], [0, 0, 1, 1], [], []>} : vector<2x32xbf16>, vector<32x512xbf16>, vector<2x512xf32> -> vector<2x512xf32>
    %345 = arith.addf %342, %344 : vector<2x512xf32>
    %cst_130 = arith.constant dense<0.000000e+00> : vector<2x512xf32>
    %346 = tpu.matmul %296, %13, %cst_130 {dimension_numbers = #tpu.dot_dimension_numbers<[1], [0], [0], [1], [0, 0, 1, 1], [], []>} : vector<2x128xbf16>, vector<128x512xbf16>, vector<2x512xf32> -> vector<2x512xf32>
    %347 = arith.addf %345, %346 : vector<2x512xf32>
    %348 = vector.broadcast %14 : vector<1x512xf32> to vector<2x512xf32>
    %349 = arith.addf %347, %348 : vector<2x512xf32>
    %350 = vector.extract_strided_slice %349 {offsets = [0, 0], sizes = [2, 128], strides = [1, 1]} : vector<2x512xf32> to vector<2x128xf32>
    %351 = arith.negf %350 : vector<2x128xf32>
    %352 = math.exp %351 : vector<2x128xf32>
    %cst_131 = arith.constant 1.000000e+00 : f32
    %353 = vector.broadcast %cst_131 : f32 to vector<2x128xf32>
    %354 = arith.addf %353, %352 : vector<2x128xf32>
    %355 = arith.divf %353, %354 : vector<2x128xf32>
    %356 = vector.extract_strided_slice %349 {offsets = [0, 128], sizes = [2, 128], strides = [1, 1]} : vector<2x512xf32> to vector<2x128xf32>
    %357 = arith.negf %356 : vector<2x128xf32>
    %358 = math.exp %357 : vector<2x128xf32>
    %cst_132 = arith.constant 1.000000e+00 : f32
    %359 = vector.broadcast %cst_132 : f32 to vector<2x128xf32>
    %360 = arith.addf %359, %358 : vector<2x128xf32>
    %361 = arith.divf %359, %360 : vector<2x128xf32>
    %362 = vector.extract_strided_slice %349 {offsets = [0, 256], sizes = [2, 128], strides = [1, 1]} : vector<2x512xf32> to vector<2x128xf32>
    %363 = math.tanh %362 : vector<2x128xf32>
    %364 = vector.extract_strided_slice %349 {offsets = [0, 384], sizes = [2, 128], strides = [1, 1]} : vector<2x512xf32> to vector<2x128xf32>
    %365 = arith.negf %364 : vector<2x128xf32>
    %366 = math.exp %365 : vector<2x128xf32>
    %cst_133 = arith.constant 1.000000e+00 : f32
    %367 = vector.broadcast %cst_133 : f32 to vector<2x128xf32>
    %368 = arith.addf %367, %366 : vector<2x128xf32>
    %369 = arith.divf %367, %368 : vector<2x128xf32>
    %370 = arith.mulf %361, %295 : vector<2x128xf32>
    %371 = arith.mulf %355, %363 : vector<2x128xf32>
    %372 = arith.addf %370, %371 : vector<2x128xf32>
    %373 = math.tanh %372 : vector<2x128xf32>
    %374 = arith.mulf %369, %373 : vector<2x128xf32>
    %375 = arith.truncf %374 : vector<2x128xf32> to vector<2x128xbf16>
    %376 = arith.index_cast %c3_i32 : i32 to index
    %c0_134 = arith.constant 0 : index
    %c0_135 = arith.constant 0 : index
    %377 = vector.load %arg17[%376, %c0_134, %c0_135] : memref<4x2x128xbf16, #tpu.memory_space<vmem>>, vector<1x2x128xbf16>
    %378 = vector.shape_cast %377 : vector<1x2x128xbf16> to vector<2x128xbf16>
    %379 = vector.shape_cast %375 : vector<2x128xbf16> to vector<1x2x128xbf16>
    tpu.vector_store %arg17[%376, %c0_134, %c0_135], %379 {strides = array<i32>} : memref<4x2x128xbf16, #tpu.memory_space<vmem>>, vector<1x2x128xbf16>,
    %380 = arith.index_cast %c3_i32 : i32 to index
    %c0_136 = arith.constant 0 : index
    %c0_137 = arith.constant 0 : index
    %381 = vector.load %arg18[%380, %c0_136, %c0_137] : memref<4x2x128xf32, #tpu.memory_space<vmem>>, vector<1x2x128xf32>
    %382 = vector.shape_cast %381 : vector<1x2x128xf32> to vector<2x128xf32>
    %383 = vector.shape_cast %324 : vector<2x128xf32> to vector<1x2x128xf32>
    tpu.vector_store %arg18[%380, %c0_136, %c0_137], %383 {strides = array<i32>} : memref<4x2x128xf32, #tpu.memory_space<vmem>>, vector<1x2x128xf32>,
    %c0_138 = arith.constant 0 : index
    %c0_139 = arith.constant 0 : index
    %384 = vector.load %arg19[%c0_138, %c0_139] : memref<2x128xf32, #tpu.memory_space<vmem>>, vector<2x128xf32>
    tpu.vector_store %arg19[%c0_138, %c0_139], %374 {strides = array<i32>} : memref<2x128xf32, #tpu.memory_space<vmem>>, vector<2x128xf32>,
    %c0_140 = arith.constant 0 : index
    %c0_141 = arith.constant 0 : index
    %385 = vector.load %arg20[%c0_140, %c0_141] : memref<2x128xf32, #tpu.memory_space<vmem>>, vector<2x128xf32>
    tpu.vector_store %arg20[%c0_140, %c0_141], %372 {strides = array<i32>} : memref<2x128xf32, #tpu.memory_space<vmem>>, vector<2x128xf32>,
    %c4_i32 = arith.constant 4 : i32
    return
  }
  func.func @transform_0(%arg0: i32, %arg1: i32) -> (i32, i32, i32) {
    %c0_i32 = arith.constant 0 : i32
    %c0_i32_0 = arith.constant 0 : i32
    %c0_i32_1 = arith.constant 0 : i32
    return %arg0, %c0_i32, %c0_i32_0 : i32, i32, i32
  }
  func.func @transform_1(%arg0: i32, %arg1: i32) -> (i32, i32, i32) {
    %c0_i32 = arith.constant 0 : i32
    %c0_i32_0 = arith.constant 0 : i32
    %c0_i32_1 = arith.constant 0 : i32
    return %arg0, %c0_i32, %c0_i32_0 : i32, i32, i32
  }
  func.func @transform_2(%arg0: i32, %arg1: i32) -> (i32, i32, i32) {
    %c0_i32 = arith.constant 0 : i32
    %c0_i32_0 = arith.constant 0 : i32
    return %arg1, %arg0, %c0_i32 : i32, i32, i32
  }
  func.func @transform_3(%arg0: i32, %arg1: i32) -> (i32, i32) {
    %c0_i32 = arith.constant 0 : i32
    %c0_i32_0 = arith.constant 0 : i32
    return %arg0, %c0_i32 : i32, i32
  }
  func.func @transform_4(%arg0: i32, %arg1: i32) -> (i32, i32) {
    %c0_i32 = arith.constant 0 : i32
    %c0_i32_0 = arith.constant 0 : i32
    return %arg0, %c0_i32 : i32, i32
  }
  func.func @transform_5(%arg0: i32, %arg1: i32) -> (i32, i32) {
    %c0_i32 = arith.constant 0 : i32
    %c0_i32_0 = arith.constant 0 : i32
    %c0_i32_1 = arith.constant 0 : i32
    return %c0_i32, %c0_i32_0 : i32, i32
  }
  func.func @transform_6(%arg0: i32, %arg1: i32) -> (i32, i32) {
    %c0_i32 = arith.constant 0 : i32
    %c0_i32_0 = arith.constant 0 : i32
    %c0_i32_1 = arith.constant 0 : i32
    return %c0_i32, %c0_i32_0 : i32, i32
  }
  func.func @transform_7(%arg0: i32, %arg1: i32) -> (i32, i32) {
    %c0_i32 = arith.constant 0 : i32
    %c0_i32_0 = arith.constant 0 : i32
    %c0_i32_1 = arith.constant 0 : i32
    return %c0_i32, %c0_i32_0 : i32, i32
  }
  func.func @transform_8(%arg0: i32, %arg1: i32) -> (i32, i32) {
    %c0_i32 = arith.constant 0 : i32
    %c0_i32_0 = arith.constant 0 : i32
    %c0_i32_1 = arith.constant 0 : i32
    return %c0_i32, %c0_i32_0 : i32, i32
  }
  func.func @transform_9(%arg0: i32, %arg1: i32) -> (i32, i32) {
    %c0_i32 = arith.constant 0 : i32
    %c0_i32_0 = arith.constant 0 : i32
    %c0_i32_1 = arith.constant 0 : i32
    return %c0_i32, %c0_i32_0 : i32, i32
  }
  func.func @transform_10(%arg0: i32, %arg1: i32) -> (i32, i32) {
    %c0_i32 = arith.constant 0 : i32
    %c0_i32_0 = arith.constant 0 : i32
    %c0_i32_1 = arith.constant 0 : i32
    return %c0_i32, %c0_i32_0 : i32, i32
  }
  func.func @transform_11(%arg0: i32, %arg1: i32) -> (i32, i32) {
    %c0_i32 = arith.constant 0 : i32
    %c0_i32_0 = arith.constant 0 : i32
    %c0_i32_1 = arith.constant 0 : i32
    return %c0_i32, %c0_i32_0 : i32, i32
  }
  func.func @transform_12(%arg0: i32, %arg1: i32) -> (i32, i32) {
    %c0_i32 = arith.constant 0 : i32
    %c0_i32_0 = arith.constant 0 : i32
    %c0_i32_1 = arith.constant 0 : i32
    return %c0_i32, %c0_i32_0 : i32, i32
  }
  func.func @transform_13(%arg0: i32, %arg1: i32) -> (i32, i32) {
    %c0_i32 = arith.constant 0 : i32
    %c0_i32_0 = arith.constant 0 : i32
    %c0_i32_1 = arith.constant 0 : i32
    return %c0_i32, %c0_i32_0 : i32, i32
  }
  func.func @transform_14(%arg0: i32, %arg1: i32) -> (i32, i32) {
    %c0_i32 = arith.constant 0 : i32
    %c0_i32_0 = arith.constant 0 : i32
    %c0_i32_1 = arith.constant 0 : i32
    return %c0_i32, %c0_i32_0 : i32, i32
  }
  func.func @transform_15(%arg0: i32, %arg1: i32) -> (i32, i32, i32) {
    %c0_i32 = arith.constant 0 : i32
    %c0_i32_0 = arith.constant 0 : i32
    return %arg1, %arg0, %c0_i32 : i32, i32, i32
  }
  func.func @transform_16(%arg0: i32, %arg1: i32) -> (i32, i32, i32) {
    %c0_i32 = arith.constant 0 : i32
    %c0_i32_0 = arith.constant 0 : i32
    return %arg1, %arg0, %c0_i32 : i32, i32, i32
  }
}

</mosaic_0001>

<bundles_post_ra>
// kernel: tpu_custom_call.1
= control target key start
LH: loop header
LB: loop body
LE: loop exit
PB: predicated region body
PF: predicated region fallthrough
CT: control target
= control target key end

     0   :  { %6 = vsyncpa [#allocation3], 0  ;;  %s287_s0 = inlined_call_operand.hbm [shape: f32[8,128], index: 0, kind: input, shape index: {}]   ;;  %s288_s1 = inlined_call_operand.hbm [shape: f32[8,128], index: 1, kind: output, shape index: {}]  }
   0x1   :  { %7 = vsyncpa [#allocation4], 0  ;;  %s270_s6 = smov 0  }
   0x2 LB: > { %s149_s7 = sadd.s32 4294967295, %s256_s6   ;;  %p150_p0 = scmp.ge.s32.totalorder %s256_s6, 1  ;;  %s256_s6 = sphi %s270_s6, %s13_s6  }
   0x3   : > { %p60_p1 = scmp.lt.s32.totalorder %s256_s6, 3  ;;  %s72_s10 = sshll.u32 %s287_s0, 4  ;;  %s73_s10 = int_to_ptr.hbm [resolvable:$true] %s72_s10 }
   0x4   : > { %p170_p3 = scmp.eq.s32.totalorder %s149_s7, 0  ;;  %s258_s11 = smov [#allocation2]  }
   0x5   : > { %p61_p2 = pnand %p150_p0, %p60_p1  ;;  %s74_s12 = sshll.u32 %s258_s11, 4  ;;  %s75_s12 = int_to_ptr.vmem [resolvable:$true] %s74_s12 }
   0x7   : > { %p166_p4 = pneg %p61_p2  ;;  %87 = sbr.rel (%p61_p2) target bundleno = 20 (0x14), region = 24 }
   0x9   : > { %p167_p5 = pnand %p170_p3, %p166_p4 }
   0xb   : > { %169 = dma.hbm_to_vmem [thread:$0]  (!%p167_p5), %s73_s10, 128, %s75_s12, [#allocation3]  }
   0xc   : > { %247 = dma.done.wait (%p170_p3), [#allocation3], 128  }
   0xd   : > { %249 = vsyncadd (%p170_p3), [#allocation3], 4294967168  ;;  %s259_s13 = smov [#allocation5]   ;;  %s109_s17 = sshll.u32 %s288_s1, 4  ;;  %v98_v0 = vld [vmem:[#allocation2] sm:$0xff]  ;;  %s110_s17 = int_to_ptr.hbm [resolvable:$true] %s109_s17 }
   0xe   : > { %s107_s14 = sshll.u32 %s259_s13, 4  ;;  %p172_p6 = scmp.eq.s32.totalorder %s149_s7, 1  ;;  %v99_v1 = vadd.f32 1.0, %v98_v0  ;;  %s108_s14 = int_to_ptr.vmem [resolvable:$true] %s107_s14 }
  0x10   : > { %100 = vst [vmem:[#allocation5] sm:$0xff] %v99_v1 }
  0x11   : > { %163 = dma.vmem_to_hbm [thread:$0]  (%p172_p6), %s108_s14, 128, %s110_s17, [#allocation4]  }
  0x12   : > { %251 = dma.done.wait (%p172_p6), [#allocation4], 128  }
  0x13   : > { %253 = vsyncadd (%p172_p6), [#allocation4], 4294967168 }
  0x14 PF: > { %s13_s6 = sadd.s32 1, %s256_s6  }
  0x15   : > { %p10_p7 = scmp.ge.s32.totalorder %s13_s6, 4  }
  0x17   :  { %12 = sbr.rel (!%p10_p7) target bundleno = 2 (0x2), region = 53 }
  0x1c   :  { %123 = vsyncpa [#allocation3], 1 }
  0x1d   :  { %125 = vsyncpa [#allocation3 + $0x1], 1 }
  0x1e   :  { %126 = vsyncpa [#allocation4], 1 }
  0x1f   :  { %128 = vsyncpa [#allocation4 + $0x1], 1 }

// kernel: _decoder_attn_impl.1
= control target key start
LH: loop header
LB: loop body
LE: loop exit
PB: predicated region body
PF: predicated region fallthrough
CT: control target
= control target key end

     0   :  { %s6876_s23 = smov 0   ;;  %s6878_s24 = smov 0   ;;  %s9810_s0 = inlined_call_operand.vmem [shape: bf16[2,128,32], index: 0, kind: input, shape index: {}]   ;;  %s9811_s1 = inlined_call_operand.vmem [shape: bf16[2,128,32], index: 1, kind: input, shape index: {}]   ;;  %s9812_s2 = inlined_call_operand.vmem [shape: bf16[8,2,16], index: 2, kind: input, shape index: {}]   ;;  %s9813_s3 = inlined_call_operand.vmem [shape: f32[2,128], index: 3, kind: input, shape index: {}]   ;;  %s9814_s4 = inlined_call_operand.vmem [shape: f32[2,128], index: 4, kind: input, shape index: {}]   ;;  %s9815_s5 = inlined_call_operand.vmem [shape: bf16[128,32], index: 5, kind: input, shape index: {}]   ;;  %s9816_s6 = inlined_call_operand.vmem [shape: f32[1,32], index: 6, kind: input, shape index: {}]   ;;  %s9817_s7 = inlined_call_operand.vmem [shape: bf16[1,32], index: 7, kind: input, shape index: {}]   ;;  %s9818_s8 = inlined_call_operand.<no memory space> [shape: f32[1,1], index: 8, kind: input, shape index: {}]   ;;  %s9819_s9 = inlined_call_operand.vmem [shape: bf16[128,32], index: 9, kind: input, shape index: {}]   ;;  %s9820_s10 = inlined_call_operand.vmem [shape: f32[1,32], index: 10, kind: input, shape index: {}]   ;;  %s9821_s11 = inlined_call_operand.vmem [shape: bf16[16,512], index: 11, kind: input, shape index: {}]   ;;  %s9822_s12 = inlined_call_operand.vmem [shape: bf16[32,512], index: 12, kind: input, shape index: {}]   ;;  %s9823_s13 = inlined_call_operand.vmem [shape: bf16[128,512], index: 13, kind: input, shape index: {}]   ;;  %s9824_s14 = inlined_call_operand.vmem [shape: f32[1,512], index: 14, kind: input, shape index: {}]   ;;  %s9825_s15 = inlined_call_operand.vmem [shape: bf16[8,2,128], index: 15, kind: output, shape index: {0}]   ;;  %s9826_s16 = inlined_call_operand.vmem [shape: f32[8,2,128], index: 16, kind: output, shape index: {1}]  }
   0x1   :  { %10155 = sst [smem:[#allocation143_spill]] %s9810_s0  ;;  %v22_v0 = vstv %s9818_s8  ;;  %s6880_s25 = smov 0  }
   0x2   :  { %10156 = sst [smem:[#allocation144_spill]] %s9811_s1  ;;  %23 = vst [vmem:[#allocation4] sm:$0x1] %v22_v0 }
   0x3 LB: > { %s38_s8 = sadd.s32 1, %s6781_s24  ;;  %p5943_p0 = scmp.ge.s32.totalorder %s6785_s25, 1  ;;  %s6785_s25 = sphi %s6880_s25, %s29_s25   ;;  %s6781_s24 = sphi %s6878_s24, %s10741_s24   ;;  %s6777_s23 = sphi %s6876_s23, %s10740_s23  }
   0x4   : > { %p39_p1 = scmp.ge.s32.totalorder %s38_s8, 2  ;;  %p530_p2 = scmp.lt.s32.totalorder %s6785_s25, 3 }
   0x6   : > { %s10743_s8 = smov (%p39_p1, %s38_s8), 0  ;;  %p531_p3 = pnand %p5943_p0, %p530_p2 }
   0x8   : > { %534 = sbr.rel (%p531_p3) target bundleno = 4806 (0x12c6), region = 80 }
   0xd   : > { %s5944_s26 = sshll.u32 %s6777_s23, 2  ;;  %s10157_s29 = sld [smem:[#allocation143_spill]] }
   0xe   : > { %p6906_p4 = scmp.lt.s32.totalorder %s5944_s26, 7  ;;  %s10183_s1 = sld [smem:[#allocation144_spill]] }
   0xf   : > { %p5948_p5 = scmp.ne.s32.totalorder %s6777_s23, 0 }
  0x10   : > { %s10745_s26 = smov (!%p6906_p4, %s5944_s26), 7 }
  0x11   : > { %s6983_s30 = scalar_lea.vmem %s9812_s2, %s10745_s26  ;;  %s6989_s17 = scalar_lea.vmem %s9825_s15, %s10745_s26 }
  0x12   : > { %s5947_s27 = sshll.u32 %s10745_s26, 1 }
  0x13   : > { %v6313_v1 = vld [vmem:[%s10157_s29] sm:$0xff]   ;;  %v6440_v2 = vld [vmem:[%s10157_s29 + $0x8] sm:$0xff]   ;;  %v6441_v3 = vld [vmem:[%s10157_s29 + $0x10] sm:$0xff]   ;;  %s7023_s26 = scalar_lea.vmem %s9826_s16, %s5947_s27 }
  0x14   : > { %v6910_v4 = vunpack.c.l.bf16 %v6313_v1  ;;  %v6912_v5 = vunpack.c.h.bf16 %v6313_v1  ;;  %v6914_v6 = vunpack.c.l.bf16 %v6440_v2  ;;  %v6916_v7 = vunpack.c.h.bf16 %v6440_v2  ;;  %v6442_v8 = vld [vmem:[%s10157_s29 + $0x18] sm:$0xff]   ;;  %v6443_v9 = vld [vmem:[%s10157_s29 + $0x20] sm:$0xff]   ;;  %v6444_v10 = vld [vmem:[%s10157_s29 + $0x28] sm:$0xff]  }
  0x15   : > { %v6927_v11 = vunpack.c.l.bf16 %v6441_v3  ;;  %v6929_v12 = vunpack.c.h.bf16 %v6441_v3  ;;  %v6931_v13 = vunpack.c.l.bf16 %v6442_v8  ;;  %v6933_v14 = vunpack.c.h.bf16 %v6442_v8  ;;  %v6445_v15 = vld [vmem:[%s10157_s29 + $0x30] sm:$0xff]   ;;  %v6446_v16 = vld [vmem:[%s10157_s29 + $0x38] sm:$0xff]   ;;  %v6447_v17 = vld [vmem:[%s10157_s29 + $0x40] sm:$0xff]  }
  0x16   : > { %10159 = vst [vmem:[#allocation5_spill] sm:$0xff] %v6910_v4  ;;  %v6948_v18 = vunpack.c.l.bf16 %v6443_v9  ;;  %v6950_v19 = vunpack.c.h.bf16 %v6443_v9  ;;  %v6952_v20 = vunpack.c.l.bf16 %v6444_v10  ;;  %v6954_v21 = vunpack.c.h.bf16 %v6444_v10  ;;  %v6448_v22 = vld [vmem:[%s10157_s29 + $0x48] sm:$0xff]   ;;  %v6449_v23 = vld [vmem:[%s10157_s29 + $0x50] sm:$0xff]   ;;  %v6450_v24 = vld [vmem:[%s10157_s29 + $0x58] sm:$0xff]  }
  0x17   : > { %10160 = vst [vmem:[#allocation6_spill] sm:$0xff] %v6912_v5  ;;  %v6965_v25 = vunpack.c.l.bf16 %v6445_v15  ;;  %v6967_v26 = vunpack.c.h.bf16 %v6445_v15  ;;  %v6969_v27 = vunpack.c.l.bf16 %v6446_v16  ;;  %v6971_v28 = vunpack.c.h.bf16 %v6446_v16  ;;  %v6451_v29 = vld [vmem:[%s10157_s29 + $0x60] sm:$0xff]   ;;  %v6452_v30 = vld [vmem:[%s10157_s29 + $0x68] sm:$0xff]   ;;  %v6453_v35 = vld [vmem:[%s10157_s29 + $0x70] sm:$0xff]  }
  0x18   : > { %10161 = vst [vmem:[#allocation7_spill] sm:$0xff] %v6914_v6  ;;  %v6991_v31 = vunpack.c.l.bf16 %v6447_v17  ;;  %v6993_v32 = vunpack.c.h.bf16 %v6447_v17  ;;  %v6995_v33 = vunpack.c.l.bf16 %v6448_v22  ;;  %v6997_v34 = vunpack.c.h.bf16 %v6448_v22  ;;  %v6454_v36 = vld [vmem:[%s10157_s29 + $0x78] sm:$0xff]   ;;  %v6377_v41 = vld [vmem:[%s10183_s1] sm:$0xff]   ;;  %v6455_v42 = vld [vmem:[%s10183_s1 + $0x8] sm:$0xff]  }
  0x19   : > { %10162 = vst [vmem:[#allocation8_spill] sm:$0xff] %v6916_v7  ;;  %v7006_v37 = vunpack.c.l.bf16 %v6449_v23  ;;  %v7008_v38 = vunpack.c.h.bf16 %v6449_v23  ;;  %v7010_v39 = vunpack.c.l.bf16 %v6450_v24  ;;  %v7012_v40 = vunpack.c.h.bf16 %v6450_v24  ;;  %v6456_v47 = vld [vmem:[%s10183_s1 + $0x10] sm:$0xff]   ;;  %v6457_v48 = vld [vmem:[%s10183_s1 + $0x18] sm:$0xff]   ;;  %v6458_v53 = vld [vmem:[%s10183_s1 + $0x20] sm:$0xff]  }
  0x1a   : > { %10163 = vst [vmem:[#allocation9_spill] sm:$0xff] %v6927_v11  ;;  %v7025_v43 = vunpack.c.l.bf16 %v6451_v29  ;;  %v7027_v44 = vunpack.c.h.bf16 %v6451_v29  ;;  %v7029_v45 = vunpack.c.l.bf16 %v6452_v30  ;;  %v7031_v46 = vunpack.c.h.bf16 %v6452_v30  ;;  %v6459_v54 = vld [vmem:[%s10183_s1 + $0x28] sm:$0xff]   ;;  %v6460_v59 = vld [vmem:[%s10183_s1 + $0x30] sm:$0xff]   ;;  %v6461_v60 = vld [vmem:[%s10183_s1 + $0x38] sm:$0xff]  }
  0x1b   : > { %10164 = vst [vmem:[#allocation10_spill] sm:$0xff] %v6929_v12  ;;  %v7039_v49 = vunpack.c.l.bf16 %v6453_v35  ;;  %v7041_v50 = vunpack.c.h.bf16 %v6453_v35  ;;  %v7043_v51 = vunpack.c.l.bf16 %v6454_v36  ;;  %v7045_v52 = vunpack.c.h.bf16 %v6454_v36  ;;  %v6462_v1 = vld [vmem:[%s10183_s1 + $0x40] sm:$0xff]   ;;  %v6463_v2 = vld [vmem:[%s10183_s1 + $0x48] sm:$0xff]   ;;  %v6464_v15 = vld [vmem:[%s10183_s1 + $0x50] sm:$0xff]  }
  0x1c   : > { %10165 = vst [vmem:[#allocation11_spill] sm:$0xff] %v6931_v13  ;;  %v7053_v55 = vunpack.c.l.bf16 %v6377_v41  ;;  %v7055_v56 = vunpack.c.h.bf16 %v6377_v41  ;;  %v7057_v57 = vunpack.c.l.bf16 %v6455_v42  ;;  %v7059_v58 = vunpack.c.h.bf16 %v6455_v42  ;;  %v6465_v16 = vld [vmem:[%s10183_s1 + $0x58] sm:$0xff]   ;;  %v6466_v29 = vld [vmem:[%s10183_s1 + $0x60] sm:$0xff]   ;;  %v6467_v30 = vld [vmem:[%s10183_s1 + $0x68] sm:$0xff]  }
  0x1d   : > { %10166 = vst [vmem:[#allocation12_spill] sm:$0xff] %v6933_v14  ;;  %v7067_v61 = vunpack.c.l.bf16 %v6456_v47  ;;  %v7069_v62 = vunpack.c.h.bf16 %v6456_v47  ;;  %v7071_v63 = vunpack.c.l.bf16 %v6457_v48  ;;  %v7073_v0 = vunpack.c.h.bf16 %v6457_v48  ;;  %v6468_v47 = vld [vmem:[%s10183_s1 + $0x70] sm:$0xff]   ;;  %v6469_v48 = vld [vmem:[%s10183_s1 + $0x78] sm:$0xff]  }
  0x1e   : > { %10167 = vst [vmem:[#allocation13_spill] sm:$0xff] %v6948_v18  ;;  %v7081_v3 = vunpack.c.l.bf16 %v6458_v53  ;;  %v7083_v8 = vunpack.c.h.bf16 %v6458_v53  ;;  %v7085_v9 = vunpack.c.l.bf16 %v6459_v54  ;;  %v7087_v10 = vunpack.c.h.bf16 %v6459_v54 }
  0x1f   : > { %10168 = vst [vmem:[#allocation14_spill] sm:$0xff] %v6950_v19  ;;  %v7095_v17 = vunpack.c.l.bf16 %v6460_v59  ;;  %v7097_v22 = vunpack.c.h.bf16 %v6460_v59  ;;  %v7099_v23 = vunpack.c.l.bf16 %v6461_v60  ;;  %v7101_v24 = vunpack.c.h.bf16 %v6461_v60 }
  0x20   : > { %10169 = vst [vmem:[#allocation15_spill] sm:$0xff] %v6952_v20  ;;  %v7109_v35 = vunpack.c.l.bf16 %v6462_v1  ;;  %v7111_v36 = vunpack.c.h.bf16 %v6462_v1  ;;  %v7113_v41 = vunpack.c.l.bf16 %v6463_v2  ;;  %v7115_v42 = vunpack.c.h.bf16 %v6463_v2 }
  0x21   : > { %10170 = vst [vmem:[#allocation16_spill] sm:$0xff] %v6954_v21  ;;  %v7123_v53 = vunpack.c.l.bf16 %v6464_v15  ;;  %v7125_v54 = vunpack.c.h.bf16 %v6464_v15  ;;  %v7127_v59 = vunpack.c.l.bf16 %v6465_v16  ;;  %v7129_v60 = vunpack.c.h.bf16 %v6465_v16 }
  0x22   : > { %10171 = vst [vmem:[#allocation17_spill] sm:$0xff] %v6965_v25  ;;  %v7131_v1 = vunpack.c.l.bf16 %v6466_v29  ;;  %v7133_v2 = vunpack.c.h.bf16 %v6466_v29  ;;  %v7145_v15 = vunpack.c.h.bf16 %v6469_v48 }
  0x23   : > { %10172 = vst [vmem:[#allocation18_spill] sm:$0xff] %v6967_v26 }
  0x24   : > { %10173 = vst [vmem:[#allocation19_spill] sm:$0xff] %v6969_v27 }
  0x25   : > { %10174 = vst [vmem:[#allocation20_spill] sm:$0xff] %v6971_v28  ;;  %v7139_v28 = vunpack.c.l.bf16 %v6468_v47 }
  0x26   : > { %10175 = vst [vmem:[#allocation21_spill] sm:$0xff] %v6991_v31 }
  0x27   : > { %10176 = vst [vmem:[#allocation22_spill] sm:$0xff] %v6993_v32 }
  0x28   : > { %10177 = vst [vmem:[#allocation23_spill] sm:$0xff] %v6995_v33 }
  0x29   : > { %10178 = vst [vmem:[#allocation24_spill] sm:$0xff] %v6997_v34 }
  0x2a   : > { %10179 = vst [vmem:[#allocation25_spill] sm:$0xff] %v7006_v37 }
  0x2b   : > { %10180 = vst [vmem:[#allocation26_spill] sm:$0xff] %v7008_v38 }
  0x2c   : > { %10181 = vst [vmem:[#allocation27_spill] sm:$0xff] %v7010_v39 }
  0x2d   : > { %10182 = vst [vmem:[#allocation28_spill] sm:$0xff] %v7012_v40 }
  0x2e   : > { %10184 = vst [vmem:[#allocation29_spill] sm:$0xff] %v7025_v43 }
  0x2f   : > { %10185 = vst [vmem:[#allocation30_spill] sm:$0xff] %v7027_v44 }
  0x30   : > { %10186 = vst [vmem:[#allocation31_spill] sm:$0xff] %v7029_v45 }
  0x31   : > { %10187 = vst [vmem:[#allocation32_spill] sm:$0xff] %v7031_v46 }
  0x32   : > { %10188 = vst [vmem:[#allocation33_spill] sm:$0xff] %v7039_v49  ;;  %v7143_v49 = vunpack.c.l.bf16 %v6469_v48 }
  0x33   : > { %10189 = vst [vmem:[#allocation34_spill] sm:$0xff] %v7041_v50  ;;  %v7141_v50 = vunpack.c.h.bf16 %v6468_v47 }
  0x34   : > { %10190 = vst [vmem:[#allocation35_spill] sm:$0xff] %v7043_v51  ;;  %v7137_v51 = vunpack.c.h.bf16 %v6467_v30 }
  0x35   : > { %10191 = vst [vmem:[#allocation36_spill] sm:$0xff] %v7045_v52  ;;  %v7135_v52 = vunpack.c.l.bf16 %v6467_v30 }
  0x36   : > { %10192 = vst [vmem:[#allocation37_spill] sm:$0xff] %v7053_v55 }
  0x37   : > { %10193 = vst [vmem:[#allocation38_spill] sm:$0xff] %v7055_v56 }
  0x38   : > { %10194 = vst [vmem:[#allocation39_spill] sm:$0xff] %v7057_v57 }
  0x39   : > { %10195 = vst [vmem:[#allocation40_spill] sm:$0xff] %v7059_v58 }
  0x3a   : > { %10196 = vst [vmem:[#allocation41_spill] sm:$0xff] %v7067_v61 }
  0x3b   : > { %10197 = vst [vmem:[#allocation42_spill] sm:$0xff] %v7069_v62 }
  0x3c   : > { %10198 = vst [vmem:[#allocation43_spill] sm:$0xff] %v7071_v63 }
  0x3d   : > { %10199 = vst [vmem:[#allocation44_spill] sm:$0xff] %v7073_v0 }
  0x3e   : > { %10200 = vst [vmem:[#allocation45_spill] sm:$0xff] %v7081_v3 }
  0x3f   : > { %10201 = vst [vmem:[#allocation46_spill] sm:$0xff] %v7083_v8 }
  0x40   : > { %10202 = vst [vmem:[#allocation47_spill] sm:$0xff] %v7085_v9 }
  0x41   : > { %10203 = vst [vmem:[#allocation48_spill] sm:$0xff] %v7087_v10 }
  0x42   : > { %10204 = vst [vmem:[#allocation49_spill] sm:$0xff] %v7095_v17 }
  0x43   : > { %10205 = vst [vmem:[#allocation50_spill] sm:$0xff] %v7097_v22 }
  0x44   : > { %10206 = vst [vmem:[#allocation51_spill] sm:$0xff] %v7099_v23 }
  0x45   : > { %10207 = vst [vmem:[#allocation52_spill] sm:$0xff] %v7101_v24 }
  0x46   : > { %10208 = vst [vmem:[#allocation53_spill] sm:$0xff] %v7109_v35 }
  0x47   : > { %10209 = vst [vmem:[#allocation54_spill] sm:$0xff] %v7111_v36 }
  0x48   : > { %10210 = vst [vmem:[#allocation55_spill] sm:$0xff] %v7113_v41 }
  0x49   : > { %10211 = vst [vmem:[#allocation56_spill] sm:$0xff] %v7115_v42 }
  0x4a   : > { %10212 = vst [vmem:[#allocation57_spill] sm:$0xff] %v7123_v53 }
  0x4b   : > { %10213 = vst [vmem:[#allocation58_spill] sm:$0xff] %v7125_v54 }
  0x4c   : > { %10214 = vst [vmem:[#allocation59_spill] sm:$0xff] %v7127_v59 }
  0x4d   : > { %10215 = vst [vmem:[#allocation60_spill] sm:$0xff] %v7129_v60 }
  0x4e   : > { %10216 = vst [vmem:[#allocation61_spill] sm:$0xff] %v7131_v1 }
  0x4f   : > { %10217 = vst [vmem:[#allocation62_spill] sm:$0xff] %v7133_v2 }
  0x50   : > { %10218 = vst [vmem:[#allocation63_spill] sm:$0xff] %v7135_v52 }
  0x51   : > { %10219 = vst [vmem:[#allocation64_spill] sm:$0xff] %v7137_v51  ;;  %727 = sbr.rel (%p5948_p5) target bundleno = 89 (0x59), region = 84 }
  0x52   : > { %10220 = vst [vmem:[#allocation65_spill] sm:$0xff] %v7139_v28 }
  0x53   : > { %10221 = vst [vmem:[#allocation66_spill] sm:$0xff] %v7141_v50 }
  0x54   : > { %10222 = vst [vmem:[#allocation67_spill] sm:$0xff] %v7143_v49 }
  0x55   : > { %10223 = vst [vmem:[#allocation68_spill] sm:$0xff] %v7145_v15 }
  0x56   : > { %v728_v16 = vld [vmem:[%s9813_s3] sm:$0x3] }
  0x57   : > { %v730_v29 = vld [vmem:[%s9814_s4] sm:$0x3]  ;;  %729 = vst [vmem:[#allocation2] sm:$0x3] %v728_v16 }
  0x58   : > { %731 = vst [vmem:[#allocation3] sm:$0x3] %v730_v29 }
  0x59 PF: > { %v6259_v30 = vld [vmem:[%s9815_s5 + $0x38] sm:$0xff]  ;;  %v6258_v47 = vld [vmem:[%s9815_s5 + $0x30] sm:$0xff]  ;;  %v6787_v48 = vmov 0   ;;  %v6623_v27 = vld [vmem:[#allocation4] ss:$0 sm:$0xff]  ;;  %vm886_vm0 = vcmask 1040384  }
  0x5a   : > { %870 = vmatpush.bf16.msra.mxu0 %v6259_v30  ;;  %6495 = vset.pattern.permute.xlu0 %v6787_v48  ;;  %v6257_v16 = vld [vmem:[%s9815_s5 + $0x28] sm:$0xff]  ;;  %v6256_v29 = vld [vmem:[%s9815_s5 + $0x20] sm:$0xff]  ;;  %v6255_v30 = vld [vmem:[%s9815_s5 + $0x18] sm:$0xff]  ;;  %vm1216_vm1 = vcmask 261120   ;;  %vm1386_vm2 = vcmask 130112   ;;  %vm1390_vm3 = vcmask 195712  }
  0x5b   : > { %1316 = vperm.xlu0 %6495, %v6623_v27   ;;  %v6254_v27 = vld [vmem:[%s9815_s5 + $0x10] sm:$0xff]  ;;  %v6252_v48 = vld [vmem:[%s9815_s5] sm:$0xff]  ;;  %vm1394_vm4 = vcmask 261312   ;;  %vm1398_vm5 = vcmask 326912   ;;  %vm10052_vm6 = vcmask 392512   ;;  %vm10045_vm7 = vcmask 458112  }
  0x5c   : > { %vm10042_vm8 = vcmask 523712   ;;  %vm9900_vm9 = vcmask 589312   ;;  %vm9897_vm10 = vcmask 654912   ;;  %vm9899_vm11 = vcmask 720512  }
  0x5d   : > { %vm9898_vm12 = vcmask 786112   ;;  %vm10041_vm13 = vcmask 851712   ;;  %vm10038_vm14 = vcmask 917312   ;;  %vm9992_vm15 = vcmask 982912  }
  0x5e   : > { %871 = vmatpush.bf16.msra.mxu0 %v6258_v47  ;;  %v6253_v47 = vld [vmem:[%s9815_s5 + $0x8] sm:$0xff] }
  0x62   : > { %872 = vmatpush.bf16.msra.mxu0 %v6257_v16  ;;  %v816_v16 = vld [vmem:[#allocation2] sm:$0x3] }
  0x66   : > { %873 = vmatpush.bf16.msra.mxu0 %v6256_v29  ;;  %v7178_v29 = vpack.c.bf16 %v816_v16, %v816_v16 }
  0x6a   : > { %874 = vmatpush.bf16.msra.mxu0 %v6255_v30  ;;  %v6624_v30 = vld [vmem:[%s9816_s6] ss:$0 sm:$0xff] }
  0x6e   : > { %875 = vmatpush.bf16.msra.mxu0 %v6254_v27 }
  0x72   : > { %876 = vmatpush.bf16.msra.mxu0 %v6253_v47  ;;  %v749_v47 = vld [vmem:[%s9817_s7] sm:$0x1] }
  0x73   : > { %v1100_v21 = vpack.i.b16 %v749_v47, %v749_v47 }
  0x75   : > { %v1102_v19 = vperm.slane %v1100_v21, 0 }
  0x76   : > { %877 = vmatpush.bf16.msra.mxu0 %v6252_v48 }
  0x79   : > { %878 = vmatmul.bf16.vlgmr.msra.gmra.mxu0 %v7178_v29 }
  0xf6   : > { %v879_v27 = vpop.f32.mrf.mxu0 }
  0xf7   : > { %v880_v46 = vadd.f32 %v6624_v30, %v879_v27  ;;  %v7190_v27 = vunpack.c.l.bf16 %v1102_v19 }
  0xf9   : > { %v883_v45 = vpack.c.bf16 %v880_v46, %v880_v46  ;;  %10224 = vst [vmem:[#allocation69_spill] sm:$0xff] %v7190_v27 }
  0xfb   : > { %v885_v44 = vrot.slane %v883_v45, 3 }
  0xfd   : > { %v889_v26 = vsel %vm886_vm0, %v883_v45, %v885_v44 }
  0xfe   : > { %v892_v16 = vunpack.i.h.s16 %v889_v26  ;;  %v5981_v25 = vpack.i.b16 %v889_v26, %v889_v26  ;;  %v881_v48 = vpop.f32.mrf.mxu0 }
 0x100   : > { %v894_v43 = vpack.i.b16 %v892_v16, %v892_v16  ;;  %v895_v40 = vperm.slane %v5981_v25, 0 }
 0x102   : > { %v896_v39 = vperm.slane %v894_v43, 0  ;;  %v898_v20 = vpack.i.b16 %v895_v40, %v895_v40 }
 0x104   : > { %v900_v38 = vperm.slane %v898_v20, 0  ;;  %v902_v30 = vpack.i.b16 %v896_v39, %v896_v39 }
 0x106   : > { %v7188_v46 = vunpack.c.l.bf16 %v900_v38  ;;  %v904_v37 = vperm.slane %v902_v30, 0 }
 0x108   : > { %v941_v18 = vadd.f32 %v7057_v57, %v7188_v46  ;;  %v942_v26 = vadd.f32 %v7059_v58, %v7188_v46  ;;  %v939_v44 = vadd.f32 %v7053_v55, %v7188_v46  ;;  %v940_v25 = vadd.f32 %v7055_v56, %v7188_v46 }
 0x109   : > { %v943_v20 = vadd.f32 %v7067_v61, %v7188_v46  ;;  %v944_v19 = vadd.f32 %v7069_v62, %v7188_v46  ;;  %v947_v21 = vadd.f32 %v7081_v3, %v7188_v46  ;;  %v948_v43 = vadd.f32 %v7083_v8, %v7188_v46 }
 0x10a   : > { %v1037_v38 = vmax.f32 %v941_v18, 0.0  ;;  %v1038_v39 = vmax.f32 %v942_v26, 0.0  ;;  %v1035_v40 = vmax.f32 %v939_v44, 0.0  ;;  %v1036_v45 = vmax.f32 %v940_v25, 0.0 }
 0x10b   : > { %v1039_v47 = vmax.f32 %v943_v20, 0.0  ;;  %v1040_v16 = vmax.f32 %v944_v19, 0.0  ;;  %v1043_v48 = vmax.f32 %v947_v21, 0.0  ;;  %v1044_v56 = vmax.f32 %v948_v43, 0.0 }
 0x10c   : > { %v1069_v30 = vpack.c.bf16 %v1037_v38, %v1037_v38  ;;  %v1070_v58 = vpack.c.bf16 %v1038_v39, %v1038_v39  ;;  %v1067_v57 = vpack.c.bf16 %v1035_v40, %v1035_v40  ;;  %v1068_v55 = vpack.c.bf16 %v1036_v45, %v1036_v45 }
 0x10d   : > { %v1071_v61 = vpack.c.bf16 %v1039_v47, %v1039_v47  ;;  %v1072_v62 = vpack.c.bf16 %v1040_v16, %v1040_v16  ;;  %v1075_v34 = vpack.c.bf16 %v1043_v48, %v1043_v48  ;;  %v1076_v26 = vpack.c.bf16 %v1044_v56, %v1044_v56 }
 0x10e   : > { %v1105_v14 = vunpack.c.l.bf16 %v1069_v30  ;;  %v1106_v3 = vunpack.c.l.bf16 %v1070_v58  ;;  %v1103_v18 = vunpack.c.l.bf16 %v1067_v57  ;;  %v1104_v44 = vunpack.c.l.bf16 %v1068_v55 }
 0x10f   : > { %v1107_v33 = vunpack.c.l.bf16 %v1071_v61  ;;  %v1108_v32 = vunpack.c.l.bf16 %v1072_v62  ;;  %v1111_v8 = vunpack.c.l.bf16 %v1075_v34  ;;  %v1112_v21 = vunpack.c.l.bf16 %v1076_v26 }
 0x110   : > { %v1138_v25 = vmul.f32 %v7190_v27, %v1105_v14  ;;  %v1139_v20 = vmul.f32 %v7190_v27, %v1106_v3  ;;  %v1136_v19 = vmul.f32 %v7190_v27, %v1103_v18  ;;  %v1137_v38 = vmul.f32 %v7190_v27, %v1104_v44 }
 0x111   : > { %v1140_v39 = vmul.f32 %v7190_v27, %v1107_v33  ;;  %v1141_v40 = vmul.f32 %v7190_v27, %v1108_v32  ;;  %v1144_v57 = vmul.f32 %v7190_v27, %v1111_v8  ;;  %v1145_v55 = vmul.f32 %v7190_v27, %v1112_v21 }
 0x112   : > { %v1169_v56 = vpack.c.bf16 %v1139_v20, %v1138_v25  ;;  %v949_v34 = vadd.f32 %v7085_v9, %v7188_v46  ;;  %v950_v14 = vadd.f32 %v7087_v10, %v7188_v46  ;;  %v1168_v58 = vpack.c.bf16 %v1137_v38, %v1136_v19 }
 0x113   : > { %v1170_v61 = vpack.c.bf16 %v1141_v40, %v1140_v39  ;;  %v7220_v43 = vpack.c.bf16 %v1145_v55, %v1144_v57  ;;  %v7222_v32 = vunpack.c.l.bf16 %v904_v37  ;;  %v945_v45 = vadd.f32 %v7071_v63, %v7188_v46 }
 0x114   : > { %v1187_v62 = vunpack.c.h.bf16 %v1169_v56  ;;  %v1186_v3 = vunpack.c.l.bf16 %v1169_v56  ;;  %v1045_v33 = vmax.f32 %v949_v34, 0.0  ;;  %v1184_v8 = vunpack.c.l.bf16 %v1168_v58 }
 0x115   : > { %v946_v47 = vadd.f32 %v7073_v0, %v7188_v46  ;;  %v1046_v30 = vmax.f32 %v950_v14, 0.0  ;;  %v1188_v26 = vunpack.c.l.bf16 %v1170_v61  ;;  %v1193_v37 = vunpack.c.h.bf16 %v7220_v43 }
 0x116   : > { %v1226_v16 = vsel %vm1216_vm1, %v1187_v62, 0.0  ;;  %v1223_v48 = vsel %vm1216_vm1, %v1186_v3, 0.0  ;;  %v1217_v18 = vsel %vm1216_vm1, %v1184_v8, 0.0  ;;  %v1077_v44 = vpack.c.bf16 %v1045_v33, %v1045_v33 }
 0x117   : > { %1227 = vadd.xlane.f32.xlu1 %v1226_v16  ;;  %1224 = vadd.xlane.f32.xlu2 %v1223_v48  ;;  %v1078_v25 = vpack.c.bf16 %v1046_v30, %v1046_v30  ;;  %v1041_v20 = vmax.f32 %v945_v45, 0.0  ;;  %v1042_v19 = vmax.f32 %v946_v47, 0.0  ;;  %v969_v21 = vadd.f32 %v7143_v49, %v7222_v32 }
 0x118   : > { %1218 = vadd.xlane.f32.xlu0 %v1217_v18  ;;  %v970_v38 = vadd.f32 %v7145_v15, %v7222_v32  ;;  %v1185_v39 = vunpack.c.h.bf16 %v1168_v58  ;;  %v1113_v40 = vunpack.c.l.bf16 %v1077_v44  ;;  %v951_v56 = vadd.f32 %v7095_v17, %v7188_v46 }
 0x119   : > { %v1114_v57 = vunpack.c.l.bf16 %v1078_v25  ;;  %v1073_v55 = vpack.c.bf16 %v1041_v20, %v1041_v20  ;;  %v1074_v34 = vpack.c.bf16 %v1042_v19, %v1042_v19  ;;  %v1065_v14 = vmax.f32 %v969_v21, 0.0 }
 0x11a   : > { %v1066_v62 = vmax.f32 %v970_v38, 0.0  ;;  %v1229_v3 = vsel %vm1216_vm1, %v1188_v26, 0.0  ;;  %v1146_v33 = vmul.f32 %v7190_v27, %v1113_v40  ;;  %v952_v45 = vadd.f32 %v7097_v22, %v7188_v46 }
 0x11b   : > { %v1147_v8 = vmul.f32 %v7190_v27, %v1114_v57  ;;  %v1244_v58 = vsel %vm1216_vm1, %v1193_v37, 0.0  ;;  %v1097_v47 = vpack.c.bf16 %v1065_v14, %v1065_v14  ;;  %v1047_v48 = vmax.f32 %v951_v56, 0.0 }
 0x11c   : > { %v1098_v16 = vpack.c.bf16 %v1066_v62, %v1066_v62  ;;  %v1109_v18 = vunpack.c.l.bf16 %v1073_v55  ;;  %v1110_v44 = vunpack.c.l.bf16 %v1074_v34  ;;  %v1048_v25 = vmax.f32 %v952_v45, 0.0 }
 0x11d   : > { %v1173_v30 = vpack.c.bf16 %v1147_v8, %v1146_v33  ;;  %v1220_v26 = vsel %vm1216_vm1, %v1185_v39, 0.0  ;;  %v1133_v20 = vunpack.c.l.bf16 %v1097_v47  ;;  %v1189_v21 = vunpack.c.h.bf16 %v1170_v61 }
 0x11e   : > { %v1134_v19 = vunpack.c.l.bf16 %v1098_v16  ;;  %v1079_v38 = vpack.c.bf16 %v1047_v48, %v1047_v48  ;;  %v1080_v40 = vpack.c.bf16 %v1048_v25, %v1048_v25  ;;  %v955_v37 = vadd.f32 %v7109_v35, %v7222_v32 }
 0x11f   : > { %1230 = vadd.xlane.f32.xlu1 %v1229_v3  ;;  %1245 = vadd.xlane.f32.xlu2 %v1244_v58  ;;  %v1194_v57 = vunpack.c.l.bf16 %v1173_v30  ;;  %v1142_v56 = vmul.f32 %v7190_v27, %v1109_v18  ;;  %v1143_v55 = vmul.f32 %v7190_v27, %v1110_v44  ;;  %v956_v34 = vadd.f32 %v7111_v36, %v7222_v32 }
 0x120   : > { %1221 = vadd.xlane.f32.xlu0 %v1220_v26  ;;  %v1192_v14 = vunpack.c.l.bf16 %v7220_v43  ;;  %v1166_v39 = vmul.f32 %v7190_v27, %v1133_v20  ;;  %v1167_v62 = vmul.f32 %v7190_v27, %v1134_v19  ;;  %v1232_v61 = vsel %vm1216_vm1, %v1189_v21, 0.0 }
 0x121   : > { %v1115_v3 = vunpack.c.l.bf16 %v1079_v38  ;;  %v1116_v33 = vunpack.c.l.bf16 %v1080_v40  ;;  %v1247_v8 = vsel %vm1216_vm1, %v1194_v57, 0.0  ;;  %v1171_v45 = vpack.c.bf16 %v1143_v55, %v1142_v56 }
 0x122   : > { %v1051_v58 = vmax.f32 %v955_v37, 0.0  ;;  %v1052_v47 = vmax.f32 %v956_v34, 0.0  ;;  %v1241_v16 = vsel %vm1216_vm1, %v1192_v14, 0.0  ;;  %v7257_v48 = vpack.c.bf16 %v1167_v62, %v1166_v39 }
 0x123   : > { %v1148_v43 = vmul.f32 %v7190_v27, %v1115_v3  ;;  %v1149_v18 = vmul.f32 %v7190_v27, %v1116_v33  ;;  %v953_v44 = vadd.f32 %v7099_v23, %v7188_v46  ;;  %v954_v25 = vadd.f32 %v7101_v24, %v7188_v46 }
 0x124   : > { %v1190_v26 = vunpack.c.l.bf16 %v1171_v45  ;;  %v1195_v20 = vunpack.c.h.bf16 %v1173_v30  ;;  %v1083_v19 = vpack.c.bf16 %v1051_v58, %v1051_v58  ;;  %v1084_v21 = vpack.c.bf16 %v1052_v47, %v1052_v47 }
 0x125   : > { %v1214_v38 = vunpack.c.l.bf16 %v7257_v48  ;;  %v1174_v40 = vpack.c.bf16 %v1149_v18, %v1148_v43  ;;  %v1049_v37 = vmax.f32 %v953_v44, 0.0  ;;  %v1050_v57 = vmax.f32 %v954_v25, 0.0 }
 0x126   : > { %v1235_v56 = vsel %vm1216_vm1, %v1190_v26, 0.0  ;;  %v1250_v55 = vsel %vm1216_vm1, %v1195_v20, 0.0  ;;  %v1119_v34 = vunpack.c.l.bf16 %v1083_v19  ;;  %v1120_v14 = vunpack.c.l.bf16 %v1084_v21 }
 0x127   : > { %1233 = vadd.xlane.f32.xlu1 %v1232_v61  ;;  %1248 = vadd.xlane.f32.xlu2 %v1247_v8  ;;  %v1307_v39 = vsel %vm1216_vm1, %v1214_v38, 0.0  ;;  %v1191_v46 = vunpack.c.h.bf16 %v1171_v45  ;;  %v957_v30 = vadd.f32 %v7113_v41, %v7222_v32  ;;  %v1196_v62 = vunpack.c.l.bf16 %v1174_v40 }
 0x128   : > { %1242 = vadd.xlane.f32.xlu0 %v1241_v16  ;;  %v1081_v61 = vpack.c.bf16 %v1049_v37, %v1049_v37  ;;  %v1082_v3 = vpack.c.bf16 %v1050_v57, %v1050_v57  ;;  %v958_v33 = vadd.f32 %v7115_v42, %v7222_v32  ;;  %v1152_v8 = vmul.f32 %v7190_v27, %v1119_v34 }
 0x129   : > { %v1153_v58 = vmul.f32 %v7190_v27, %v1120_v14  ;;  %v963_v47 = vadd.f32 %v7131_v1, %v7222_v32  ;;  %v964_v16 = vadd.f32 %v7133_v2, %v7222_v32  ;;  %v1238_v45 = vsel %vm1216_vm1, %v1191_v46, 0.0 }
 0x12a   : > { %v1117_v43 = vunpack.c.l.bf16 %v1081_v61  ;;  %v1118_v18 = vunpack.c.l.bf16 %v1082_v3  ;;  %v1053_v44 = vmax.f32 %v957_v30, 0.0  ;;  %v1054_v25 = vmax.f32 %v958_v33, 0.0 }
 0x12b   : > { %v1253_v26 = vsel %vm1216_vm1, %v1196_v62, 0.0  ;;  %v1176_v20 = vpack.c.bf16 %v1153_v58, %v1152_v8  ;;  %v1059_v19 = vmax.f32 %v963_v47, 0.0  ;;  %v1060_v21 = vmax.f32 %v964_v16, 0.0 }
 0x12c   : > { %v1150_v38 = vmul.f32 %v7190_v27, %v1117_v43  ;;  %v1151_v37 = vmul.f32 %v7190_v27, %v1118_v18  ;;  %v1085_v57 = vpack.c.bf16 %v1053_v44, %v1053_v44  ;;  %v959_v47 = vadd.f32 %v7123_v53, %v7222_v32 }
 0x12d   : > { %v1200_v34 = vunpack.c.l.bf16 %v1176_v20  ;;  %v1091_v14 = vpack.c.bf16 %v1059_v19, %v1059_v19  ;;  %v1201_v58 = vunpack.c.h.bf16 %v1176_v20  ;;  %v960_v43 = vadd.f32 %v7125_v54, %v7222_v32 }
 0x12e   : > { %v7283_v46 = vpack.c.bf16 %v1151_v37, %v1150_v38  ;;  %v1121_v30 = vunpack.c.l.bf16 %v1085_v57  ;;  %v1055_v20 = vmax.f32 %v959_v47, 0.0 }
 0x12f   : > { %1236 = vadd.xlane.f32.xlu1 %v1235_v56  ;;  %1251 = vadd.xlane.f32.xlu2 %v1250_v55  ;;  %v1086_v56 = vpack.c.bf16 %v1054_v25, %v1054_v25  ;;  %v1197_v55 = vunpack.c.h.bf16 %v1174_v40  ;;  %v1265_v3 = vsel %vm1216_vm1, %v1200_v34, 0.0  ;;  %v1127_v33 = vunpack.c.l.bf16 %v1091_v14 }
 0x130   : > { %1308 = vadd.xlane.f32.xlu0 %v1307_v39  ;;  %v1092_v39 = vpack.c.bf16 %v1060_v21, %v1060_v21  ;;  %v1198_v40 = vunpack.c.l.bf16 %v7283_v46  ;;  %v1154_v16 = vmul.f32 %v7190_v27, %v1121_v30  ;;  %v965_v25 = vadd.f32 %v7135_v52, %v7222_v32 }
 0x131   : > { %v1122_v61 = vunpack.c.l.bf16 %v1086_v56  ;;  %v1256_v62 = vsel %vm1216_vm1, %v1197_v55, 0.0  ;;  %v1160_v18 = vmul.f32 %v7190_v27, %v1127_v33  ;;  %v1268_v19 = vsel %vm1216_vm1, %v1201_v58, 0.0 }
 0x132   : > { %v1128_v8 = vunpack.c.l.bf16 %v1092_v39  ;;  %v1056_v38 = vmax.f32 %v960_v43, 0.0  ;;  %v1259_v37 = vsel %vm1216_vm1, %v1198_v40, 0.0  ;;  %v1061_v56 = vmax.f32 %v965_v25, 0.0 }
 0x133   : > { %v1087_v34 = vpack.c.bf16 %v1055_v20, %v1055_v20  ;;  %v962_v25 = vadd.f32 %v7129_v60, %v7222_v32 }
 0x134   : > { %v1161_v44 = vmul.f32 %v7190_v27, %v1128_v8  ;;  %v1088_v14 = vpack.c.bf16 %v1056_v38, %v1056_v38 }
 0x136   : > { %v1180_v57 = vpack.c.bf16 %v1161_v44, %v1160_v18  ;;  %v1124_v33 = vunpack.c.l.bf16 %v1088_v14  ;;  %v961_v44 = vadd.f32 %v7127_v59, %v7222_v32 }
 0x137   : > { %1239 = vadd.xlane.f32.xlu1 %v1238_v45  ;;  %1254 = vadd.xlane.f32.xlu2 %v1253_v26  ;;  %v1155_v45 = vmul.f32 %v7190_v27, %v1122_v61  ;;  %v966_v26 = vadd.f32 %v7137_v51, %v7222_v32  ;;  %v1093_v61 = vpack.c.bf16 %v1061_v56, %v1061_v56  ;;  %v1058_v56 = vmax.f32 %v962_v25, 0.0 }
 0x138   : > { %v1208_v30 = vunpack.c.l.bf16 %v1180_v57  ;;  %v1209_v43 = vunpack.c.h.bf16 %v1180_v57  ;;  %v1157_v18 = vmul.f32 %v7190_v27, %v1124_v33  ;;  %v1057_v57 = vmax.f32 %v961_v44, 0.0 }
 0x139   : > { %v1177_v21 = vpack.c.bf16 %v1155_v45, %v1154_v16  ;;  %v1062_v55 = vmax.f32 %v966_v26, 0.0  ;;  %v1129_v47 = vunpack.c.l.bf16 %v1093_v61 }
 0x13a   : > { %v1289_v58 = vsel %vm1216_vm1, %v1208_v30, 0.0  ;;  %v1089_v61 = vpack.c.bf16 %v1057_v57, %v1057_v57 }
 0x13b   : > { %v1202_v39 = vunpack.c.l.bf16 %v1177_v21  ;;  %v1203_v40 = vunpack.c.h.bf16 %v1177_v21  ;;  %v1162_v26 = vmul.f32 %v7190_v27, %v1129_v47  ;;  %v968_v21 = vadd.f32 %v7141_v50, %v7222_v32 }
 0x13d   : > { %v1271_v8 = vsel %vm1216_vm1, %v1202_v39, 0.0  ;;  %v1274_v38 = vsel %vm1216_vm1, %v1203_v40, 0.0  ;;  %v1064_v39 = vmax.f32 %v968_v21, 0.0 }
 0x13f   : > { %1257 = vadd.xlane.f32.xlu2 %v1256_v62  ;;  %1266 = vadd.xlane.f32.xlu1 %v1265_v3  ;;  %v1094_v62 = vpack.c.bf16 %v1062_v55, %v1062_v55  ;;  %v1123_v3 = vunpack.c.l.bf16 %v1087_v34  ;;  %v1292_v55 = vsel %vm1216_vm1, %v1209_v43, 0.0 }
 0x141   : > { %v1130_v16 = vunpack.c.l.bf16 %v1094_v62  ;;  %v1156_v45 = vmul.f32 %v7190_v27, %v1123_v3  ;;  %v1090_v3 = vpack.c.bf16 %v1058_v56, %v1058_v56 }
 0x143   : > { %v1163_v20 = vmul.f32 %v7190_v27, %v1130_v16  ;;  %v1126_v16 = vunpack.c.l.bf16 %v1090_v3  ;;  %v1199_v3 = vunpack.c.h.bf16 %v7283_v46 }
 0x145   : > { %v1181_v34 = vpack.c.bf16 %v1163_v20, %v1162_v26  ;;  %v1159_v25 = vmul.f32 %v7190_v27, %v1126_v16 }
 0x147   : > { %1260 = vadd.xlane.f32.xlu2 %v1259_v37  ;;  %1269 = vadd.xlane.f32.xlu1 %v1268_v19  ;;  %v967_v19 = vadd.f32 %v7139_v28, %v7222_v32  ;;  %v1178_v37 = vpack.c.bf16 %v1157_v18, %v1156_v45  ;;  %v1210_v62 = vunpack.c.l.bf16 %v1181_v34  ;;  %v1211_v44 = vunpack.c.h.bf16 %v1181_v34 }
 0x149   : > { %v1063_v14 = vmax.f32 %v967_v19, 0.0  ;;  %v1204_v30 = vunpack.c.l.bf16 %v1178_v37  ;;  %v1295_v47 = vsel %vm1216_vm1, %v1210_v62, 0.0  ;;  %v1205_v43 = vunpack.c.h.bf16 %v1178_v37 }
 0x14a   : > { %v1298_v21 = vsel %vm1216_vm1, %v1211_v44, 0.0  ;;  %v1215_v62 = vunpack.c.h.bf16 %v7257_v48 }
 0x14b   : > { %v1095_v33 = vpack.c.bf16 %v1063_v14, %v1063_v14  ;;  %v1277_v32 = vsel %vm1216_vm1, %v1204_v30, 0.0  ;;  %v1280_v19 = vsel %vm1216_vm1, %v1205_v43, 0.0 }
 0x14d   : > { %v1131_v40 = vunpack.c.l.bf16 %v1095_v33  ;;  %v1310_v33 = vsel %vm1216_vm1, %v1215_v62, 0.0 }
 0x14f   : > { %1272 = vadd.xlane.f32.xlu2 %v1271_v8  ;;  %1290 = vadd.xlane.f32.xlu1 %v1289_v58  ;;  %v1096_v8 = vpack.c.bf16 %v1064_v39, %v1064_v39  ;;  %v1125_v58 = vunpack.c.l.bf16 %v1089_v61  ;;  %v1164_v26 = vmul.f32 %v7190_v27, %v1131_v40 }
 0x151   : > { %v1132_v45 = vunpack.c.l.bf16 %v1096_v8  ;;  %v1158_v18 = vmul.f32 %v7190_v27, %v1125_v58  ;;  %v1262_v8 = vsel %vm1216_vm1, %v1199_v3, 0.0 }
 0x153   : > { %v1165_v20 = vmul.f32 %v7190_v27, %v1132_v45 }
 0x155   : > { %v1182_v57 = vpack.c.bf16 %v1165_v20, %v1164_v26  ;;  %v7346_v26 = vpop.permute.xlu0 %1316 }
 0x156   : > { %10225 = vst [vmem:[#allocation70_spill] sm:$0xff] %v7346_v26 }
 0x157   : > { %1275 = vadd.xlane.f32.xlu2 %v1274_v38  ;;  %1293 = vadd.xlane.f32.xlu1 %v1292_v55  ;;  %v1179_v38 = vpack.c.bf16 %v1159_v25, %v1158_v18  ;;  %v1212_v55 = vunpack.c.l.bf16 %v1182_v57  ;;  %v1213_v39 = vunpack.c.h.bf16 %v1182_v57 }
 0x159   : > { %v1206_v56 = vunpack.c.l.bf16 %v1179_v38  ;;  %v1301_v34 = vsel %vm1216_vm1, %v1212_v55, 0.0  ;;  %v1207_v14 = vunpack.c.h.bf16 %v1179_v38  ;;  %v1304_v61 = vsel %vm1216_vm1, %v1213_v39, 0.0 }
 0x15b   : > { %v1283_v37 = vsel %vm1216_vm1, %v1206_v56, 0.0  ;;  %v1286_v30 = vsel %vm1216_vm1, %v1207_v14, 0.0  ;;  %v9870_v56 = vlaneseq }
 0x15d   : > { %v7355_v14 = vand.u32 127, %v9870_v56 }
 0x15f   : > { %1278 = vadd.xlane.f32.xlu2 %v1277_v32  ;;  %1296 = vadd.xlane.f32.xlu1 %v1295_v47  ;;  %10226 = vst [vmem:[#allocation71_spill] sm:$0xff] %v7355_v14  ;;  %v7358_v39 = vadd.s32 4294967288, %v7355_v14  ;;  %v7364_v3 = vadd.s32 4294967280, %v7355_v14  ;;  %v7371_v28 = vadd.s32 4294967272, %v7355_v14  ;;  %v7377_v15 = vadd.s32 4294967264, %v7355_v14 }
 0x161   : > { %10227 = vst [vmem:[#allocation72_spill] sm:$0xff] %v7358_v39 }
 0x162   : > { %10228 = vst [vmem:[#allocation73_spill] sm:$0xff] %v7364_v3 }
 0x163   : > { %10229 = vst [vmem:[#allocation74_spill] sm:$0xff] %v7371_v28 }
 0x164   : > { %10230 = vst [vmem:[#allocation75_spill] sm:$0xff] %v7377_v15 }
 0x167   : > { %1281 = vadd.xlane.f32.xlu2 %v1280_v19  ;;  %1299 = vadd.xlane.f32.xlu1 %v1298_v21 }
 0x16f   : > { %1284 = vadd.xlane.f32.xlu2 %v1283_v37  ;;  %1302 = vadd.xlane.f32.xlu1 %v1301_v34 }
 0x177   : > { %1287 = vadd.xlane.f32.xlu2 %v1286_v30  ;;  %1305 = vadd.xlane.f32.xlu1 %v1304_v61 }
 0x17f   : > { %1311 = vadd.xlane.f32.xlu2 %v1310_v33  ;;  %1263 = vadd.xlane.f32.xlu1 %v1262_v8 }
 0x18a   : > { %v1228_v32 = vpop.xlane.xlu1 %1227  ;;  %v1225_v58 = vpop.xlane.xlu2 %1224 }
 0x18b   : > { %v1219_v21 = vpop.xlane.xlu0 %1218  ;;  %v1321_v33 = vadd.f32 %v7346_v26, %v1225_v58  ;;  %v7380_v58 = vadd.s32 4294967256, %v7355_v14 }
 0x18c   : > { %v1319_v61 = vadd.f32 %v7346_v26, %v1219_v21 }
 0x18d   : > { %10231 = vst [vmem:[#allocation76_spill] sm:$0xff] %v7380_v58 }
 0x18e   : > { %v1383_v56 = vperm.slane %v1319_v61, %v7355_v14 }
 0x192   : > { %v1231_v47 = vpop.xlane.xlu1 %1230  ;;  %v7334_v16 = vpop.xlane.xlu2 %1245 }
 0x193   : > { %v1222_v55 = vpop.xlane.xlu0 %1221  ;;  %v1323_v61 = vadd.f32 %v7346_v26, %v1231_v47 }
 0x194   : > { %v1320_v30 = vadd.f32 %v7346_v26, %v1222_v55  ;;  %v1322_v55 = vadd.f32 %v7346_v26, %v1228_v32  ;;  %v7386_v32 = vadd.s32 4294967248, %v7355_v14 }
 0x196   : > { %v1385_v62 = vperm.slane %v1320_v30, %v7358_v39  ;;  %v1389_v30 = vperm.slane %v1321_v33, %v7364_v3  ;;  %10232 = vst [vmem:[#allocation77_spill] sm:$0xff] %v7386_v32  ;;  %v7391_v33 = vadd.s32 4294967240, %v7355_v14 }
 0x198   : > { %v1387_v21 = vsel %vm1386_vm2, %v1385_v62, %v1383_v56  ;;  %v1393_v62 = vperm.slane %v1322_v55, %v7371_v28  ;;  %10233 = vst [vmem:[#allocation78_spill] sm:$0xff] %v7391_v33 }
 0x199   : > { %v1391_v51 = vsel %vm1390_vm3, %v1389_v30, %v1387_v21  ;;  %v1397_v30 = vperm.slane %v1323_v61, %v7377_v15 }
 0x19a   : > { %v1234_v40 = vpop.xlane.xlu1 %1233  ;;  %v7336_v45 = vpop.xlane.xlu2 %1248  ;;  %v1395_v47 = vsel %vm1394_vm4, %v1393_v62, %v1391_v51 }
 0x19b   : > { %v1324_v49 = vadd.f32 %v7346_v26, %v1234_v40  ;;  %v1243_v21 = vpop.xlane.xlu0 %1242  ;;  %v1399_v1 = vsel %vm1398_vm5, %v1397_v30, %v1395_v47 }
 0x19c   : > { %v1327_v59 = vadd.f32 %v7346_v26, %v1243_v21 }
 0x19d   : > { %v1401_v40 = vperm.slane %v1324_v49, %v7380_v58  ;;  %v7408_v49 = vadd.s32 4294967224, %v7355_v14 }
 0x19f   : > { %v1403_v51 = vsel %vm10052_vm6, %v1401_v40, %v1399_v1  ;;  %10235 = vst [vmem:[#allocation80_spill] sm:$0xff] %v7408_v49  ;;  %v7418_v1 = vadd.s32 4294967216, %v7355_v14  ;;  %v7421_v40 = vadd.s32 4294967208, %v7355_v14 }
 0x1a1   : > { %10236 = vst [vmem:[#allocation81_spill] sm:$0xff] %v7418_v1 }
 0x1a2   : > { %v1237_v43 = vpop.xlane.xlu1 %1236  ;;  %v7338_v18 = vpop.xlane.xlu2 %1251  ;;  %10237 = vst [vmem:[#allocation82_spill] sm:$0xff] %v7421_v40 }
 0x1a3   : > { %v1325_v56 = vadd.f32 %v7346_v26, %v1237_v43 }
 0x1a5   : > { %v1405_v43 = vperm.slane %v1325_v56, %v7386_v32  ;;  %v1328_v56 = vadd.f32 %v7346_v26, %v7334_v16 }
 0x1a7   : > { %v1407_v61 = vsel %vm10045_vm7, %v1405_v43, %v1403_v51  ;;  %v1330_v51 = vadd.f32 %v7346_v26, %v7338_v18 }
 0x1aa   : > { %v1240_v48 = vpop.xlane.xlu1 %1239  ;;  %v7340_v44 = vpop.xlane.xlu2 %1254 }
 0x1ab   : > { %v1326_v52 = vadd.f32 %v7346_v26, %v1240_v48  ;;  %v7403_v48 = vadd.s32 4294967232, %v7355_v14 }
 0x1ad   : > { %v1409_v55 = vperm.slane %v1326_v52, %v7391_v33  ;;  %10234 = vst [vmem:[#allocation79_spill] sm:$0xff] %v7403_v48  ;;  %v1413_v47 = vperm.slane %v1327_v59, %v7403_v48 }
 0x1af   : > { %v1411_v52 = vsel %vm10042_vm8, %v1409_v55, %v1407_v61  ;;  %v1417_v55 = vperm.slane %v1328_v56, %v7408_v49 }
 0x1b0   : > { %v1415_v59 = vsel %vm9900_vm9, %v1413_v47, %v1411_v52  ;;  %v1425_v47 = vperm.slane %v1330_v51, %v7421_v40  ;;  %v1331_v51 = vadd.f32 %v7346_v26, %v7340_v44 }
 0x1b1   : > { %v1419_v52 = vsel %vm9897_vm10, %v1417_v55, %v1415_v59 }
 0x1b2   : > { %v7342_v46 = vpop.xlane.xlu2 %1257  ;;  %v7344_v25 = vpop.xlane.xlu1 %1266 }
 0x1b3   : > { %v1335_v16 = vadd.f32 %v7346_v26, %v7344_v25  ;;  %v7436_v25 = vadd.s32 4294967184, %v7355_v14 }
 0x1b5   : > { %10238 = vst [vmem:[#allocation83_spill] sm:$0xff] %v7436_v25 }
 0x1ba   : > { %v7348_v20 = vpop.xlane.xlu2 %1260  ;;  %v1270_v19 = vpop.xlane.xlu1 %1269 }
 0x1bb   : > { %v1336_v62 = vadd.f32 %v7346_v26, %v1270_v19  ;;  %v1329_v19 = vadd.f32 %v7346_v26, %v7336_v45 }
 0x1bd   : > { %v1445_v61 = vperm.slane %v1336_v62, %v7358_v39  ;;  %v1421_v18 = vperm.slane %v1329_v19, %v7418_v1  ;;  %v7445_v62 = vadd.s32 4294967200, %v7355_v14 }
 0x1bf   : > { %10239 = vst [vmem:[#allocation84_spill] sm:$0xff] %v7445_v62 }
 0x1c2   : > { %v1273_v38 = vpop.xlane.xlu2 %1272  ;;  %v7350_v57 = vpop.xlane.xlu1 %1290 }
 0x1c3   : > { %v1337_v21 = vadd.f32 %v7346_v26, %v1273_v38  ;;  %v1343_v19 = vadd.f32 %v7346_v26, %v7350_v57 }
 0x1c5   : > { %v1447_v45 = vperm.slane %v1337_v21, %v7364_v3  ;;  %v7450_v21 = vadd.s32 4294967192, %v7355_v14 }
 0x1c7   : > { %10240 = vst [vmem:[#allocation85_spill] sm:$0xff] %v7450_v21 }
 0x1ca   : > { %v1276_v37 = vpop.xlane.xlu2 %1275  ;;  %v7352_v34 = vpop.xlane.xlu1 %1293 }
 0x1cb   : > { %v1338_v43 = vadd.f32 %v7346_v26, %v1276_v37 }
 0x1cd   : > { %v1449_v56 = vperm.slane %v1338_v43, %v7371_v28 }
 0x1d2   : > { %v1279_v8 = vpop.xlane.xlu2 %1278  ;;  %v7367_v50 = vpop.xlane.xlu1 %1296 }
 0x1d3   : > { %v1339_v38 = vadd.f32 %v7346_v26, %v1279_v8  ;;  %v1444_v8 = vperm.slane %v1335_v16, %v7355_v14  ;;  %v1423_v16 = vsel %vm9899_vm11, %v1421_v18, %v1419_v52  ;;  %v1309_v52 = vpop.xlane.xlu0 %1308 }
 0x1da   : > { %v1282_v60 = vpop.xlane.xlu2 %1281  ;;  %v7394_v2 = vpop.xlane.xlu1 %1299 }
 0x1db   : > { %v1340_v53 = vadd.f32 %v7346_v26, %v1282_v60  ;;  %v1451_v60 = vperm.slane %v1339_v38, %v7377_v15 }
 0x1dd   : > { %v1453_v59 = vperm.slane %v1340_v53, %v7380_v58 }
 0x1e2   : > { %v1285_v30 = vpop.xlane.xlu2 %1284  ;;  %v1303_v54 = vpop.xlane.xlu1 %1302 }
 0x1e3   : > { %v1341_v37 = vadd.f32 %v7346_v26, %v1285_v30  ;;  %v1446_v30 = vsel %vm1386_vm2, %v1445_v61, %v1444_v8  ;;  %v1344_v61 = vadd.f32 %v7346_v26, %v7352_v34  ;;  %v1427_v8 = vsel %vm9898_vm12, %v1425_v47, %v1423_v16 }
 0x1e4   : > { %v1448_v43 = vsel %vm1390_vm3, %v1447_v45, %v1446_v30  ;;  %v1332_v45 = vadd.f32 %v7346_v26, %v7342_v46  ;;  %v1459_v46 = vperm.slane %v1343_v19, %v7403_v48  ;;  %v1347_v18 = vadd.f32 %v7346_v26, %v1303_v54 }
 0x1e5   : > { %v1455_v55 = vperm.slane %v1341_v37, %v7386_v32  ;;  %v1450_v15 = vsel %vm1394_vm4, %v1449_v56, %v1448_v43  ;;  %v1345_v37 = vadd.f32 %v7346_v26, %v7367_v50  ;;  %v1346_v56 = vadd.f32 %v7346_v26, %v7394_v2 }
 0x1e6   : > { %v1452_v57 = vsel %vm1398_vm5, %v1451_v60, %v1450_v15  ;;  %v1429_v50 = vperm.slane %v1331_v51, %v7445_v62  ;;  %v1461_v60 = vperm.slane %v1344_v61, %v7408_v49  ;;  %v1349_v2 = vadd.f32 %v7346_v26, %v1309_v52 }
 0x1e7   : > { %v1454_v44 = vsel %vm10052_vm6, %v1453_v59, %v1452_v57  ;;  %v1433_v59 = vperm.slane %v1332_v45, %v7450_v21  ;;  %v1465_v54 = vperm.slane %v1346_v56, %v7421_v40 }
 0x1e8   : > { %v1456_v15 = vsel %vm10045_vm7, %v1455_v55, %v1454_v44  ;;  %v1431_v43 = vsel %vm10041_vm13, %v1429_v50, %v1427_v8  ;;  %v7492_v55 = vadd.s32 4294967176, %v7355_v14  ;;  %v1471_v44 = vperm.slane %v1349_v2, %v7436_v25 }
 0x1e9   : > { %v1435_v56 = vsel %vm10038_vm14, %v1433_v59, %v1431_v43 }
 0x1ea   : > { %v1288_v28 = vpop.xlane.xlu2 %1287  ;;  %v1306_v38 = vpop.xlane.xlu1 %1305  ;;  %10241 = vst [vmem:[#allocation86_spill] sm:$0xff] %v7492_v55 }
 0x1eb   : > { %v1342_v53 = vadd.f32 %v7346_v26, %v1288_v28  ;;  %v1333_v28 = vadd.f32 %v7346_v26, %v7348_v20  ;;  %v1348_v30 = vadd.f32 %v7346_v26, %v1306_v38  ;;  %v1463_v20 = vperm.slane %v1345_v37, %v7418_v1 }
 0x1ec   : > { %v1467_v38 = vperm.slane %v1347_v18, %v7445_v62 }
 0x1ed   : > { %v1457_v34 = vperm.slane %v1342_v53, %v7391_v33  ;;  %v1437_v51 = vperm.slane %v1333_v28, %v7436_v25  ;;  %v1469_v37 = vperm.slane %v1348_v30, %v7450_v21 }
 0x1ef   : > { %v1458_v47 = vsel %vm10042_vm8, %v1457_v34, %v1456_v15  ;;  %v1439_v18 = vsel %vm9992_vm15, %v1437_v51, %v1435_v56  ;;  %v10242_v51 = vlaneseq }
 0x1f0   : > { %v1460_v16 = vsel %vm9900_vm9, %v1459_v46, %v1458_v47  ;;  %vm9979_vm9 = vcmask 1041408  }
 0x1f1   : > { %v1462_v19 = vsel %vm9897_vm10, %v1461_v60, %v1460_v16  ;;  %vm9987_vm10 = vcmask 1048512  }
 0x1f2   : > { %v1464_v61 = vsel %vm9899_vm11, %v1463_v20, %v1462_v19  ;;  %v1312_v53 = vpop.xlane.xlu2 %1311  ;;  %v1264_v45 = vpop.xlane.xlu1 %1263  ;;  %vm9986_vm11 = vcmp.ge.s32.totalorder %v7355_v14, 16 }
 0x1f3   : > { %v1466_v57 = vsel %vm9898_vm12, %v1465_v54, %v1464_v61  ;;  %v1350_v52 = vadd.f32 %v7346_v26, %v1312_v53  ;;  %v1334_v8 = vadd.f32 %v7346_v26, %v1264_v45  ;;  %vm10035_vm12 = vcmask 1041409  }
 0x1f4   : > { %v1468_v34 = vsel %vm10041_vm13, %v1467_v38, %v1466_v57  ;;  %v7518_v38 = vshrl.u32 %v10242_v51, 7 }
 0x1f5   : > { %v1470_v28 = vsel %vm10038_vm14, %v1469_v37, %v1468_v34  ;;  %v1473_v46 = vperm.slane %v1350_v52, %v7492_v55  ;;  %v1441_v15 = vperm.slane %v1334_v8, %v7492_v55 }
 0x1f6   : > { %v1472_v50 = vsel %vm9992_vm15, %v1471_v44, %v1470_v28  ;;  %10243 = vst [vmem:[#allocation87_spill] sm:$0xff] %v7518_v38  ;;  %6498 = vset.pattern.permute.xlu1 %v7518_v38  ;;  %6496 = vset.pattern.permute.xlu2 %v7518_v38  ;;  %v7523_v61 = vadd.s32 8, %v7518_v38  ;;  %v7535_v8 = vadd.s32 16, %v7518_v38  ;;  %v7538_v44 = vadd.s32 32, %v7518_v38 }
 0x1f7   : > { %v1443_v60 = vsel %vm9987_vm10, %v1441_v15, %v1439_v18  ;;  %v1474_v47 = vsel %vm9987_vm10, %v1473_v46, %v1472_v50  ;;  %v7547_v56 = vadd.s32 24, %v7518_v38  ;;  %v7550_v34 = vadd.s32 48, %v7518_v38 }
 0x1f8   : > { %v1476_v30 = vsel %vm10035_vm12, %v1474_v47, %v1443_v60  ;;  %10244 = vst [vmem:[#allocation88_spill] sm:$0xff] %v7523_v61  ;;  %6497 = vset.pattern.permute.xlu0 %v7523_v61  ;;  %v7559_v28 = vadd.s32 40, %v7518_v38  ;;  %v7562_v46 = vadd.s32 72, %v7518_v38  ;;  %v7571_v15 = vadd.s32 88, %v7518_v38  ;;  %v7597_v47 = vld [vmem:[%s9819_s9 + $0x38] sm:$0xff] }
 0x1f9   : > { %v1478_v2 = vsel %vm9986_vm11, -1e+30, %v1476_v30  ;;  %10245 = vst [vmem:[#allocation89_spill] sm:$0xff] %v7535_v8  ;;  %v7580_v18 = vadd.s32 56, %v7518_v38  ;;  %v7583_v50 = vadd.s32 112, %v7518_v38  ;;  %v7592_v60 = vadd.s32 64, %v7518_v38  ;;  %1874 = vmatpush.bf16.msra.mxu1 %v7597_v47 }
 0x1fa   : > { %v1480_v59 = vsel %vm9979_vm9, %v1478_v2, -inf  ;;  %10246 = vst [vmem:[#allocation90_spill] sm:$0xff] %v7538_v44  ;;  %v7605_v30 = vld [vmem:[%s9819_s9 + $0x30] sm:$0xff]  ;;  %v7660_v51 = vadd.s32 96, %v7518_v38 }
 0x1fb   : > { %1481 = vmax.xlane.f32.xlu0 %v1480_v59  ;;  %10247 = vst [vmem:[#allocation91_spill] sm:$0xff] %v7547_v56  ;;  %v7620_v59 = vld [vmem:[%s9819_s9 + $0x20] sm:$0xff] }
 0x1fc   : > { %10248 = vst [vmem:[#allocation92_spill] sm:$0xff] %v7550_v34 }
 0x1fd   : > { %10249 = vst [vmem:[#allocation93_spill] sm:$0xff] %v7559_v28  ;;  %1875 = vmatpush.bf16.msra.mxu1 %v7605_v30 }
 0x1fe   : > { %10250 = vst [vmem:[#allocation94_spill] sm:$0xff] %v7562_v46 }
 0x1ff   : > { %10251 = vst [vmem:[#allocation95_spill] sm:$0xff] %v7571_v15 }
 0x200   : > { %10252 = vst [vmem:[#allocation96_spill] sm:$0xff] %v7580_v18 }
 0x201   : > { %10253 = vst [vmem:[#allocation97_spill] sm:$0xff] %v7583_v50 }
 0x202   : > { %10254 = vst [vmem:[#allocation98_spill] sm:$0xff] %v7592_v60 }
 0x203   : > { %10256 = vst [vmem:[#allocation100_spill] sm:$0xff] %v7660_v51 }
 0x26e   : > { %v1482_v20 = vpop.xlane.xlu0 %1481 }
 0x26f   : > { %v1483_v16 = vsub.f32 %v1478_v2, %v1482_v20  ;;  %v7612_v2 = vld [vmem:[%s9819_s9 + $0x28] sm:$0xff]  ;;  %v7623_v20 = vadd.s32 80, %v7518_v38 }
 0x270   : > { %1876 = vmatpush.bf16.msra.mxu1 %v7612_v2 }
 0x271   : > { %v1484_v43 = vmul.f32 1.442695, %v1483_v16  ;;  %10255 = vst [vmem:[#allocation99_spill] sm:$0xff] %v7623_v20  ;;  %v7629_v16 = vld [vmem:[%s9819_s9 + $0x18] sm:$0xff] }
 0x273   : > { %6626 = vpow2.f32 %v1484_v43  ;;  %v7637_v43 = vld [vmem:[%s9819_s9 + $0x10] sm:$0xff] }
 0x274   : > { %1877 = vmatpush.bf16.msra.mxu1 %v7620_v59 }
 0x278   : > { %1878 = vmatpush.bf16.msra.mxu1 %v7629_v16 }
 0x279   : > { %v6627_v54 = vpop.eup %6626 }
 0x27a   : > { %v1486_v19 = vsel %vm9979_vm9, %v6627_v54, 0.0  ;;  %vm2028_vm9 = vcmask 130048  }
 0x27b   : > { %1487 = vadd.xlane.f32.xlu1 %v1486_v19  ;;  %v7651_v19 = vld [vmem:[%s9819_s9] sm:$0xff] }
 0x27c   : > { %1879 = vmatpush.bf16.msra.mxu1 %v7637_v43 }
 0x2ee   : > { %v1488_v53 = vpop.xlane.xlu1 %1487 }
 0x2ef   : > { %6628 = vrcp.f32 %v1488_v53  ;;  %v7667_v53 = vadd.s32 104, %v7518_v38 }
 0x2f1   : > { %10257 = vst [vmem:[#allocation101_spill] sm:$0xff] %v7667_v53 }
 0x2f5   : > { %v6629_v45 = vpop.eup %6628 }
 0x2f6   : > { %v1490_v57 = vmul.f32 %v6629_v45, %v6627_v54  ;;  %v7643_v54 = vld [vmem:[%s9819_s9 + $0x8] sm:$0xff]  ;;  %v7674_v45 = vadd.s32 120, %v7518_v38 }
 0x2f7   : > { %1880 = vmatpush.bf16.msra.mxu1 %v7643_v54 }
 0x2f8   : > { %v7526_v37 = vperm.slane %v1490_v57, 0  ;;  %v7528_v52 = vperm.slane %v1490_v57, 1  ;;  %2378 = vst [vmem:[%s7023_s26] sm:$0x3] %v1490_v57 }
 0x2f9   : > { %10258 = vst [vmem:[#allocation102_spill] sm:$0xff] %v7674_v45 }
 0x2fa   : > { %1593 = vperm.xlu1 %6498, %v7528_v52   ;;  %1502 = vperm.xlu0 %6497, %v7526_v37  }
 0x2fb   : > { %1496 = vperm.xlu2 %6496, %v7526_v37   ;;  %1881 = vmatpush.bf16.msra.mxu1 %v7651_v19 }
 0x2fe   : > { %1882 = vmatmul.bf16.vlgmr.msra.gmra.mxu1 %v7178_v29 }
 0x302   : > { %6501 = vset.pattern.permute.xlu1 %v7535_v8  ;;  %6504 = vset.pattern.permute.xlu0 %v7538_v44 }
 0x303   : > { %6499 = vset.pattern.permute.xlu2 %v7523_v61 }
 0x30a   : > { %1605 = vperm.xlu1 %6501, %v7528_v52   ;;  %1520 = vperm.xlu0 %6504, %v7526_v37  }
 0x30b   : > { %1599 = vperm.xlu2 %6499, %v7528_v52  }
 0x312   : > { %6503 = vset.pattern.permute.xlu1 %v7547_v56  ;;  %6509 = vset.pattern.permute.xlu0 %v7550_v34 }
 0x313   : > { %6500 = vset.pattern.permute.xlu2 %v7535_v8 }
 0x31a   : > { %1611 = vperm.xlu1 %6503, %v7528_v52   ;;  %1629 = vperm.xlu0 %6509, %v7528_v52  }
 0x31b   : > { %1508 = vperm.xlu2 %6500, %v7526_v37  }
 0x322   : > { %6506 = vset.pattern.permute.xlu1 %v7559_v28  ;;  %6514 = vset.pattern.permute.xlu0 %v7562_v46 }
 0x323   : > { %6502 = vset.pattern.permute.xlu2 %v7547_v56 }
 0x32a   : > { %1526 = vperm.xlu1 %6506, %v7526_v37   ;;  %1550 = vperm.xlu0 %6514, %v7526_v37  }
 0x32b   : > { %1514 = vperm.xlu2 %6502, %v7526_v37  }
 0x332   : > { %6508 = vset.pattern.permute.xlu1 %v7550_v34  ;;  %6519 = vset.pattern.permute.xlu0 %v7571_v15 }
 0x333   : > { %6505 = vset.pattern.permute.xlu2 %v7538_v44 }
 0x33a   : > { %1532 = vperm.xlu1 %6508, %v7526_v37   ;;  %1659 = vperm.xlu0 %6519, %v7528_v52  }
 0x33b   : > { %1617 = vperm.xlu2 %6505, %v7528_v52  }
 0x342   : > { %6511 = vset.pattern.permute.xlu1 %v7580_v18  ;;  %6524 = vset.pattern.permute.xlu0 %v7583_v50 }
 0x343   : > { %6507 = vset.pattern.permute.xlu2 %v7559_v28 }
 0x34a   : > { %1635 = vperm.xlu1 %6511, %v7528_v52   ;;  %1580 = vperm.xlu0 %6524, %v7526_v37  }
 0x34b   : > { %1623 = vperm.xlu2 %6507, %v7528_v52  }
 0x352   : > { %6513 = vset.pattern.permute.xlu1 %v7592_v60  ;;  %6528 = vset.pattern.permute.xlu0 %v7518_v38 }
 0x353   : > { %6510 = vset.pattern.permute.xlu2 %v7580_v18 }
 0x355   : > { %v1497_v57 = vpop.permute.xlu2 %1496 }
 0x35a   : > { %1641 = vperm.xlu1 %6513, %v7528_v52  }
 0x35b   : > { %1538 = vperm.xlu2 %6510, %v7526_v37  }
 0x362   : > { %6516 = vset.pattern.permute.xlu1 %v7623_v20 }
 0x363   : > { %6512 = vset.pattern.permute.xlu2 %v7592_v60 }
 0x36a   : > { %1556 = vperm.xlu1 %6516, %v7526_v37  }
 0x36b   : > { %1544 = vperm.xlu2 %6512, %v7526_v37  }
 0x36c   : > { %v1503_v44 = vpop.permute.xlu0 %1502 }
 0x372   : > { %6518 = vset.pattern.permute.xlu1 %v7571_v15  ;;  %v1594_v15 = vpop.permute.xlu1 %1593 }
 0x373   : > { %6515 = vset.pattern.permute.xlu2 %v7562_v46 }
 0x37a   : > { %1562 = vperm.xlu1 %6518, %v7526_v37  }
 0x37b   : > { %1647 = vperm.xlu2 %6515, %v7528_v52   ;;  %v1883_v8 = vpop.f32.mrf.mxu1 }
 0x37c   : > { %v1606_v18 = vpop.permute.xlu1 %1605 }
 0x382   : > { %6521 = vset.pattern.permute.xlu1 %v7660_v51 }
 0x383   : > { %6517 = vset.pattern.permute.xlu2 %v7623_v20  ;;  %v1885_v21 = vpop.f32.mrf.mxu1 }
 0x38a   : > { %1665 = vperm.xlu1 %6521, %v7528_v52  }
 0x38b   : > { %1653 = vperm.xlu2 %6517, %v7528_v52  }
 0x38c   : > { %v1612_v20 = vpop.permute.xlu1 %1611 }
 0x392   : > { %6523 = vset.pattern.permute.xlu1 %v7667_v53 }
 0x393   : > { %6520 = vset.pattern.permute.xlu2 %v7660_v51  ;;  %v1600_v51 = vpop.permute.xlu2 %1599 }
 0x39a   : > { %1671 = vperm.xlu1 %6523, %v7528_v52  }
 0x39b   : > { %1568 = vperm.xlu2 %6520, %v7526_v37   ;;  %v1509_v46 = vpop.permute.xlu2 %1508 }
 0x39c   : > { %v1527_v34 = vpop.permute.xlu1 %1526  ;;  %v1719_v62 = vmul.f32 %v6914_v6, %v1509_v46  ;;  %v6625_v46 = vld [vmem:[%s9820_s10] ss:$0 sm:$0xff]  ;;  %v10260_v6 = vld [vmem:[#allocation23_spill] sm:$0xff] }
 0x39e   : > { %v1752_v48 = vsel %vm1216_vm1, %v1719_v62, 0.0 }
 0x3a2   : > { %6526 = vset.pattern.permute.xlu1 %v7674_v45 }
 0x3a3   : > { %6522 = vset.pattern.permute.xlu2 %v7667_v53  ;;  %v1515_v53 = vpop.permute.xlu2 %1514 }
 0x3a4   : > { %v1720_v1 = vmul.f32 %v6916_v7, %v1515_v53  ;;  %v1722_v53 = vmul.f32 %v6929_v12, %v1527_v34  ;;  %v10259_v7 = vld [vmem:[#allocation22_spill] sm:$0xff] }
 0x3aa   : > { %1586 = vperm.xlu1 %6526, %v7526_v37  }
 0x3ab   : > { %1574 = vperm.xlu2 %6522, %v7526_v37   ;;  %v1618_v37 = vpop.permute.xlu2 %1617 }
 0x3ac   : > { %v1533_v60 = vpop.permute.xlu1 %1532 }
 0x3ad   : > { %v1723_v62 = vmul.f32 %v6931_v13, %v1533_v60 }
 0x3af   : > { %v1760_v60 = vsel %vm1216_vm1, %v1723_v62, 0.0 }
 0x3b2   : > { %6530 = vset.pattern.permute.xlu1 %v7518_v38 }
 0x3b3   : > { %6525 = vset.pattern.permute.xlu2 %v7583_v50  ;;  %v1624_v38 = vpop.permute.xlu2 %1623 }
 0x3bb   : > { %1677 = vperm.xlu2 %6525, %v7528_v52   ;;  %v1539_v50 = vpop.permute.xlu2 %1538 }
 0x3bc   : > { %v7686_v28 = vpop.permute.xlu1 %1635 }
 0x3c3   : > { %6527 = vset.pattern.permute.xlu2 %v7674_v45  ;;  %v1521_v45 = vpop.permute.xlu0 %1520 }
 0x3c5   : > { %v1545_v56 = vpop.permute.xlu2 %1544 }
 0x3cb   : > { %1683 = vperm.xlu2 %6527, %v7528_v52   ;;  %v1718_v52 = vmul.f32 %v6912_v5, %v1503_v44  ;;  %v1630_v33 = vpop.permute.xlu0 %1629  ;;  %v1754_v44 = vsel %vm1216_vm1, %v1720_v1, 0.0  ;;  %v1735_v5 = vmul.f32 %v10260_v6, %v1606_v18  ;;  %v10264_v6 = vld [vmem:[#allocation25_spill] sm:$0xff] }
 0x3cc   : > { %v1642_v55 = vpop.permute.xlu1 %1641 }
 0x3cd   : > { %v1750_v40 = vsel %vm1216_vm1, %v1718_v52, 0.0 }
 0x3d3   : > { %6529 = vset.pattern.permute.xlu2 %v7523_v61  ;;  %v1717_v61 = vmul.f32 %v6910_v4, %v1497_v57  ;;  %v1721_v57 = vmul.f32 %v6927_v11, %v1521_v45  ;;  %v1551_v1 = vpop.permute.xlu0 %1550  ;;  %v10261_v4 = vld [vmem:[#allocation12_spill] sm:$0xff] }
 0x3d4   : > { %v1724_v14 = vmul.f32 %v10261_v4, %v1539_v50  ;;  %v10265_v4 = vld [vmem:[#allocation26_spill] sm:$0xff] }
 0x3d5   : > { %v7688_v25 = vpop.permute.xlu2 %1647  ;;  %v1749_v49 = vsel %vm1216_vm1, %v1717_v61, 0.0  ;;  %v1733_v61 = vmul.f32 %v6991_v31, %v1594_v15  ;;  %v10262_v15 = vld [vmem:[#allocation24_spill] sm:$0xff] }
 0x3d6   : > { %v1751_v58 = vadd.f32 %v1750_v40, %v1749_v49  ;;  %v1734_v49 = vmul.f32 %v10259_v7, %v1600_v51  ;;  %v1884_v40 = vadd.f32 %v6625_v46, %v1883_v8  ;;  %v10263_v51 = vld [vmem:[#allocation13_spill] sm:$0xff]  ;;  %v1737_v7 = vmul.f32 %v10264_v6, %v1618_v37 }
 0x3d7   : > { %v1725_v8 = vmul.f32 %v10263_v51, %v1545_v56  ;;  %v1762_v50 = vsel %vm1216_vm1, %v1724_v14, 0.0 }
 0x3d8   : > { %v1753_v21 = vadd.f32 %v1752_v48, %v1751_v58  ;;  %v1756_v58 = vsel %vm1216_vm1, %v1721_v57, 0.0  ;;  %v1758_v48 = vsel %vm1216_vm1, %v1722_v53, 0.0  ;;  %v6014_v18 = vmul.f32 -1.442695, %v1884_v40 }
 0x3d9   : > { %v1787_v57 = vsel %vm1216_vm1, %v1734_v49, 0.0  ;;  %v1789_v53 = vsel %vm1216_vm1, %v1735_v5, 0.0  ;;  %v1764_v62 = vsel %vm1216_vm1, %v1725_v8, 0.0  ;;  %v10266_v49 = vld [vmem:[#allocation14_spill] sm:$0xff]  ;;  %v10269_v8 = vld [vmem:[#allocation28_spill] sm:$0xff] }
 0x3da   : > { %v1755_v52 = vadd.f32 %v1754_v44, %v1753_v21  ;;  %v1786_v44 = vsel %vm1216_vm1, %v1733_v61, 0.0  ;;  %v1736_v21 = vmul.f32 %v10262_v15, %v1612_v20  ;;  %v1738_v20 = vmul.f32 %v10265_v4, %v1624_v38 }
 0x3db   : > { %6630 = vpow2.f32 %v6014_v18  ;;  %v1726_v40 = vmul.f32 %v10266_v49, %v1551_v1  ;;  %v1660_v5 = vpop.permute.xlu0 %1659  ;;  %v10270_v18 = vld [vmem:[#allocation29_spill] sm:$0xff] }
 0x3dc   : > { %v1557_v32 = vpop.permute.xlu1 %1556  ;;  %v1757_v11 = vadd.f32 %v1756_v58, %v1755_v52  ;;  %v1788_v52 = vadd.f32 %v1787_v57, %v1786_v44  ;;  %v1791_v61 = vsel %vm1216_vm1, %v1736_v21, 0.0  ;;  %v1795_v38 = vsel %vm1216_vm1, %v1738_v20, 0.0 }
 0x3dd   : > { %v1740_v57 = vmul.f32 %v10269_v8, %v7686_v28  ;;  %v1766_v1 = vsel %vm1216_vm1, %v1726_v40, 0.0  ;;  %v6053_v8 = vld [vmem:[%s9821_s11] sm:$0xf] }
 0x3de   : > { %v1759_v46 = vadd.f32 %v1758_v48, %v1757_v11  ;;  %v1790_v15 = vadd.f32 %v1789_v53, %v1788_v52  ;;  %v1793_v11 = vsel %vm1216_vm1, %v1737_v7, 0.0  ;;  %v10267_v48 = vld [vmem:[#allocation15_spill] sm:$0xff]  ;;  %v10271_v7 = vld [vmem:[#allocation16_spill] sm:$0xff] }
 0x3df   : > { %v1727_v37 = vmul.f32 %v10267_v48, %v1557_v32  ;;  %v1799_v28 = vsel %vm1216_vm1, %v1740_v57, 0.0 }
 0x3e0   : > { %v1761_v58 = vadd.f32 %v1760_v60, %v1759_v46  ;;  %v1792_v14 = vadd.f32 %v1791_v61, %v1790_v15  ;;  %v10268_v46 = vld [vmem:[#allocation27_spill] sm:$0xff]  ;;  %v10273_v61 = vld [vmem:[#allocation18_spill] sm:$0xff] }
 0x3e1   : > { %v1739_v21 = vmul.f32 %v10268_v46, %v1630_v33  ;;  %v1768_v32 = vsel %vm1216_vm1, %v1727_v37, 0.0 }
 0x3e2   : > { %v1763_v56 = vadd.f32 %v1762_v50, %v1761_v58  ;;  %v1794_v53 = vadd.f32 %v1793_v11, %v1792_v14  ;;  %v1741_v50 = vmul.f32 %v10270_v18, %v1642_v55  ;;  %v10272_v58 = vld [vmem:[#allocation17_spill] sm:$0xff]  ;;  %v10274_v55 = vld [vmem:[#allocation30_spill] sm:$0xff] }
 0x3e3   : > { %v1797_v20 = vsel %vm1216_vm1, %v1739_v21, 0.0  ;;  %v1581_v37 = vpop.permute.xlu0 %1580 }
 0x3e4   : > { %v1765_v44 = vadd.f32 %v1764_v62, %v1763_v56  ;;  %v6631_v56 = vpop.eup %6630  ;;  %v1796_v33 = vadd.f32 %v1795_v38, %v1794_v53  ;;  %v1801_v11 = vsel %vm1216_vm1, %v1741_v50, 0.0  ;;  %v6061_v53 = vld [vmem:[%s9821_s11 + $0x8] sm:$0xf] }
 0x3e5   : > { %v7697_v3 = vpop.permute.xlu2 %1653  ;;  %v7746_v38 = vadd.f32 1.0, %v6631_v56 }
 0x3e6   : > { %v1767_v46 = vadd.f32 %v1766_v1, %v1765_v44  ;;  %v1798_v57 = vadd.f32 %v1797_v20, %v1796_v33  ;;  %v10278_v33 = vld [vmem:[#allocation19_spill] sm:$0xff] }
 0x3e7   : > { %v1731_v20 = vmul.f32 %v10278_v33, %v1581_v37  ;;  %6632 = vrcp.f32 %v7746_v38  ;;  %vm1896_vm11 = vweird.f32 %v7746_v38 }
 0x3e8   : > { %v1769_v14 = vadd.f32 %v1768_v32, %v1767_v46  ;;  %v10276_v46 = vld [vmem:[#allocation32_spill] sm:$0xff]  ;;  %v1800_v56 = vadd.f32 %v1799_v28, %v1798_v57 }
 0x3e9   : > { %v1744_v50 = vmul.f32 %v10276_v46, %v1660_v5  ;;  %v6063_v32 = vld [vmem:[%s9821_s11 + $0x18] sm:$0xf0] }
 0x3ec   : > { %v1563_v45 = vpop.permute.xlu1 %1562 }
 0x3ed   : > { %v1728_v52 = vmul.f32 %v10271_v7, %v1563_v45  ;;  %v1742_v45 = vmul.f32 %v10274_v55, %v7688_v25  ;;  %v6271_v25 = vld [vmem:[%s9821_s11 + $0x14] sm:$0xf0]  ;;  %v7920_v55 = vld [vmem:[%s6983_s30] sm:$0x1] }
 0x3ee   : > { %v7758_v1 = vor.u32 %v6271_v25, %v6061_v53  ;;  %v6193_v53 = vld [vmem:[%s9823_s13 + $0xe8] sm:$0xf] }
 0x3ef   : > { %v1770_v40 = vsel %vm1216_vm1, %v1728_v52, 0.0  ;;  %v1803_v28 = vsel %vm1216_vm1, %v1742_v45, 0.0 }
 0x3f0   : > { %v1771_v52 = vadd.f32 %v1770_v40, %v1769_v14  ;;  %10277 = vst [vmem:[#allocation103_spill] sm:$0xff] %v7758_v1  ;;  %v6276_v14 = vld [vmem:[%s9822_s12 + $0x24] sm:$0xf]  ;;  %v6035_v40 = vld [vmem:[%s9822_s12 + $0x30] sm:$0xf0]  ;;  %2065 = vmatpush.bf16.msrb.mxu0 %v7758_v1 }
 0x3f1   : > { %v7786_v25 = vor.u32 %v6276_v14, %v6035_v40 }
 0x3f3   : > { %10281 = vst [vmem:[#allocation106_spill] sm:$0xff] %v7786_v25  ;;  %1975 = vmatpush.bf16.msra.mxu3 %v7786_v25  ;;  %6069 = vmatmul.msk.bf16.vlgmr.msrb.gmra.mxu0 %vm2028_vm9, %v7920_v55 }
 0x3f5   : > { %v1569_v34 = vpop.permute.xlu2 %1568 }
 0x3f6   : > { %v1729_v15 = vmul.f32 %v10272_v58, %v1569_v34  ;;  %v10275_v34 = vld [vmem:[#allocation31_spill] sm:$0xff] }
 0x3f7   : > { %v1743_v18 = vmul.f32 %v10275_v34, %v7697_v3  ;;  %v6269_v3 = vld [vmem:[%s9821_s11 + $0xc] sm:$0xf] }
 0x3f8   : > { %v7770_v34 = vor.u32 %v6269_v3, %v6063_v32  ;;  %v6311_v3 = vld [vmem:[%s9823_s13 + $0xf4] sm:$0xf0]  ;;  %v6309_v32 = vld [vmem:[%s9823_s13 + $0xec] sm:$0xf] }
 0x3f9   : > { %v1805_v37 = vsel %vm1216_vm1, %v1743_v18, 0.0  ;;  %v7796_v45 = vor.u32 %v6311_v3, %v6193_v53  ;;  %v6195_v18 = vld [vmem:[%s9823_s13 + $0xf8] sm:$0xf0]  ;;  %v6272_v53 = vld [vmem:[%s9822_s12 + $0x4] sm:$0xf] }
 0x3fa   : > { %10279 = vst [vmem:[#allocation104_spill] sm:$0xff] %v7770_v34  ;;  %2078 = vmatpush.bf16.msrb.mxu1 %v7770_v34  ;;  %v7809_v14 = vor.u32 %v6309_v32, %v6195_v18  ;;  %v6019_v3 = vld [vmem:[%s9822_s12 + $0x10] sm:$0xf0]  ;;  %v6177_v34 = vld [vmem:[%s9823_s13 + $0xc8] sm:$0xf] }
 0x3fb   : > { %10282 = vst [vmem:[#allocation107_spill] sm:$0xff] %v7796_v45  ;;  %2270 = vmatpush.bf16.msra.mxu0 %v7796_v45  ;;  %v7825_v32 = vor.u32 %v6272_v53, %v6019_v3  ;;  %v6307_v18 = vld [vmem:[%s9823_s13 + $0xd4] sm:$0xf0]  ;;  %v6041_v45 = vld [vmem:[%s9822_s12 + $0x28] sm:$0xf] }
 0x3fc   : > { %v1666_v51 = vpop.permute.xlu1 %1665  ;;  %10284 = vst [vmem:[#allocation108_spill] sm:$0xff] %v7809_v14  ;;  %v7839_v53 = vor.u32 %v6307_v18, %v6177_v34  ;;  %v6277_v34 = vld [vmem:[%s9822_s12 + $0x2c] sm:$0xf] }
 0x3fd   : > { %10287 = vst [vmem:[#allocation110_spill] sm:$0xff] %v7825_v32  ;;  %1976 = vmatpush.bf16.msra.mxu3 %v7825_v32  ;;  %6070 = vmatmul.msk.bf16.vlgmr.msrb.gmra.mxu1 %vm2028_vm9, %v7920_v55 }
 0x3fe   : > { %2283 = vmatpush.bf16.msra.mxu1 %v7809_v14  ;;  %10288 = vst [vmem:[#allocation111_spill] sm:$0xff] %v7839_v53 }
 0x3ff   : > { %2271 = vmatpush.bf16.msra.mxu0 %v7839_v53 }
 0x405   : > { %v1575_v60 = vpop.permute.xlu2 %1574 }
 0x406   : > { %v1730_v62 = vmul.f32 %v10273_v61, %v1575_v60  ;;  %v1772_v60 = vsel %vm1216_vm1, %v1729_v15, 0.0  ;;  %v6033_v15 = vld [vmem:[%s9822_s12 + $0x20] sm:$0xf] }
 0x407   : > { %v1773_v57 = vadd.f32 %v1772_v60, %v1771_v52  ;;  %v6017_v60 = vld [vmem:[%s9822_s12] sm:$0xf]  ;;  %v6274_v52 = vld [vmem:[%s9822_s12 + $0xc] sm:$0xf0] }
 0x408   : > { %v1774_v44 = vsel %vm1216_vm1, %v1730_v62, 0.0  ;;  %v6278_v62 = vld [vmem:[%s9822_s12 + $0x2c] sm:$0xf0]  ;;  %v7811_v40 = vor.u32 %v6274_v52, %v6017_v60  ;;  %v6305_v60 = vld [vmem:[%s9823_s13 + $0xcc] sm:$0xf] }
 0x409   : > { %v7772_v5 = vor.u32 %v6278_v62, %v6033_v15  ;;  %v1802_v15 = vadd.f32 %v1801_v11, %v1800_v56  ;;  %v10283_v62 = vld [vmem:[#allocation33_spill] sm:$0xff]  ;;  %v1775_v56 = vadd.f32 %v1774_v44, %v1773_v57  ;;  %v10286_v44 = vld [vmem:[#allocation34_spill] sm:$0xff] }
 0x40a   : > { %v1745_v11 = vmul.f32 %v10283_v62, %v1666_v51  ;;  %10285 = vst [vmem:[#allocation109_spill] sm:$0xff] %v7811_v40  ;;  %v10290_v62 = vld [vmem:[#allocation20_spill] sm:$0xff] }
 0x40b   : > { %10280 = vst [vmem:[#allocation105_spill] sm:$0xff] %v7772_v5  ;;  %1962 = vmatpush.bf16.msra.mxu2 %v7772_v5  ;;  %v1804_v51 = vadd.f32 %v1803_v28, %v1802_v15  ;;  %v6179_v28 = vld [vmem:[%s9823_s13 + $0xd8] sm:$0xf0]  ;;  %v1807_v15 = vsel %vm1216_vm1, %v1744_v50, 0.0  ;;  %v6279_v50 = vld [vmem:[%s9822_s12 + $0x34] sm:$0xf0] }
 0x40c   : > { %v1672_v21 = vpop.permute.xlu1 %1671  ;;  %v7841_v3 = vor.u32 %v6305_v60, %v6179_v28  ;;  %v1809_v18 = vsel %vm1216_vm1, %v1745_v11, 0.0  ;;  %v6161_v28 = vld [vmem:[%s9823_s13 + $0xa8] sm:$0xf] }
 0x40d   : > { %v1746_v57 = vmul.f32 %v10286_v44, %v1672_v21  ;;  %v1776_v21 = vsel %vm1216_vm1, %v1731_v20, 0.0  ;;  %v1806_v1 = vadd.f32 %v1805_v37, %v1804_v51  ;;  %v6043_v20 = vld [vmem:[%s9822_s12 + $0x38] sm:$0xf0]  ;;  %v7859_v51 = vor.u32 %v6279_v50, %v6041_v45  ;;  %v6301_v45 = vld [vmem:[%s9823_s13 + $0xac] sm:$0xf] }
 0x40e   : > { %10289 = vst [vmem:[#allocation112_spill] sm:$0xff] %v7841_v3  ;;  %v1777_v37 = vadd.f32 %v1776_v21, %v1775_v56  ;;  %v7861_v60 = vor.u32 %v6277_v34, %v6043_v20  ;;  %v6163_v56 = vld [vmem:[%s9823_s13 + $0xb8] sm:$0xf0]  ;;  %2284 = vmatpush.bf16.msra.mxu1 %v7841_v3  ;;  %v6299_v20 = vld [vmem:[%s9823_s13 + $0x94] sm:$0xf0] }
 0x40f   : > { %1963 = vmatpush.bf16.msra.mxu2 %v7811_v40  ;;  %10291 = vst [vmem:[#allocation113_spill] sm:$0xff] %v7859_v51  ;;  %v1811_v14 = vsel %vm1216_vm1, %v1746_v57, 0.0  ;;  %v10294_v21 = vld [vmem:[#allocation35_spill] sm:$0xff]  ;;  %v6145_v57 = vld [vmem:[%s9823_s13 + $0x88] sm:$0xf] }
 0x410   : > { %10292 = vst [vmem:[#allocation114_spill] sm:$0xff] %v7861_v60  ;;  %2001 = vmatpush.bf16.msrb.mxu3 %v7861_v60 }
 0x413   : > { %1988 = vmatpush.bf16.msrb.mxu2 %v7859_v51 }
 0x415   : > { %v1678_v44 = vpop.permute.xlu2 %1677 }
 0x416   : > { %v1747_v50 = vmul.f32 %v10294_v21, %v1678_v44  ;;  %v1808_v44 = vadd.f32 %v1807_v15, %v1806_v1  ;;  %v6273_v1 = vld [vmem:[%s9822_s12 + $0xc] sm:$0xf]  ;;  %v6027_v15 = vld [vmem:[%s9822_s12 + $0x18] sm:$0xf0]  ;;  %v7915_v21 = vor.u32 %v6299_v20, %v6145_v57  ;;  %v6295_v57 = vld [vmem:[%s9823_s13 + $0x74] sm:$0xf0] }
 0x417   : > { %v7917_v33 = vor.u32 %v6273_v1, %v6027_v15 }
 0x418   : > { %v1810_v53 = vadd.f32 %v1809_v18, %v1808_v44  ;;  %10297 = vst [vmem:[#allocation118_spill] sm:$0xff] %v7915_v21  ;;  %v6129_v18 = vld [vmem:[%s9823_s13 + $0x68] sm:$0xf] }
 0x419   : > { %10298 = vst [vmem:[#allocation119_spill] sm:$0xff] %v7917_v33  ;;  %2002 = vmatpush.bf16.msrb.mxu3 %v7917_v33 }
 0x41a   : > { %v1812_v20 = vadd.f32 %v1811_v14, %v1810_v53  ;;  %v7948_v53 = vor.u32 %v6295_v57, %v6129_v18  ;;  %v6115_v18 = vld [vmem:[%s9823_s13 + $0x58] sm:$0xf0] }
 0x41c   : > { %v1587_v52 = vpop.permute.xlu1 %1586  ;;  %10301 = vst [vmem:[#allocation121_spill] sm:$0xff] %v7948_v53 }
 0x41d   : > { %v1732_v46 = vmul.f32 %v10290_v62, %v1587_v52  ;;  %v6303_v52 = vld [vmem:[%s9823_s13 + $0xb4] sm:$0xf0] }
 0x41e   : > { %v7872_v11 = vor.u32 %v6303_v52, %v6161_v28  ;;  %v6297_v28 = vld [vmem:[%s9823_s13 + $0x8c] sm:$0xf]  ;;  %v6025_v52 = vld [vmem:[%s9822_s12 + $0x8] sm:$0xf] }
 0x41f   : > { %v1778_v62 = vsel %vm1216_vm1, %v1732_v46, 0.0  ;;  %v7883_v46 = vor.u32 %v6301_v45, %v6163_v56  ;;  %v6275_v45 = vld [vmem:[%s9822_s12 + $0x14] sm:$0xf0] }
 0x420   : > { %10293 = vst [vmem:[#allocation115_spill] sm:$0xff] %v7872_v11  ;;  %v1779_v34 = vadd.f32 %v1778_v62, %v1777_v37  ;;  %v7894_v62 = vpop.eup %6632  ;;  %v6147_v37 = vld [vmem:[%s9823_s13 + $0x98] sm:$0xf0]  ;;  %v7906_v3 = vor.u32 %v6275_v45, %v6025_v52  ;;  %2272 = vmatpush.bf16.msra.mxu0 %v7872_v11  ;;  %v1813_v45 = vsel %vm1216_vm1, %v1747_v50, 0.0  ;;  %v6293_v50 = vld [vmem:[%s9823_s13 + $0x6c] sm:$0xf] }
 0x421   : > { %10295 = vst [vmem:[#allocation116_spill] sm:$0xff] %v7883_v46  ;;  %v1892_v52 = vmul.f32 %v7894_v62, %v7746_v38  ;;  %2285 = vmatpush.bf16.msra.mxu1 %v7883_v46  ;;  %v7926_v61 = vor.u32 %v6297_v28, %v6147_v37  ;;  %v6131_v28 = vld [vmem:[%s9823_s13 + $0x78] sm:$0xf0]  ;;  %v1814_v14 = vadd.f32 %v1813_v45, %v1812_v20  ;;  %v6113_v11 = vld [vmem:[%s9823_s13 + $0x48] sm:$0xf]  ;;  %vm1897_vm10 = vweird.f32 %v7894_v62 }
 0x422   : > { %v1780_v56 = vrot.slane %v1779_v34, 4  ;;  %10296 = vst [vmem:[#allocation117_spill] sm:$0xff] %v7906_v3  ;;  %1989 = vmatpush.bf16.msrb.mxu2 %v7906_v3  ;;  %v10300_v37 = vld [vmem:[#allocation36_spill] sm:$0xff]  ;;  %v7952_v46 = vor.u32 %v6293_v50, %v6131_v28  ;;  %vm7996_vm15 = vmor %vm1896_vm11, %vm1897_vm10 }
 0x423   : > { %10299 = vst [vmem:[#allocation120_spill] sm:$0xff] %v7926_v61 }
 0x424   : > { %v1781_v44 = vadd.f32 %v1780_v56, %v1779_v34  ;;  %2273 = vmatpush.bf16.msra.mxu0 %v7915_v21  ;;  %v1893_v34 = vsub.f32 1.0, %v1892_v52  ;;  %10302 = vst [vmem:[#allocation122_spill] sm:$0xff] %v7952_v46  ;;  %v6289_v52 = vld [vmem:[%s9823_s13 + $0x4c] sm:$0xf] }
 0x425   : > { %v1684_v1 = vpop.permute.xlu2 %1683  ;;  %2286 = vmatpush.bf16.msra.mxu1 %v7926_v61  ;;  %v6097_v61 = vld [vmem:[%s9823_s13 + $0x28] sm:$0xf] }
 0x426   : > { %v1748_v15 = vmul.f32 %v10300_v37, %v1684_v1  ;;  %v6291_v1 = vld [vmem:[%s9823_s13 + $0x54] sm:$0xf0]  ;;  %v1782_v45 = vrot.slane %v1781_v44, 2  ;;  %v1894_v28 = vmul.f32 %v7894_v62, %v1893_v34 }
 0x427   : > { %v7967_v50 = vor.u32 %v6291_v1, %v6113_v11  ;;  %v1902_v11 = vand.u32 2147483648, %v7746_v38  ;;  %v6287_v34 = vld [vmem:[%s9823_s13 + $0x34] sm:$0xf0] }
 0x428   : > { %v1815_v56 = vsel %vm1216_vm1, %v1748_v15, 0.0  ;;  %2274 = vmatpush.bf16.msra.mxu0 %v7948_v53  ;;  %v7971_v15 = vor.u32 %v6289_v52, %v6115_v18  ;;  %v1895_v1 = vadd.f32 %v7894_v62, %v1894_v28  ;;  %v6099_v52 = vld [vmem:[%s9823_s13 + $0x38] sm:$0xf0]  ;;  %v6081_v28 = vld [vmem:[%s9823_s13 + $0x8] sm:$0xf] }
 0x429   : > { %v1816_v20 = vadd.f32 %v1815_v56, %v1814_v14  ;;  %10303 = vst [vmem:[#allocation123_spill] sm:$0xff] %v7967_v50  ;;  %2287 = vmatpush.bf16.msra.mxu1 %v7952_v46  ;;  %v1783_v14 = vadd.f32 %v1782_v45, %v1781_v44  ;;  %v6285_v44 = vld [vmem:[%s9823_s13 + $0x2c] sm:$0xf]  ;;  %v1900_v45 = vand.u32 2147483647, %v7746_v38 }
 0x42a   : > { %10304 = vst [vmem:[#allocation124_spill] sm:$0xff] %v7971_v15  ;;  %v8000_v46 = vor.u32 %v6285_v44, %v6099_v52  ;;  %v6083_v38 = vld [vmem:[%s9823_s13 + $0x18] sm:$0xf0]  ;;  %v1899_v52 = vsel %vm7996_vm15, %v7894_v62, %v1895_v1  ;;  %v6055_v62 = vld [vmem:[%s9821_s11 + $0x10] sm:$0xf0] }
 0x42b   : > { %v1817_v57 = vrot.slane %v1816_v20, 4  ;;  %v1784_v18 = vrot.slane %v1783_v14, 1  ;;  %vm1901_vm10 = vcmp.eq.f32.partialorder %v1900_v45, 8.507059e+37 }
 0x42c   : > { %2275 = vmatpush.bf16.msra.mxu0 %v7967_v50  ;;  %10308 = vst [vmem:[#allocation126_spill] sm:$0xff] %v8000_v46  ;;  %v6268_v50 = vld [vmem:[%s9821_s11 + $0x4] sm:$0xf] }
 0x42d   : > { %v1818_v56 = vadd.f32 %v1817_v57, %v1816_v20  ;;  %2288 = vmatpush.bf16.msra.mxu1 %v7971_v15  ;;  %v7989_v20 = vor.u32 %v6287_v34, %v6097_v61  ;;  %v6283_v61 = vld [vmem:[%s9823_s13 + $0x14] sm:$0xf0]  ;;  %v1903_v34 = vor.u32 1.1754944e-38, %v1902_v11  ;;  %v1785_v53 = vadd.f32 %v1784_v18, %v1783_v14  ;;  %v6270_v11 = vld [vmem:[%s9821_s11 + $0xc] sm:$0xf0] }
 0x42e   : > { %v8015_v44 = vor.u32 %v6283_v61, %v6081_v28  ;;  %v8039_v18 = vor.u32 %v6270_v11, %v6053_v8  ;;  %v6185_v8 = vld [vmem:[%s9823_s13 + $0xe0] sm:$0xf]  ;;  %v6187_v61 = vld [vmem:[%s9823_s13 + $0xf0] sm:$0xf0] }
 0x42f   : > { %v1819_v21 = vrot.slane %v1818_v56, 2  ;;  %10305 = vst [vmem:[#allocation125_spill] sm:$0xff] %v7989_v20  ;;  %v1904_v1 = vsel %vm1901_vm10, %v1903_v34, %v1899_v52  ;;  %v6306_v34 = vld [vmem:[%s9823_s13 + $0xcc] sm:$0xf0]  ;;  %v6304_v52 = vld [vmem:[%s9823_s13 + $0xc4] sm:$0xf] }
 0x430   : > { %2276 = vmatpush.bf16.msra.mxu0 %v7989_v20  ;;  %10309 = vst [vmem:[#allocation127_spill] sm:$0xff] %v8015_v44  ;;  %v6171_v11 = vld [vmem:[%s9823_s13 + $0xd0] sm:$0xf0] }
 0x431   : > { %v1820_v57 = vadd.f32 %v1819_v21, %v1818_v56  ;;  %v6281_v21 = vld [vmem:[%s9823_s13 + $0xc] sm:$0xf]  ;;  %2289 = vmatpush.bf16.msra.mxu1 %v8000_v46 }
 0x432   : > { %v8021_v15 = vor.u32 %v6281_v21, %v6083_v38 }
 0x433   : > { %v1821_v56 = vrot.slane %v1820_v57, 1 }
 0x434   : > { %10310 = vst [vmem:[#allocation128_spill] sm:$0xff] %v8021_v15  ;;  %2277 = vmatpush.bf16.msra.mxu0 %v8015_v44 }
 0x435   : > { %v1822_v37 = vadd.f32 %v1821_v56, %v1820_v57  ;;  %2290 = vmatpush.bf16.msra.mxu1 %v8021_v15  ;;  %v8041_v57 = vor.u32 %v6268_v50, %v6055_v62  ;;  %v6169_v56 = vld [vmem:[%s9823_s13 + $0xc0] sm:$0xf]  ;;  %v8090_v62 = vor.u32 %v6304_v52, %v6171_v11 }
 0x436   : > { %v8088_v50 = vor.u32 %v6306_v34, %v6169_v56  ;;  %v6296_v56 = vld [vmem:[%s9823_s13 + $0x84] sm:$0xf]  ;;  %v6139_v34 = vld [vmem:[%s9823_s13 + $0x90] sm:$0xf0] }
 0x437   : > { %v1908_v14 = vsel %vm10035_vm12, %v1822_v37, %v1785_v53  ;;  %2278 = vmatmul.bf16.vlgmr.msra.gmra.mxu0 %v7178_v29  ;;  %v6310_v37 = vld [vmem:[%s9823_s13 + $0xec] sm:$0xf0]  ;;  %v6308_v53 = vld [vmem:[%s9823_s13 + $0xe4] sm:$0xf]  ;;  %v8126_v11 = vor.u32 %v6296_v56, %v6139_v34  ;;  %v6105_v56 = vld [vmem:[%s9823_s13 + $0x40] sm:$0xf] }
 0x438   : > { %v1910_v45 = vmul.f32 %v1908_v14, %v1904_v1  ;;  %3277 = vmatpush.bf16.msrb.mxu0 %v7772_v5  ;;  %2291 = vmatmul.bf16.vlgmr.msra.gmra.mxu1 %v7178_v29  ;;  %v8068_v21 = vor.u32 %v6310_v37, %v6185_v8  ;;  %v8070_v38 = vor.u32 %v6308_v53, %v6187_v61  ;;  %v6153_v1 = vld [vmem:[%s9823_s13 + $0xa0] sm:$0xf]  ;;  %v6302_v14 = vld [vmem:[%s9823_s13 + $0xac] sm:$0xf0] }
 0x439   : > { %3290 = vmatpush.bf16.msrb.mxu1 %v7786_v25  ;;  %v8106_v8 = vor.u32 %v6302_v14, %v6153_v1  ;;  %v6137_v53 = vld [vmem:[%s9823_s13 + $0x80] sm:$0xf]  ;;  %v6298_v61 = vld [vmem:[%s9823_s13 + $0x8c] sm:$0xf0]  ;;  %10312 = vst [vmem:[#allocation130_spill] sm:$0xff] %v8126_v11 }
 0x43a   : > { %v1912_v28 = vpack.c.bf16 %v1910_v45, %v1910_v45  ;;  %v6300_v45 = vld [vmem:[%s9823_s13 + $0xa4] sm:$0xf]  ;;  %v8124_v52 = vor.u32 %v6298_v61, %v6137_v53  ;;  %v6121_v1 = vld [vmem:[%s9823_s13 + $0x60] sm:$0xf]  ;;  %v6294_v14 = vld [vmem:[%s9823_s13 + $0x6c] sm:$0xf0] }
 0x43b   : > { %v8142_v53 = vor.u32 %v6294_v14, %v6121_v1  ;;  %v6290_v34 = vld [vmem:[%s9823_s13 + $0x4c] sm:$0xf0] }
 0x43c   : > { %6047 = vmatmul.msk.bf16.vlgmr.msra.gmra.mxu2 %vm1216_vm1, %v1912_v28  ;;  %6048 = vmatmul.msk.bf16.vlgmr.msra.gmra.mxu3 %vm1216_vm1, %v1912_v28  ;;  %10311 = vst [vmem:[#allocation129_spill] sm:$0xff] %v8124_v52  ;;  %v8164_v1 = vor.u32 %v6290_v34, %v6105_v56  ;;  %v6073_v56 = vld [vmem:[%s9823_s13] sm:$0xf]  ;;  %v6282_v34 = vld [vmem:[%s9823_s13 + $0xc] sm:$0xf0] }
 0x43d   : > { %2039 = vmatpush.bf16.msra.mxu2 %v8039_v18  ;;  %2052 = vmatpush.bf16.msra.mxu3 %v8041_v57  ;;  %10313 = vst [vmem:[#allocation131_spill] sm:$0xff] %v8142_v53 }
 0x43e   : > { %3291 = vmatpush.bf16.msrb.mxu1 %v7825_v32  ;;  %3278 = vmatpush.bf16.msrb.mxu0 %v7811_v40  ;;  %10315 = vst [vmem:[#allocation133_spill] sm:$0xff] %v8164_v1  ;;  %v6075_v40 = vld [vmem:[%s9823_s13 + $0x10] sm:$0xf0] }
 0x442   : > { %3316 = vmatpush.bf16.msra.mxu1 %v7861_v60  ;;  %3303 = vmatpush.bf16.msra.mxu0 %v7859_v51  ;;  %v6091_v51 = vld [vmem:[%s9823_s13 + $0x30] sm:$0xf0]  ;;  %v6280_v60 = vld [vmem:[%s9823_s13 + $0x4] sm:$0xf] }
 0x446   : > { %3317 = vmatpush.bf16.msra.mxu1 %v7917_v33  ;;  %3304 = vmatpush.bf16.msra.mxu0 %v7906_v3  ;;  %v6288_v3 = vld [vmem:[%s9823_s13 + $0x44] sm:$0xf]  ;;  %v6107_v33 = vld [vmem:[%s9823_s13 + $0x50] sm:$0xf0] }
 0x447   : > { %v8166_v14 = vor.u32 %v6288_v3, %v6107_v33 }
 0x449   : > { %10316 = vst [vmem:[#allocation134_spill] sm:$0xff] %v8166_v14 }
 0x44c   : > { %6049 = vmatmul.msk.bf16.vlgmr.msrb.gmra.mxu2 %vm1216_vm1, %v1912_v28  ;;  %6050 = vmatmul.msk.bf16.vlgmr.msrb.gmra.mxu3 %vm1216_vm1, %v1912_v28  ;;  %v6155_v28 = vld [vmem:[%s9823_s13 + $0xb0] sm:$0xf0] }
 0x44d   : > { %2244 = vmatpush.bf16.msrb.mxu2 %v8068_v21  ;;  %2257 = vmatpush.bf16.msrb.mxu3 %v8070_v38  ;;  %v8108_v37 = vor.u32 %v6300_v45, %v6155_v28  ;;  %v6292_v45 = vld [vmem:[%s9823_s13 + $0x64] sm:$0xf]  ;;  %v6123_v28 = vld [vmem:[%s9823_s13 + $0x70] sm:$0xf0] }
 0x44e   : > { %v8144_v61 = vor.u32 %v6292_v45, %v6123_v28  ;;  %v6089_v45 = vld [vmem:[%s9823_s13 + $0x20] sm:$0xf]  ;;  %v6286_v28 = vld [vmem:[%s9823_s13 + $0x2c] sm:$0xf0] }
 0x44f   : > { %v8182_v33 = vor.u32 %v6286_v28, %v6089_v45  ;;  %v8202_v45 = vor.u32 %v6280_v60, %v6075_v40  ;;  %v8209_v28 = vld [vmem:[%s9815_s5 + $0x38] sm:$0xff]  ;;  %v8218_v40 = vld [vmem:[%s9815_s5 + $0x30] sm:$0xff]  ;;  %v8225_v60 = vld [vmem:[%s9815_s5 + $0x28] sm:$0xff] }
 0x450   : > { %10314 = vst [vmem:[#allocation132_spill] sm:$0xff] %v8144_v61 }
 0x451   : > { %2245 = vmatpush.bf16.msrb.mxu2 %v8088_v50  ;;  %2258 = vmatpush.bf16.msrb.mxu3 %v8090_v62  ;;  %10317 = vst [vmem:[#allocation135_spill] sm:$0xff] %v8182_v33 }
 0x452   : > { %10320 = vst [vmem:[#allocation138_spill] sm:$0xff] %v8202_v45 }
 0x455   : > { %2246 = vmatpush.bf16.msrb.mxu2 %v8106_v8  ;;  %2259 = vmatpush.bf16.msrb.mxu3 %v8108_v37 }
 0x459   : > { %2247 = vmatpush.bf16.msrb.mxu2 %v8124_v52  ;;  %2260 = vmatpush.bf16.msrb.mxu3 %v8126_v11 }
 0x45c   : > { %6067 = vmatmul.msk.bf16.vlgmr.msra.gmra.mxu2 %vm2028_vm9, %v7920_v55  ;;  %6068 = vmatmul.msk.bf16.vlgmr.msra.gmra.mxu3 %vm2028_vm9, %v7920_v55  ;;  %v6284_v55 = vld [vmem:[%s9823_s13 + $0x24] sm:$0xf] }
 0x45d   : > { %2248 = vmatpush.bf16.msrb.mxu2 %v8142_v53  ;;  %2261 = vmatpush.bf16.msrb.mxu3 %v8144_v61  ;;  %v8184_v3 = vor.u32 %v6284_v55, %v6091_v51  ;;  %v8200_v51 = vor.u32 %v6282_v34, %v6073_v56 }
 0x45f   : > { %10318 = vst [vmem:[#allocation136_spill] sm:$0xff] %v8184_v3 }
 0x460   : > { %10319 = vst [vmem:[#allocation137_spill] sm:$0xff] %v8200_v51 }
 0x461   : > { %2249 = vmatpush.bf16.msrb.mxu2 %v8164_v1  ;;  %2262 = vmatpush.bf16.msrb.mxu3 %v8166_v14 }
 0x465   : > { %2250 = vmatpush.bf16.msrb.mxu2 %v8182_v33  ;;  %2263 = vmatpush.bf16.msrb.mxu3 %v8184_v3 }
 0x469   : > { %2251 = vmatpush.bf16.msrb.mxu2 %v8200_v51  ;;  %2264 = vmatpush.bf16.msrb.mxu3 %v8202_v45 }
 0x46c   : > { %2252 = vmatmul.bf16.vlgmr.msrb.gmra.mxu2 %v7178_v29  ;;  %2265 = vmatmul.bf16.vlgmr.msrb.gmra.mxu3 %v7178_v29  ;;  %v8232_v29 = vld [vmem:[%s9815_s5 + $0x20] sm:$0xff] }
 0x46d   : > { %2384 = vmatpush.bf16.msra.mxu2 %v8209_v28  ;;  %3228 = vmatpush.bf16.msra.mxu3 %v7597_v47  ;;  %v8239_v47 = vld [vmem:[%s9815_s5 + $0x18] sm:$0xff] }
 0x471   : > { %2385 = vmatpush.bf16.msra.mxu2 %v8218_v40  ;;  %3229 = vmatpush.bf16.msra.mxu3 %v7605_v30  ;;  %v8246_v30 = vld [vmem:[%s9815_s5 + $0x10] sm:$0xff] }
 0x475   : > { %2386 = vmatpush.bf16.msra.mxu2 %v8225_v60  ;;  %3230 = vmatpush.bf16.msra.mxu3 %v7612_v2  ;;  %v8253_v2 = vld [vmem:[%s9815_s5 + $0x8] sm:$0xff] }
 0x479   : > { %2387 = vmatpush.bf16.msra.mxu2 %v8232_v29  ;;  %3231 = vmatpush.bf16.msra.mxu3 %v7620_v59  ;;  %v8260_v59 = vld [vmem:[%s9815_s5] sm:$0xff] }
 0x47d   : > { %2388 = vmatpush.bf16.msra.mxu2 %v8239_v47  ;;  %3232 = vmatpush.bf16.msra.mxu3 %v7629_v16  ;;  %v2067_v16 = vpop.f32.mrf.mxu0 }
 0x481   : > { %2389 = vmatpush.bf16.msra.mxu2 %v8246_v30  ;;  %3233 = vmatpush.bf16.msra.mxu3 %v7637_v43  ;;  %v2080_v43 = vpop.f32.mrf.mxu1 }
 0x485   : > { %2390 = vmatpush.bf16.msra.mxu2 %v8253_v2  ;;  %3234 = vmatpush.bf16.msra.mxu3 %v7643_v54  ;;  %v2069_v55 = vpop.f32.mrf.mxu0 }
 0x486   : > { %v812_v55 = vld [vmem:[%s9824_s14] sm:$0xf] }
 0x489   : > { %2391 = vmatpush.bf16.msra.mxu2 %v8260_v59  ;;  %3235 = vmatpush.bf16.msra.mxu3 %v7651_v19  ;;  %v2082_v56 = vpop.f32.mrf.mxu1 }
 0x48a   : > { %v8269_v56 = vperm.slane %v812_v55, 3 }
 0x48c   : > { %10321 = vst [vmem:[#allocation139_spill] sm:$0xff] %v8269_v56 }
 0x48d   : > { %3333 = vmatpush.bf16.msrb.mxu2 %v8039_v18  ;;  %3346 = vmatpush.bf16.msrb.mxu3 %v8041_v57 }
 0x4b4   : > { %v2279_v34 = vpop.f32.mrf.mxu0 }
 0x4b5   : > { %v2292_v32 = vpop.f32.mrf.mxu1 }
 0x4bc   : > { %v2281_v15 = vpop.f32.mrf.mxu0 }
 0x4bd   : > { %v2294_v25 = vpop.f32.mrf.mxu1 }
 0x4bf   : > { %v1965_v54 = vpop.f32.mrf.mxu2  ;;  %v1978_v5 = vpop.f32.mrf.mxu3 }
 0x4c7   : > { %v1967_v44 = vpop.f32.mrf.mxu2  ;;  %v1980_v46 = vpop.f32.mrf.mxu3 }
 0x4cf   : > { %v1991_v20 = vpop.f32.mrf.mxu2  ;;  %v2004_v58 = vpop.f32.mrf.mxu3 }
 0x4d0   : > { %v2068_v7 = vadd.f32 %v2067_v16, %v1991_v20  ;;  %v2081_v19 = vadd.f32 %v2080_v43, %v2004_v58  ;;  %v8272_v20 = vperm.slane %v812_v55, 0 }
 0x4d2   : > { %v2298_v4 = vadd.f32 %v2279_v34, %v2068_v7  ;;  %v2299_v48 = vadd.f32 %v2292_v32, %v2081_v19  ;;  %10322 = vst [vmem:[#allocation140_spill] sm:$0xff] %v8272_v20  ;;  %v8274_v32 = vperm.slane %v812_v55, 1 }
 0x4d4   : > { %v2312_v46 = vadd.f32 %v8269_v56, %v2299_v48  ;;  %10323 = vst [vmem:[#allocation141_spill] sm:$0xff] %v8274_v32 }
 0x4d6   : > { %v6201_v44 = vmul.f32 -1.442695, %v2312_v46 }
 0x4d7   : > { %v1993_v49 = vpop.f32.mrf.mxu2  ;;  %v2006_v6 = vpop.f32.mrf.mxu3 }
 0x4d8   : > { %6634 = vpow2.f32 %v6201_v44  ;;  %v8278_v44 = vperm.slane %v812_v55, 2 }
 0x4da   : > { %10324 = vst [vmem:[#allocation142_spill] sm:$0xff] %v8278_v44 }
 0x4de   : > { %v6635_v48 = vpop.eup %6634 }
 0x4df   : > { %v2041_v13 = vpop.f32.mrf.mxu2  ;;  %v2054_v31 = vpop.f32.mrf.mxu3 }
 0x4e0   : > { %v2042_v12 = vadd.f32 %v2041_v13, %v1965_v54  ;;  %v2055_v7 = vadd.f32 %v2054_v31, %v1978_v5 }
 0x4e7   : > { %v2043_v25 = vpop.f32.mrf.mxu2  ;;  %v2056_v15 = vpop.f32.mrf.mxu3 }
 0x4e8   : > { %v2355_v15 = vadd.f32 1.0, %v6635_v48 }
 0x4ef   : > { %v2253_v58 = vpop.f32.mrf.mxu2  ;;  %v2266_v6 = vpop.f32.mrf.mxu3 }
 0x4f0   : > { %v2296_v49 = vadd.f32 %v2253_v58, %v2042_v12  ;;  %v2297_v16 = vadd.f32 %v2266_v6, %v2055_v7 }
 0x4f2   : > { %v2309_v43 = vadd.f32 %v8272_v20, %v2296_v49  ;;  %v2310_v34 = vadd.f32 %v8274_v32, %v2297_v16  ;;  %v2311_v49 = vadd.f32 %v8278_v44, %v2298_v4 }
 0x4f4   : > { %v6199_v19 = vmul.f32 -1.442695, %v2309_v43  ;;  %v6200_v25 = vmul.f32 -1.442695, %v2310_v34 }
 0x4f6   : > { %6636 = vpow2.f32 %v6199_v19 }
 0x4f7   : > { %6638 = vpow2.f32 %v6200_v25  ;;  %v2255_v13 = vpop.f32.mrf.mxu2  ;;  %v2268_v54 = vpop.f32.mrf.mxu3 }
 0x4f8   : > { %6640 = vrcp.f32 %v2355_v15 }
 0x4fc   : > { %v6637_v31 = vpop.eup %6636 }
 0x4fd   : > { %v6639_v5 = vpop.eup %6638  ;;  %v2316_v12 = vadd.f32 1.0, %v6637_v31 }
 0x4fe   : > { %v2335_v46 = vadd.f32 1.0, %v6639_v5  ;;  %v6641_v7 = vpop.eup %6640 }
 0x4ff   : > { %6642 = vrcp.f32 %v2316_v12  ;;  %v2357_v34 = vmul.f32 %v6641_v7, %v2355_v15  ;;  %v2328_v25 = vand.u32 2147483648, %v2316_v12  ;;  %v2326_v54 = vand.u32 2147483647, %v2316_v12 }
 0x500   : > { %6644 = vrcp.f32 %v2335_v46  ;;  %v2347_v31 = vand.u32 2147483648, %v2335_v46  ;;  %v2345_v55 = vand.u32 2147483647, %v2335_v46  ;;  %vm2322_vm10 = vweird.f32 %v2316_v12 }
 0x501   : > { %6646 = vtanh.f32 %v2311_v49  ;;  %v2358_v56 = vsub.f32 1.0, %v2357_v34  ;;  %v2329_v4 = vor.u32 1.1754944e-38, %v2328_v25  ;;  %vm2341_vm14 = vweird.f32 %v2335_v46 }
 0x502   : > { %vm2327_vm13 = vcmp.eq.f32.partialorder %v2326_v54, 8.507059e+37  ;;  %v2348_v49 = vor.u32 1.1754944e-38, %v2347_v31  ;;  %vm2346_vm7 = vcmp.eq.f32.partialorder %v2345_v55, 8.507059e+37  ;;  %vm2362_vm6 = vweird.f32 %v6641_v7 }
 0x503   : > { %v2359_v26 = vmul.f32 %v6641_v7, %v2358_v56 }
 0x505   : > { %v6643_v58 = vpop.eup %6642 }
 0x506   : > { %v6645_v6 = vpop.eup %6644  ;;  %v2318_v16 = vmul.f32 %v6643_v58, %v2316_v12  ;;  %vm2323_vm11 = vweird.f32 %v6643_v58  ;;  %v2367_v12 = vand.u32 2147483648, %v2355_v15 }
 0x507   : > { %v2337_v43 = vmul.f32 %v6645_v6, %v2335_v46  ;;  %vm2342_vm15 = vweird.f32 %v6645_v6  ;;  %vm2324_vm12 = vmor %vm2322_vm10, %vm2323_vm11  ;;  %vm2361_vm11 = vweird.f32 %v2355_v15 }
 0x508   : > { %v2319_v19 = vsub.f32 1.0, %v2318_v16  ;;  %v817_v16 = vld [vmem:[#allocation3] sm:$0x3]  ;;  %vm2343_vm8 = vmor %vm2341_vm14, %vm2342_vm15  ;;  %vm10361_vm15 = vcmask 523712  }
 0x509   : > { %v2338_v48 = vsub.f32 1.0, %v2337_v43  ;;  %v6647_v43 = vpop.eup %6646  ;;  %vm10363_vm10 = vmmov %vm10361_vm15 }
 0x50a   : > { %v2320_v13 = vmul.f32 %v6643_v58, %v2319_v19 }
 0x50b   : > { %v2339_v5 = vmul.f32 %v6645_v6, %v2338_v48 }
 0x50c   : > { %v2321_v20 = vadd.f32 %v6643_v58, %v2320_v13  ;;  %v2360_v13 = vadd.f32 %v6641_v7, %v2359_v26  ;;  %v6730_v26 = vld [vmem:[%s9819_s9 + $0x38] sm:$0xff] }
 0x50d   : > { %v2340_v44 = vadd.f32 %v6645_v6, %v2339_v5 }
 0x50e   : > { %v2325_v32 = vsel %vm2324_vm12, %v6643_v58, %v2321_v20  ;;  %v2365_v20 = vand.u32 2147483647, %v2355_v15  ;;  %vm2363_vm12 = vmor %vm2361_vm11, %vm2362_vm6  ;;  %v2368_v58 = vor.u32 1.1754944e-38, %v2367_v12  ;;  %v6731_v15 = vld [vmem:[%s9819_s9 + $0x30] sm:$0xff]  ;;  %vm10355_vm6 = vcmask 392512  }
 0x50f   : > { %v2330_v19 = vsel %vm2327_vm13, %v2329_v4, %v2325_v32  ;;  %v2344_v39 = vsel %vm2343_vm8, %v6645_v6, %v2340_v44  ;;  %v2364_v46 = vsel %vm2363_vm12, %v6641_v7, %v2360_v13  ;;  %v6733_v7 = vld [vmem:[%s9819_s9 + $0x20] sm:$0xff]  ;;  %vm10358_vm8 = vcmask 458112  }
 0x510   : > { %v2372_v48 = vmul.f32 %v6647_v43, %v2330_v19  ;;  %v2349_v42 = vsel %vm2346_vm7, %v2348_v49, %v2344_v39  ;;  %vm2366_vm14 = vcmp.eq.f32.partialorder %v2365_v20, 8.507059e+37  ;;  %vm10356_vm7 = vmmov %vm10355_vm6  ;;  %vm10364_vm11 = vcmask 589312  }
 0x511   : > { %v2371_v24 = vmul.f32 %v2349_v42, %v817_v16  ;;  %v2369_v32 = vsel %vm2366_vm14, %v2368_v58, %v2364_v46  ;;  %v10325_v46 = vld [vmem:[#allocation41_spill] sm:$0xff]  ;;  %vm10359_vm13 = vmmov %vm10358_vm8  ;;  %vm10367_vm14 = vcmask 654912  }
 0x512   : > { %vm10365_vm12 = vmmov %vm10364_vm11 }
 0x513   : > { %v2373_v34 = vadd.f32 %v2372_v48, %v2371_v24  ;;  %v6204_v24 = vld [vmem:[%s6983_s30 + $0x1] sm:$0x1] }
 0x515   : > { %6648 = vtanh.f32 %v2373_v34  ;;  %2380 = vst [vmem:[#allocation3] sm:$0x3] %v2373_v34 }
 0x51b   : > { %v6649_v25 = vpop.eup %6648 }
 0x51c   : > { %v2375_v44 = vmul.f32 %v6649_v25, %v2369_v32  ;;  %v10326_v25 = vld [vmem:[#allocation42_spill] sm:$0xff] }
 0x51e   : > { %2379 = vst [vmem:[#allocation2] sm:$0x3] %v2375_v44  ;;  %v2376_v42 = vpack.c.bf16 %v2375_v44, %v2375_v44  ;;  %v10327_v44 = vld [vmem:[#allocation37_spill] sm:$0xff] }
 0x520   : > { %2377 = vst [vmem:[%s6989_s17] sm:$0x1] %v2376_v42 }
 0x525   : > { %v2381_v56 = vld [vmem:[#allocation2] sm:$0x3] }
 0x526   : > { %v8281_v39 = vpack.c.bf16 %v2381_v56, %v2381_v56 }
 0x528   : > { %2392 = vmatmul.bf16.vlgmr.msra.gmra.mxu2 %v8281_v39  ;;  %3236 = vmatmul.bf16.vlgmr.msra.gmra.mxu3 %v8281_v39 }
 0x529   : > { %3378 = vmatpush.bf16.msra.mxu2 %v8068_v21  ;;  %3391 = vmatpush.bf16.msra.mxu3 %v8070_v38 }
 0x52d   : > { %3379 = vmatpush.bf16.msra.mxu2 %v8088_v50  ;;  %3392 = vmatpush.bf16.msra.mxu3 %v8090_v62 }
 0x531   : > { %3380 = vmatpush.bf16.msra.mxu2 %v8106_v8  ;;  %3393 = vmatpush.bf16.msra.mxu3 %v8108_v37 }
 0x535   : > { %3381 = vmatpush.bf16.msra.mxu2 %v8124_v52  ;;  %3394 = vmatpush.bf16.msra.mxu3 %v8126_v11 }
 0x538   : > { %6209 = vmatmul.msk.bf16.vlgmr.msrb.gmra.mxu2 %vm2028_vm9, %v6204_v24  ;;  %6210 = vmatmul.msk.bf16.vlgmr.msrb.gmra.mxu3 %vm2028_vm9, %v6204_v24  ;;  %v10328_v24 = vld [vmem:[#allocation38_spill] sm:$0xff] }
 0x539   : > { %3382 = vmatpush.bf16.msra.mxu2 %v8142_v53  ;;  %3395 = vmatpush.bf16.msra.mxu3 %v8144_v61 }
 0x53d   : > { %3383 = vmatpush.bf16.msra.mxu2 %v8164_v1  ;;  %3396 = vmatpush.bf16.msra.mxu3 %v8166_v14 }
 0x541   : > { %3384 = vmatpush.bf16.msra.mxu2 %v8182_v33  ;;  %3397 = vmatpush.bf16.msra.mxu3 %v8184_v3 }
 0x545   : > { %3385 = vmatpush.bf16.msra.mxu2 %v8200_v51  ;;  %3398 = vmatpush.bf16.msra.mxu3 %v8202_v45 }
 0x548   : > { %3386 = vmatmul.bf16.vlgmr.msra.gmra.mxu2 %v8281_v39  ;;  %3399 = vmatmul.bf16.vlgmr.msra.gmra.mxu3 %v8281_v39 }
 0x549   : > { %3511 = vmatpush.bf16.msrb.mxu2 %v8209_v28  ;;  %4355 = vmatpush.bf16.msrb.mxu3 %v6730_v26  ;;  %v6732_v28 = vld [vmem:[%s9819_s9 + $0x28] sm:$0xff] }
 0x54d   : > { %3512 = vmatpush.bf16.msrb.mxu2 %v8218_v40  ;;  %4356 = vmatpush.bf16.msrb.mxu3 %v6731_v15  ;;  %v6734_v40 = vld [vmem:[%s9819_s9 + $0x18] sm:$0xff] }
 0x551   : > { %3513 = vmatpush.bf16.msrb.mxu2 %v8225_v60  ;;  %4357 = vmatpush.bf16.msrb.mxu3 %v6732_v28  ;;  %v6735_v60 = vld [vmem:[%s9819_s9 + $0x10] sm:$0xff] }
 0x552   : > { %v10329_v28 = vld [vmem:[#allocation39_spill] sm:$0xff] }
 0x555   : > { %3514 = vmatpush.bf16.msrb.mxu2 %v8232_v29  ;;  %4358 = vmatpush.bf16.msrb.mxu3 %v6733_v7  ;;  %v6736_v29 = vld [vmem:[%s9819_s9 + $0x8] sm:$0xff] }
 0x559   : > { %3515 = vmatpush.bf16.msrb.mxu2 %v8239_v47  ;;  %4359 = vmatpush.bf16.msrb.mxu3 %v6734_v40  ;;  %v6737_v47 = vld [vmem:[%s9819_s9] sm:$0xff] }
 0x55d   : > { %3516 = vmatpush.bf16.msrb.mxu2 %v8246_v30  ;;  %4360 = vmatpush.bf16.msrb.mxu3 %v6735_v60 }
 0x561   : > { %3517 = vmatpush.bf16.msrb.mxu2 %v8253_v2  ;;  %4361 = vmatpush.bf16.msrb.mxu3 %v6736_v29  ;;  %v6738_v2 = vld [vmem:[%s9816_s6] ss:$0 sm:$0xff] }
 0x565   : > { %3518 = vmatpush.bf16.msrb.mxu2 %v8260_v59  ;;  %4362 = vmatpush.bf16.msrb.mxu3 %v6737_v47 }
 0x569   : > { %4460 = vmatpush.bf16.msra.mxu2 %v8039_v18  ;;  %4473 = vmatpush.bf16.msra.mxu3 %v8041_v57 }
 0x5ab   : > { %v2393_v30 = vpop.f32.mrf.mxu2  ;;  %v8341_v6 = vpop.f32.mrf.mxu3 }
 0x5ac   : > { %v2394_v54 = vadd.f32 %v6738_v2, %v2393_v30 }
 0x5ae   : > { %v2397_v31 = vpack.c.bf16 %v2394_v54, %v2394_v54  ;;  %v10330_v54 = vld [vmem:[#allocation40_spill] sm:$0xff] }
 0x5b0   : > { %v2399_v5 = vrot.slane %v2397_v31, 3 }
 0x5b2   : > { %v2402_v59 = vsel %vm886_vm0, %v2397_v31, %v2399_v5 }
 0x5b3   : > { %v6202_v55 = vpack.i.b16 %v2402_v59, %v2402_v59  ;;  %v2395_v4 = vpop.f32.mrf.mxu2  ;;  %v3239_v16 = vpop.f32.mrf.mxu3  ;;  %v2405_v19 = vunpack.i.h.s16 %v2402_v59 }
 0x5b5   : > { %v2408_v49 = vperm.slane %v6202_v55, 0  ;;  %v2407_v20 = vpack.i.b16 %v2405_v19, %v2405_v19 }
 0x5b7   : > { %v2411_v43 = vpack.i.b16 %v2408_v49, %v2408_v49  ;;  %v2409_v47 = vperm.slane %v2407_v20, 0 }
 0x5b9   : > { %v2413_v48 = vperm.slane %v2411_v43, 0 }
 0x5bb   : > { %v8347_v34 = vunpack.c.l.bf16 %v2413_v48  ;;  %v8349_v13 = vpop.f32.mrf.mxu2  ;;  %v8351_v12 = vpop.f32.mrf.mxu3 }
 0x5bd   : > { %v2424_v58 = vadd.f32 %v10325_v46, %v8347_v34  ;;  %v2425_v32 = vadd.f32 %v10326_v25, %v8347_v34  ;;  %v2420_v56 = vadd.f32 %v10327_v44, %v8347_v34  ;;  %v2421_v42 = vadd.f32 %v10328_v24, %v8347_v34 }
 0x5be   : > { %v2426_v26 = vadd.f32 %v7071_v63, %v8347_v34  ;;  %v2427_v15 = vadd.f32 %v7073_v0, %v8347_v34  ;;  %v2422_v7 = vadd.f32 %v10329_v28, %v8347_v34  ;;  %v2423_v31 = vadd.f32 %v10330_v54, %v8347_v34 }
 0x5bf   : > { %v2520_v40 = vmax.f32 %v2424_v58, 0.0  ;;  %v2521_v60 = vmax.f32 %v2425_v32, 0.0  ;;  %v2516_v29 = vmax.f32 %v2420_v56, 0.0  ;;  %v2517_v30 = vmax.f32 %v2421_v42, 0.0 }
 0x5c0   : > { %v2522_v2 = vmax.f32 %v2426_v26, 0.0  ;;  %v2523_v4 = vmax.f32 %v2427_v15, 0.0  ;;  %v2518_v43 = vmax.f32 %v2422_v7, 0.0  ;;  %v2415_v56 = vpack.i.b16 %v2409_v47, %v2409_v47 }
 0x5c1   : > { %v2552_v5 = vpack.c.bf16 %v2520_v40, %v2520_v40  ;;  %v2553_v59 = vpack.c.bf16 %v2521_v60, %v2521_v60  ;;  %v2548_v55 = vpack.c.bf16 %v2516_v29, %v2516_v29  ;;  %v2549_v16 = vpack.c.bf16 %v2517_v30, %v2517_v30 }
 0x5c2   : > { %v2554_v49 = vpack.c.bf16 %v2522_v2, %v2522_v2  ;;  %v2555_v32 = vpack.c.bf16 %v2523_v4, %v2523_v4  ;;  %v2519_v26 = vmax.f32 %v2423_v31, 0.0  ;;  %v2550_v30 = vpack.c.bf16 %v2518_v43, %v2518_v43 }
 0x5c3   : > { %v3337_v19 = vpop.f32.mrf.mxu2  ;;  %v3350_v48 = vpop.f32.mrf.mxu3  ;;  %v2584_v0 = vunpack.c.l.bf16 %v2552_v5  ;;  %v2585_v63 = vunpack.c.l.bf16 %v2553_v59  ;;  %v2580_v58 = vunpack.c.l.bf16 %v2548_v55  ;;  %v2581_v20 = vunpack.c.l.bf16 %v2549_v16 }
 0x5c4   : > { %v2586_v42 = vunpack.c.l.bf16 %v2554_v49  ;;  %v2587_v15 = vunpack.c.l.bf16 %v2555_v32  ;;  %v2551_v2 = vpack.c.bf16 %v2519_v26, %v2519_v26  ;;  %v2430_v31 = vadd.f32 %v7085_v9, %v8347_v34 }
 0x5c5   : > { %v2616_v28 = vmul.f32 %v2584_v0, %v7190_v27  ;;  %v2617_v40 = vmul.f32 %v2585_v63, %v7190_v27  ;;  %v2612_v60 = vmul.f32 %v2580_v58, %v7190_v27  ;;  %v2613_v29 = vmul.f32 %v2581_v20, %v7190_v27 }
 0x5c6   : > { %v2618_v7 = vmul.f32 %v2586_v42, %v7190_v27  ;;  %v2619_v47 = vmul.f32 %v2587_v15, %v7190_v27  ;;  %v2431_v0 = vadd.f32 %v7087_v10, %v8347_v34  ;;  %v2417_v63 = vperm.slane %v2415_v56, 0 }
 0x5c7   : > { %v8374_v5 = vpack.c.bf16 %v2617_v40, %v2616_v28  ;;  %v2644_v59 = vpack.c.bf16 %v2613_v29, %v2612_v60  ;;  %v2582_v55 = vunpack.c.l.bf16 %v2550_v30  ;;  %v2583_v4 = vunpack.c.l.bf16 %v2551_v2 }
 0x5c8   : > { %v8382_v49 = vpack.c.bf16 %v2619_v47, %v2618_v7  ;;  %v2526_v43 = vmax.f32 %v2430_v31, 0.0  ;;  %v2527_v19 = vmax.f32 %v2431_v0, 0.0  ;;  %v2432_v60 = vadd.f32 %v7095_v17, %v8347_v34 }
 0x5c9   : > { %v2664_v16 = vunpack.c.l.bf16 %v8374_v5  ;;  %v2661_v28 = vunpack.c.h.bf16 %v2644_v59  ;;  %v2660_v48 = vunpack.c.l.bf16 %v2644_v59  ;;  %v2614_v58 = vmul.f32 %v2582_v55, %v7190_v27 }
 0x5ca   : > { %v2615_v32 = vmul.f32 %v2583_v4, %v7190_v27  ;;  %v2558_v26 = vpack.c.bf16 %v2526_v43, %v2526_v43  ;;  %v2559_v40 = vpack.c.bf16 %v2527_v19, %v2527_v19  ;;  %v8395_v30 = vunpack.c.l.bf16 %v2417_v63  ;;  %v10331_v63 = vld [vmem:[#allocation45_spill] sm:$0xff] }
 0x5cb   : > { %v8386_v20 = vpop.f32.mrf.mxu2  ;;  %v8388_v42 = vpop.f32.mrf.mxu3  ;;  %v2704_v56 = vsel %vm1216_vm1, %v2664_v16, 0.0  ;;  %v2695_v15 = vsel %vm1216_vm1, %v2661_v28, 0.0  ;;  %v2692_v29 = vsel %vm1216_vm1, %v2660_v48, 0.0  ;;  %v2667_v2 = vunpack.c.h.bf16 %v8382_v49 }
 0x5cc   : > { %2705 = vadd.xlane.f32.xlu2 %v2704_v56  ;;  %v2645_v7 = vpack.c.bf16 %v2615_v32, %v2614_v58  ;;  %2696 = vadd.xlane.f32.xlu0 %v2695_v15  ;;  %v2590_v47 = vunpack.c.l.bf16 %v2558_v26  ;;  %v2591_v31 = vunpack.c.l.bf16 %v2559_v40  ;;  %v2433_v59 = vadd.f32 %v7097_v22, %v8347_v34  ;;  %v10332_v32 = vld [vmem:[#allocation46_spill] sm:$0xff] }
 0x5cd   : > { %2693 = vadd.xlane.f32.xlu1 %v2692_v29  ;;  %v2528_v43 = vmax.f32 %v2432_v60, 0.0  ;;  %v2428_v28 = vadd.f32 %v10331_v63, %v8347_v34  ;;  %v2713_v48 = vsel %vm1216_vm1, %v2667_v2, 0.0  ;;  %v2429_v56 = vadd.f32 %v10332_v32, %v8347_v34  ;;  %v10351_v63 = vld [vmem:[#allocation74_spill] sm:$0xff] }
 0x5ce   : > { %v2662_v0 = vunpack.c.l.bf16 %v2645_v7  ;;  %v2663_v55 = vunpack.c.h.bf16 %v2645_v7  ;;  %v2622_v4 = vmul.f32 %v2590_v47, %v7190_v27  ;;  %v2623_v16 = vmul.f32 %v2591_v31, %v7190_v27 }
 0x5cf   : > { %v2529_v19 = vmax.f32 %v2433_v59, 0.0  ;;  %v2560_v58 = vpack.c.bf16 %v2528_v43, %v2528_v43  ;;  %v2436_v26 = vadd.f32 %v7109_v35, %v8395_v30  ;;  %v2524_v29 = vmax.f32 %v2428_v28, 0.0 }
 0x5d0   : > { %v2698_v40 = vsel %vm1216_vm1, %v2662_v0, 0.0  ;;  %v2437_v60 = vadd.f32 %v7111_v36, %v8395_v30  ;;  %v2701_v31 = vsel %vm1216_vm1, %v2663_v55, 0.0  ;;  %v8413_v59 = vpack.c.bf16 %v2623_v16, %v2622_v4  ;;  %v10348_v36 = vld [vmem:[#allocation72_spill] sm:$0xff] }
 0x5d1   : > { %v2561_v15 = vpack.c.bf16 %v2529_v19, %v2529_v19  ;;  %v2592_v2 = vunpack.c.l.bf16 %v2560_v58  ;;  %v2525_v43 = vmax.f32 %v2429_v56, 0.0  ;;  %v2556_v17 = vpack.c.bf16 %v2524_v29, %v2524_v29 }
 0x5d2   : > { %v2532_v10 = vmax.f32 %v2436_v26, 0.0  ;;  %v2533_v35 = vmax.f32 %v2437_v60, 0.0  ;;  %v2665_v0 = vunpack.c.h.bf16 %v8374_v5  ;;  %v2666_v19 = vunpack.c.l.bf16 %v8382_v49  ;;  %v10333_v49 = vld [vmem:[#allocation52_spill] sm:$0xff] }
 0x5d3   : > { %v3389_v7 = vpop.f32.mrf.mxu2  ;;  %v3402_v47 = vpop.f32.mrf.mxu3  ;;  %v2593_v22 = vunpack.c.l.bf16 %v2561_v15  ;;  %v2557_v28 = vpack.c.bf16 %v2525_v43, %v2525_v43  ;;  %v2588_v4 = vunpack.c.l.bf16 %v2556_v17  ;;  %v2670_v58 = vunpack.c.l.bf16 %v8413_v59  ;;  %v10334_v17 = vld [vmem:[#allocation56_spill] sm:$0xff] }
 0x5d4   : > { %2714 = vadd.xlane.f32.xlu2 %v2713_v48  ;;  %2699 = vadd.xlane.f32.xlu0 %v2698_v40  ;;  %v2624_v7 = vmul.f32 %v2592_v2, %v7190_v27  ;;  %v2564_v16 = vpack.c.bf16 %v2532_v10, %v2532_v10  ;;  %v2565_v56 = vpack.c.bf16 %v2533_v35, %v2533_v35 }
 0x5d5   : > { %2702 = vadd.xlane.f32.xlu1 %v2701_v31  ;;  %v2625_v55 = vmul.f32 %v2593_v22, %v7190_v27  ;;  %v2589_v48 = vunpack.c.l.bf16 %v2557_v28  ;;  %v2438_v26 = vadd.f32 %v7113_v41, %v8395_v30  ;;  %v2620_v40 = vmul.f32 %v2588_v4, %v7190_v27 }
 0x5d6   : > { %v2434_v5 = vadd.f32 %v7099_v23, %v8347_v34  ;;  %v2435_v15 = vadd.f32 %v10333_v49, %v8347_v34  ;;  %v2439_v10 = vadd.f32 %v10334_v17, %v8395_v30  ;;  %v2707_v22 = vsel %vm1216_vm1, %v2665_v0, 0.0 }
 0x5d7   : > { %v2621_v29 = vmul.f32 %v2589_v48, %v7190_v27  ;;  %v2650_v60 = vpack.c.bf16 %v2625_v55, %v2624_v7  ;;  %v2596_v35 = vunpack.c.l.bf16 %v2564_v16  ;;  %v2722_v47 = vsel %vm1216_vm1, %v2670_v58, 0.0  ;;  %v10335_v16 = vld [vmem:[#allocation57_spill] sm:$0xff] }
 0x5d8   : > { %v2710_v31 = vsel %vm1216_vm1, %v2666_v19, 0.0  ;;  %v2597_v2 = vunpack.c.l.bf16 %v2565_v56  ;;  %v2534_v43 = vmax.f32 %v2438_v26, 0.0  ;;  %v2530_v4 = vmax.f32 %v2434_v5, 0.0 }
 0x5d9   : > { %v2648_v28 = vpack.c.bf16 %v2621_v29, %v2620_v40  ;;  %v2531_v41 = vmax.f32 %v2435_v15, 0.0  ;;  %v2535_v34 = vmax.f32 %v2439_v10, 0.0  ;;  %v2673_v48 = vunpack.c.h.bf16 %v2650_v60  ;;  %v10336_v40 = vld [vmem:[#allocation58_spill] sm:$0xff] }
 0x5da   : > { %v2628_v17 = vmul.f32 %v2596_v35, %v7190_v27  ;;  %v2629_v0 = vmul.f32 %v2597_v2, %v7190_v27  ;;  %v2566_v7 = vpack.c.bf16 %v2534_v43, %v2534_v43  ;;  %v2440_v58 = vadd.f32 %v10335_v16, %v8395_v30 }
 0x5db   : > { %v2567_v55 = vpack.c.bf16 %v2535_v34, %v2535_v34  ;;  %v2668_v19 = vunpack.c.l.bf16 %v2648_v28  ;;  %v2669_v56 = vunpack.c.h.bf16 %v2648_v28  ;;  %v2562_v26 = vpack.c.bf16 %v2530_v4, %v2530_v4 }
 0x5dc   : > { %2723 = vadd.xlane.f32.xlu2 %v2722_v47  ;;  %2708 = vadd.xlane.f32.xlu0 %v2707_v22  ;;  %v2563_v47 = vpack.c.bf16 %v2531_v41, %v2531_v41  ;;  %v2441_v5 = vadd.f32 %v10336_v40, %v8395_v30  ;;  %v2731_v15 = vsel %vm1216_vm1, %v2673_v48, 0.0  ;;  %v2536_v29 = vmax.f32 %v2440_v58, 0.0  ;;  %v10337_v41 = vld [vmem:[#allocation59_spill] sm:$0xff]  ;;  %v10338_v48 = vld [vmem:[#allocation61_spill] sm:$0xff] }
 0x5dd   : > { %2711 = vadd.xlane.f32.xlu1 %v2710_v31  ;;  %v2652_v10 = vpack.c.bf16 %v2629_v0, %v2628_v17  ;;  %v2598_v22 = vunpack.c.l.bf16 %v2566_v7  ;;  %v2599_v35 = vunpack.c.l.bf16 %v2567_v55  ;;  %v2716_v2 = vsel %vm1216_vm1, %v2668_v19, 0.0  ;;  %v10339_v0 = vld [vmem:[#allocation62_spill] sm:$0xff] }
 0x5de   : > { %v2537_v31 = vmax.f32 %v2441_v5, 0.0  ;;  %v2719_v43 = vsel %vm1216_vm1, %v2669_v56, 0.0  ;;  %v2594_v34 = vunpack.c.l.bf16 %v2562_v26  ;;  %v2595_v16 = vunpack.c.l.bf16 %v2563_v47 }
 0x5df   : > { %v2442_v28 = vadd.f32 %v10337_v41, %v8395_v30  ;;  %v2568_v4 = vpack.c.bf16 %v2536_v29, %v2536_v29  ;;  %v2444_v17 = vadd.f32 %v10338_v48, %v8395_v30  ;;  %v2445_v7 = vadd.f32 %v10339_v0, %v8395_v30 }
 0x5e0   : > { %v2569_v40 = vpack.c.bf16 %v2537_v31, %v2537_v31  ;;  %v2671_v55 = vunpack.c.h.bf16 %v8413_v59  ;;  %v2676_v58 = vunpack.c.l.bf16 %v2652_v10  ;;  %v2630_v19 = vmul.f32 %v2598_v22, %v7190_v27 }
 0x5e1   : > { %v2631_v56 = vmul.f32 %v2599_v35, %v7190_v27  ;;  %v2672_v26 = vunpack.c.l.bf16 %v2650_v60  ;;  %v2626_v47 = vmul.f32 %v2594_v34, %v7190_v27  ;;  %v2627_v5 = vmul.f32 %v2595_v16, %v7190_v27 }
 0x5e2   : > { %v2538_v31 = vmax.f32 %v2442_v28, 0.0  ;;  %v2540_v48 = vmax.f32 %v2444_v17, 0.0  ;;  %v2541_v0 = vmax.f32 %v2445_v7, 0.0  ;;  %v2740_v59 = vsel %vm1216_vm1, %v2676_v58, 0.0  ;;  %v10341_v58 = vld [vmem:[#allocation63_spill] sm:$0xff] }
 0x5e3   : > { %v2653_v41 = vpack.c.bf16 %v2631_v56, %v2630_v19  ;;  %v2725_v22 = vsel %vm1216_vm1, %v2671_v55, 0.0  ;;  %v2728_v35 = vsel %vm1216_vm1, %v2672_v26, 0.0  ;;  %v8458_v60 = vpack.c.bf16 %v2627_v5, %v2626_v47  ;;  %v10342_v55 = vld [vmem:[#allocation64_spill] sm:$0xff] }
 0x5e4   : > { %2732 = vadd.xlane.f32.xlu2 %v2731_v15  ;;  %2717 = vadd.xlane.f32.xlu0 %v2716_v2  ;;  %v10340_v15 = vld [vmem:[#allocation60_spill] sm:$0xff]  ;;  %v2600_v2 = vunpack.c.l.bf16 %v2568_v4  ;;  %v2570_v16 = vpack.c.bf16 %v2538_v31, %v2538_v31  ;;  %v2572_v4 = vpack.c.bf16 %v2540_v48, %v2540_v48  ;;  %v2573_v17 = vpack.c.bf16 %v2541_v0, %v2541_v0 }
 0x5e5   : > { %2720 = vadd.xlane.f32.xlu1 %v2719_v43  ;;  %v2443_v29 = vadd.f32 %v10340_v15, %v8395_v30  ;;  %v2601_v43 = vunpack.c.l.bf16 %v2569_v40  ;;  %v2678_v7 = vunpack.c.l.bf16 %v2653_v41  ;;  %v2446_v19 = vadd.f32 %v10341_v58, %v8395_v30 }
 0x5e6   : > { %v2632_v28 = vmul.f32 %v2600_v2, %v7190_v27  ;;  %v2447_v56 = vadd.f32 %v10342_v55, %v8395_v30  ;;  %v2674_v26 = vunpack.c.l.bf16 %v8458_v60  ;;  %v2677_v47 = vunpack.c.h.bf16 %v2652_v10 }
 0x5e7   : > { %v2539_v34 = vmax.f32 %v2443_v29, 0.0  ;;  %v2633_v40 = vmul.f32 %v2601_v43, %v7190_v27  ;;  %v2604_v31 = vunpack.c.l.bf16 %v2572_v4  ;;  %v2746_v2 = vsel %vm1216_vm1, %v2678_v7, 0.0  ;;  %v10343_v4 = vld [vmem:[#allocation67_spill] sm:$0xff]  ;;  %v10344_v7 = vld [vmem:[#allocation68_spill] sm:$0xff] }
 0x5e8   : > { %v2542_v43 = vmax.f32 %v2446_v19, 0.0  ;;  %v2543_v48 = vmax.f32 %v2447_v56, 0.0  ;;  %v2734_v0 = vsel %vm1216_vm1, %v2674_v26, 0.0  ;;  %v2679_v55 = vunpack.c.h.bf16 %v2653_v41  ;;  %v10345_v41 = vld [vmem:[#allocation65_spill] sm:$0xff] }
 0x5e9   : > { %v2571_v5 = vpack.c.bf16 %v2539_v34, %v2539_v34  ;;  %v2654_v29 = vpack.c.bf16 %v2633_v40, %v2632_v28  ;;  %v2636_v34 = vmul.f32 %v2604_v31, %v7190_v27  ;;  %v2451_v19 = vadd.f32 %v10344_v7, %v8395_v30 }
 0x5ea   : > { %v2574_v28 = vpack.c.bf16 %v2542_v43, %v2542_v43  ;;  %v2575_v40 = vpack.c.bf16 %v2543_v48, %v2543_v48  ;;  %v2749_v31 = vsel %vm1216_vm1, %v2679_v55, 0.0 }
 0x5eb   : > { %v2603_v58 = vunpack.c.l.bf16 %v2571_v5  ;;  %v2681_v15 = vunpack.c.h.bf16 %v2654_v29  ;;  %v2680_v56 = vunpack.c.l.bf16 %v2654_v29  ;;  %v10346_v5 = vld [vmem:[#allocation66_spill] sm:$0xff] }
 0x5ec   : > { %2741 = vadd.xlane.f32.xlu2 %v2740_v59  ;;  %2726 = vadd.xlane.f32.xlu0 %v2725_v22  ;;  %v2602_v59 = vunpack.c.l.bf16 %v2570_v16  ;;  %v2605_v22 = vunpack.c.l.bf16 %v2573_v17  ;;  %v2450_v17 = vadd.f32 %v10343_v4, %v8395_v30  ;;  %v2606_v43 = vunpack.c.l.bf16 %v2574_v28 }
 0x5ed   : > { %2729 = vadd.xlane.f32.xlu1 %v2728_v35  ;;  %v2743_v35 = vsel %vm1216_vm1, %v2677_v47, 0.0  ;;  %v2635_v26 = vmul.f32 %v2603_v58, %v7190_v27  ;;  %v2448_v47 = vadd.f32 %v10345_v41, %v8395_v30  ;;  %v2607_v48 = vunpack.c.l.bf16 %v2575_v40 }
 0x5ee   : > { %v2634_v10 = vmul.f32 %v2602_v59, %v7190_v27  ;;  %v2637_v16 = vmul.f32 %v2605_v22, %v7190_v27  ;;  %v2449_v59 = vadd.f32 %v10346_v5, %v8395_v30  ;;  %v2755_v22 = vsel %vm1216_vm1, %v2681_v15, 0.0 }
 0x5ef   : > { %v2752_v7 = vsel %vm1216_vm1, %v2680_v56, 0.0  ;;  %v2544_v58 = vmax.f32 %v2448_v47, 0.0  ;;  %v2638_v30 = vmul.f32 %v2606_v43, %v7190_v27  ;;  %v2639_v55 = vmul.f32 %v2607_v48, %v7190_v27 }
 0x5f0   : > { %v2655_v29 = vpack.c.bf16 %v2635_v26, %v2634_v10  ;;  %v2545_v4 = vmax.f32 %v2449_v59, 0.0 }
 0x5f1   : > { %v2576_v28 = vpack.c.bf16 %v2544_v58, %v2544_v58 }
 0x5f2   : > { %v2577_v40 = vpack.c.bf16 %v2545_v4, %v2545_v4 }
 0x5f3   : > { %v2608_v47 = vunpack.c.l.bf16 %v2576_v28 }
 0x5f4   : > { %2747 = vadd.xlane.f32.xlu2 %v2746_v2  ;;  %2735 = vadd.xlane.f32.xlu0 %v2734_v0  ;;  %v2656_v2 = vpack.c.bf16 %v2637_v16, %v2636_v34  ;;  %v2546_v0 = vmax.f32 %v2450_v17, 0.0  ;;  %v2682_v34 = vunpack.c.l.bf16 %v2655_v29  ;;  %v2683_v16 = vunpack.c.h.bf16 %v2655_v29 }
 0x5f5   : > { %2744 = vadd.xlane.f32.xlu1 %v2743_v35  ;;  %v2547_v35 = vmax.f32 %v2451_v19, 0.0  ;;  %v2657_v19 = vpack.c.bf16 %v2639_v55, %v2638_v30  ;;  %v2609_v59 = vunpack.c.l.bf16 %v2577_v40 }
 0x5f6   : > { %v2684_v41 = vunpack.c.l.bf16 %v2656_v2  ;;  %v2578_v5 = vpack.c.bf16 %v2546_v0, %v2546_v0  ;;  %v2758_v26 = vsel %vm1216_vm1, %v2682_v34, 0.0  ;;  %v2685_v4 = vunpack.c.h.bf16 %v2656_v2 }
 0x5f7   : > { %v2579_v15 = vpack.c.bf16 %v2547_v35, %v2547_v35  ;;  %v2686_v48 = vunpack.c.l.bf16 %v2657_v19 }
 0x5f8   : > { %v2764_v17 = vsel %vm1216_vm1, %v2684_v41, 0.0  ;;  %v2610_v56 = vunpack.c.l.bf16 %v2578_v5  ;;  %v2640_v41 = vmul.f32 %v2608_v47, %v7190_v27  ;;  %v2641_v5 = vmul.f32 %v2609_v59, %v7190_v27 }
 0x5f9   : > { %v2611_v10 = vunpack.c.l.bf16 %v2579_v15  ;;  %v2767_v29 = vsel %vm1216_vm1, %v2685_v4, 0.0  ;;  %v2770_v58 = vsel %vm1216_vm1, %v2686_v48, 0.0 }
 0x5fa   : > { %v2658_v30 = vpack.c.bf16 %v2641_v5, %v2640_v41 }
 0x5fb   : > { %v2643_v43 = vmul.f32 %v2611_v10, %v7190_v27 }
 0x5fc   : > { %2756 = vadd.xlane.f32.xlu2 %v2755_v22  ;;  %2750 = vadd.xlane.f32.xlu0 %v2749_v31  ;;  %v2687_v31 = vunpack.c.h.bf16 %v2657_v19  ;;  %v2642_v22 = vmul.f32 %v2610_v56, %v7190_v27  ;;  %v2688_v15 = vunpack.c.l.bf16 %v2658_v30  ;;  %v2689_v34 = vunpack.c.h.bf16 %v2658_v30 }
 0x5fd   : > { %2753 = vadd.xlane.f32.xlu1 %v2752_v7  ;;  %v2761_v7 = vsel %vm1216_vm1, %v2683_v16, 0.0 }
 0x5fe   : > { %v2773_v0 = vsel %vm1216_vm1, %v2687_v31, 0.0  ;;  %v2659_v35 = vpack.c.bf16 %v2643_v43, %v2642_v22  ;;  %v2776_v16 = vsel %vm1216_vm1, %v2688_v15, 0.0  ;;  %v2779_v28 = vsel %vm1216_vm1, %v2689_v34, 0.0 }
 0x600   : > { %v2690_v55 = vunpack.c.l.bf16 %v2659_v35  ;;  %v2691_v40 = vunpack.c.h.bf16 %v2659_v35 }
 0x602   : > { %v2782_v2 = vsel %vm1216_vm1, %v2690_v55, 0.0  ;;  %v2785_v19 = vsel %vm1216_vm1, %v2691_v40, 0.0  ;;  %v10347_v55 = vld [vmem:[#allocation70_spill] sm:$0xff] }
 0x604   : > { %2765 = vadd.xlane.f32.xlu2 %v2764_v17  ;;  %2759 = vadd.xlane.f32.xlu0 %v2758_v26  ;;  %v2675_v17 = vunpack.c.h.bf16 %v8458_v60 }
 0x605   : > { %2762 = vadd.xlane.f32.xlu1 %v2761_v7 }
 0x606   : > { %v2737_v56 = vsel %vm1216_vm1, %v2675_v17, 0.0 }
 0x60c   : > { %2774 = vadd.xlane.f32.xlu2 %v2773_v0  ;;  %2768 = vadd.xlane.f32.xlu0 %v2767_v29 }
 0x60d   : > { %2771 = vadd.xlane.f32.xlu1 %v2770_v58 }
 0x614   : > { %2783 = vadd.xlane.f32.xlu2 %v2782_v2  ;;  %2777 = vadd.xlane.f32.xlu0 %v2776_v16 }
 0x615   : > { %2780 = vadd.xlane.f32.xlu1 %v2779_v28 }
 0x61c   : > { %2786 = vadd.xlane.f32.xlu0 %v2785_v19 }
 0x61d   : > { %2738 = vadd.xlane.f32.xlu1 %v2737_v56 }
 0x63f   : > { %v2706_v10 = vpop.xlane.xlu2 %2705  ;;  %v2697_v26 = vpop.xlane.xlu0 %2696 }
 0x640   : > { %v2694_v7 = vpop.xlane.xlu1 %2693  ;;  %v2789_v34 = vadd.f32 %v2697_v26, %v10347_v55 }
 0x641   : > { %v2788_v2 = vadd.f32 %v2694_v7, %v10347_v55 }
 0x642   : > { %v2853_v9 = vperm.slane %v2789_v34, %v10348_v36 }
 0x647   : > { %v2715_v47 = vpop.xlane.xlu2 %2714  ;;  %v2700_v59 = vpop.xlane.xlu0 %2699 }
 0x648   : > { %v2703_v31 = vpop.xlane.xlu1 %2702  ;;  %v2790_v40 = vadd.f32 %v2700_v59, %v10347_v55 }
 0x649   : > { %v2791_v26 = vadd.f32 %v2703_v31, %v10347_v55  ;;  %v2792_v31 = vadd.f32 %v2706_v10, %v10347_v55 }
 0x64b   : > { %v2857_v34 = vperm.slane %v2791_v26, %v10351_v63  ;;  %v10353_v26 = vld [vmem:[#allocation76_spill] sm:$0xff] }
 0x64f   : > { %v8503_v22 = vpop.xlane.xlu2 %2723  ;;  %v2709_v43 = vpop.xlane.xlu0 %2708 }
 0x650   : > { %v2712_v4 = vpop.xlane.xlu1 %2711 }
 0x657   : > { %v8505_v48 = vpop.xlane.xlu2 %2732  ;;  %v2718_v41 = vpop.xlane.xlu0 %2717 }
 0x658   : > { %v2721_v60 = vpop.xlane.xlu1 %2720 }
 0x65f   : > { %v2742_v5 = vpop.xlane.xlu2 %2741  ;;  %v8507_v0 = vpop.xlane.xlu0 %2726 }
 0x660   : > { %v8509_v35 = vpop.xlane.xlu1 %2729  ;;  %v2804_v16 = vadd.f32 %v2742_v5, %v10347_v55  ;;  %v10350_v5 = vld [vmem:[#allocation73_spill] sm:$0xff] }
 0x661   : > { %v2855_v54 = vperm.slane %v2790_v40, %v10350_v5 }
 0x667   : > { %v2748_v29 = vpop.xlane.xlu2 %2747  ;;  %v8511_v58 = vpop.xlane.xlu0 %2735 }
 0x668   : > { %v2745_v30 = vpop.xlane.xlu1 %2744  ;;  %v2806_v17 = vadd.f32 %v2748_v29, %v10347_v55 }
 0x669   : > { %v2805_v15 = vadd.f32 %v2745_v30, %v10347_v55  ;;  %v10349_v30 = vld [vmem:[#allocation71_spill] sm:$0xff] }
 0x66a   : > { %v2852_v27 = vperm.slane %v2788_v2, %v10349_v30  ;;  %v2883_v7 = vperm.slane %v2804_v16, %v10349_v30  ;;  %v2886_v59 = vperm.slane %v2806_v17, %v10350_v5  ;;  %v2793_v2 = vadd.f32 %v2709_v43, %v10347_v55  ;;  %v10352_v17 = vld [vmem:[#allocation75_spill] sm:$0xff] }
 0x66b   : > { %v2884_v49 = vperm.slane %v2805_v15, %v10348_v36 }
 0x66c   : > { %v2861_v10 = vperm.slane %v2793_v2, %v10353_v26 }
 0x66d   : > { %v2885_v32 = vsel %vm1386_vm2, %v2884_v49, %v2883_v7 }
 0x66e   : > { %v2887_v40 = vsel %vm1390_vm3, %v2886_v59, %v2885_v32  ;;  %v2859_v32 = vperm.slane %v2792_v31, %v10352_v17  ;;  %v10354_v59 = vld [vmem:[#allocation77_spill] sm:$0xff] }
 0x66f   : > { %v2757_v28 = vpop.xlane.xlu2 %2756  ;;  %v2751_v19 = vpop.xlane.xlu0 %2750 }
 0x670   : > { %v2754_v56 = vpop.xlane.xlu1 %2753  ;;  %v2807_v23 = vadd.f32 %v2751_v19, %v10347_v55  ;;  %v2854_v19 = vsel %vm1386_vm2, %v2853_v9, %v2852_v27  ;;  %v2794_v27 = vadd.f32 %v2712_v4, %v10347_v55  ;;  %v2796_v4 = vadd.f32 %v2718_v41, %v10347_v55 }
 0x671   : > { %v2808_v29 = vadd.f32 %v2754_v56, %v10347_v55  ;;  %v2856_v16 = vsel %vm1390_vm3, %v2855_v54, %v2854_v19 }
 0x672   : > { %v2888_v15 = vperm.slane %v2807_v23, %v10351_v63  ;;  %v2809_v23 = vadd.f32 %v2757_v28, %v10347_v55  ;;  %v2858_v43 = vsel %vm1394_vm4, %v2857_v34, %v2856_v16  ;;  %v2863_v19 = vperm.slane %v2794_v27, %v10354_v59  ;;  %v10357_v16 = vld [vmem:[#allocation78_spill] sm:$0xff]  ;;  %v10413_v63 = vld [vmem:[#allocation11_spill] sm:$0xff] }
 0x673   : > { %v2890_v5 = vperm.slane %v2808_v29, %v10352_v17  ;;  %v2860_v28 = vsel %vm1398_vm5, %v2859_v32, %v2858_v43  ;;  %v2795_v34 = vadd.f32 %v2715_v47, %v10347_v55  ;;  %v10360_v47 = vld [vmem:[#allocation79_spill] sm:$0xff]  ;;  %v10412_v17 = vld [vmem:[#allocation21_spill] sm:$0xff] }
 0x674   : > { %v2889_v49 = vsel %vm1394_vm4, %v2888_v15, %v2887_v40  ;;  %v2892_v15 = vperm.slane %v2809_v23, %v10353_v26  ;;  %v2862_v2 = vsel %vm10355_vm6, %v2861_v10, %v2860_v28  ;;  %v2797_v23 = vadd.f32 %v2721_v60, %v10347_v55  ;;  %vm10368_vm6 = vmmov %vm10367_vm14 }
 0x675   : > { %v2891_v7 = vsel %vm1398_vm5, %v2890_v5, %v2889_v49  ;;  %v2864_v41 = vsel %vm10359_vm13, %v2863_v19, %v2862_v2  ;;  %v2867_v43 = vperm.slane %v2796_v4, %v10360_v47  ;;  %v2865_v32 = vperm.slane %v2795_v34, %v10357_v16  ;;  %v10366_v2 = vld [vmem:[#allocation81_spill] sm:$0xff] }
 0x676   : > { %v2799_v28 = vadd.f32 %v8507_v0, %v10347_v55  ;;  %v2798_v19 = vadd.f32 %v8503_v22, %v10347_v55  ;;  %vm10373_vm13 = vcmask 786112  }
 0x677   : > { %v2766_v36 = vpop.xlane.xlu2 %2765  ;;  %v2760_v56 = vpop.xlane.xlu0 %2759 }
 0x678   : > { %v2763_v24 = vpop.xlane.xlu1 %2762  ;;  %v2810_v9 = vadd.f32 %v2760_v56, %v10347_v55  ;;  %v2812_v40 = vadd.f32 %v2766_v36, %v10347_v55 }
 0x679   : > { %v2811_v54 = vadd.f32 %v2763_v24, %v10347_v55  ;;  %v2893_v24 = vsel %vm10356_vm7, %v2892_v15, %v2891_v7  ;;  %v10362_v7 = vld [vmem:[#allocation80_spill] sm:$0xff]  ;;  %v2866_v15 = vsel %vm10363_vm10, %v2865_v32, %v2864_v41  ;;  %vm10370_vm7 = vcmask 720512  }
 0x67a   : > { %v2894_v29 = vperm.slane %v2810_v9, %v10354_v59  ;;  %v2898_v36 = vperm.slane %v2812_v40, %v10360_v47  ;;  %v2869_v60 = vperm.slane %v2797_v23, %v10362_v7  ;;  %v2868_v4 = vsel %vm10364_vm11, %v2867_v43, %v2866_v15  ;;  %v10369_v23 = vld [vmem:[#allocation82_spill] sm:$0xff]  ;;  %v10409_v47 = vld [vmem:[#allocation8_spill] sm:$0xff] }
 0x67b   : > { %v2896_v31 = vperm.slane %v2811_v54, %v10357_v16  ;;  %v2800_v40 = vadd.f32 %v8509_v35, %v10347_v55  ;;  %v2871_v43 = vperm.slane %v2798_v19, %v10366_v2  ;;  %v2802_v15 = vadd.f32 %v8511_v58, %v10347_v55 }
 0x67c   : > { %v2895_v5 = vsel %vm10358_vm8, %v2894_v29, %v2893_v24  ;;  %v2870_v0 = vsel %vm10368_vm6, %v2869_v60, %v2868_v4  ;;  %vm10372_vm8 = vmmov %vm10370_vm7  ;;  %v2801_v60 = vadd.f32 %v8505_v48, %v10347_v55  ;;  %v10375_v4 = vld [vmem:[#allocation85_spill] sm:$0xff]  ;;  %vm10376_vm10 = vcmask 851712  }
 0x67d   : > { %v2897_v54 = vsel %vm10361_vm15, %v2896_v31, %v2895_v5  ;;  %v2872_v35 = vsel %vm10372_vm8, %v2871_v43, %v2870_v0  ;;  %vm10374_vm15 = vmmov %vm10373_vm13  ;;  %v10380_v43 = vld [vmem:[#allocation86_spill] sm:$0xff]  ;;  %vm10382_vm6 = vcmask 982912   ;;  %vm10384_vm8 = vcmask 1048512  }
 0x67e   : > { %v2899_v34 = vsel %vm10365_vm12, %v2898_v36, %v2897_v54  ;;  %vm10377_vm11 = vmmov %vm10376_vm10  ;;  %v2877_v58 = vperm.slane %v2801_v60, %v10375_v4  ;;  %vm10379_vm12 = vcmask 917312  }
 0x67f   : > { %v2769_v56 = vpop.xlane.xlu0 %2768  ;;  %v2775_v27 = vpop.xlane.xlu2 %2774 }
 0x680   : > { %v2772_v49 = vpop.xlane.xlu1 %2771  ;;  %v2813_v9 = vadd.f32 %v2769_v56, %v10347_v55  ;;  %v2815_v5 = vadd.f32 %v2775_v27, %v10347_v55  ;;  %v10371_v27 = vld [vmem:[#allocation84_spill] sm:$0xff] }
 0x681   : > { %v2814_v10 = vadd.f32 %v2772_v49, %v10347_v55  ;;  %v2875_v36 = vperm.slane %v2800_v40, %v10371_v27 }
 0x682   : > { %v2900_v29 = vperm.slane %v2813_v9, %v10362_v7  ;;  %v2873_v9 = vperm.slane %v2799_v28, %v10369_v23  ;;  %v2904_v32 = vperm.slane %v2815_v5, %v10369_v23 }
 0x683   : > { %v2902_v24 = vperm.slane %v2814_v10, %v10366_v2 }
 0x684   : > { %v2901_v31 = vsel %vm10367_vm14, %v2900_v29, %v2899_v34  ;;  %v2874_v28 = vsel %vm10373_vm13, %v2873_v9, %v2872_v35  ;;  %vm10381_vm14 = vmmov %vm10379_vm12 }
 0x685   : > { %v2903_v10 = vsel %vm10370_vm7, %v2902_v24, %v2901_v31  ;;  %v2876_v5 = vsel %vm10377_vm11, %v2875_v36, %v2874_v28  ;;  %vm10383_vm7 = vmmov %vm10382_vm6  ;;  %vm10388_vm11 = vcmask 1041408  }
 0x686   : > { %v2905_v19 = vsel %vm10374_vm15, %v2904_v32, %v2903_v10  ;;  %vm10385_vm13 = vmmov %vm10384_vm8  ;;  %vm10386_vm15 = vcmask 1041409  }
 0x687   : > { %v2778_v56 = vpop.xlane.xlu0 %2777  ;;  %v2784_v29 = vpop.xlane.xlu2 %2783 }
 0x688   : > { %v2781_v49 = vpop.xlane.xlu1 %2780  ;;  %v2816_v22 = vadd.f32 %v2778_v56, %v10347_v55  ;;  %v2818_v31 = vadd.f32 %v2784_v29, %v10347_v55  ;;  %v10378_v56 = vld [vmem:[#allocation83_spill] sm:$0xff] }
 0x689   : > { %v2817_v41 = vadd.f32 %v2781_v49, %v10347_v55  ;;  %v2879_v40 = vperm.slane %v2802_v15, %v10378_v56 }
 0x68a   : > { %v2906_v54 = vperm.slane %v2816_v22, %v10371_v27 }
 0x68b   : > { %v2908_v34 = vperm.slane %v2817_v41, %v10375_v4  ;;  %v2910_v41 = vperm.slane %v2818_v31, %v10378_v56 }
 0x68c   : > { %v2907_v24 = vsel %vm10376_vm10, %v2906_v54, %v2905_v19  ;;  %v2878_v54 = vsel %vm10381_vm14, %v2877_v58, %v2876_v5  ;;  %vm10387_vm10 = vcmp.ge.s32.totalorder %v10349_v30, 16 }
 0x68d   : > { %v2909_v48 = vsel %vm10379_vm12, %v2908_v34, %v2907_v24  ;;  %v2880_v29 = vsel %vm10382_vm6, %v2879_v40, %v2878_v54  ;;  %vm10389_vm12 = vmmov %vm10388_vm11  ;;  %v10394_v54 = vld [vmem:[#allocation98_spill] sm:$0xff] }
 0x68e   : > { %v2911_v35 = vsel %vm10383_vm7, %v2910_v41, %v2909_v48  ;;  %v10391_v41 = vld [vmem:[#allocation91_spill] sm:$0xff] }
 0x68f   : > { %v2787_v49 = vpop.xlane.xlu0 %2786 }
 0x690   : > { %v2739_v0 = vpop.xlane.xlu1 %2738  ;;  %v2819_v9 = vadd.f32 %v2787_v49, %v10347_v55 }
 0x691   : > { %v2803_v22 = vadd.f32 %v2739_v0, %v10347_v55 }
 0x692   : > { %v2912_v10 = vperm.slane %v2819_v9, %v10380_v43 }
 0x693   : > { %v2881_v32 = vperm.slane %v2803_v22, %v10380_v43  ;;  %v10390_v22 = vld [vmem:[#allocation89_spill] sm:$0xff] }
 0x694   : > { %v2913_v15 = vsel %vm10385_vm13, %v2912_v10, %v2911_v35  ;;  %v10392_v10 = vld [vmem:[#allocation93_spill] sm:$0xff]  ;;  %v10396_v35 = vld [vmem:[#allocation99_spill] sm:$0xff]  ;;  %vm10438_vm13 = vmmov %vm10386_vm15 }
 0x695   : > { %v2882_v36 = vsel %vm10384_vm8, %v2881_v32, %v2880_v29  ;;  %v10393_v32 = vld [vmem:[#allocation90_spill] sm:$0xff]  ;;  %v10395_v29 = vld [vmem:[#allocation92_spill] sm:$0xff] }
 0x696   : > { %v2914_v60 = vsel %vm10386_vm15, %v2913_v15, %v2882_v36  ;;  %v10397_v36 = vld [vmem:[#allocation96_spill] sm:$0xff]  ;;  %v10398_v15 = vld [vmem:[#allocation101_spill] sm:$0xff] }
 0x697   : > { %v2916_v28 = vsel %vm10387_vm10, -1e+30, %v2914_v60  ;;  %v10399_v60 = vld [vmem:[#allocation102_spill] sm:$0xff] }
 0x698   : > { %v2917_v19 = vsel %vm10388_vm11, %v2916_v28, -inf }
 0x699   : > { %2918 = vmax.xlane.f32.xlu2 %v2917_v19  ;;  %v10401_v19 = vld [vmem:[#allocation87_spill] sm:$0xff] }
 0x70c   : > { %v2919_v34 = vpop.xlane.xlu2 %2918 }
 0x70d   : > { %v2920_v24 = vsub.f32 %v2916_v28, %v2919_v34  ;;  %v10400_v28 = vld [vmem:[#allocation94_spill] sm:$0xff]  ;;  %v10402_v34 = vld [vmem:[#allocation95_spill] sm:$0xff] }
 0x70f   : > { %v2921_v31 = vmul.f32 1.442695, %v2920_v24  ;;  %v10403_v24 = vld [vmem:[#allocation100_spill] sm:$0xff] }
 0x711   : > { %6650 = vpow2.f32 %v2921_v31  ;;  %v10404_v31 = vld [vmem:[#allocation97_spill] sm:$0xff] }
 0x717   : > { %v6651_v5 = vpop.eup %6650 }
 0x718   : > { %v2923_v40 = vsel %vm10389_vm12, %v6651_v5, 0.0 }
 0x719   : > { %2924 = vadd.xlane.f32.xlu1 %v2923_v40  ;;  %v10405_v40 = vld [vmem:[#allocation88_spill] sm:$0xff] }
 0x78c   : > { %v2925_v49 = vpop.xlane.xlu1 %2924 }
 0x78d   : > { %6652 = vrcp.f32 %v2925_v49 }
 0x793   : > { %v6653_v0 = vpop.eup %6652 }
 0x794   : > { %v2927_v58 = vmul.f32 %v6653_v0, %v6651_v5 }
 0x796   : > { %v8617_v48 = vperm.slane %v2927_v58, 0  ;;  %v3025_v9 = vperm.slane %v2927_v58, 1  ;;  %6217 = vst [vmem:[%s7023_s26 + $0x2] sm:$0x3] %v2927_v58 }
 0x798   : > { %3030 = vperm.xlu1 %6530, %v3025_v9   ;;  %2939 = vperm.xlu2 %6529, %v8617_v48  }
 0x799   : > { %2933 = vperm.xlu0 %6528, %v8617_v48  }
 0x7a0   : > { %6531 = vset.pattern.permute.xlu1 %v10390_v22  ;;  %3036 = vperm.xlu2 %6529, %v3025_v9  }
 0x7a1   : > { %6533 = vset.pattern.permute.xlu0 %v10391_v41 }
 0x7a8   : > { %2945 = vperm.xlu1 %6531, %v8617_v48   ;;  %6532 = vset.pattern.permute.xlu2 %v10390_v22 }
 0x7a9   : > { %2951 = vperm.xlu0 %6533, %v8617_v48  }
 0x7b0   : > { %6534 = vset.pattern.permute.xlu1 %v10391_v41  ;;  %3042 = vperm.xlu2 %6532, %v3025_v9  }
 0x7b1   : > { %6538 = vset.pattern.permute.xlu0 %v10392_v10 }
 0x7b8   : > { %3048 = vperm.xlu1 %6534, %v3025_v9   ;;  %6535 = vset.pattern.permute.xlu2 %v10393_v32 }
 0x7b9   : > { %3060 = vperm.xlu0 %6538, %v3025_v9  }
 0x7c0   : > { %6536 = vset.pattern.permute.xlu1 %v10393_v32  ;;  %2957 = vperm.xlu2 %6535, %v8617_v48  }
 0x7c1   : > { %6543 = vset.pattern.permute.xlu0 %v10394_v54 }
 0x7c8   : > { %3054 = vperm.xlu1 %6536, %v3025_v9   ;;  %6537 = vset.pattern.permute.xlu2 %v10392_v10 }
 0x7c9   : > { %2981 = vperm.xlu0 %6543, %v8617_v48  }
 0x7d0   : > { %6539 = vset.pattern.permute.xlu1 %v10395_v29  ;;  %2963 = vperm.xlu2 %6537, %v8617_v48  }
 0x7d1   : > { %6548 = vset.pattern.permute.xlu0 %v10396_v35 }
 0x7d8   : > { %2969 = vperm.xlu1 %6539, %v8617_v48   ;;  %6540 = vset.pattern.permute.xlu2 %v10395_v29  ;;  %v10407_v29 = vld [vmem:[#allocation6_spill] sm:$0xff] }
 0x7d9   : > { %3090 = vperm.xlu0 %6548, %v3025_v9  }
 0x7e0   : > { %6541 = vset.pattern.permute.xlu1 %v10397_v36  ;;  %3066 = vperm.xlu2 %6540, %v3025_v9  }
 0x7e1   : > { %6553 = vset.pattern.permute.xlu0 %v10398_v15 }
 0x7e8   : > { %2975 = vperm.xlu1 %6541, %v8617_v48   ;;  %6542 = vset.pattern.permute.xlu2 %v10397_v36 }
 0x7e9   : > { %3011 = vperm.xlu0 %6553, %v8617_v48  }
 0x7f0   : > { %6544 = vset.pattern.permute.xlu1 %v10394_v54  ;;  %3072 = vperm.xlu2 %6542, %v3025_v9   ;;  %v10406_v54 = vld [vmem:[#allocation5_spill] sm:$0xff] }
 0x7f1   : > { %6558 = vset.pattern.permute.xlu0 %v10399_v60 }
 0x7f2   : > { %v2940_v5 = vpop.permute.xlu2 %2939 }
 0x7f3   : > { %v3123_v41 = vmul.f32 %v10407_v29, %v2940_v5 }
 0x7f5   : > { %v3155_v27 = vsel %vm1216_vm1, %v3123_v41, 0.0 }
 0x7f8   : > { %3078 = vperm.xlu1 %6544, %v3025_v9   ;;  %6545 = vset.pattern.permute.xlu2 %v10400_v28 }
 0x7f9   : > { %3120 = vperm.xlu0 %6558, %v3025_v9  }
 0x7fa   : > { %v3037_v49 = vpop.permute.xlu2 %3036 }
 0x800   : > { %6546 = vset.pattern.permute.xlu1 %v10400_v28  ;;  %2987 = vperm.xlu2 %6545, %v8617_v48  }
 0x801   : > { %6559 = vset.pattern.permute.xlu0 %v10401_v19 }
 0x808   : > { %3084 = vperm.xlu1 %6546, %v3025_v9   ;;  %6547 = vset.pattern.permute.xlu2 %v10396_v35 }
 0x80a   : > { %v3031_v0 = vpop.permute.xlu1 %3030  ;;  %v3043_v58 = vpop.permute.xlu2 %3042 }
 0x80b   : > { %v3138_v41 = vmul.f32 %v10412_v17, %v3031_v0 }
 0x810   : > { %6549 = vset.pattern.permute.xlu1 %v10402_v34  ;;  %2993 = vperm.xlu2 %6547, %v8617_v48  }
 0x818   : > { %2999 = vperm.xlu1 %6549, %v8617_v48   ;;  %6550 = vset.pattern.permute.xlu2 %v10402_v34 }
 0x81a   : > { %v2958_v35 = vpop.permute.xlu2 %2957 }
 0x820   : > { %6551 = vset.pattern.permute.xlu1 %v10403_v24  ;;  %3096 = vperm.xlu2 %6550, %v3025_v9  }
 0x828   : > { %3005 = vperm.xlu1 %6551, %v8617_v48   ;;  %6552 = vset.pattern.permute.xlu2 %v10403_v24  ;;  %v2946_v24 = vpop.permute.xlu1 %2945 }
 0x830   : > { %6554 = vset.pattern.permute.xlu1 %v10398_v15  ;;  %3102 = vperm.xlu2 %6552, %v3025_v9   ;;  %v3049_v28 = vpop.permute.xlu1 %3048  ;;  %v2964_v15 = vpop.permute.xlu2 %2963 }
 0x838   : > { %3108 = vperm.xlu1 %6554, %v3025_v9   ;;  %6555 = vset.pattern.permute.xlu2 %v10404_v31 }
 0x83a   : > { %v8667_v36 = vpop.permute.xlu2 %3066 }
 0x840   : > { %6556 = vset.pattern.permute.xlu1 %v10404_v31  ;;  %3017 = vperm.xlu2 %6555, %v8617_v48   ;;  %v3055_v31 = vpop.permute.xlu1 %3054 }
 0x848   : > { %3114 = vperm.xlu1 %6556, %v3025_v9   ;;  %6557 = vset.pattern.permute.xlu2 %v10399_v60  ;;  %v2934_v60 = vpop.permute.xlu0 %2933 }
 0x84a   : > { %v2970_v34 = vpop.permute.xlu1 %2969  ;;  %v8669_v9 = vpop.permute.xlu2 %3072 }
 0x850   : > { %3023 = vperm.xlu2 %6557, %v8617_v48   ;;  %6560 = vset.pattern.permute.xlu1 %v10405_v40  ;;  %v3122_v40 = vmul.f32 %v10406_v54, %v2934_v60  ;;  %v2952_v32 = vpop.permute.xlu0 %2951  ;;  %v10410_v54 = vld [vmem:[#allocation9_spill] sm:$0xff] }
 0x851   : > { %v3125_v7 = vmul.f32 %v10409_v47, %v2952_v32  ;;  %v3126_v5 = vmul.f32 %v10410_v54, %v2958_v35  ;;  %v10415_v32 = vld [vmem:[#allocation12_spill] sm:$0xff] }
 0x852   : > { %v3154_v56 = vsel %vm1216_vm1, %v3122_v40, 0.0 }
 0x853   : > { %v3156_v2 = vadd.f32 %v3155_v27, %v3154_v56  ;;  %v10414_v27 = vld [vmem:[#allocation22_spill] sm:$0xff] }
 0x854   : > { %v3139_v56 = vmul.f32 %v10414_v27, %v3037_v49 }
 0x856   : > { %v3192_v0 = vsel %vm1216_vm1, %v3139_v56, 0.0 }
 0x858   : > { %6561 = vset.pattern.permute.xlu2 %v10401_v19  ;;  %v10408_v19 = vld [vmem:[#allocation7_spill] sm:$0xff]  ;;  %v3061_v26 = vpop.permute.xlu0 %3060 }
 0x859   : > { %v3124_v22 = vmul.f32 %v10408_v19, %v2946_v24  ;;  %v3159_v24 = vsel %vm1216_vm1, %v3125_v7, 0.0  ;;  %v10411_v19 = vld [vmem:[#allocation10_spill] sm:$0xff]  ;;  %v3191_v7 = vsel %vm1216_vm1, %v3138_v41, 0.0 }
 0x85a   : > { %v2976_v10 = vpop.permute.xlu1 %2975  ;;  %v2988_v48 = vpop.permute.xlu2 %2987  ;;  %v3127_v29 = vmul.f32 %v10411_v19, %v2964_v15  ;;  %v10416_v19 = vld [vmem:[#allocation23_spill] sm:$0xff]  ;;  %v3193_v17 = vadd.f32 %v3192_v0, %v3191_v7 }
 0x85b   : > { %v3157_v23 = vsel %vm1216_vm1, %v3124_v22, 0.0  ;;  %v3128_v22 = vmul.f32 %v10413_v63, %v2970_v34  ;;  %v3129_v47 = vmul.f32 %v10415_v32, %v2976_v10  ;;  %v3140_v34 = vmul.f32 %v10416_v19, %v3043_v58  ;;  %v10417_v63 = vld [vmem:[#allocation24_spill] sm:$0xff] }
 0x85c   : > { %v3158_v16 = vadd.f32 %v3157_v23, %v3156_v2  ;;  %v3161_v2 = vsel %vm1216_vm1, %v3126_v5, 0.0  ;;  %v3163_v23 = vsel %vm1216_vm1, %v3127_v29, 0.0  ;;  %v3141_v49 = vmul.f32 %v10417_v63, %v3049_v28 }
 0x85d   : > { %v3167_v5 = vsel %vm1216_vm1, %v3129_v47, 0.0  ;;  %v3194_v58 = vsel %vm1216_vm1, %v3140_v34, 0.0 }
 0x85e   : > { %v3160_v59 = vadd.f32 %v3159_v24, %v3158_v16  ;;  %v3165_v16 = vsel %vm1216_vm1, %v3128_v22, 0.0  ;;  %v6739_v22 = vld [vmem:[%s9820_s10] ss:$0 sm:$0xff]  ;;  %v3196_v28 = vsel %vm1216_vm1, %v3141_v49, 0.0  ;;  %v3195_v47 = vadd.f32 %v3194_v58, %v3193_v17  ;;  %v10424_v58 = vld [vmem:[#allocation17_spill] sm:$0xff] }
 0x85f   : > { %v3238_v56 = vadd.f32 %v6739_v22, %v8341_v6  ;;  %v10422_v6 = vld [vmem:[#allocation26_spill] sm:$0xff] }
 0x860   : > { %v3162_v35 = vadd.f32 %v3161_v2, %v3160_v59  ;;  %v2982_v54 = vpop.permute.xlu0 %2981  ;;  %v10418_v59 = vld [vmem:[#allocation25_spill] sm:$0xff]  ;;  %v3197_v32 = vadd.f32 %v3196_v28, %v3195_v47  ;;  %v10426_v28 = vld [vmem:[#allocation28_spill] sm:$0xff] }
 0x861   : > { %v3142_v10 = vmul.f32 %v10418_v59, %v3055_v31  ;;  %v10419_v2 = vld [vmem:[#allocation13_spill] sm:$0xff]  ;;  %v10420_v31 = vld [vmem:[#allocation14_spill] sm:$0xff] }
 0x862   : > { %v3164_v15 = vadd.f32 %v3163_v23, %v3162_v35  ;;  %v3130_v41 = vmul.f32 %v10419_v2, %v2982_v54  ;;  %v10421_v54 = vld [vmem:[#allocation15_spill] sm:$0xff]  ;;  %v6203_v2 = vmul.f32 -1.442695, %v3238_v56 }
 0x863   : > { %v3198_v7 = vsel %vm1216_vm1, %v3142_v10, 0.0  ;;  %v10425_v56 = vld [vmem:[#allocation27_spill] sm:$0xff] }
 0x864   : > { %v3166_v29 = vadd.f32 %v3165_v16, %v3164_v15  ;;  %v3169_v16 = vsel %vm1216_vm1, %v3130_v41, 0.0  ;;  %v3131_v15 = vmul.f32 %v10420_v31, %v2988_v48  ;;  %v3199_v22 = vadd.f32 %v3198_v7, %v3197_v32 }
 0x865   : > { %6654 = vpow2.f32 %v6203_v2 }
 0x866   : > { %v3168_v23 = vadd.f32 %v3167_v5, %v3166_v29  ;;  %v3143_v5 = vmul.f32 %v10422_v6, %v3061_v26  ;;  %v10423_v29 = vld [vmem:[#allocation16_spill] sm:$0xff]  ;;  %v3171_v17 = vsel %vm1216_vm1, %v3131_v15, 0.0  ;;  %v3145_v26 = vmul.f32 %v10426_v28, %v8669_v9 }
 0x868   : > { %v3091_v35 = vpop.permute.xlu0 %3090  ;;  %v3170_v59 = vadd.f32 %v3169_v16, %v3168_v23  ;;  %v3144_v23 = vmul.f32 %v10425_v56, %v8667_v36  ;;  %v10427_v16 = vld [vmem:[#allocation29_spill] sm:$0xff] }
 0x86a   : > { %v8674_v43 = vpop.permute.xlu1 %3078  ;;  %v2994_v4 = vpop.permute.xlu2 %2993  ;;  %v3172_v48 = vadd.f32 %v3171_v17, %v3170_v59  ;;  %v3202_v59 = vsel %vm1216_vm1, %v3144_v23, 0.0  ;;  %v10429_v17 = vld [vmem:[#allocation30_spill] sm:$0xff] }
 0x86b   : > { %v3132_v0 = vmul.f32 %v10421_v54, %v2994_v4  ;;  %v3200_v4 = vsel %vm1216_vm1, %v3143_v5, 0.0  ;;  %v3146_v15 = vmul.f32 %v10427_v16, %v8674_v43  ;;  %v10428_v5 = vld [vmem:[#allocation18_spill] sm:$0xff]  ;;  %v10432_v54 = vld [vmem:[#allocation31_spill] sm:$0xff] }
 0x86c   : > { %v3201_v32 = vadd.f32 %v3200_v4, %v3199_v22 }
 0x86d   : > { %v3173_v10 = vsel %vm1216_vm1, %v3132_v0, 0.0  ;;  %v3204_v0 = vsel %vm1216_vm1, %v3145_v26, 0.0 }
 0x86e   : > { %v3174_v7 = vadd.f32 %v3173_v10, %v3172_v48  ;;  %v3206_v10 = vsel %vm1216_vm1, %v3146_v15, 0.0 }
 0x870   : > { %v3012_v47 = vpop.permute.xlu0 %3011 }
 0x871   : > { %v3135_v36 = vmul.f32 %v10428_v5, %v3012_v47 }
 0x873   : > { %v3179_v43 = vsel %vm1216_vm1, %v3135_v36, 0.0  ;;  %v10434_v36 = vld [vmem:[#allocation33_spill] sm:$0xff] }
 0x87a   : > { %v8680_v60 = vpop.permute.xlu1 %3084  ;;  %v8685_v40 = vpop.permute.xlu2 %3096 }
 0x87b   : > { %v3147_v9 = vmul.f32 %v10429_v17, %v8680_v60  ;;  %v3148_v60 = vmul.f32 %v10432_v54, %v3091_v35 }
 0x88a   : > { %v3000_v24 = vpop.permute.xlu1 %2999  ;;  %v8699_v27 = vpop.permute.xlu2 %3102 }
 0x88b   : > { %v3133_v34 = vmul.f32 %v10423_v29, %v3000_v24 }
 0x88d   : > { %v3175_v24 = vsel %vm1216_vm1, %v3133_v34, 0.0  ;;  %v3203_v34 = vadd.f32 %v3202_v59, %v3201_v32  ;;  %v3210_v59 = vsel %vm1216_vm1, %v3148_v60, 0.0  ;;  %v10436_v60 = vld [vmem:[#allocation36_spill] sm:$0xff] }
 0x88e   : > { %v3176_v2 = vadd.f32 %v3175_v24, %v3174_v7  ;;  %v10430_v24 = vld [vmem:[#allocation19_spill] sm:$0xff]  ;;  %v10431_v7 = vld [vmem:[#allocation20_spill] sm:$0xff] }
 0x88f   : > { %v3205_v48 = vadd.f32 %v3204_v0, %v3203_v34  ;;  %v10433_v0 = vld [vmem:[#allocation32_spill] sm:$0xff] }
 0x891   : > { %v3207_v47 = vadd.f32 %v3206_v10, %v3205_v48 }
 0x89a   : > { %v3006_v63 = vpop.permute.xlu1 %3005  ;;  %v3018_v49 = vpop.permute.xlu2 %3017 }
 0x89b   : > { %v3134_v41 = vmul.f32 %v10424_v58, %v3006_v63  ;;  %v6655_v58 = vpop.eup %6654  ;;  %v3136_v23 = vmul.f32 %v10430_v24, %v3018_v49  ;;  %v3149_v49 = vmul.f32 %v10433_v0, %v8685_v40 }
 0x89c   : > { %v3244_v29 = vadd.f32 1.0, %v6655_v58  ;;  %v3150_v58 = vmul.f32 %v10434_v36, %v8699_v27  ;;  %v10437_v27 = vld [vmem:[#allocation35_spill] sm:$0xff] }
 0x89d   : > { %v3177_v63 = vsel %vm1216_vm1, %v3134_v41, 0.0  ;;  %v3208_v41 = vsel %vm1216_vm1, %v3147_v9, 0.0  ;;  %v3181_v32 = vsel %vm1216_vm1, %v3136_v23, 0.0 }
 0x89e   : > { %v3178_v22 = vadd.f32 %v3177_v63, %v3176_v2  ;;  %v3209_v31 = vadd.f32 %v3208_v41, %v3207_v47  ;;  %6656 = vrcp.f32 %v3244_v29  ;;  %v3214_v10 = vsel %vm1216_vm1, %v3150_v58, 0.0 }
 0x89f   : > { %vm3250_vm6 = vweird.f32 %v3244_v29 }
 0x8a0   : > { %v3180_v5 = vadd.f32 %v3179_v43, %v3178_v22  ;;  %v3211_v9 = vadd.f32 %v3210_v59, %v3209_v31  ;;  %v10435_v22 = vld [vmem:[#allocation34_spill] sm:$0xff]  ;;  %v3121_v43 = vpop.permute.xlu0 %3120 }
 0x8a2   : > { %v3182_v15 = vadd.f32 %v3181_v32, %v3180_v5  ;;  %v3153_v32 = vmul.f32 %v10436_v60, %v3121_v43  ;;  %v3256_v43 = vand.u32 2147483648, %v3244_v29 }
 0x8a4   : > { %v6657_v48 = vpop.eup %6656  ;;  %v3220_v58 = vsel %vm1216_vm1, %v3153_v32, 0.0 }
 0x8a5   : > { %v3246_v40 = vmul.f32 %v6657_v48, %v3244_v29  ;;  %vm3251_vm14 = vweird.f32 %v6657_v48 }
 0x8a6   : > { %vm3252_vm7 = vmor %vm3250_vm6, %vm3251_vm14 }
 0x8aa   : > { %v3024_v4 = vpop.permute.xlu2 %3023  ;;  %v3109_v2 = vpop.permute.xlu1 %3108 }
 0x8ab   : > { %v3137_v26 = vmul.f32 %v10431_v7, %v3024_v4  ;;  %v3151_v35 = vmul.f32 %v10435_v22, %v3109_v2  ;;  %v3212_v4 = vsel %vm1216_vm1, %v3149_v49, 0.0  ;;  %v3247_v49 = vsub.f32 1.0, %v3246_v40 }
 0x8ac   : > { %v3213_v5 = vadd.f32 %v3212_v4, %v3211_v9 }
 0x8ad   : > { %v3183_v63 = vsel %vm1216_vm1, %v3137_v26, 0.0  ;;  %v3216_v23 = vsel %vm1216_vm1, %v3151_v35, 0.0  ;;  %v3248_v24 = vmul.f32 %v6657_v48, %v3247_v49  ;;  %v10446_v49 = vld [vmem:[#allocation116_spill] sm:$0xff] }
 0x8ae   : > { %v3184_v34 = vadd.f32 %v3183_v63, %v3182_v15  ;;  %v3215_v26 = vadd.f32 %v3214_v10, %v3213_v5 }
 0x8af   : > { %v3249_v22 = vadd.f32 %v6657_v48, %v3248_v24  ;;  %v10439_v24 = vld [vmem:[#allocation103_spill] sm:$0xff] }
 0x8b0   : > { %v3185_v41 = vrot.slane %v3184_v34, 4  ;;  %v3217_v63 = vadd.f32 %v3216_v23, %v3215_v26  ;;  %v3257_v26 = vor.u32 1.1754944e-38, %v3256_v43  ;;  %v10452_v43 = vld [vmem:[#allocation124_spill] sm:$0xff] }
 0x8b1   : > { %v3253_v23 = vsel %vm3252_vm7, %v6657_v48, %v3249_v22  ;;  %v10441_v22 = vld [vmem:[#allocation107_spill] sm:$0xff]  ;;  %v10442_v48 = vld [vmem:[#allocation108_spill] sm:$0xff] }
 0x8b2   : > { %v3186_v15 = vadd.f32 %v3185_v41, %v3184_v34  ;;  %v3254_v34 = vand.u32 2147483647, %v3244_v29  ;;  %v10440_v29 = vld [vmem:[#allocation104_spill] sm:$0xff] }
 0x8b4   : > { %v3187_v7 = vrot.slane %v3186_v15, 2  ;;  %vm3255_vm8 = vcmp.eq.f32.partialorder %v3254_v34, 8.507059e+37  ;;  %v10454_v34 = vld [vmem:[#allocation126_spill] sm:$0xff] }
 0x8b6   : > { %v3188_v35 = vadd.f32 %v3187_v7, %v3186_v15 }
 0x8b8   : > { %v3189_v60 = vrot.slane %v3188_v35, 1 }
 0x8ba   : > { %v3115_v47 = vpop.permute.xlu1 %3114  ;;  %v3190_v40 = vadd.f32 %v3189_v60, %v3188_v35  ;;  %v10443_v60 = vld [vmem:[#allocation111_spill] sm:$0xff]  ;;  %v10449_v35 = vld [vmem:[#allocation121_spill] sm:$0xff] }
 0x8bb   : > { %v3152_v31 = vmul.f32 %v10437_v27, %v3115_v47 }
 0x8bd   : > { %v3218_v2 = vsel %vm1216_vm1, %v3152_v31, 0.0  ;;  %v3258_v31 = vsel %vm3255_vm8, %v3257_v26, %v3253_v23  ;;  %v10456_v23 = vld [vmem:[#allocation128_spill] sm:$0xff]  ;;  %v10457_v26 = vld [vmem:[#allocation106_spill] sm:$0xff] }
 0x8be   : > { %v3219_v59 = vadd.f32 %v3218_v2, %v3217_v63  ;;  %v10444_v2 = vld [vmem:[#allocation112_spill] sm:$0xff] }
 0x8c0   : > { %v3221_v9 = vadd.f32 %v3220_v58, %v3219_v59  ;;  %v10445_v59 = vld [vmem:[#allocation115_spill] sm:$0xff]  ;;  %v10447_v58 = vld [vmem:[#allocation118_spill] sm:$0xff] }
 0x8c2   : > { %v3222_v4 = vrot.slane %v3221_v9, 4 }
 0x8c4   : > { %v3223_v10 = vadd.f32 %v3222_v4, %v3221_v9  ;;  %v10448_v9 = vld [vmem:[#allocation120_spill] sm:$0xff] }
 0x8c5   : > { %v6740_v4 = vld [vmem:[%s6983_s30 + $0x1] sm:$0x1] }
 0x8c6   : > { %v3224_v5 = vrot.slane %v3223_v10, 2 }
 0x8c8   : > { %v3225_v47 = vadd.f32 %v3224_v5, %v3223_v10  ;;  %v10450_v10 = vld [vmem:[#allocation122_spill] sm:$0xff]  ;;  %v10451_v5 = vld [vmem:[#allocation123_spill] sm:$0xff] }
 0x8ca   : > { %v3226_v41 = vrot.slane %v3225_v47, 1 }
 0x8cc   : > { %v3227_v32 = vadd.f32 %v3226_v41, %v3225_v47  ;;  %v10453_v47 = vld [vmem:[#allocation125_spill] sm:$0xff]  ;;  %v10455_v41 = vld [vmem:[#allocation127_spill] sm:$0xff] }
 0x8ce   : > { %v3262_v63 = vsel %vm10438_vm13, %v3227_v32, %v3190_v40  ;;  %v10458_v40 = vld [vmem:[#allocation105_spill] sm:$0xff]  ;;  %v10459_v32 = vld [vmem:[#allocation110_spill] sm:$0xff] }
 0x8cf   : > { %v3264_v7 = vmul.f32 %v3262_v63, %v3258_v31  ;;  %v10460_v31 = vld [vmem:[#allocation109_spill] sm:$0xff]  ;;  %v10461_v63 = vld [vmem:[#allocation114_spill] sm:$0xff] }
 0x8d1   : > { %v3267_v15 = vpack.c.bf16 %v3264_v7, %v3264_v7  ;;  %v10462_v7 = vld [vmem:[#allocation113_spill] sm:$0xff] }
 0x8d3   : > { %6205 = vmatmul.msk.bf16.vlgmr.msrb.gmra.mxu0 %vm1216_vm1, %v3267_v15  ;;  %6206 = vmatmul.msk.bf16.vlgmr.msrb.gmra.mxu1 %vm1216_vm1, %v3267_v15 }
 0x8d4   : > { %3359 = vmatpush.bf16.msrb.mxu0 %v10439_v24  ;;  %3372 = vmatpush.bf16.msrb.mxu1 %v10440_v29 }
 0x8e3   : > { %6207 = vmatmul.msk.bf16.vlgmr.msra.gmra.mxu0 %vm1216_vm1, %v3267_v15  ;;  %6208 = vmatmul.msk.bf16.vlgmr.msra.gmra.mxu1 %vm1216_vm1, %v3267_v15  ;;  %v10463_v15 = vld [vmem:[#allocation119_spill] sm:$0xff] }
 0x8e4   : > { %3404 = vmatpush.bf16.msra.mxu0 %v10441_v22  ;;  %3417 = vmatpush.bf16.msra.mxu1 %v10442_v48 }
 0x8e8   : > { %3405 = vmatpush.bf16.msra.mxu0 %v10443_v60  ;;  %3418 = vmatpush.bf16.msra.mxu1 %v10444_v2  ;;  %v10468_v60 = vld [vmem:[#allocation139_spill] sm:$0xff] }
 0x8ec   : > { %3406 = vmatpush.bf16.msra.mxu0 %v10445_v59  ;;  %3419 = vmatpush.bf16.msra.mxu1 %v10446_v49  ;;  %v10467_v59 = vld [vmem:[#allocation142_spill] sm:$0xff] }
 0x8f0   : > { %3407 = vmatpush.bf16.msra.mxu0 %v10447_v58  ;;  %3420 = vmatpush.bf16.msra.mxu1 %v10448_v9 }
 0x8f3   : > { %6211 = vmatmul.msk.bf16.vlgmr.msrb.gmra.mxu0 %vm2028_vm9, %v6740_v4  ;;  %6212 = vmatmul.msk.bf16.vlgmr.msrb.gmra.mxu1 %vm2028_vm9, %v6740_v4  ;;  %v10464_v4 = vld [vmem:[#allocation117_spill] sm:$0xff] }
 0x8f4   : > { %3408 = vmatpush.bf16.msra.mxu0 %v10449_v35  ;;  %3421 = vmatpush.bf16.msra.mxu1 %v10450_v10 }
 0x8f8   : > { %3409 = vmatpush.bf16.msra.mxu0 %v10451_v5  ;;  %3422 = vmatpush.bf16.msra.mxu1 %v10452_v43  ;;  %v10466_v43 = vld [vmem:[#allocation140_spill] sm:$0xff] }
 0x8fc   : > { %3410 = vmatpush.bf16.msra.mxu0 %v10453_v47  ;;  %3423 = vmatpush.bf16.msra.mxu1 %v10454_v34  ;;  %v10465_v34 = vld [vmem:[#allocation141_spill] sm:$0xff] }
 0x900   : > { %3411 = vmatpush.bf16.msra.mxu0 %v10455_v41  ;;  %3424 = vmatpush.bf16.msra.mxu1 %v10456_v23 }
 0x903   : > { %3412 = vmatmul.bf16.vlgmr.msra.gmra.mxu0 %v8281_v39  ;;  %3425 = vmatmul.bf16.vlgmr.msra.gmra.mxu1 %v8281_v39 }
 0x904   : > { %4417 = vmatpush.bf16.msrb.mxu1 %v10457_v26  ;;  %4404 = vmatpush.bf16.msrb.mxu0 %v10458_v40 }
 0x908   : > { %4418 = vmatpush.bf16.msrb.mxu1 %v10459_v32  ;;  %4405 = vmatpush.bf16.msrb.mxu0 %v10460_v31 }
 0x90c   : > { %4443 = vmatpush.bf16.msra.mxu1 %v10461_v63  ;;  %4430 = vmatpush.bf16.msra.mxu0 %v10462_v7 }
 0x910   : > { %4444 = vmatpush.bf16.msra.mxu1 %v10463_v15  ;;  %4431 = vmatpush.bf16.msra.mxu0 %v10464_v4 }
 0x950   : > { %v3280_v23 = vpop.f32.mrf.mxu0  ;;  %v3293_v26 = vpop.f32.mrf.mxu1 }
 0x951   : > { %v3349_v40 = vadd.f32 %v8351_v12, %v3293_v26  ;;  %v3336_v41 = vadd.f32 %v8349_v13, %v3280_v23 }
 0x953   : > { %v3431_v39 = vadd.f32 %v8388_v42, %v3349_v40  ;;  %v3430_v32 = vadd.f32 %v8386_v20, %v3336_v41 }
 0x955   : > { %v3435_v31 = vadd.f32 %v3431_v39, %v10465_v34  ;;  %v3434_v7 = vadd.f32 %v3430_v32, %v10466_v43 }
 0x957   : > { %v6214_v5 = vmul.f32 -1.442695, %v3435_v31  ;;  %v6213_v15 = vmul.f32 -1.442695, %v3434_v7 }
 0x958   : > { %v3282_v47 = vpop.f32.mrf.mxu0  ;;  %v3295_v63 = vpop.f32.mrf.mxu1 }
 0x959   : > { %6658 = vpow2.f32 %v6214_v5 }
 0x95a   : > { %6660 = vpow2.f32 %v6213_v15 }
 0x95f   : > { %v6659_v35 = vpop.eup %6658 }
 0x960   : > { %v3306_v4 = vpop.f32.mrf.mxu0  ;;  %v3319_v10 = vpop.f32.mrf.mxu1  ;;  %v3460_v23 = vadd.f32 1.0, %v6659_v35 }
 0x961   : > { %v6661_v12 = vpop.eup %6660 }
 0x962   : > { %v3441_v42 = vadd.f32 1.0, %v6661_v12  ;;  %6662 = vrcp.f32 %v3460_v23  ;;  %v3472_v49 = vand.u32 2147483648, %v3460_v23  ;;  %vm3466_vm10 = vweird.f32 %v3460_v23 }
 0x964   : > { %6664 = vrcp.f32 %v3441_v42  ;;  %vm3447_vm14 = vweird.f32 %v3441_v42 }
 0x968   : > { %v3308_v26 = vpop.f32.mrf.mxu0  ;;  %v3321_v13 = vpop.f32.mrf.mxu1 }
 0x969   : > { %v6663_v47 = vpop.eup %6662 }
 0x96a   : > { %v6665_v40 = vpop.eup %6664  ;;  %v3462_v63 = vmul.f32 %v6663_v47, %v3460_v23  ;;  %vm3467_vm15 = vweird.f32 %v6663_v47 }
 0x96b   : > { %v3443_v32 = vmul.f32 %v6665_v40, %v3441_v42  ;;  %vm3448_vm11 = vweird.f32 %v6665_v40  ;;  %vm3468_vm12 = vmor %vm3466_vm10, %vm3467_vm15 }
 0x96c   : > { %v3463_v5 = vsub.f32 1.0, %v3462_v63  ;;  %v3470_v63 = vand.u32 2147483647, %v3460_v23  ;;  %vm3449_vm6 = vmor %vm3447_vm14, %vm3448_vm11  ;;  %vm10506_vm14 = vcmask 458112  }
 0x96d   : > { %v3444_v39 = vsub.f32 1.0, %v3443_v32  ;;  %v3453_v32 = vand.u32 2147483648, %v3441_v42 }
 0x96e   : > { %v3464_v43 = vmul.f32 %v6663_v47, %v3463_v5  ;;  %vm3471_vm7 = vcmp.eq.f32.partialorder %v3470_v63, 8.507059e+37 }
 0x96f   : > { %v3445_v26 = vmul.f32 %v6665_v40, %v3444_v39 }
 0x970   : > { %v3361_v20 = vpop.f32.mrf.mxu0  ;;  %v3374_v41 = vpop.f32.mrf.mxu1  ;;  %v3465_v58 = vadd.f32 %v6663_v47, %v3464_v43 }
 0x971   : > { %v3362_v15 = vadd.f32 %v3361_v20, %v3306_v4  ;;  %v3375_v34 = vadd.f32 %v3374_v41, %v3319_v10  ;;  %v3451_v4 = vand.u32 2147483647, %v3441_v42 }
 0x972   : > { %v3469_v20 = vsel %vm3468_vm12, %v6663_v47, %v3465_v58  ;;  %vm10505_vm12 = vcmask 392512  }
 0x973   : > { %vm3452_vm8 = vcmp.eq.f32.partialorder %v3451_v4, 8.507059e+37 }
 0x978   : > { %v3363_v31 = vpop.f32.mrf.mxu0  ;;  %v3376_v7 = vpop.f32.mrf.mxu1 }
 0x979   : > { %v3446_v31 = vadd.f32 %v6665_v40, %v3445_v26  ;;  %v3454_v7 = vor.u32 1.1754944e-38, %v3453_v32 }
 0x97b   : > { %v3450_v43 = vsel %vm3449_vm6, %v6665_v40, %v3446_v31  ;;  %vm10507_vm6 = vmmov %vm10505_vm12 }
 0x97c   : > { %v3455_v23 = vsel %vm3452_vm8, %v3454_v7, %v3450_v43  ;;  %v6741_v7 = vld [vmem:[%s9815_s5 + $0x38] sm:$0xff]  ;;  %vm10511_vm8 = vmmov %vm10506_vm14 }
 0x980   : > { %v3413_v9 = vpop.f32.mrf.mxu0  ;;  %v3426_v13 = vpop.f32.mrf.mxu1 }
 0x981   : > { %v3432_v35 = vadd.f32 %v3413_v9, %v3362_v15  ;;  %v3433_v12 = vadd.f32 %v3426_v13, %v3375_v34  ;;  %v3473_v9 = vor.u32 1.1754944e-38, %v3472_v49  ;;  %v2382_v15 = vld [vmem:[#allocation3] sm:$0x3] }
 0x983   : > { %v3436_v2 = vadd.f32 %v3432_v35, %v10467_v59  ;;  %v3437_v48 = vadd.f32 %v3433_v12, %v10468_v60  ;;  %v3474_v5 = vsel %vm3471_vm7, %v3473_v9, %v3469_v20  ;;  %vm10509_vm7 = vcmask 523712  }
 0x984   : > { %v3496_v26 = vmul.f32 %v3474_v5, %v2382_v15  ;;  %v6742_v5 = vld [vmem:[%s9819_s9 + $0x38] sm:$0xff]  ;;  %v6744_v15 = vld [vmem:[%s9819_s9 + $0x30] sm:$0xff] }
 0x985   : > { %6666 = vtanh.f32 %v3436_v2  ;;  %v6215_v10 = vmul.f32 -1.442695, %v3437_v48 }
 0x987   : > { %6668 = vpow2.f32 %v6215_v10 }
 0x988   : > { %v3415_v34 = vpop.f32.mrf.mxu0  ;;  %v3428_v41 = vpop.f32.mrf.mxu1 }
 0x989   : > { %v6220_v41 = vld [vmem:[%s6983_s30 + $0x2] sm:$0x1] }
 0x98b   : > { %v6667_v39 = vpop.eup %6666 }
 0x98c   : > { %v3497_v13 = vmul.f32 %v6667_v39, %v3455_v23  ;;  %v6743_v39 = vld [vmem:[%s9815_s5 + $0x30] sm:$0xff]  ;;  %v6745_v23 = vld [vmem:[%s9815_s5 + $0x28] sm:$0xff] }
 0x98d   : > { %v6669_v2 = vpop.eup %6668 }
 0x98e   : > { %v3498_v48 = vadd.f32 %v3497_v13, %v3496_v26  ;;  %v3480_v35 = vadd.f32 1.0, %v6669_v2  ;;  %v6746_v26 = vld [vmem:[%s9819_s9 + $0x28] sm:$0xff]  ;;  %v6747_v13 = vld [vmem:[%s9815_s5 + $0x20] sm:$0xff] }
 0x98f   : > { %v6748_v2 = vld [vmem:[%s9819_s9 + $0x20] sm:$0xff] }
 0x990   : > { %3507 = vst [vmem:[#allocation3] sm:$0x3] %v3498_v48  ;;  %6670 = vrcp.f32 %v3480_v35  ;;  %v3492_v47 = vand.u32 2147483648, %v3480_v35  ;;  %v3490_v12 = vand.u32 2147483647, %v3480_v35  ;;  %vm3486_vm15 = vweird.f32 %v3480_v35 }
 0x991   : > { %6672 = vtanh.f32 %v3498_v48  ;;  %v6749_v48 = vld [vmem:[%s9815_s5 + $0x18] sm:$0xff] }
 0x992   : > { %v3493_v63 = vor.u32 1.1754944e-38, %v3492_v47  ;;  %vm3491_vm11 = vcmp.eq.f32.partialorder %v3490_v12, 8.507059e+37  ;;  %v6754_v47 = vld [vmem:[%s9819_s9 + $0x8] sm:$0xff]  ;;  %v6756_v12 = vld [vmem:[%s9819_s9] sm:$0xff] }
 0x996   : > { %v6671_v58 = vpop.eup %6670 }
 0x997   : > { %v3482_v49 = vmul.f32 %v6671_v58, %v3480_v35  ;;  %vm3487_vm13 = vweird.f32 %v6671_v58  ;;  %v6673_v10 = vpop.eup %6672  ;;  %v6750_v35 = vld [vmem:[%s9819_s9 + $0x18] sm:$0xff] }
 0x998   : > { %vm3488_vm10 = vmor %vm3486_vm15, %vm3487_vm13  ;;  %vm10513_vm13 = vcmask 589312  }
 0x999   : > { %v3483_v42 = vsub.f32 1.0, %v3482_v49  ;;  %v6752_v49 = vld [vmem:[%s9819_s9 + $0x10] sm:$0xff]  ;;  %vm10514_vm15 = vmmov %vm10509_vm7 }
 0x99b   : > { %v3484_v40 = vmul.f32 %v6671_v58, %v3483_v42  ;;  %v6753_v42 = vld [vmem:[%s9815_s5 + $0x8] sm:$0xff] }
 0x99d   : > { %v3485_v31 = vadd.f32 %v6671_v58, %v3484_v40  ;;  %v6755_v40 = vld [vmem:[%s9815_s5] sm:$0xff] }
 0x99f   : > { %v3489_v32 = vsel %vm3488_vm10, %v6671_v58, %v3485_v31  ;;  %v6751_v58 = vld [vmem:[%s9815_s5 + $0x10] sm:$0xff]  ;;  %vm10515_vm10 = vcmask 654912  }
 0x9a0   : > { %v3494_v4 = vsel %vm3491_vm11, %v3493_v63, %v3489_v32  ;;  %v6757_v32 = vld [vmem:[%s9816_s6] ss:$0 sm:$0xff]  ;;  %vm10516_vm11 = vmmov %vm10513_vm13 }
 0x9a1   : > { %v3500_v20 = vmul.f32 %v6673_v10, %v3494_v4 }
 0x9a3   : > { %v3501_v9 = vpack.c.bf16 %v3500_v20, %v3500_v20  ;;  %3506 = vst [vmem:[#allocation2] sm:$0x3] %v3500_v20 }
 0x9a5   : > { %6216 = vst [vmem:[%s6989_s17 + $0x1] sm:$0x1] %v3501_v9 }
 0x9aa   : > { %v3508_v43 = vld [vmem:[#allocation2] sm:$0x3] }
 0x9ab   : > { %v8798_v34 = vpack.c.bf16 %v3508_v43, %v3508_v43 }
 0x9ad   : > { %3519 = vmatmul.bf16.vlgmr.msrb.gmra.mxu2 %v8798_v34  ;;  %4363 = vmatmul.bf16.vlgmr.msrb.gmra.mxu3 %v8798_v34 }
 0x9ae   : > { %4505 = vmatpush.bf16.msrb.mxu2 %v8068_v21  ;;  %4518 = vmatpush.bf16.msrb.mxu3 %v8070_v38 }
 0x9b2   : > { %4506 = vmatpush.bf16.msrb.mxu2 %v8088_v50  ;;  %4519 = vmatpush.bf16.msrb.mxu3 %v8090_v62 }
 0x9b6   : > { %4507 = vmatpush.bf16.msrb.mxu2 %v8106_v8  ;;  %4520 = vmatpush.bf16.msrb.mxu3 %v8108_v37 }
 0x9ba   : > { %4508 = vmatpush.bf16.msrb.mxu2 %v8124_v52  ;;  %4521 = vmatpush.bf16.msrb.mxu3 %v8126_v11 }
 0x9bd   : > { %6225 = vmatmul.msk.bf16.vlgmr.msra.gmra.mxu2 %vm2028_vm9, %v6220_v41  ;;  %6226 = vmatmul.msk.bf16.vlgmr.msra.gmra.mxu3 %vm2028_vm9, %v6220_v41 }
 0x9be   : > { %4509 = vmatpush.bf16.msrb.mxu2 %v8142_v53  ;;  %4522 = vmatpush.bf16.msrb.mxu3 %v8144_v61 }
 0x9c2   : > { %4510 = vmatpush.bf16.msrb.mxu2 %v8164_v1  ;;  %4523 = vmatpush.bf16.msrb.mxu3 %v8166_v14 }
 0x9c6   : > { %4511 = vmatpush.bf16.msrb.mxu2 %v8182_v33  ;;  %4524 = vmatpush.bf16.msrb.mxu3 %v8184_v3 }
 0x9ca   : > { %4512 = vmatpush.bf16.msrb.mxu2 %v8200_v51  ;;  %4525 = vmatpush.bf16.msrb.mxu3 %v8202_v45  ;;  %v10474_v51 = vld [vmem:[#allocation69_spill] sm:$0xff] }
 0x9cd   : > { %4513 = vmatmul.bf16.vlgmr.msrb.gmra.mxu2 %v8798_v34  ;;  %4526 = vmatmul.bf16.vlgmr.msrb.gmra.mxu3 %v8798_v34 }
 0x9ce   : > { %4638 = vmatpush.bf16.msra.mxu2 %v6741_v7  ;;  %5482 = vmatpush.bf16.msra.mxu3 %v6742_v5 }
 0x9d2   : > { %4639 = vmatpush.bf16.msra.mxu2 %v6743_v39  ;;  %5483 = vmatpush.bf16.msra.mxu3 %v6744_v15 }
 0x9d6   : > { %4640 = vmatpush.bf16.msra.mxu2 %v6745_v23  ;;  %5484 = vmatpush.bf16.msra.mxu3 %v6746_v26 }
 0x9da   : > { %4641 = vmatpush.bf16.msra.mxu2 %v6747_v13  ;;  %5485 = vmatpush.bf16.msra.mxu3 %v6748_v2 }
 0x9de   : > { %4642 = vmatpush.bf16.msra.mxu2 %v6749_v48  ;;  %5486 = vmatpush.bf16.msra.mxu3 %v6750_v35 }
 0x9e2   : > { %4643 = vmatpush.bf16.msra.mxu2 %v6751_v58  ;;  %5487 = vmatpush.bf16.msra.mxu3 %v6752_v49  ;;  %v10469_v58 = vld [vmem:[#allocation38_spill] sm:$0xff] }
 0x9e6   : > { %4644 = vmatpush.bf16.msra.mxu2 %v6753_v42  ;;  %5488 = vmatpush.bf16.msra.mxu3 %v6754_v47  ;;  %v10470_v42 = vld [vmem:[#allocation45_spill] sm:$0xff] }
 0x9ea   : > { %4645 = vmatpush.bf16.msra.mxu2 %v6755_v40  ;;  %5489 = vmatpush.bf16.msra.mxu3 %v6756_v12  ;;  %v10471_v40 = vld [vmem:[#allocation46_spill] sm:$0xff] }
 0x9ee   : > { %5587 = vmatpush.bf16.msrb.mxu2 %v8039_v18  ;;  %5600 = vmatpush.bf16.msrb.mxu3 %v8041_v57 }
 0xa30   : > { %v3520_v31 = vpop.f32.mrf.mxu2  ;;  %v8873_v63 = vpop.f32.mrf.mxu3 }
 0xa31   : > { %v3521_v10 = vadd.f32 %v6757_v32, %v3520_v31  ;;  %v10472_v31 = vld [vmem:[#allocation39_spill] sm:$0xff] }
 0xa33   : > { %v3524_v4 = vpack.c.bf16 %v3521_v10, %v3521_v10 }
 0xa35   : > { %v3526_v20 = vrot.slane %v3524_v4, 3 }
 0xa37   : > { %v3529_v9 = vsel %vm886_vm0, %v3524_v4, %v3526_v20 }
 0xa38   : > { %v6218_v43 = vpack.i.b16 %v3529_v9, %v3529_v9  ;;  %v3522_v41 = vpop.f32.mrf.mxu2  ;;  %v4366_v7 = vpop.f32.mrf.mxu3  ;;  %v3532_v18 = vunpack.i.h.s16 %v3529_v9 }
 0xa39   : > { %v10473_v7 = vld [vmem:[#allocation40_spill] sm:$0xff] }
 0xa3a   : > { %v3535_v5 = vperm.slane %v6218_v43, 0  ;;  %v3534_v13 = vpack.i.b16 %v3532_v18, %v3532_v18 }
 0xa3c   : > { %v3538_v39 = vpack.i.b16 %v3535_v5, %v3535_v5  ;;  %v3536_v9 = vperm.slane %v3534_v13, 0 }
 0xa3e   : > { %v3540_v15 = vperm.slane %v3538_v39, 0 }
 0xa40   : > { %v8879_v57 = vunpack.c.l.bf16 %v3540_v15  ;;  %v8881_v23 = vpop.f32.mrf.mxu2  ;;  %v8883_v26 = vpop.f32.mrf.mxu3 }
 0xa42   : > { %v3551_v2 = vadd.f32 %v10325_v46, %v8879_v57  ;;  %v3552_v48 = vadd.f32 %v10326_v25, %v8879_v57  ;;  %v3547_v35 = vadd.f32 %v10327_v44, %v8879_v57  ;;  %v3548_v49 = vadd.f32 %v10469_v58, %v8879_v57 }
 0xa43   : > { %v3555_v47 = vadd.f32 %v10470_v42, %v8879_v57  ;;  %v3556_v12 = vadd.f32 %v10471_v40, %v8879_v57  ;;  %v3549_v32 = vadd.f32 %v10472_v31, %v8879_v57  ;;  %v3550_v5 = vadd.f32 %v10473_v7, %v8879_v57 }
 0xa44   : > { %v3647_v10 = vmax.f32 %v3551_v2, 0.0  ;;  %v3648_v4 = vmax.f32 %v3552_v48, 0.0  ;;  %v3643_v20 = vmax.f32 %v3547_v35, 0.0  ;;  %v3644_v43 = vmax.f32 %v3548_v49, 0.0 }
 0xa45   : > { %v3651_v41 = vmax.f32 %v3555_v47, 0.0  ;;  %v3652_v58 = vmax.f32 %v3556_v12, 0.0  ;;  %v3645_v25 = vmax.f32 %v3549_v32, 0.0  ;;  %v3542_v35 = vpack.i.b16 %v3536_v9, %v3536_v9  ;;  %v10476_v9 = vld [vmem:[#allocation48_spill] sm:$0xff] }
 0xa46   : > { %v3679_v39 = vpack.c.bf16 %v3647_v10, %v3647_v10  ;;  %v3680_v18 = vpack.c.bf16 %v3648_v4, %v3648_v4  ;;  %v3675_v15 = vpack.c.bf16 %v3643_v20, %v3643_v20  ;;  %v3676_v42 = vpack.c.bf16 %v3644_v43, %v3644_v43 }
 0xa47   : > { %v3683_v44 = vpack.c.bf16 %v3651_v41, %v3651_v41  ;;  %v3684_v48 = vpack.c.bf16 %v3652_v58, %v3652_v58  ;;  %v3646_v47 = vmax.f32 %v3550_v5, 0.0  ;;  %v3544_v41 = vperm.slane %v3542_v35, 0 }
 0xa48   : > { %v4464_v40 = vpop.f32.mrf.mxu2  ;;  %v4477_v46 = vpop.f32.mrf.mxu3  ;;  %v3711_v45 = vunpack.c.l.bf16 %v3679_v39  ;;  %v3712_v31 = vunpack.c.l.bf16 %v3680_v18  ;;  %v3707_v2 = vunpack.c.l.bf16 %v3675_v15  ;;  %v3708_v13 = vunpack.c.l.bf16 %v3676_v42  ;;  %v10475_v42 = vld [vmem:[#allocation47_spill] sm:$0xff] }
 0xa49   : > { %v3715_v49 = vunpack.c.l.bf16 %v3683_v44  ;;  %v3716_v12 = vunpack.c.l.bf16 %v3684_v48  ;;  %v3677_v46 = vpack.c.bf16 %v3645_v25, %v3645_v25  ;;  %v3678_v32 = vpack.c.bf16 %v3646_v47, %v3646_v47  ;;  %v10477_v25 = vld [vmem:[#allocation43_spill] sm:$0xff] }
 0xa4a   : > { %v3743_v3 = vmul.f32 %v3711_v45, %v10474_v51  ;;  %v3744_v10 = vmul.f32 %v3712_v31, %v10474_v51  ;;  %v3739_v4 = vmul.f32 %v3707_v2, %v10474_v51  ;;  %v3740_v20 = vmul.f32 %v3708_v13, %v10474_v51 }
 0xa4b   : > { %v3747_v40 = vmul.f32 %v3715_v49, %v10474_v51  ;;  %v3748_v58 = vmul.f32 %v3716_v12, %v10474_v51  ;;  %v3557_v44 = vadd.f32 %v10475_v42, %v8879_v57  ;;  %v3558_v45 = vadd.f32 %v10476_v9, %v8879_v57 }
 0xa4c   : > { %v3773_v43 = vpack.c.bf16 %v3744_v10, %v3743_v3  ;;  %v3771_v31 = vpack.c.bf16 %v3740_v20, %v3739_v4  ;;  %v3709_v5 = vunpack.c.l.bf16 %v3677_v46  ;;  %v3710_v39 = vunpack.c.l.bf16 %v3678_v32 }
 0xa4d   : > { %v8911_v15 = vpack.c.bf16 %v3748_v58, %v3747_v40  ;;  %v3653_v2 = vmax.f32 %v3557_v44, 0.0  ;;  %v3553_v48 = vadd.f32 %v10477_v25, %v8879_v57  ;;  %v3654_v20 = vmax.f32 %v3558_v45, 0.0  ;;  %v10479_v45 = vld [vmem:[#allocation51_spill] sm:$0xff] }
 0xa4e   : > { %v3792_v18 = vunpack.c.h.bf16 %v3773_v43  ;;  %v3788_v3 = vunpack.c.h.bf16 %v3771_v31  ;;  %v3787_v13 = vunpack.c.l.bf16 %v3771_v31  ;;  %v3741_v49 = vmul.f32 %v3709_v5, %v10474_v51  ;;  %v10478_v31 = vld [vmem:[#allocation44_spill] sm:$0xff] }
 0xa4f   : > { %v3742_v47 = vmul.f32 %v3710_v39, %v10474_v51  ;;  %v3791_v4 = vunpack.c.l.bf16 %v3773_v43  ;;  %v3685_v58 = vpack.c.bf16 %v3653_v2, %v3653_v2  ;;  %v3686_v44 = vpack.c.bf16 %v3654_v20, %v3654_v20  ;;  %v10480_v2 = vld [vmem:[#allocation52_spill] sm:$0xff] }
 0xa50   : > { %v8917_v10 = vpop.f32.mrf.mxu2  ;;  %v8919_v12 = vpop.f32.mrf.mxu3  ;;  %v3834_v35 = vsel %vm1216_vm1, %v3792_v18, 0.0  ;;  %v3822_v40 = vsel %vm1216_vm1, %v3788_v3, 0.0  ;;  %v3819_v46 = vsel %vm1216_vm1, %v3787_v13, 0.0  ;;  %v3554_v5 = vadd.f32 %v10478_v31, %v8879_v57 }
 0xa51   : > { %3835 = vadd.xlane.f32.xlu0 %v3834_v35  ;;  %v3772_v32 = vpack.c.bf16 %v3742_v47, %v3741_v49  ;;  %3823 = vadd.xlane.f32.xlu2 %v3822_v40  ;;  %v3649_v39 = vmax.f32 %v3553_v48, 0.0  ;;  %v8926_v9 = vunpack.c.l.bf16 %v3544_v41  ;;  %v3795_v18 = vunpack.c.l.bf16 %v8911_v15 }
 0xa52   : > { %3820 = vadd.xlane.f32.xlu1 %v3819_v46  ;;  %v3717_v43 = vunpack.c.l.bf16 %v3685_v58  ;;  %v3561_v35 = vadd.f32 %v10479_v45, %v8879_v57  ;;  %v3718_v3 = vunpack.c.l.bf16 %v3686_v44  ;;  %v3650_v42 = vmax.f32 %v3554_v5, 0.0  ;;  %v10481_v44 = vld [vmem:[#allocation49_spill] sm:$0xff] }
 0xa53   : > { %v3681_v13 = vpack.c.bf16 %v3649_v39, %v3649_v39  ;;  %v3562_v49 = vadd.f32 %v10480_v2, %v8879_v57  ;;  %v3789_v47 = vunpack.c.l.bf16 %v3772_v32  ;;  %v3831_v20 = vsel %vm1216_vm1, %v3791_v4, 0.0  ;;  %v10482_v39 = vld [vmem:[#allocation50_spill] sm:$0xff] }
 0xa54   : > { %v3749_v40 = vmul.f32 %v3717_v43, %v10474_v51  ;;  %v3657_v48 = vmax.f32 %v3561_v35, 0.0  ;;  %v3750_v41 = vmul.f32 %v3718_v3, %v10474_v51  ;;  %v3682_v46 = vpack.c.bf16 %v3650_v42, %v3650_v42 }
 0xa55   : > { %v3713_v7 = vunpack.c.l.bf16 %v3681_v13  ;;  %v3658_v58 = vmax.f32 %v3562_v49, 0.0  ;;  %v3843_v31 = vsel %vm1216_vm1, %v3795_v18, 0.0  ;;  %v3559_v5 = vadd.f32 %v10481_v44, %v8879_v57 }
 0xa56   : > { %v3689_v45 = vpack.c.bf16 %v3657_v48, %v3657_v48  ;;  %v3560_v2 = vadd.f32 %v10482_v39, %v8879_v57  ;;  %v3776_v4 = vpack.c.bf16 %v3750_v41, %v3749_v40  ;;  %v3714_v14 = vunpack.c.l.bf16 %v3682_v46 }
 0xa57   : > { %v3745_v43 = vmul.f32 %v3713_v7, %v10474_v51  ;;  %v3690_v35 = vpack.c.bf16 %v3658_v58, %v3658_v58  ;;  %v3825_v42 = vsel %vm1216_vm1, %v3789_v47, 0.0  ;;  %v3655_v13 = vmax.f32 %v3559_v5, 0.0 }
 0xa58   : > { %v4516_v25 = vpop.f32.mrf.mxu2  ;;  %v4529_v33 = vpop.f32.mrf.mxu3  ;;  %v3721_v3 = vunpack.c.l.bf16 %v3689_v45  ;;  %v3656_v18 = vmax.f32 %v3560_v2, 0.0  ;;  %v3746_v49 = vmul.f32 %v3714_v14, %v10474_v51  ;;  %v3790_v44 = vunpack.c.h.bf16 %v3772_v32  ;;  %v10484_v45 = vld [vmem:[#allocation54_spill] sm:$0xff]  ;;  %v10485_v14 = vld [vmem:[#allocation55_spill] sm:$0xff] }
 0xa59   : > { %3844 = vadd.xlane.f32.xlu0 %v3843_v31  ;;  %3826 = vadd.xlane.f32.xlu2 %v3825_v42  ;;  %v3722_v48 = vunpack.c.l.bf16 %v3690_v35  ;;  %v3687_v57 = vpack.c.bf16 %v3655_v13, %v3655_v13  ;;  %v10483_v33 = vld [vmem:[#allocation53_spill] sm:$0xff]  ;;  %v3798_v41 = vunpack.c.h.bf16 %v3776_v4  ;;  %v3564_v2 = vadd.f32 %v10484_v45, %v8926_v9 }
 0xa5a   : > { %3832 = vadd.xlane.f32.xlu1 %v3831_v20  ;;  %v3688_v25 = vpack.c.bf16 %v3656_v18, %v3656_v18  ;;  %v3563_v40 = vadd.f32 %v10483_v33, %v8926_v9  ;;  %v3774_v7 = vpack.c.bf16 %v3746_v49, %v3745_v43  ;;  %v3753_v31 = vmul.f32 %v3721_v3, %v10474_v51  ;;  %v10486_v3 = vld [vmem:[#allocation56_spill] sm:$0xff] }
 0xa5b   : > { %v3754_v47 = vmul.f32 %v3722_v48, %v10474_v51  ;;  %v3565_v58 = vadd.f32 %v10485_v14, %v8926_v9  ;;  %v3719_v32 = vunpack.c.l.bf16 %v3687_v57  ;;  %v3660_v35 = vmax.f32 %v3564_v2, 0.0 }
 0xa5c   : > { %v3659_v46 = vmax.f32 %v3563_v40, 0.0  ;;  %v3794_v20 = vunpack.c.h.bf16 %v3774_v7  ;;  %v3720_v5 = vunpack.c.l.bf16 %v3688_v25  ;;  %v3852_v13 = vsel %vm1216_vm1, %v3798_v41, 0.0 }
 0xa5d   : > { %v3828_v43 = vsel %vm1216_vm1, %v3790_v44, 0.0  ;;  %v8954_v18 = vpack.c.bf16 %v3754_v47, %v3753_v31  ;;  %v3566_v49 = vadd.f32 %v10486_v3, %v8926_v9  ;;  %v3692_v40 = vpack.c.bf16 %v3660_v35, %v3660_v35 }
 0xa5e   : > { %v3691_v42 = vpack.c.bf16 %v3659_v46, %v3659_v46  ;;  %v3840_v48 = vsel %vm1216_vm1, %v3794_v20, 0.0  ;;  %v3661_v33 = vmax.f32 %v3565_v58, 0.0  ;;  %v3797_v57 = vunpack.c.l.bf16 %v3776_v4  ;;  %v10487_v58 = vld [vmem:[#allocation57_spill] sm:$0xff]  ;;  %v10488_v4 = vld [vmem:[#allocation58_spill] sm:$0xff] }
 0xa5f   : > { %v3662_v25 = vmax.f32 %v3566_v49, 0.0  ;;  %v3793_v2 = vunpack.c.l.bf16 %v3774_v7  ;;  %v3751_v41 = vmul.f32 %v3719_v32, %v10474_v51  ;;  %v3752_v44 = vmul.f32 %v3720_v5, %v10474_v51  ;;  %v10489_v7 = vld [vmem:[#allocation59_spill] sm:$0xff]  ;;  %v10490_v49 = vld [vmem:[#allocation60_spill] sm:$0xff] }
 0xa60   : > { %v3723_v45 = vunpack.c.l.bf16 %v3691_v42  ;;  %v3724_v31 = vunpack.c.l.bf16 %v3692_v40  ;;  %v3801_v47 = vunpack.c.l.bf16 %v8954_v18  ;;  %v3567_v35 = vadd.f32 %v10487_v58, %v8926_v9 }
 0xa61   : > { %3853 = vadd.xlane.f32.xlu0 %v3852_v13  ;;  %3829 = vadd.xlane.f32.xlu2 %v3828_v43  ;;  %v3693_v13 = vpack.c.bf16 %v3661_v33, %v3661_v33  ;;  %v3694_v3 = vpack.c.bf16 %v3662_v25, %v3662_v25  ;;  %v3568_v42 = vadd.f32 %v10488_v4, %v8926_v9  ;;  %v3837_v5 = vsel %vm1216_vm1, %v3793_v2, 0.0 }
 0xa62   : > { %3841 = vadd.xlane.f32.xlu1 %v3840_v48  ;;  %v3755_v46 = vmul.f32 %v3723_v45, %v10474_v51  ;;  %v3756_v20 = vmul.f32 %v3724_v31, %v10474_v51  ;;  %v3569_v32 = vadd.f32 %v10489_v7, %v8926_v9  ;;  %v3849_v43 = vsel %vm1216_vm1, %v3797_v57, 0.0  ;;  %v10491_v57 = vld [vmem:[#allocation61_spill] sm:$0xff] }
 0xa63   : > { %v3570_v45 = vadd.f32 %v10490_v49, %v8926_v9  ;;  %v3861_v48 = vsel %vm1216_vm1, %v3801_v47, 0.0  ;;  %v3725_v25 = vunpack.c.l.bf16 %v3693_v13  ;;  %v3726_v31 = vunpack.c.l.bf16 %v3694_v3 }
 0xa64   : > { %v3665_v33 = vmax.f32 %v3569_v32, 0.0  ;;  %v3779_v40 = vpack.c.bf16 %v3756_v20, %v3755_v46  ;;  %v3777_v58 = vpack.c.bf16 %v3752_v44, %v3751_v41  ;;  %v3663_v14 = vmax.f32 %v3567_v35, 0.0  ;;  %v10492_v46 = vld [vmem:[#allocation62_spill] sm:$0xff] }
 0xa65   : > { %v3664_v4 = vmax.f32 %v3568_v42, 0.0  ;;  %v3666_v39 = vmax.f32 %v3570_v45, 0.0  ;;  %v3571_v1 = vadd.f32 %v10491_v57, %v8926_v9  ;;  %v3757_v32 = vmul.f32 %v3725_v25, %v10474_v51 }
 0xa66   : > { %v3697_v7 = vpack.c.bf16 %v3665_v33, %v3665_v33  ;;  %v3803_v61 = vunpack.c.l.bf16 %v3779_v40  ;;  %v3758_v47 = vmul.f32 %v3726_v31, %v10474_v51  ;;  %v3572_v3 = vadd.f32 %v10492_v46, %v8926_v9  ;;  %v10501_v46 = vld [vmem:[#allocation74_spill] sm:$0xff] }
 0xa67   : > { %v3698_v2 = vpack.c.bf16 %v3666_v39, %v3666_v39  ;;  %v3796_v41 = vunpack.c.h.bf16 %v8911_v15  ;;  %v3800_v44 = vunpack.c.h.bf16 %v3777_v58  ;;  %v3695_v13 = vpack.c.bf16 %v3663_v14, %v3663_v14 }
 0xa68   : > { %v3696_v20 = vpack.c.bf16 %v3664_v4, %v3664_v4  ;;  %v3729_v35 = vunpack.c.l.bf16 %v3697_v7  ;;  %v3867_v39 = vsel %vm1216_vm1, %v3803_v61, 0.0  ;;  %v3668_v45 = vmax.f32 %v3572_v3, 0.0  ;;  %v10494_v3 = vld [vmem:[#allocation66_spill] sm:$0xff] }
 0xa69   : > { %3862 = vadd.xlane.f32.xlu0 %v3861_v48  ;;  %3838 = vadd.xlane.f32.xlu2 %v3837_v5  ;;  %v3730_v42 = vunpack.c.l.bf16 %v3698_v2  ;;  %v3667_v5 = vmax.f32 %v3571_v1, 0.0  ;;  %v3846_v33 = vsel %vm1216_vm1, %v3796_v41, 0.0  ;;  %v3858_v48 = vsel %vm1216_vm1, %v3800_v44, 0.0  ;;  %v10493_v1 = vld [vmem:[#allocation65_spill] sm:$0xff] }
 0xa6a   : > { %3850 = vadd.xlane.f32.xlu1 %v3849_v43  ;;  %v3780_v43 = vpack.c.bf16 %v3758_v47, %v3757_v32  ;;  %v3727_v25 = vunpack.c.l.bf16 %v3695_v13  ;;  %v3728_v31 = vunpack.c.l.bf16 %v3696_v20  ;;  %v3799_v15 = vunpack.c.l.bf16 %v3777_v58  ;;  %v10495_v58 = vld [vmem:[#allocation63_spill] sm:$0xff] }
 0xa6b   : > { %v3761_v14 = vmul.f32 %v3729_v35, %v10474_v51  ;;  %v3762_v4 = vmul.f32 %v3730_v42, %v10474_v51  ;;  %v3699_v7 = vpack.c.bf16 %v3667_v5, %v3667_v5  ;;  %v3575_v61 = vadd.f32 %v10493_v1, %v8926_v9  ;;  %v10496_v35 = vld [vmem:[#allocation64_spill] sm:$0xff] }
 0xa6c   : > { %v3804_v2 = vunpack.c.h.bf16 %v3779_v40  ;;  %v3806_v32 = vunpack.c.h.bf16 %v3780_v43  ;;  %v3700_v47 = vpack.c.bf16 %v3668_v45, %v3668_v45  ;;  %v3576_v41 = vadd.f32 %v10494_v3, %v8926_v9 }
 0xa6d   : > { %v3759_v44 = vmul.f32 %v3727_v25, %v10474_v51  ;;  %v3760_v13 = vmul.f32 %v3728_v31, %v10474_v51  ;;  %v3573_v20 = vadd.f32 %v10495_v58, %v8926_v9  ;;  %v3574_v42 = vadd.f32 %v10496_v35, %v8926_v9 }
 0xa6e   : > { %v3782_v5 = vpack.c.bf16 %v3762_v4, %v3761_v14  ;;  %v3855_v40 = vsel %vm1216_vm1, %v3799_v15, 0.0  ;;  %v3876_v45 = vsel %vm1216_vm1, %v3806_v32, 0.0  ;;  %v3672_v1 = vmax.f32 %v3576_v41, 0.0  ;;  %v10497_v15 = vld [vmem:[#allocation67_spill] sm:$0xff]  ;;  %v10498_v32 = vld [vmem:[#allocation68_spill] sm:$0xff] }
 0xa6f   : > { %v3870_v3 = vsel %vm1216_vm1, %v3804_v2, 0.0  ;;  %v3781_v25 = vpack.c.bf16 %v3760_v13, %v3759_v44  ;;  %v3669_v31 = vmax.f32 %v3573_v20, 0.0  ;;  %v3670_v49 = vmax.f32 %v3574_v42, 0.0 }
 0xa70   : > { %v3809_v58 = vunpack.c.l.bf16 %v3782_v5  ;;  %v3805_v41 = vunpack.c.l.bf16 %v3780_v43 }
 0xa71   : > { %3868 = vadd.xlane.f32.xlu0 %v3867_v39  ;;  %3847 = vadd.xlane.f32.xlu2 %v3846_v33  ;;  %v3731_v39 = vunpack.c.l.bf16 %v3699_v7  ;;  %v3671_v33 = vmax.f32 %v3575_v61, 0.0  ;;  %v3704_v7 = vpack.c.bf16 %v3672_v1, %v3672_v1  ;;  %v3577_v61 = vadd.f32 %v10497_v15, %v8926_v9 }
 0xa72   : > { %3859 = vadd.xlane.f32.xlu1 %v3858_v48  ;;  %v3732_v48 = vunpack.c.l.bf16 %v3700_v47  ;;  %v3578_v47 = vadd.f32 %v10498_v32, %v8926_v9  ;;  %v3807_v2 = vunpack.c.l.bf16 %v3781_v25  ;;  %v3701_v44 = vpack.c.bf16 %v3669_v31, %v3669_v31 }
 0xa73   : > { %v3763_v35 = vmul.f32 %v3731_v39, %v10474_v51  ;;  %v3703_v14 = vpack.c.bf16 %v3671_v33, %v3671_v33  ;;  %v3702_v13 = vpack.c.bf16 %v3670_v49, %v3670_v49  ;;  %v3885_v20 = vsel %vm1216_vm1, %v3809_v58, 0.0 }
 0xa74   : > { %v3764_v4 = vmul.f32 %v3732_v48, %v10474_v51  ;;  %v3673_v39 = vmax.f32 %v3577_v61, 0.0  ;;  %v3674_v33 = vmax.f32 %v3578_v47, 0.0  ;;  %v3873_v1 = vsel %vm1216_vm1, %v3805_v41, 0.0 }
 0xa75   : > { %v3733_v48 = vunpack.c.l.bf16 %v3701_v44  ;;  %v3734_v15 = vunpack.c.l.bf16 %v3702_v13 }
 0xa76   : > { %v3783_v42 = vpack.c.bf16 %v3764_v4, %v3763_v35  ;;  %v3705_v58 = vpack.c.bf16 %v3673_v39, %v3673_v39  ;;  %v3706_v31 = vpack.c.bf16 %v3674_v33, %v3674_v33  ;;  %v3810_v35 = vunpack.c.h.bf16 %v3782_v5 }
 0xa77   : > { %v3765_v4 = vmul.f32 %v3733_v48, %v10474_v51 }
 0xa78   : > { %v3812_v43 = vunpack.c.h.bf16 %v3783_v42  ;;  %v3738_v41 = vunpack.c.l.bf16 %v3706_v31  ;;  %v3888_v44 = vsel %vm1216_vm1, %v3810_v35, 0.0 }
 0xa79   : > { %3877 = vadd.xlane.f32.xlu0 %v3876_v45  ;;  %3856 = vadd.xlane.f32.xlu2 %v3855_v40  ;;  %v3736_v40 = vunpack.c.l.bf16 %v3704_v7  ;;  %v3879_v45 = vsel %vm1216_vm1, %v3807_v2, 0.0  ;;  %v3766_v7 = vmul.f32 %v3734_v15, %v10474_v51  ;;  %v3737_v2 = vunpack.c.l.bf16 %v3705_v58 }
 0xa7a   : > { %3871 = vadd.xlane.f32.xlu1 %v3870_v3  ;;  %v3735_v3 = vunpack.c.l.bf16 %v3703_v14  ;;  %v3808_v14 = vunpack.c.h.bf16 %v3781_v25  ;;  %v3894_v61 = vsel %vm1216_vm1, %v3812_v43, 0.0  ;;  %v3770_v25 = vmul.f32 %v3738_v41, %v10474_v51 }
 0xa7b   : > { %v3768_v49 = vmul.f32 %v3736_v40, %v10474_v51  ;;  %v3769_v5 = vmul.f32 %v3737_v2, %v10474_v51  ;;  %v3811_v15 = vunpack.c.l.bf16 %v3783_v42  ;;  %v3802_v42 = vunpack.c.h.bf16 %v8954_v18 }
 0xa7c   : > { %v3767_v9 = vmul.f32 %v3735_v3, %v10474_v51  ;;  %v3882_v13 = vsel %vm1216_vm1, %v3808_v14, 0.0 }
 0xa7d   : > { %v3786_v33 = vpack.c.bf16 %v3770_v25, %v3769_v5  ;;  %v3864_v14 = vsel %vm1216_vm1, %v3802_v42, 0.0 }
 0xa7e   : > { %v3785_v47 = vpack.c.bf16 %v3768_v49, %v3767_v9 }
 0xa7f   : > { %v3818_v48 = vunpack.c.h.bf16 %v3786_v33  ;;  %v3817_v35 = vunpack.c.l.bf16 %v3786_v33 }
 0xa80   : > { %v3815_v3 = vunpack.c.l.bf16 %v3785_v47  ;;  %v3816_v9 = vunpack.c.h.bf16 %v3785_v47 }
 0xa81   : > { %3886 = vadd.xlane.f32.xlu0 %v3885_v20  ;;  %3880 = vadd.xlane.f32.xlu2 %v3879_v45  ;;  %v3784_v20 = vpack.c.bf16 %v3766_v7, %v3765_v4  ;;  %v3912_v49 = vsel %vm1216_vm1, %v3818_v48, 0.0  ;;  %v3909_v4 = vsel %vm1216_vm1, %v3817_v35, 0.0 }
 0xa82   : > { %3874 = vadd.xlane.f32.xlu1 %v3873_v1  ;;  %v3903_v39 = vsel %vm1216_vm1, %v3815_v3, 0.0  ;;  %v3891_v1 = vsel %vm1216_vm1, %v3811_v15, 0.0  ;;  %v3906_v58 = vsel %vm1216_vm1, %v3816_v9, 0.0 }
 0xa83   : > { %v3813_v40 = vunpack.c.l.bf16 %v3784_v20  ;;  %v3814_v43 = vunpack.c.h.bf16 %v3784_v20 }
 0xa85   : > { %v3897_v45 = vsel %vm1216_vm1, %v3813_v40, 0.0  ;;  %v3900_v31 = vsel %vm1216_vm1, %v3814_v43, 0.0 }
 0xa89   : > { %3895 = vadd.xlane.f32.xlu0 %v3894_v61  ;;  %3889 = vadd.xlane.f32.xlu2 %v3888_v44  ;;  %v10499_v44 = vld [vmem:[#allocation72_spill] sm:$0xff] }
 0xa8a   : > { %3883 = vadd.xlane.f32.xlu1 %v3882_v13 }
 0xa91   : > { %3904 = vadd.xlane.f32.xlu0 %v3903_v39  ;;  %3898 = vadd.xlane.f32.xlu2 %v3897_v45 }
 0xa92   : > { %3892 = vadd.xlane.f32.xlu1 %v3891_v1 }
 0xa99   : > { %3913 = vadd.xlane.f32.xlu0 %v3912_v49  ;;  %3907 = vadd.xlane.f32.xlu2 %v3906_v58 }
 0xa9a   : > { %3901 = vadd.xlane.f32.xlu1 %v3900_v31 }
 0xaa1   : > { %3865 = vadd.xlane.f32.xlu2 %v3864_v14 }
 0xaa2   : > { %3910 = vadd.xlane.f32.xlu1 %v3909_v4 }
 0xac4   : > { %v3836_v7 = vpop.xlane.xlu0 %3835  ;;  %v3824_v61 = vpop.xlane.xlu2 %3823 }
 0xac5   : > { %v3821_v47 = vpop.xlane.xlu1 %3820  ;;  %v3916_v2 = vadd.f32 %v3824_v61, %v10347_v55 }
 0xac6   : > { %v3915_v41 = vadd.f32 %v3821_v47, %v10347_v55 }
 0xac7   : > { %v3980_v13 = vperm.slane %v3916_v2, %v10499_v44 }
 0xac8   : > { %v3979_v20 = vperm.slane %v3915_v41, %v10349_v30 }
 0xaca   : > { %v3981_v18 = vsel %vm1386_vm2, %v3980_v13, %v3979_v20  ;;  %v10500_v13 = vld [vmem:[#allocation73_spill] sm:$0xff] }
 0xacc   : > { %v3845_v3 = vpop.xlane.xlu0 %3844  ;;  %v3827_v5 = vpop.xlane.xlu2 %3826 }
 0xacd   : > { %v3833_v25 = vpop.xlane.xlu1 %3832  ;;  %v3917_v35 = vadd.f32 %v3827_v5, %v10347_v55 }
 0xace   : > { %v3919_v5 = vadd.f32 %v3833_v25, %v10347_v55 }
 0xacf   : > { %v3982_v20 = vperm.slane %v3917_v35, %v10500_v13 }
 0xad4   : > { %v9032_v40 = vpop.xlane.xlu0 %3853  ;;  %v3830_v15 = vpop.xlane.xlu2 %3829 }
 0xad5   : > { %v3842_v39 = vpop.xlane.xlu1 %3841  ;;  %v3918_v47 = vadd.f32 %v3830_v15, %v10347_v55  ;;  %v3920_v15 = vadd.f32 %v3836_v7, %v10347_v55 }
 0xad7   : > { %v3984_v57 = vperm.slane %v3918_v47, %v10501_v46 }
 0xadc   : > { %v9034_v33 = vpop.xlane.xlu0 %3862  ;;  %v3839_v45 = vpop.xlane.xlu2 %3838 }
 0xadd   : > { %v3851_v1 = vpop.xlane.xlu1 %3850 }
 0xae4   : > { %v3869_v48 = vpop.xlane.xlu0 %3868  ;;  %v3848_v9 = vpop.xlane.xlu2 %3847 }
 0xae5   : > { %v9036_v43 = vpop.xlane.xlu1 %3859  ;;  %v3931_v41 = vadd.f32 %v3869_v48, %v10347_v55  ;;  %v3921_v48 = vadd.f32 %v3839_v45, %v10347_v55  ;;  %v10503_v45 = vld [vmem:[#allocation77_spill] sm:$0xff] }
 0xaec   : > { %v3878_v49 = vpop.xlane.xlu0 %3877  ;;  %v3857_v58 = vpop.xlane.xlu2 %3856 }
 0xaed   : > { %v3872_v31 = vpop.xlane.xlu1 %3871  ;;  %v3934_v53 = vadd.f32 %v3878_v49, %v10347_v55  ;;  %v10502_v49 = vld [vmem:[#allocation75_spill] sm:$0xff] }
 0xaee   : > { %v3932_v14 = vadd.f32 %v3872_v31, %v10347_v55  ;;  %v4010_v31 = vperm.slane %v3931_v41, %v10349_v30 }
 0xaef   : > { %v4015_v7 = vperm.slane %v3934_v53, %v10501_v46  ;;  %v3924_v53 = vadd.f32 %v3848_v9, %v10347_v55 }
 0xaf0   : > { %v4011_v32 = vperm.slane %v3932_v14, %v10499_v44  ;;  %v3986_v44 = vperm.slane %v3919_v5, %v10502_v49 }
 0xaf2   : > { %v4012_v35 = vsel %vm1386_vm2, %v4011_v32, %v4010_v31  ;;  %v10504_v31 = vld [vmem:[#allocation76_spill] sm:$0xff] }
 0xaf4   : > { %v3887_v42 = vpop.xlane.xlu0 %3886  ;;  %v3881_v4 = vpop.xlane.xlu2 %3880 }
 0xaf5   : > { %v3875_v61 = vpop.xlane.xlu1 %3874 }
 0xaf6   : > { %v3933_v2 = vadd.f32 %v3875_v61, %v10347_v55  ;;  %v3983_v61 = vsel %vm1390_vm3, %v3982_v20, %v3981_v18  ;;  %v3990_v20 = vperm.slane %v3921_v48, %v10503_v45  ;;  %v3923_v48 = vadd.f32 %v3845_v3, %v10347_v55 }
 0xaf7   : > { %v3985_v47 = vsel %vm1394_vm4, %v3984_v57, %v3983_v61  ;;  %v3988_v57 = vperm.slane %v3920_v15, %v10504_v31  ;;  %v3937_v61 = vadd.f32 %v3887_v42, %v10347_v55 }
 0xaf8   : > { %v4013_v51 = vperm.slane %v3933_v2, %v10500_v13  ;;  %v3935_v2 = vadd.f32 %v3881_v4, %v10347_v55  ;;  %v3987_v18 = vsel %vm1398_vm5, %v3986_v44, %v3985_v47  ;;  %v3922_v4 = vadd.f32 %v3842_v39, %v10347_v55 }
 0xaf9   : > { %v3989_v5 = vsel %vm10505_vm12, %v3988_v57, %v3987_v18  ;;  %v4021_v42 = vperm.slane %v3937_v61, %v10503_v45  ;;  %v3926_v61 = vadd.f32 %v9032_v40, %v10347_v55  ;;  %vm10519_vm12 = vcmask 720512  }
 0xafa   : > { %v4014_v25 = vsel %vm1390_vm3, %v4013_v51, %v4012_v35  ;;  %v4017_v51 = vperm.slane %v3935_v2, %v10502_v49  ;;  %v3991_v35 = vsel %vm10506_vm14, %v3990_v20, %v3989_v5  ;;  %vm10521_vm14 = vmmov %vm10515_vm10 }
 0xafb   : > { %v4016_v32 = vsel %vm1394_vm4, %v4015_v7, %v4014_v25  ;;  %v10508_v25 = vld [vmem:[#allocation78_spill] sm:$0xff]  ;;  %v10510_v7 = vld [vmem:[#allocation80_spill] sm:$0xff] }
 0xafc   : > { %v3890_v11 = vpop.xlane.xlu2 %3889  ;;  %v3896_v13 = vpop.xlane.xlu0 %3895  ;;  %v4018_v44 = vsel %vm1398_vm5, %v4017_v51, %v4016_v32  ;;  %v3992_v2 = vperm.slane %v3922_v4, %v10508_v25  ;;  %v3996_v18 = vperm.slane %v3924_v53, %v10510_v7  ;;  %v10512_v32 = vld [vmem:[#allocation79_spill] sm:$0xff]  ;;  %v3927_v53 = vadd.f32 %v3857_v58, %v10347_v55 }
 0xafd   : > { %v3884_v14 = vpop.xlane.xlu1 %3883  ;;  %v3940_v4 = vadd.f32 %v3896_v13, %v10347_v55 }
 0xafe   : > { %v3936_v41 = vadd.f32 %v3884_v14, %v10347_v55  ;;  %v3938_v14 = vadd.f32 %v3890_v11, %v10347_v55  ;;  %v3993_v9 = vsel %vm10509_vm7, %v3992_v2, %v3991_v35  ;;  %v3994_v11 = vperm.slane %v3923_v48, %v10512_v32  ;;  %vm10523_vm7 = vmmov %vm10519_vm12 }
 0xb00   : > { %v4019_v52 = vperm.slane %v3936_v41, %v10504_v31  ;;  %v4023_v51 = vperm.slane %v3938_v14, %v10508_v25  ;;  %v3995_v5 = vsel %vm10513_vm13, %v3994_v11, %v3993_v9  ;;  %v4027_v14 = vperm.slane %v3940_v4, %v10510_v7  ;;  %v10520_v9 = vld [vmem:[#allocation84_spill] sm:$0xff] }
 0xb01   : > { %v3997_v35 = vsel %vm10515_vm10, %v3996_v18, %v3995_v5  ;;  %v3929_v5 = vadd.f32 %v9034_v33, %v10347_v55  ;;  %v10558_v7 = vld [vmem:[#allocation24_spill] sm:$0xff] }
 0xb02   : > { %v4020_v15 = vsel %vm10507_vm6, %v4019_v52, %v4018_v44  ;;  %v3925_v52 = vadd.f32 %v3851_v1, %v10347_v55  ;;  %v10517_v1 = vld [vmem:[#allocation81_spill] sm:$0xff]  ;;  %vm10522_vm6 = vcmask 786112  }
 0xb03   : > { %v4022_v3 = vsel %vm10511_vm8, %v4021_v42, %v4020_v15  ;;  %v10518_v42 = vld [vmem:[#allocation82_spill] sm:$0xff]  ;;  %vm10524_vm8 = vcmask 851712   ;;  %vm10525_vm13 = vmmov %vm10522_vm6 }
 0xb04   : > { %v3899_v47 = vpop.xlane.xlu2 %3898  ;;  %v3905_v57 = vpop.xlane.xlu0 %3904  ;;  %v4024_v44 = vsel %vm10514_vm15, %v4023_v51, %v4022_v3  ;;  %v4002_v3 = vperm.slane %v3927_v53, %v10520_v9  ;;  %vm10527_vm15 = vcmask 917312   ;;  %vm10528_vm10 = vmmov %vm10524_vm8 }
 0xb05   : > { %v3893_v39 = vpop.xlane.xlu1 %3892  ;;  %v3941_v15 = vadd.f32 %v3899_v47, %v10347_v55  ;;  %v3928_v47 = vadd.f32 %v9036_v43, %v10347_v55  ;;  %v3943_v11 = vadd.f32 %v3905_v57, %v10347_v55 }
 0xb06   : > { %v3939_v41 = vadd.f32 %v3893_v39, %v10347_v55  ;;  %v3998_v39 = vperm.slane %v3925_v52, %v10517_v1 }
 0xb07   : > { %v4033_v57 = vperm.slane %v3943_v11, %v10520_v9 }
 0xb08   : > { %v4025_v20 = vperm.slane %v3939_v41, %v10512_v32  ;;  %v4000_v41 = vperm.slane %v3926_v61, %v10518_v42  ;;  %v3999_v58 = vsel %vm10519_vm12, %v3998_v39, %v3997_v35  ;;  %v10526_v35 = vld [vmem:[#allocation85_spill] sm:$0xff]  ;;  %vm10532_vm12 = vcmask 982912  }
 0xb0a   : > { %v4026_v48 = vsel %vm10516_vm11, %v4025_v20, %v4024_v44  ;;  %v4029_v20 = vperm.slane %v3941_v15, %v10517_v1  ;;  %v4001_v51 = vsel %vm10522_vm6, %v4000_v41, %v3999_v58  ;;  %v4004_v15 = vperm.slane %v3928_v47, %v10526_v35  ;;  %v10529_v58 = vld [vmem:[#allocation83_spill] sm:$0xff]  ;;  %vm10531_vm11 = vmmov %vm10527_vm15 }
 0xb0b   : > { %v4028_v18 = vsel %vm10521_vm14, %v4027_v14, %v4026_v48  ;;  %v4003_v53 = vsel %vm10524_vm8, %v4002_v3, %v4001_v51  ;;  %vm10533_vm14 = vmmov %vm10532_vm12  ;;  %vm10534_vm6 = vcmask 1048512   ;;  %vm10536_vm8 = vcmask 1041409  }
 0xb0c   : > { %v3908_v13 = vpop.xlane.xlu2 %3907  ;;  %v4030_v4 = vsel %vm10523_vm7, %v4029_v20, %v4028_v18  ;;  %v3914_v61 = vpop.xlane.xlu0 %3913  ;;  %v10530_v18 = vld [vmem:[#allocation86_spill] sm:$0xff]  ;;  %vm10535_vm7 = vmmov %vm10534_vm6 }
 0xb0d   : > { %v3902_v2 = vpop.xlane.xlu1 %3901  ;;  %v3944_v44 = vadd.f32 %v3908_v13, %v10347_v55  ;;  %v3946_v48 = vadd.f32 %v3914_v61, %v10347_v55  ;;  %v4006_v13 = vperm.slane %v3929_v5, %v10529_v58 }
 0xb0e   : > { %v3942_v40 = vadd.f32 %v3902_v2, %v10347_v55  ;;  %v4005_v2 = vsel %vm10527_vm15, %v4004_v15, %v4003_v53  ;;  %vm10538_vm15 = vcmask 1041408  }
 0xb0f   : > { %v4035_v3 = vperm.slane %v3944_v44, %v10526_v35  ;;  %v4039_v11 = vperm.slane %v3946_v48, %v10530_v18  ;;  %v4007_v51 = vsel %vm10532_vm12, %v4006_v13, %v4005_v2 }
 0xb10   : > { %v4031_v52 = vperm.slane %v3942_v40, %v10518_v42 }
 0xb12   : > { %v4032_v43 = vsel %vm10525_vm13, %v4031_v52, %v4030_v4  ;;  %vm10537_vm13 = vcmp.ge.s32.totalorder %v10349_v30, 16 }
 0xb13   : > { %v4034_v40 = vsel %vm10528_vm10, %v4033_v57, %v4032_v43  ;;  %vm10539_vm10 = vmmov %vm10538_vm15 }
 0xb14   : > { %v3866_v39 = vpop.xlane.xlu2 %3865  ;;  %v4036_v52 = vsel %vm10531_vm11, %v4035_v3, %v4034_v40  ;;  %v10540_v3 = vld [vmem:[#allocation89_spill] sm:$0xff] }
 0xb15   : > { %v3911_v14 = vpop.xlane.xlu1 %3910  ;;  %v3930_v33 = vadd.f32 %v3866_v39, %v10347_v55 }
 0xb16   : > { %v3945_v41 = vadd.f32 %v3911_v14, %v10347_v55 }
 0xb17   : > { %v4008_v47 = vperm.slane %v3930_v33, %v10530_v18 }
 0xb18   : > { %v4037_v20 = vperm.slane %v3945_v41, %v10529_v58 }
 0xb19   : > { %v4009_v61 = vsel %vm10534_vm6, %v4008_v47, %v4007_v51  ;;  %v10541_v47 = vld [vmem:[#allocation91_spill] sm:$0xff]  ;;  %v10545_v51 = vld [vmem:[#allocation93_spill] sm:$0xff] }
 0xb1a   : > { %v4038_v4 = vsel %vm10533_vm14, %v4037_v20, %v4036_v52  ;;  %v10542_v20 = vld [vmem:[#allocation92_spill] sm:$0xff]  ;;  %v10544_v52 = vld [vmem:[#allocation98_spill] sm:$0xff] }
 0xb1b   : > { %v4040_v53 = vsel %vm10535_vm7, %v4039_v11, %v4038_v4  ;;  %v10543_v11 = vld [vmem:[#allocation90_spill] sm:$0xff]  ;;  %v10546_v4 = vld [vmem:[#allocation95_spill] sm:$0xff]  ;;  %vm10578_vm7 = vmmov %vm10536_vm8 }
 0xb1c   : > { %v4041_v5 = vsel %vm10536_vm8, %v4040_v53, %v4009_v61  ;;  %v10547_v61 = vld [vmem:[#allocation96_spill] sm:$0xff]  ;;  %v10548_v53 = vld [vmem:[#allocation101_spill] sm:$0xff] }
 0xb1d   : > { %v4043_v44 = vsel %vm10537_vm13, -1e+30, %v4041_v5  ;;  %v10549_v5 = vld [vmem:[#allocation87_spill] sm:$0xff] }
 0xb1e   : > { %v4044_v43 = vsel %vm10538_vm15, %v4043_v44, -inf }
 0xb1f   : > { %4045 = vmax.xlane.f32.xlu1 %v4044_v43  ;;  %v10551_v43 = vld [vmem:[#allocation99_spill] sm:$0xff] }
 0xb92   : > { %v4046_v15 = vpop.xlane.xlu1 %4045 }
 0xb93   : > { %v4047_v57 = vsub.f32 %v4043_v44, %v4046_v15  ;;  %v10550_v44 = vld [vmem:[#allocation94_spill] sm:$0xff]  ;;  %v10552_v15 = vld [vmem:[#allocation100_spill] sm:$0xff] }
 0xb95   : > { %v4048_v48 = vmul.f32 1.442695, %v4047_v57  ;;  %v10553_v57 = vld [vmem:[#allocation97_spill] sm:$0xff] }
 0xb97   : > { %6674 = vpow2.f32 %v4048_v48  ;;  %v10554_v48 = vld [vmem:[#allocation102_spill] sm:$0xff] }
 0xb9d   : > { %v6675_v39 = vpop.eup %6674 }
 0xb9e   : > { %v4050_v14 = vsel %vm10539_vm10, %v6675_v39, 0.0 }
 0xb9f   : > { %4051 = vadd.xlane.f32.xlu2 %v4050_v14 }
 0xc12   : > { %v4052_v2 = vpop.xlane.xlu2 %4051 }
 0xc13   : > { %6676 = vrcp.f32 %v4052_v2 }
 0xc19   : > { %v6677_v40 = vpop.eup %6676 }
 0xc1a   : > { %v4054_v33 = vmul.f32 %v6677_v40, %v6675_v39 }
 0xc1c   : > { %v4055_v41 = vperm.slane %v4054_v33, 0  ;;  %v9135_v13 = vperm.slane %v4054_v33, 1  ;;  %6233 = vst [vmem:[%s7023_s26 + $0x4] sm:$0x3] %v4054_v33  ;;  %v10555_v33 = vld [vmem:[#allocation88_spill] sm:$0xff] }
 0xc1e   : > { %4157 = vperm.xlu2 %6561, %v9135_v13   ;;  %4066 = vperm.xlu1 %6560, %v4055_v41  }
 0xc1f   : > { %4060 = vperm.xlu0 %6559, %v4055_v41  }
 0xc26   : > { %6562 = vset.pattern.permute.xlu2 %v10540_v3  ;;  %4163 = vperm.xlu1 %6560, %v9135_v13  }
 0xc27   : > { %6565 = vset.pattern.permute.xlu0 %v10541_v47 }
 0xc2e   : > { %4072 = vperm.xlu2 %6562, %v4055_v41   ;;  %6563 = vset.pattern.permute.xlu1 %v10540_v3  ;;  %v10557_v3 = vld [vmem:[#allocation21_spill] sm:$0xff] }
 0xc2f   : > { %4175 = vperm.xlu0 %6565, %v9135_v13  }
 0xc36   : > { %6564 = vset.pattern.permute.xlu2 %v10541_v47  ;;  %4169 = vperm.xlu1 %6563, %v9135_v13   ;;  %v10556_v47 = vld [vmem:[#allocation22_spill] sm:$0xff] }
 0xc37   : > { %6570 = vset.pattern.permute.xlu0 %v10542_v20 }
 0xc3e   : > { %4078 = vperm.xlu2 %6564, %v4055_v41   ;;  %6566 = vset.pattern.permute.xlu1 %v10543_v11 }
 0xc3f   : > { %4096 = vperm.xlu0 %6570, %v4055_v41  }
 0xc46   : > { %6567 = vset.pattern.permute.xlu2 %v10543_v11  ;;  %4084 = vperm.xlu1 %6566, %v4055_v41  }
 0xc47   : > { %6575 = vset.pattern.permute.xlu0 %v10544_v52 }
 0xc4e   : > { %4181 = vperm.xlu2 %6567, %v9135_v13   ;;  %6568 = vset.pattern.permute.xlu1 %v10545_v51 }
 0xc4f   : > { %4205 = vperm.xlu0 %6575, %v9135_v13  }
 0xc56   : > { %6569 = vset.pattern.permute.xlu2 %v10545_v51  ;;  %4090 = vperm.xlu1 %6568, %v4055_v41  }
 0xc57   : > { %6580 = vset.pattern.permute.xlu0 %v10546_v4 }
 0xc5e   : > { %4187 = vperm.xlu2 %6569, %v9135_v13   ;;  %6571 = vset.pattern.permute.xlu1 %v10542_v20 }
 0xc5f   : > { %4126 = vperm.xlu0 %6580, %v4055_v41  }
 0xc66   : > { %6572 = vset.pattern.permute.xlu2 %v10547_v61  ;;  %4193 = vperm.xlu1 %6571, %v9135_v13  }
 0xc67   : > { %6585 = vset.pattern.permute.xlu0 %v10548_v53 }
 0xc6e   : > { %4102 = vperm.xlu2 %6572, %v4055_v41   ;;  %6573 = vset.pattern.permute.xlu1 %v10547_v61 }
 0xc6f   : > { %4235 = vperm.xlu0 %6585, %v9135_v13  }
 0xc76   : > { %6574 = vset.pattern.permute.xlu2 %v10544_v52  ;;  %4199 = vperm.xlu1 %6573, %v9135_v13  }
 0xc77   : > { %6592 = vset.pattern.permute.xlu0 %v10549_v5 }
 0xc78   : > { %v4158_v39 = vpop.permute.xlu2 %4157 }
 0xc79   : > { %v4265_v11 = vmul.f32 %v10557_v3, %v4158_v39  ;;  %v10559_v3 = vld [vmem:[#allocation25_spill] sm:$0xff] }
 0xc7b   : > { %v4318_v35 = vsel %vm1216_vm1, %v4265_v11, 0.0  ;;  %v10561_v11 = vld [vmem:[#allocation5_spill] sm:$0xff] }
 0xc7e   : > { %4108 = vperm.xlu2 %6574, %v4055_v41   ;;  %6576 = vset.pattern.permute.xlu1 %v10550_v44 }
 0xc86   : > { %6577 = vset.pattern.permute.xlu2 %v10550_v44  ;;  %4114 = vperm.xlu1 %6576, %v4055_v41  }
 0xc88   : > { %v4073_v2 = vpop.permute.xlu2 %4072 }
 0xc8e   : > { %4211 = vperm.xlu2 %6577, %v9135_v13   ;;  %6578 = vset.pattern.permute.xlu1 %v10551_v43 }
 0xc90   : > { %v4067_v14 = vpop.permute.xlu1 %4066 }
 0xc96   : > { %6579 = vset.pattern.permute.xlu2 %v10551_v43  ;;  %4120 = vperm.xlu1 %6578, %v4055_v41  }
 0xc98   : > { %v4164_v40 = vpop.permute.xlu1 %4163 }
 0xc9e   : > { %4217 = vperm.xlu2 %6579, %v9135_v13   ;;  %6581 = vset.pattern.permute.xlu1 %v10546_v4 }
 0xca6   : > { %6582 = vset.pattern.permute.xlu2 %v10552_v15  ;;  %4223 = vperm.xlu1 %6581, %v9135_v13  }
 0xca8   : > { %v4170_v4 = vpop.permute.xlu1 %4169 }
 0xcae   : > { %4132 = vperm.xlu2 %6582, %v4055_v41   ;;  %6583 = vset.pattern.permute.xlu1 %v10552_v15  ;;  %v4061_v15 = vpop.permute.xlu0 %4060 }
 0xcaf   : > { %v4249_v49 = vmul.f32 %v10561_v11, %v4061_v15 }
 0xcb6   : > { %6584 = vset.pattern.permute.xlu2 %v10548_v53  ;;  %4229 = vperm.xlu1 %6583, %v9135_v13   ;;  %v4079_v53 = vpop.permute.xlu2 %4078  ;;  %v4176_v61 = vpop.permute.xlu0 %4175 }
 0xcb7   : > { %v4268_v32 = vmul.f32 %v10558_v7, %v4176_v61  ;;  %v10564_v7 = vld [vmem:[#allocation9_spill] sm:$0xff] }
 0xcb8   : > { %v4085_v52 = vpop.permute.xlu1 %4084 }
 0xcb9   : > { %v4323_v39 = vsel %vm1216_vm1, %v4268_v32, 0.0 }
 0xcbe   : > { %4138 = vperm.xlu2 %6584, %v4055_v41   ;;  %6586 = vset.pattern.permute.xlu1 %v10553_v57  ;;  %v4182_v43 = vpop.permute.xlu2 %4181  ;;  %v4097_v45 = vpop.permute.xlu0 %4096 }
 0xcc6   : > { %6587 = vset.pattern.permute.xlu2 %v10553_v57  ;;  %4144 = vperm.xlu1 %6586, %v4055_v41   ;;  %v4188_v20 = vpop.permute.xlu2 %4187 }
 0xcc8   : > { %v4091_v57 = vpop.permute.xlu1 %4090 }
 0xcce   : > { %4241 = vperm.xlu2 %6587, %v9135_v13   ;;  %6588 = vset.pattern.permute.xlu1 %v10554_v48  ;;  %v9185_v51 = vpop.permute.xlu2 %4102 }
 0xcd6   : > { %6589 = vset.pattern.permute.xlu2 %v10554_v48  ;;  %4150 = vperm.xlu1 %6588, %v4055_v41  }
 0xcd8   : > { %v4194_v48 = vpop.permute.xlu1 %4193  ;;  %v9187_v41 = vpop.permute.xlu2 %4108 }
 0xcde   : > { %4247 = vperm.xlu2 %6589, %v9135_v13   ;;  %6590 = vset.pattern.permute.xlu1 %v10549_v5  ;;  %v4266_v5 = vmul.f32 %v10556_v47, %v4164_v40 }
 0xce0   : > { %v4319_v58 = vsel %vm1216_vm1, %v4266_v5, 0.0  ;;  %v10560_v5 = vld [vmem:[#allocation6_spill] sm:$0xff] }
 0xce1   : > { %v4320_v42 = vadd.f32 %v4319_v58, %v4318_v35  ;;  %v4250_v31 = vmul.f32 %v10560_v5, %v4067_v14  ;;  %v4271_v35 = vmul.f32 %v10425_v56, %v4194_v48  ;;  %v10563_v56 = vld [vmem:[#allocation8_spill] sm:$0xff] }
 0xce6   : > { %6591 = vset.pattern.permute.xlu2 %v10555_v33  ;;  %v4267_v33 = vmul.f32 %v10416_v19, %v4170_v4  ;;  %v4269_v4 = vmul.f32 %v10559_v3, %v4182_v43  ;;  %v4270_v19 = vmul.f32 %v10422_v6, %v4188_v20  ;;  %v4282_v43 = vsel %vm1216_vm1, %v4250_v31, 0.0 }
 0xce7   : > { %v4329_v20 = vsel %vm1216_vm1, %v4271_v35, 0.0  ;;  %v4252_v6 = vmul.f32 %v10563_v56, %v4079_v53 }
 0xce8   : > { %v4200_v44 = vpop.permute.xlu1 %4199  ;;  %v4212_v13 = vpop.permute.xlu2 %4211  ;;  %v4321_v9 = vsel %vm1216_vm1, %v4267_v33, 0.0 }
 0xce9   : > { %v4322_v25 = vadd.f32 %v4321_v9, %v4320_v42  ;;  %v4325_v42 = vsel %vm1216_vm1, %v4269_v4, 0.0  ;;  %v4327_v9 = vsel %vm1216_vm1, %v4270_v19, 0.0  ;;  %v4272_v61 = vmul.f32 %v10426_v28, %v4200_v44  ;;  %v4206_v33 = vpop.permute.xlu0 %4205 }
 0xcea   : > { %v4253_v44 = vmul.f32 %v10564_v7, %v4085_v52  ;;  %v4286_v53 = vsel %vm1216_vm1, %v4252_v6, 0.0 }
 0xceb   : > { %v4324_v47 = vadd.f32 %v4323_v39, %v4322_v25  ;;  %v4281_v25 = vsel %vm1216_vm1, %v4249_v49, 0.0  ;;  %v10562_v39 = vld [vmem:[#allocation7_spill] sm:$0xff]  ;;  %v4331_v4 = vsel %vm1216_vm1, %v4272_v61, 0.0  ;;  %v6758_v49 = vld [vmem:[%s9820_s10] ss:$0 sm:$0xff] }
 0xcec   : > { %v4251_v48 = vmul.f32 %v10562_v39, %v4073_v2  ;;  %v4283_v3 = vadd.f32 %v4282_v43, %v4281_v25  ;;  %v4365_v35 = vadd.f32 %v6758_v49, %v8873_v63  ;;  %v4288_v52 = vsel %vm1216_vm1, %v4253_v44, 0.0 }
 0xced   : > { %v4326_v32 = vadd.f32 %v4325_v42, %v4324_v47  ;;  %v4273_v47 = vmul.f32 %v10427_v16, %v4206_v33  ;;  %v4274_v25 = vmul.f32 %v10429_v17, %v4212_v13 }
 0xcee   : > { %v4284_v2 = vsel %vm1216_vm1, %v4251_v48, 0.0  ;;  %v6219_v63 = vmul.f32 -1.442695, %v4365_v35 }
 0xcef   : > { %v4328_v14 = vadd.f32 %v4327_v9, %v4326_v32  ;;  %v10565_v9 = vld [vmem:[#allocation10_spill] sm:$0xff]  ;;  %v4285_v32 = vadd.f32 %v4284_v2, %v4283_v3  ;;  %v4333_v33 = vsel %vm1216_vm1, %v4273_v47, 0.0  ;;  %v4335_v2 = vsel %vm1216_vm1, %v4274_v25, 0.0 }
 0xcf0   : > { %v4254_v61 = vmul.f32 %v10565_v9, %v4091_v57  ;;  %v10566_v57 = vld [vmem:[#allocation11_spill] sm:$0xff]  ;;  %6678 = vpow2.f32 %v6219_v63 }
 0xcf1   : > { %v4330_v19 = vadd.f32 %v4329_v20, %v4328_v14  ;;  %v4127_v43 = vpop.permute.xlu0 %4126  ;;  %v4287_v14 = vadd.f32 %v4286_v53, %v4285_v32  ;;  %v4255_v3 = vmul.f32 %v10566_v57, %v4097_v45  ;;  %v10568_v45 = vld [vmem:[#allocation13_spill] sm:$0xff] }
 0xcf2   : > { %v4290_v48 = vsel %vm1216_vm1, %v4254_v61, 0.0 }
 0xcf3   : > { %v4332_v42 = vadd.f32 %v4331_v4, %v4330_v19  ;;  %v4289_v49 = vadd.f32 %v4288_v52, %v4287_v14  ;;  %v4292_v61 = vsel %vm1216_vm1, %v4255_v3, 0.0  ;;  %v4257_v52 = vmul.f32 %v10568_v45, %v9187_v41  ;;  %v10569_v14 = vld [vmem:[#allocation34_spill] sm:$0xff] }
 0xcf5   : > { %v4334_v4 = vadd.f32 %v4333_v33, %v4332_v42  ;;  %v4291_v13 = vadd.f32 %v4290_v48, %v4289_v49  ;;  %v4296_v49 = vsel %vm1216_vm1, %v4257_v52, 0.0  ;;  %v10573_v52 = vld [vmem:[#allocation16_spill] sm:$0xff] }
 0xcf7   : > { %v4336_v17 = vadd.f32 %v4335_v2, %v4334_v4  ;;  %v4293_v25 = vadd.f32 %v4292_v61, %v4291_v13 }
 0xcf8   : > { %v9192_v18 = vpop.permute.xlu1 %4114  ;;  %v4218_v1 = vpop.permute.xlu2 %4217 }
 0xcf9   : > { %v4275_v20 = vmul.f32 %v10432_v54, %v4218_v1  ;;  %v4236_v35 = vpop.permute.xlu0 %4235 }
 0xcfa   : > { %v4278_v4 = vmul.f32 %v10569_v14, %v4236_v35 }
 0xcfb   : > { %v4337_v44 = vsel %vm1216_vm1, %v4275_v20, 0.0 }
 0xcfc   : > { %v4338_v53 = vadd.f32 %v4337_v44, %v4336_v17  ;;  %v4343_v44 = vsel %vm1216_vm1, %v4278_v4, 0.0 }
 0xd08   : > { %v9198_v40 = vpop.permute.xlu1 %4120  ;;  %v9206_v58 = vpop.permute.xlu2 %4132 }
 0xd18   : > { %v4224_v15 = vpop.permute.xlu1 %4223  ;;  %v9219_v31 = vpop.permute.xlu2 %4138 }
 0xd19   : > { %v4276_v6 = vmul.f32 %v10433_v0, %v4224_v15  ;;  %v10567_v15 = vld [vmem:[#allocation12_spill] sm:$0xff] }
 0xd1a   : > { %v4256_v32 = vmul.f32 %v10567_v15, %v9185_v51  ;;  %v10571_v51 = vld [vmem:[#allocation15_spill] sm:$0xff] }
 0xd1b   : > { %v4339_v42 = vsel %vm1216_vm1, %v4276_v6, 0.0  ;;  %v6679_v6 = vpop.eup %6678  ;;  %v4259_v3 = vmul.f32 %v10571_v51, %v9198_v40 }
 0xd1c   : > { %v4340_v20 = vadd.f32 %v4339_v42, %v4338_v53  ;;  %v4294_v17 = vsel %vm1216_vm1, %v4256_v32, 0.0  ;;  %v10572_v42 = vld [vmem:[#allocation36_spill] sm:$0xff] }
 0xd1d   : > { %v4295_v2 = vadd.f32 %v4294_v17, %v4293_v25  ;;  %v4300_v32 = vsel %vm1216_vm1, %v4259_v3, 0.0 }
 0xd1f   : > { %v4297_v53 = vadd.f32 %v4296_v49, %v4295_v2 }
 0xd28   : > { %v4230_v19 = vpop.permute.xlu1 %4229  ;;  %v4242_v1 = vpop.permute.xlu2 %4241 }
 0xd29   : > { %v4277_v47 = vmul.f32 %v10434_v36, %v4230_v19  ;;  %v10570_v19 = vld [vmem:[#allocation14_spill] sm:$0xff]  ;;  %v4279_v13 = vmul.f32 %v10437_v27, %v4242_v1 }
 0xd2a   : > { %v4258_v63 = vmul.f32 %v10570_v19, %v9192_v18  ;;  %v4371_v18 = vadd.f32 1.0, %v6679_v6  ;;  %v10574_v6 = vld [vmem:[#allocation17_spill] sm:$0xff] }
 0xd2b   : > { %v4341_v33 = vsel %vm1216_vm1, %v4277_v47, 0.0  ;;  %v4345_v40 = vsel %vm1216_vm1, %v4279_v13, 0.0  ;;  %v4261_v49 = vmul.f32 %v10574_v6, %v9206_v58  ;;  %v10577_v58 = vld [vmem:[#allocation20_spill] sm:$0xff] }
 0xd2c   : > { %v4342_v48 = vadd.f32 %v4341_v33, %v4340_v20  ;;  %v4298_v47 = vsel %vm1216_vm1, %v4258_v63, 0.0  ;;  %v4260_v20 = vmul.f32 %v10573_v52, %v4127_v43  ;;  %6680 = vrcp.f32 %v4371_v18 }
 0xd2d   : > { %v4299_v33 = vadd.f32 %v4298_v47, %v4297_v53  ;;  %v4304_v13 = vsel %vm1216_vm1, %v4261_v49, 0.0  ;;  %vm4377_vm12 = vweird.f32 %v4371_v18 }
 0xd2e   : > { %v4344_v61 = vadd.f32 %v4343_v44, %v4342_v48  ;;  %v4302_v1 = vsel %vm1216_vm1, %v4260_v20, 0.0  ;;  %v10575_v48 = vld [vmem:[#allocation18_spill] sm:$0xff] }
 0xd2f   : > { %v4301_v4 = vadd.f32 %v4300_v32, %v4299_v33  ;;  %v4262_v3 = vmul.f32 %v10575_v48, %v9219_v31 }
 0xd30   : > { %v4346_v17 = vadd.f32 %v4345_v40, %v4344_v61 }
 0xd31   : > { %v4303_v2 = vadd.f32 %v4302_v1, %v4301_v4 }
 0xd32   : > { %v6681_v44 = vpop.eup %6680 }
 0xd33   : > { %v4305_v53 = vadd.f32 %v4304_v13, %v4303_v2  ;;  %v4373_v61 = vmul.f32 %v6681_v44, %v4371_v18  ;;  %vm4378_vm11 = vweird.f32 %v6681_v44  ;;  %v4383_v13 = vand.u32 2147483648, %v4371_v18 }
 0xd34   : > { %vm4379_vm14 = vmor %vm4377_vm12, %vm4378_vm11 }
 0xd35   : > { %v4374_v31 = vsub.f32 1.0, %v4373_v61  ;;  %v4384_v61 = vor.u32 1.1754944e-38, %v4383_v13  ;;  %v10590_v13 = vld [vmem:[#allocation125_spill] sm:$0xff] }
 0xd37   : > { %v4375_v48 = vmul.f32 %v6681_v44, %v4374_v31  ;;  %v10584_v31 = vld [vmem:[#allocation118_spill] sm:$0xff] }
 0xd38   : > { %v4248_v41 = vpop.permute.xlu2 %4247  ;;  %v4145_v14 = vpop.permute.xlu1 %4144 }
 0xd39   : > { %v4280_v35 = vmul.f32 %v10572_v42, %v4248_v41  ;;  %v10576_v41 = vld [vmem:[#allocation19_spill] sm:$0xff]  ;;  %v4376_v2 = vadd.f32 %v6681_v44, %v4375_v48  ;;  %v10581_v48 = vld [vmem:[#allocation112_spill] sm:$0xff] }
 0xd3a   : > { %v4263_v43 = vmul.f32 %v10576_v41, %v4145_v14 }
 0xd3b   : > { %v4347_v25 = vsel %vm1216_vm1, %v4280_v35, 0.0  ;;  %v4306_v35 = vsel %vm1216_vm1, %v4262_v3, 0.0 }
 0xd3c   : > { %v4348_v63 = vadd.f32 %v4347_v25, %v4346_v17  ;;  %v4308_v32 = vsel %vm1216_vm1, %v4263_v43, 0.0  ;;  %v4307_v33 = vadd.f32 %v4306_v35, %v4305_v53  ;;  %v4380_v53 = vsel %vm4379_vm14, %v6681_v44, %v4376_v2  ;;  %v10582_v44 = vld [vmem:[#allocation115_spill] sm:$0xff]  ;;  %v10589_v2 = vld [vmem:[#allocation124_spill] sm:$0xff] }
 0xd3e   : > { %v4349_v47 = vrot.slane %v4348_v63, 4  ;;  %v4309_v17 = vadd.f32 %v4308_v32, %v4307_v33 }
 0xd40   : > { %v4350_v20 = vadd.f32 %v4349_v47, %v4348_v63  ;;  %v4381_v63 = vand.u32 2147483647, %v4371_v18  ;;  %v10579_v18 = vld [vmem:[#allocation108_spill] sm:$0xff] }
 0xd42   : > { %v4351_v14 = vrot.slane %v4350_v20, 2  ;;  %vm4382_vm6 = vcmp.eq.f32.partialorder %v4381_v63, 8.507059e+37  ;;  %v10593_v63 = vld [vmem:[#allocation128_spill] sm:$0xff] }
 0xd44   : > { %v4352_v49 = vadd.f32 %v4351_v14, %v4350_v20  ;;  %v6759_v14 = vld [vmem:[%s6983_s30 + $0x2] sm:$0x1] }
 0xd46   : > { %v4353_v43 = vrot.slane %v4352_v49, 1 }
 0xd48   : > { %v4151_v40 = vpop.permute.xlu1 %4150  ;;  %v4354_v32 = vadd.f32 %v4353_v43, %v4352_v49  ;;  %v10587_v49 = vld [vmem:[#allocation122_spill] sm:$0xff] }
 0xd49   : > { %v4264_v25 = vmul.f32 %v10577_v58, %v4151_v40  ;;  %v4385_v40 = vsel %vm4382_vm6, %v4384_v61, %v4380_v53  ;;  %v10591_v43 = vld [vmem:[#allocation126_spill] sm:$0xff]  ;;  %v10595_v53 = vld [vmem:[#allocation105_spill] sm:$0xff] }
 0xd4a   : > { %v10596_v61 = vld [vmem:[#allocation110_spill] sm:$0xff] }
 0xd4b   : > { %v4310_v4 = vsel %vm1216_vm1, %v4264_v25, 0.0 }
 0xd4c   : > { %v4311_v1 = vadd.f32 %v4310_v4, %v4309_v17  ;;  %v10583_v17 = vld [vmem:[#allocation116_spill] sm:$0xff] }
 0xd4d   : > { %v10585_v4 = vld [vmem:[#allocation120_spill] sm:$0xff] }
 0xd4e   : > { %v4312_v41 = vrot.slane %v4311_v1, 4 }
 0xd50   : > { %v4313_v6 = vadd.f32 %v4312_v41, %v4311_v1  ;;  %v10586_v1 = vld [vmem:[#allocation121_spill] sm:$0xff] }
 0xd52   : > { %v4314_v3 = vrot.slane %v4313_v6, 2 }
 0xd54   : > { %v4315_v35 = vadd.f32 %v4314_v3, %v4313_v6  ;;  %v10580_v6 = vld [vmem:[#allocation111_spill] sm:$0xff] }
 0xd55   : > { %v10588_v3 = vld [vmem:[#allocation123_spill] sm:$0xff] }
 0xd56   : > { %v4316_v47 = vrot.slane %v4315_v35, 1 }
 0xd58   : > { %v4317_v33 = vadd.f32 %v4316_v47, %v4315_v35  ;;  %v10592_v35 = vld [vmem:[#allocation127_spill] sm:$0xff]  ;;  %v10594_v47 = vld [vmem:[#allocation106_spill] sm:$0xff] }
 0xd5a   : > { %v4389_v25 = vsel %vm10578_vm7, %v4354_v32, %v4317_v33  ;;  %v10597_v32 = vld [vmem:[#allocation109_spill] sm:$0xff]  ;;  %v10598_v33 = vld [vmem:[#allocation114_spill] sm:$0xff] }
 0xd5b   : > { %v4391_v20 = vmul.f32 %v4389_v25, %v4385_v40  ;;  %v10599_v40 = vld [vmem:[#allocation113_spill] sm:$0xff]  ;;  %v10600_v25 = vld [vmem:[#allocation119_spill] sm:$0xff] }
 0xd5d   : > { %v4394_v41 = vpack.c.bf16 %v4391_v20, %v4391_v20  ;;  %v10601_v20 = vld [vmem:[#allocation117_spill] sm:$0xff] }
 0xd5f   : > { %6221 = vmatmul.msk.bf16.vlgmr.msrb.gmra.mxu0 %vm1216_vm1, %v4394_v41  ;;  %6222 = vmatmul.msk.bf16.vlgmr.msrb.gmra.mxu1 %vm1216_vm1, %v4394_v41 }
 0xd60   : > { %4486 = vmatpush.bf16.msrb.mxu0 %v10439_v24  ;;  %4499 = vmatpush.bf16.msrb.mxu1 %v10440_v29 }
 0xd6f   : > { %6223 = vmatmul.msk.bf16.vlgmr.msra.gmra.mxu0 %vm1216_vm1, %v4394_v41  ;;  %6224 = vmatmul.msk.bf16.vlgmr.msra.gmra.mxu1 %vm1216_vm1, %v4394_v41 }
 0xd70   : > { %4531 = vmatpush.bf16.msra.mxu0 %v10441_v22  ;;  %4544 = vmatpush.bf16.msra.mxu1 %v10579_v18 }
 0xd74   : > { %4532 = vmatpush.bf16.msra.mxu0 %v10580_v6  ;;  %4545 = vmatpush.bf16.msra.mxu1 %v10581_v48 }
 0xd78   : > { %4533 = vmatpush.bf16.msra.mxu0 %v10582_v44  ;;  %4546 = vmatpush.bf16.msra.mxu1 %v10583_v17 }
 0xd7c   : > { %4534 = vmatpush.bf16.msra.mxu0 %v10584_v31  ;;  %4547 = vmatpush.bf16.msra.mxu1 %v10585_v4 }
 0xd7f   : > { %6227 = vmatmul.msk.bf16.vlgmr.msrb.gmra.mxu0 %vm2028_vm9, %v6759_v14  ;;  %6228 = vmatmul.msk.bf16.vlgmr.msrb.gmra.mxu1 %vm2028_vm9, %v6759_v14 }
 0xd80   : > { %4535 = vmatpush.bf16.msra.mxu0 %v10586_v1  ;;  %4548 = vmatpush.bf16.msra.mxu1 %v10587_v49 }
 0xd84   : > { %4536 = vmatpush.bf16.msra.mxu0 %v10588_v3  ;;  %4549 = vmatpush.bf16.msra.mxu1 %v10589_v2 }
 0xd88   : > { %4537 = vmatpush.bf16.msra.mxu0 %v10590_v13  ;;  %4550 = vmatpush.bf16.msra.mxu1 %v10591_v43  ;;  %v10603_v43 = vld [vmem:[#allocation140_spill] sm:$0xff] }
 0xd8c   : > { %4538 = vmatpush.bf16.msra.mxu0 %v10592_v35  ;;  %4551 = vmatpush.bf16.msra.mxu1 %v10593_v63  ;;  %v10602_v63 = vld [vmem:[#allocation141_spill] sm:$0xff] }
 0xd8f   : > { %4539 = vmatmul.bf16.vlgmr.msra.gmra.mxu0 %v8798_v34  ;;  %4552 = vmatmul.bf16.vlgmr.msra.gmra.mxu1 %v8798_v34 }
 0xd90   : > { %5544 = vmatpush.bf16.msrb.mxu1 %v10594_v47  ;;  %5531 = vmatpush.bf16.msrb.mxu0 %v10595_v53 }
 0xd94   : > { %5545 = vmatpush.bf16.msrb.mxu1 %v10596_v61  ;;  %5532 = vmatpush.bf16.msrb.mxu0 %v10597_v32 }
 0xd98   : > { %5570 = vmatpush.bf16.msra.mxu1 %v10598_v33  ;;  %5557 = vmatpush.bf16.msra.mxu0 %v10599_v40 }
 0xd9c   : > { %5571 = vmatpush.bf16.msra.mxu1 %v10600_v25  ;;  %5558 = vmatpush.bf16.msra.mxu0 %v10601_v20 }
 0xddc   : > { %v4407_v41 = vpop.f32.mrf.mxu0  ;;  %v4420_v14 = vpop.f32.mrf.mxu1 }
 0xddd   : > { %v4476_v47 = vadd.f32 %v8883_v26, %v4420_v14  ;;  %v4463_v53 = vadd.f32 %v8881_v23, %v4407_v41 }
 0xddf   : > { %v4558_v34 = vadd.f32 %v8919_v12, %v4476_v47  ;;  %v4557_v61 = vadd.f32 %v8917_v10, %v4463_v53 }
 0xde1   : > { %v4562_v32 = vadd.f32 %v4558_v34, %v10602_v63  ;;  %v4561_v40 = vadd.f32 %v4557_v61, %v10603_v43 }
 0xde3   : > { %v6230_v13 = vmul.f32 -1.442695, %v4562_v32  ;;  %v6229_v25 = vmul.f32 -1.442695, %v4561_v40 }
 0xde4   : > { %v4409_v35 = vpop.f32.mrf.mxu0  ;;  %v4422_v33 = vpop.f32.mrf.mxu1 }
 0xde5   : > { %6682 = vpow2.f32 %v6230_v13 }
 0xde6   : > { %6684 = vpow2.f32 %v6229_v25 }
 0xdeb   : > { %v6683_v3 = vpop.eup %6682 }
 0xdec   : > { %v4433_v20 = vpop.f32.mrf.mxu0  ;;  %v4446_v2 = vpop.f32.mrf.mxu1  ;;  %v4587_v41 = vadd.f32 1.0, %v6683_v3 }
 0xded   : > { %v6685_v26 = vpop.eup %6684 }
 0xdee   : > { %v4568_v12 = vadd.f32 1.0, %v6685_v26  ;;  %6686 = vrcp.f32 %v4587_v41  ;;  %v4599_v4 = vand.u32 2147483648, %v4587_v41  ;;  %vm4593_vm13 = vweird.f32 %v4587_v41 }
 0xdf0   : > { %6688 = vrcp.f32 %v4568_v12  ;;  %vm4574_vm11 = vweird.f32 %v4568_v12 }
 0xdf4   : > { %v4435_v14 = vpop.f32.mrf.mxu0  ;;  %v4448_v23 = vpop.f32.mrf.mxu1 }
 0xdf5   : > { %v6687_v35 = vpop.eup %6686 }
 0xdf6   : > { %v6689_v53 = vpop.eup %6688  ;;  %v4589_v34 = vmul.f32 %v6687_v35, %v4587_v41  ;;  %vm4594_vm8 = vweird.f32 %v6687_v35 }
 0xdf7   : > { %v4570_v61 = vmul.f32 %v6689_v53, %v4568_v12  ;;  %vm4575_vm15 = vweird.f32 %v6689_v53  ;;  %vm4595_vm10 = vmor %vm4593_vm13, %vm4594_vm8 }
 0xdf8   : > { %v4590_v13 = vsub.f32 1.0, %v4589_v34  ;;  %v4597_v34 = vand.u32 2147483647, %v4587_v41  ;;  %vm4576_vm12 = vmor %vm4574_vm11, %vm4575_vm15  ;;  %vm10666_vm11 = vcmask 589312  }
 0xdf9   : > { %v4571_v40 = vsub.f32 1.0, %v4570_v61  ;;  %v4580_v61 = vand.u32 2147483648, %v4568_v12 }
 0xdfa   : > { %v4591_v43 = vmul.f32 %v6687_v35, %v4590_v13  ;;  %vm4598_vm14 = vcmp.eq.f32.partialorder %v4597_v34, 8.507059e+37 }
 0xdfb   : > { %v4572_v14 = vmul.f32 %v6689_v53, %v4571_v40 }
 0xdfc   : > { %v4488_v10 = vpop.f32.mrf.mxu0  ;;  %v4501_v47 = vpop.f32.mrf.mxu1  ;;  %v4592_v1 = vadd.f32 %v6687_v35, %v4591_v43 }
 0xdfd   : > { %v4489_v25 = vadd.f32 %v4488_v10, %v4433_v20  ;;  %v4502_v63 = vadd.f32 %v4501_v47, %v4446_v2  ;;  %v4578_v20 = vand.u32 2147483647, %v4568_v12 }
 0xdfe   : > { %v4596_v10 = vsel %vm4595_vm10, %v6687_v35, %v4592_v1 }
 0xdff   : > { %vm4579_vm6 = vcmp.eq.f32.partialorder %v4578_v20, 8.507059e+37 }
 0xe04   : > { %v4490_v32 = vpop.f32.mrf.mxu0  ;;  %v4503_v33 = vpop.f32.mrf.mxu1 }
 0xe05   : > { %v4573_v32 = vadd.f32 %v6689_v53, %v4572_v14  ;;  %v4581_v33 = vor.u32 1.1754944e-38, %v4580_v61 }
 0xe07   : > { %v4577_v43 = vsel %vm4576_vm12, %v6689_v53, %v4573_v32  ;;  %vm10667_vm12 = vmmov %vm10666_vm11 }
 0xe08   : > { %v4582_v41 = vsel %vm4579_vm6, %v4581_v33, %v4577_v43  ;;  %v10606_v33 = vld [vmem:[#allocation130_spill] sm:$0xff] }
 0xe0c   : > { %v4540_v49 = vpop.f32.mrf.mxu0  ;;  %v4553_v23 = vpop.f32.mrf.mxu1 }
 0xe0d   : > { %v4559_v3 = vadd.f32 %v4540_v49, %v4489_v25  ;;  %v4560_v26 = vadd.f32 %v4553_v23, %v4502_v63  ;;  %v4600_v49 = vor.u32 1.1754944e-38, %v4599_v4  ;;  %v3509_v25 = vld [vmem:[#allocation3] sm:$0x3] }
 0xe0f   : > { %v4563_v31 = vadd.f32 %v4559_v3, %v10467_v59  ;;  %v4564_v17 = vadd.f32 %v4560_v26, %v10468_v60  ;;  %v4601_v13 = vsel %vm4598_vm14, %v4600_v49, %v4596_v10  ;;  %v10625_v60 = vld [vmem:[#allocation69_spill] sm:$0xff]  ;;  %vm10669_vm14 = vcmask 654912  }
 0xe10   : > { %v4623_v14 = vmul.f32 %v4601_v13, %v3509_v25  ;;  %v6236_v13 = vld [vmem:[%s6983_s30 + $0x3] sm:$0x1]  ;;  %v10614_v25 = vld [vmem:[#allocation138_spill] sm:$0xff]  ;;  %vm10670_vm6 = vmmov %vm10669_vm14 }
 0xe11   : > { %6690 = vtanh.f32 %v4563_v31  ;;  %v6231_v2 = vmul.f32 -1.442695, %v4564_v17 }
 0xe13   : > { %6692 = vpow2.f32 %v6231_v2 }
 0xe14   : > { %v4542_v63 = vpop.f32.mrf.mxu0  ;;  %v4555_v47 = vpop.f32.mrf.mxu1 }
 0xe15   : > { %v10605_v47 = vld [vmem:[#allocation129_spill] sm:$0xff] }
 0xe17   : > { %v6691_v40 = vpop.eup %6690 }
 0xe18   : > { %v4624_v23 = vmul.f32 %v6691_v40, %v4582_v41  ;;  %v10613_v40 = vld [vmem:[#allocation137_spill] sm:$0xff] }
 0xe19   : > { %v6693_v31 = vpop.eup %6692 }
 0xe1a   : > { %v4625_v17 = vadd.f32 %v4624_v23, %v4623_v14  ;;  %v4607_v3 = vadd.f32 1.0, %v6693_v31  ;;  %v6760_v23 = vld [vmem:[%s9816_s6] ss:$0 sm:$0xff] }
 0xe1c   : > { %4634 = vst [vmem:[#allocation3] sm:$0x3] %v4625_v17  ;;  %6694 = vrcp.f32 %v4607_v3  ;;  %v4619_v35 = vand.u32 2147483648, %v4607_v3  ;;  %v4617_v26 = vand.u32 2147483647, %v4607_v3  ;;  %vm4613_vm8 = vweird.f32 %v4607_v3 }
 0xe1d   : > { %6696 = vtanh.f32 %v4625_v17 }
 0xe1e   : > { %v4620_v34 = vor.u32 1.1754944e-38, %v4619_v35  ;;  %vm4618_vm15 = vcmp.eq.f32.partialorder %v4617_v26, 8.507059e+37 }
 0xe22   : > { %v6695_v1 = vpop.eup %6694 }
 0xe23   : > { %v4609_v4 = vmul.f32 %v6695_v1, %v4607_v3  ;;  %vm4614_vm7 = vweird.f32 %v6695_v1  ;;  %v6697_v2 = vpop.eup %6696 }
 0xe24   : > { %vm4615_vm13 = vmor %vm4613_vm8, %vm4614_vm7  ;;  %vm10672_vm7 = vcmask 720512  }
 0xe25   : > { %v4610_v12 = vsub.f32 1.0, %v4609_v4  ;;  %vm10674_vm8 = vmmov %vm10672_vm7 }
 0xe27   : > { %v4611_v53 = vmul.f32 %v6695_v1, %v4610_v12 }
 0xe29   : > { %v4612_v32 = vadd.f32 %v6695_v1, %v4611_v53 }
 0xe2b   : > { %v4616_v61 = vsel %vm4615_vm13, %v6695_v1, %v4612_v32  ;;  %vm10675_vm13 = vcmask 786112  }
 0xe2c   : > { %v4621_v20 = vsel %vm4618_vm15, %v4620_v34, %v4616_v61  ;;  %vm10676_vm15 = vmmov %vm10675_vm13 }
 0xe2d   : > { %v4627_v10 = vmul.f32 %v6697_v2, %v4621_v20 }
 0xe2f   : > { %v4628_v49 = vpack.c.bf16 %v4627_v10, %v4627_v10  ;;  %4633 = vst [vmem:[#allocation2] sm:$0x3] %v4627_v10 }
 0xe31   : > { %6232 = vst [vmem:[%s6989_s17 + $0x2] sm:$0x1] %v4628_v49  ;;  %v10617_v49 = vld [vmem:[#allocation41_spill] sm:$0xff] }
 0xe36   : > { %v4635_v43 = vld [vmem:[#allocation2] sm:$0x3] }
 0xe37   : > { %v9316_v63 = vpack.c.bf16 %v4635_v43, %v4635_v43 }
 0xe39   : > { %10604 = vst [vmem:[#allocation70_spill] sm:$0xff] %v9316_v63  ;;  %4646 = vmatmul.bf16.vlgmr.msra.gmra.mxu2 %v9316_v63  ;;  %5490 = vmatmul.bf16.vlgmr.msra.gmra.mxu3 %v9316_v63 }
 0xe3a   : > { %5632 = vmatpush.bf16.msra.mxu2 %v8068_v21  ;;  %5645 = vmatpush.bf16.msra.mxu3 %v8070_v38  ;;  %v10607_v21 = vld [vmem:[#allocation131_spill] sm:$0xff]  ;;  %v10608_v38 = vld [vmem:[#allocation132_spill] sm:$0xff] }
 0xe3e   : > { %5633 = vmatpush.bf16.msra.mxu2 %v8088_v50  ;;  %5646 = vmatpush.bf16.msra.mxu3 %v8090_v62  ;;  %v10609_v50 = vld [vmem:[#allocation133_spill] sm:$0xff]  ;;  %v10610_v62 = vld [vmem:[#allocation134_spill] sm:$0xff] }
 0xe42   : > { %5634 = vmatpush.bf16.msra.mxu2 %v8106_v8  ;;  %5647 = vmatpush.bf16.msra.mxu3 %v8108_v37  ;;  %v10611_v8 = vld [vmem:[#allocation135_spill] sm:$0xff]  ;;  %v10612_v37 = vld [vmem:[#allocation136_spill] sm:$0xff] }
 0xe46   : > { %5635 = vmatpush.bf16.msra.mxu2 %v10605_v47  ;;  %5648 = vmatpush.bf16.msra.mxu3 %v10606_v33  ;;  %v10618_v47 = vld [vmem:[#allocation42_spill] sm:$0xff] }
 0xe49   : > { %6241 = vmatmul.msk.bf16.vlgmr.msrb.gmra.mxu2 %vm2028_vm9, %v6236_v13  ;;  %6242 = vmatmul.msk.bf16.vlgmr.msrb.gmra.mxu3 %vm2028_vm9, %v6236_v13  ;;  %v10619_v13 = vld [vmem:[#allocation37_spill] sm:$0xff] }
 0xe4a   : > { %5636 = vmatpush.bf16.msra.mxu2 %v10607_v21  ;;  %5649 = vmatpush.bf16.msra.mxu3 %v10608_v38  ;;  %v10620_v38 = vld [vmem:[#allocation38_spill] sm:$0xff] }
 0xe4e   : > { %5637 = vmatpush.bf16.msra.mxu2 %v10609_v50  ;;  %5650 = vmatpush.bf16.msra.mxu3 %v10610_v62  ;;  %v10621_v62 = vld [vmem:[#allocation43_spill] sm:$0xff] }
 0xe52   : > { %5638 = vmatpush.bf16.msra.mxu2 %v10611_v8  ;;  %5651 = vmatpush.bf16.msra.mxu3 %v10612_v37  ;;  %v10622_v37 = vld [vmem:[#allocation44_spill] sm:$0xff] }
 0xe56   : > { %5639 = vmatpush.bf16.msra.mxu2 %v10613_v40  ;;  %5652 = vmatpush.bf16.msra.mxu3 %v10614_v25  ;;  %v10623_v25 = vld [vmem:[#allocation39_spill] sm:$0xff] }
 0xe59   : > { %5640 = vmatmul.bf16.vlgmr.msra.gmra.mxu2 %v9316_v63  ;;  %5653 = vmatmul.bf16.vlgmr.msra.gmra.mxu3 %v9316_v63 }
 0xebc   : > { %v4647_v41 = vpop.f32.mrf.mxu2  ;;  %v9341_v14 = vpop.f32.mrf.mxu3 }
 0xebd   : > { %v4648_v31 = vadd.f32 %v6760_v23, %v4647_v41 }
 0xebf   : > { %v4651_v17 = vpack.c.bf16 %v4648_v31, %v4648_v31 }
 0xec1   : > { %v4653_v3 = vrot.slane %v4651_v17, 3 }
 0xec3   : > { %v4656_v1 = vsel %vm886_vm0, %v4651_v17, %v4653_v3  ;;  %vm10657_vm0 = vcmask 392512  }
 0xec4   : > { %v6234_v4 = vpack.i.b16 %v4656_v1, %v4656_v1  ;;  %v4649_v12 = vpop.f32.mrf.mxu2  ;;  %v5493_v35 = vpop.f32.mrf.mxu3  ;;  %v4659_v32 = vunpack.i.h.s16 %v4656_v1 }
 0xec5   : > { %v10624_v12 = vld [vmem:[#allocation40_spill] sm:$0xff] }
 0xec6   : > { %v4662_v53 = vperm.slane %v6234_v4, 0  ;;  %v4661_v10 = vpack.i.b16 %v4659_v32, %v4659_v32 }
 0xec8   : > { %v4665_v26 = vpack.i.b16 %v4662_v53, %v4662_v53  ;;  %v4663_v3 = vperm.slane %v4661_v10, 0 }
 0xeca   : > { %v4667_v34 = vperm.slane %v4665_v26, 0 }
 0xecc   : > { %v9347_v61 = vunpack.c.l.bf16 %v4667_v34  ;;  %v9349_v2 = vpop.f32.mrf.mxu2  ;;  %v9351_v20 = vpop.f32.mrf.mxu3 }
 0xecd   : > { %10615 = vst [vmem:[#allocation71_spill] sm:$0xff] %v9349_v2 }
 0xece   : > { %10616 = vst [vmem:[#allocation28_spill] sm:$0xff] %v9351_v20  ;;  %v4678_v43 = vadd.f32 %v10617_v49, %v9347_v61  ;;  %v4679_v33 = vadd.f32 %v10618_v47, %v9347_v61  ;;  %v4674_v21 = vadd.f32 %v10619_v13, %v9347_v61  ;;  %v4675_v50 = vadd.f32 %v10620_v38, %v9347_v61 }
 0xecf   : > { %v4680_v8 = vadd.f32 %v10621_v62, %v9347_v61  ;;  %v4681_v40 = vadd.f32 %v10622_v37, %v9347_v61  ;;  %v4676_v41 = vadd.f32 %v10623_v25, %v9347_v61  ;;  %v4677_v35 = vadd.f32 %v10624_v12, %v9347_v61 }
 0xed0   : > { %v4774_v23 = vmax.f32 %v4678_v43, 0.0  ;;  %v4775_v31 = vmax.f32 %v4679_v33, 0.0  ;;  %v4770_v17 = vmax.f32 %v4674_v21, 0.0  ;;  %v4771_v1 = vmax.f32 %v4675_v50, 0.0 }
 0xed1   : > { %v4776_v4 = vmax.f32 %v4680_v8, 0.0  ;;  %v4777_v34 = vmax.f32 %v4681_v40, 0.0  ;;  %v4772_v13 = vmax.f32 %v4676_v41, 0.0  ;;  %v4669_v21 = vpack.i.b16 %v4663_v3, %v4663_v3 }
 0xed2   : > { %v4806_v53 = vpack.c.bf16 %v4774_v23, %v4774_v23  ;;  %v4807_v26 = vpack.c.bf16 %v4775_v31, %v4775_v31  ;;  %v4802_v32 = vpack.c.bf16 %v4770_v17, %v4770_v17  ;;  %v4803_v49 = vpack.c.bf16 %v4771_v1, %v4771_v1 }
 0xed3   : > { %v4808_v47 = vpack.c.bf16 %v4776_v4, %v4776_v4  ;;  %v4809_v33 = vpack.c.bf16 %v4777_v34, %v4777_v34  ;;  %v4773_v8 = vmax.f32 %v4677_v35, 0.0  ;;  %v4804_v1 = vpack.c.bf16 %v4772_v13, %v4772_v13 }
 0xed4   : > { %v5591_v38 = vpop.f32.mrf.mxu2  ;;  %v5604_v62 = vpop.f32.mrf.mxu3  ;;  %v4838_v37 = vunpack.c.l.bf16 %v4806_v53  ;;  %v4839_v25 = vunpack.c.l.bf16 %v4807_v26  ;;  %v4834_v43 = vunpack.c.l.bf16 %v4802_v32  ;;  %v4835_v10 = vunpack.c.l.bf16 %v4803_v49  ;;  %v10626_v53 = vld [vmem:[#allocation47_spill] sm:$0xff]  ;;  %v10627_v26 = vld [vmem:[#allocation48_spill] sm:$0xff] }
 0xed5   : > { %v4840_v50 = vunpack.c.l.bf16 %v4808_v47  ;;  %v4841_v40 = vunpack.c.l.bf16 %v4809_v33  ;;  %v4805_v4 = vpack.c.bf16 %v4773_v8, %v4773_v8  ;;  %v4684_v35 = vadd.f32 %v10626_v53, %v9347_v61 }
 0xed6   : > { %v4870_v59 = vmul.f32 %v4838_v37, %v10625_v60  ;;  %v4871_v23 = vmul.f32 %v4839_v25, %v10625_v60  ;;  %v4866_v31 = vmul.f32 %v4834_v43, %v10625_v60  ;;  %v4867_v17 = vmul.f32 %v4835_v10, %v10625_v60 }
 0xed7   : > { %v4872_v41 = vmul.f32 %v4840_v50, %v10625_v60  ;;  %v4873_v3 = vmul.f32 %v4841_v40, %v10625_v60  ;;  %v4685_v32 = vadd.f32 %v10627_v26, %v9347_v61  ;;  %v4671_v34 = vperm.slane %v4669_v21, 0  ;;  %v10630_v40 = vld [vmem:[#allocation49_spill] sm:$0xff] }
 0xed8   : > { %v9374_v12 = vpack.c.bf16 %v4871_v23, %v4870_v59  ;;  %v4898_v49 = vpack.c.bf16 %v4867_v17, %v4866_v31  ;;  %v4836_v47 = vunpack.c.l.bf16 %v4804_v1  ;;  %v4837_v38 = vunpack.c.l.bf16 %v4805_v4 }
 0xed9   : > { %v9382_v37 = vpack.c.bf16 %v4873_v3, %v4872_v41  ;;  %v4780_v13 = vmax.f32 %v4684_v35, 0.0  ;;  %v4781_v25 = vmax.f32 %v4685_v32, 0.0  ;;  %v4686_v17 = vadd.f32 %v10630_v40, %v9347_v61 }
 0xeda   : > { %v4918_v62 = vunpack.c.l.bf16 %v9374_v12  ;;  %v4915_v59 = vunpack.c.h.bf16 %v4898_v49  ;;  %v4914_v43 = vunpack.c.l.bf16 %v4898_v49  ;;  %v4868_v33 = vmul.f32 %v4836_v47, %v10625_v60  ;;  %v10631_v49 = vld [vmem:[#allocation50_spill] sm:$0xff] }
 0xedb   : > { %v4869_v10 = vmul.f32 %v4837_v38, %v10625_v60  ;;  %v4812_v23 = vpack.c.bf16 %v4780_v13, %v4780_v13  ;;  %v4813_v31 = vpack.c.bf16 %v4781_v25, %v4781_v25  ;;  %v9395_v3 = vunpack.c.l.bf16 %v4671_v34  ;;  %v10632_v34 = vld [vmem:[#allocation45_spill] sm:$0xff] }
 0xedc   : > { %v9386_v50 = vpop.f32.mrf.mxu2  ;;  %v9388_v8 = vpop.f32.mrf.mxu3  ;;  %v4958_v21 = vsel %vm1216_vm1, %v4918_v62, 0.0  ;;  %v4949_v41 = vsel %vm1216_vm1, %v4915_v59, 0.0  ;;  %v4946_v1 = vsel %vm1216_vm1, %v4914_v43, 0.0  ;;  %v4921_v53 = vunpack.c.h.bf16 %v9382_v37 }
 0xedd   : > { %10628 = vst [vmem:[#allocation29_spill] sm:$0xff] %v9386_v50  ;;  %4959 = vadd.xlane.f32.xlu2 %v4958_v21  ;;  %v4899_v4 = vpack.c.bf16 %v4869_v10, %v4868_v33  ;;  %4950 = vadd.xlane.f32.xlu1 %v4949_v41  ;;  %v4844_v35 = vunpack.c.l.bf16 %v4812_v23  ;;  %v4845_v26 = vunpack.c.l.bf16 %v4813_v31  ;;  %v4687_v47 = vadd.f32 %v10631_v49, %v9347_v61  ;;  %v10633_v21 = vld [vmem:[#allocation46_spill] sm:$0xff]  ;;  %v10634_v31 = vld [vmem:[#allocation53_spill] sm:$0xff] }
 0xede   : > { %10629 = vst [vmem:[#allocation31_spill] sm:$0xff] %v9388_v8  ;;  %4947 = vadd.xlane.f32.xlu0 %v4946_v1  ;;  %v4782_v25 = vmax.f32 %v4686_v17, 0.0  ;;  %v4682_v43 = vadd.f32 %v10632_v34, %v9347_v61  ;;  %v4967_v33 = vsel %vm1216_vm1, %v4921_v53, 0.0  ;;  %v4683_v23 = vadd.f32 %v10633_v21, %v9347_v61 }
 0xedf   : > { %v4916_v32 = vunpack.c.l.bf16 %v4899_v4  ;;  %v4917_v38 = vunpack.c.h.bf16 %v4899_v4  ;;  %v4876_v62 = vmul.f32 %v4844_v35, %v10625_v60  ;;  %v4877_v13 = vmul.f32 %v4845_v26, %v10625_v60  ;;  %v10635_v35 = vld [vmem:[#allocation54_spill] sm:$0xff] }
 0xee0   : > { %v4783_v59 = vmax.f32 %v4687_v47, 0.0  ;;  %v4814_v10 = vpack.c.bf16 %v4782_v25, %v4782_v25  ;;  %v4690_v40 = vadd.f32 %v10634_v31, %v9395_v3  ;;  %v4778_v4 = vmax.f32 %v4682_v43, 0.0 }
 0xee1   : > { %v4952_v41 = vsel %vm1216_vm1, %v4916_v32, 0.0  ;;  %v4691_v17 = vadd.f32 %v10635_v35, %v9395_v3  ;;  %v4955_v47 = vsel %vm1216_vm1, %v4917_v38, 0.0  ;;  %v9413_v34 = vpack.c.bf16 %v4877_v13, %v4876_v62 }
 0xee2   : > { %v4815_v1 = vpack.c.bf16 %v4783_v59, %v4783_v59  ;;  %v4846_v53 = vunpack.c.l.bf16 %v4814_v10  ;;  %v4779_v25 = vmax.f32 %v4683_v23, 0.0  ;;  %v4810_v50 = vpack.c.bf16 %v4778_v4, %v4778_v4 }
 0xee3   : > { %v4786_v8 = vmax.f32 %v4690_v40, 0.0  ;;  %v4787_v31 = vmax.f32 %v4691_v17, 0.0  ;;  %v4919_v32 = vunpack.c.h.bf16 %v9374_v12  ;;  %v4920_v59 = vunpack.c.l.bf16 %v9382_v37  ;;  %v10636_v40 = vld [vmem:[#allocation55_spill] sm:$0xff]  ;;  %v10638_v37 = vld [vmem:[#allocation52_spill] sm:$0xff] }
 0xee4   : > { %v5643_v26 = vpop.f32.mrf.mxu2  ;;  %v5656_v49 = vpop.f32.mrf.mxu3  ;;  %v4847_v21 = vunpack.c.l.bf16 %v4815_v1  ;;  %v4811_v43 = vpack.c.bf16 %v4779_v25, %v4779_v25  ;;  %v4878_v35 = vmul.f32 %v4846_v53, %v10625_v60  ;;  %v4842_v62 = vunpack.c.l.bf16 %v4810_v50  ;;  %v10637_v12 = vld [vmem:[#allocation51_spill] sm:$0xff]  ;;  %v10639_v50 = vld [vmem:[#allocation56_spill] sm:$0xff] }
 0xee5   : > { %4968 = vadd.xlane.f32.xlu2 %v4967_v33  ;;  %4953 = vadd.xlane.f32.xlu1 %v4952_v41  ;;  %v4818_v13 = vpack.c.bf16 %v4786_v8, %v4786_v8  ;;  %v4924_v10 = vunpack.c.l.bf16 %v9413_v34  ;;  %v4819_v23 = vpack.c.bf16 %v4787_v31, %v4787_v31  ;;  %v4692_v1 = vadd.f32 %v10636_v40, %v9395_v3 }
 0xee6   : > { %4956 = vadd.xlane.f32.xlu0 %v4955_v47  ;;  %v4879_v38 = vmul.f32 %v4847_v21, %v10625_v60  ;;  %v4843_v33 = vunpack.c.l.bf16 %v4811_v43  ;;  %v4874_v41 = vmul.f32 %v4842_v62, %v10625_v60  ;;  %v4688_v4 = vadd.f32 %v10637_v12, %v9347_v61 }
 0xee7   : > { %v4689_v17 = vadd.f32 %v10638_v37, %v9347_v61  ;;  %v4693_v8 = vadd.f32 %v10639_v50, %v9395_v3  ;;  %v4961_v49 = vsel %vm1216_vm1, %v4919_v32, 0.0  ;;  %v4850_v53 = vunpack.c.l.bf16 %v4818_v13  ;;  %v10640_v13 = vld [vmem:[#allocation57_spill] sm:$0xff] }
 0xee8   : > { %v4875_v26 = vmul.f32 %v4843_v33, %v10625_v60  ;;  %v4904_v47 = vpack.c.bf16 %v4879_v38, %v4878_v35  ;;  %v4976_v25 = vsel %vm1216_vm1, %v4924_v10, 0.0  ;;  %v4964_v21 = vsel %vm1216_vm1, %v4920_v59, 0.0 }
 0xee9   : > { %v4851_v31 = vunpack.c.l.bf16 %v4819_v23  ;;  %v4788_v43 = vmax.f32 %v4692_v1, 0.0  ;;  %v4784_v40 = vmax.f32 %v4688_v4, 0.0  ;;  %v4785_v12 = vmax.f32 %v4689_v17, 0.0 }
 0xeea   : > { %v4902_v62 = vpack.c.bf16 %v4875_v26, %v4874_v41  ;;  %v4789_v61 = vmax.f32 %v4693_v8, 0.0  ;;  %v4927_v33 = vunpack.c.h.bf16 %v4904_v47  ;;  %v4882_v37 = vmul.f32 %v4850_v53, %v10625_v60  ;;  %v10641_v41 = vld [vmem:[#allocation58_spill] sm:$0xff] }
 0xeeb   : > { %v4883_v32 = vmul.f32 %v4851_v31, %v10625_v60  ;;  %v4820_v35 = vpack.c.bf16 %v4788_v43, %v4788_v43  ;;  %v4694_v10 = vadd.f32 %v10640_v13, %v9395_v3  ;;  %v4816_v1 = vpack.c.bf16 %v4784_v40, %v4784_v40 }
 0xeec   : > { %v4821_v38 = vpack.c.bf16 %v4789_v61, %v4789_v61  ;;  %v4922_v59 = vunpack.c.l.bf16 %v4902_v62  ;;  %v4923_v23 = vunpack.c.h.bf16 %v4902_v62  ;;  %v4817_v50 = vpack.c.bf16 %v4785_v12, %v4785_v12  ;;  %v10642_v62 = vld [vmem:[#allocation59_spill] sm:$0xff] }
 0xeed   : > { %4977 = vadd.xlane.f32.xlu2 %v4976_v25  ;;  %4962 = vadd.xlane.f32.xlu1 %v4961_v49  ;;  %v4695_v4 = vadd.f32 %v10641_v41, %v9395_v3  ;;  %v4985_v17 = vsel %vm1216_vm1, %v4927_v33, 0.0  ;;  %v4790_v26 = vmax.f32 %v4694_v10, 0.0  ;;  %v4906_v8 = vpack.c.bf16 %v4883_v32, %v4882_v37  ;;  %v10643_v33 = vld [vmem:[#allocation61_spill] sm:$0xff]  ;;  %v10644_v32 = vld [vmem:[#allocation62_spill] sm:$0xff] }
 0xeee   : > { %4965 = vadd.xlane.f32.xlu0 %v4964_v21  ;;  %v4852_v49 = vunpack.c.l.bf16 %v4820_v35  ;;  %v4853_v53 = vunpack.c.l.bf16 %v4821_v38  ;;  %v4970_v21 = vsel %vm1216_vm1, %v4922_v59, 0.0  ;;  %v4973_v31 = vsel %vm1216_vm1, %v4923_v23, 0.0 }
 0xeef   : > { %v4791_v25 = vmax.f32 %v4695_v4, 0.0  ;;  %v4848_v43 = vunpack.c.l.bf16 %v4816_v1  ;;  %v4849_v61 = vunpack.c.l.bf16 %v4817_v50  ;;  %v4696_v40 = vadd.f32 %v10642_v62, %v9395_v3  ;;  %v10645_v4 = vld [vmem:[#allocation60_spill] sm:$0xff] }
 0xef0   : > { %v4822_v12 = vpack.c.bf16 %v4790_v26, %v4790_v26  ;;  %v4698_v37 = vadd.f32 %v10643_v33, %v9395_v3  ;;  %v4699_v35 = vadd.f32 %v10644_v32, %v9395_v3  ;;  %v4925_v38 = vunpack.c.h.bf16 %v9413_v34 }
 0xef1   : > { %v4823_v13 = vpack.c.bf16 %v4791_v25, %v4791_v25  ;;  %v4930_v10 = vunpack.c.l.bf16 %v4906_v8  ;;  %v4884_v59 = vmul.f32 %v4852_v49, %v10625_v60  ;;  %v4885_v23 = vmul.f32 %v4853_v53, %v10625_v60 }
 0xef2   : > { %v4926_v1 = vunpack.c.l.bf16 %v4904_v47  ;;  %v4880_v50 = vmul.f32 %v4848_v43, %v10625_v60  ;;  %v4881_v41 = vmul.f32 %v4849_v61, %v10625_v60  ;;  %v4792_v26 = vmax.f32 %v4696_v40, 0.0 }
 0xef3   : > { %v4854_v25 = vunpack.c.l.bf16 %v4822_v12  ;;  %v4795_v62 = vmax.f32 %v4699_v35, 0.0  ;;  %v4994_v34 = vsel %vm1216_vm1, %v4930_v10, 0.0  ;;  %v4907_v33 = vpack.c.bf16 %v4885_v23, %v4884_v59  ;;  %v10646_v35 = vld [vmem:[#allocation63_spill] sm:$0xff] }
 0xef4   : > { %v4979_v49 = vsel %vm1216_vm1, %v4925_v38, 0.0  ;;  %v4982_v53 = vsel %vm1216_vm1, %v4926_v1, 0.0  ;;  %v9458_v47 = vpack.c.bf16 %v4881_v41, %v4880_v50  ;;  %v4824_v61 = vpack.c.bf16 %v4792_v26, %v4792_v26  ;;  %v10647_v38 = vld [vmem:[#allocation64_spill] sm:$0xff] }
 0xef5   : > { %4986 = vadd.xlane.f32.xlu2 %v4985_v17  ;;  %4971 = vadd.xlane.f32.xlu1 %v4970_v21  ;;  %v4697_v17 = vadd.f32 %v10645_v4, %v9395_v3  ;;  %v4855_v21 = vunpack.c.l.bf16 %v4823_v13  ;;  %v4886_v40 = vmul.f32 %v4854_v25, %v10625_v60  ;;  %v4932_v32 = vunpack.c.l.bf16 %v4907_v33 }
 0xef6   : > { %4974 = vadd.xlane.f32.xlu0 %v4973_v31  ;;  %v4794_v31 = vmax.f32 %v4698_v37, 0.0  ;;  %v4827_v37 = vpack.c.bf16 %v4795_v62, %v4795_v62  ;;  %v4700_v10 = vadd.f32 %v10646_v35, %v9395_v3  ;;  %v4701_v59 = vadd.f32 %v10647_v38, %v9395_v3 }
 0xef7   : > { %v4793_v43 = vmax.f32 %v4697_v17, 0.0  ;;  %v4887_v12 = vmul.f32 %v4855_v21, %v10625_v60  ;;  %v4928_v23 = vunpack.c.l.bf16 %v9458_v47  ;;  %v4931_v1 = vunpack.c.h.bf16 %v4906_v8 }
 0xef8   : > { %v4826_v13 = vpack.c.bf16 %v4794_v31, %v4794_v31  ;;  %v4856_v4 = vunpack.c.l.bf16 %v4824_v61  ;;  %v4859_v26 = vunpack.c.l.bf16 %v4827_v37  ;;  %v5000_v25 = vsel %vm1216_vm1, %v4932_v32, 0.0  ;;  %v10649_v32 = vld [vmem:[#allocation68_spill] sm:$0xff] }
 0xef9   : > { %v4825_v50 = vpack.c.bf16 %v4793_v43, %v4793_v43  ;;  %v4908_v41 = vpack.c.bf16 %v4887_v12, %v4886_v40  ;;  %v4796_v21 = vmax.f32 %v4700_v10, 0.0  ;;  %v4797_v31 = vmax.f32 %v4701_v59, 0.0 }
 0xefa   : > { %v4858_v17 = vunpack.c.l.bf16 %v4826_v13  ;;  %v4988_v62 = vsel %vm1216_vm1, %v4928_v23, 0.0  ;;  %v4888_v8 = vmul.f32 %v4856_v4, %v10625_v60  ;;  %v4891_v61 = vmul.f32 %v4859_v26, %v10625_v60  ;;  %v10648_v13 = vld [vmem:[#allocation67_spill] sm:$0xff] }
 0xefb   : > { %v4935_v35 = vunpack.c.h.bf16 %v4908_v41  ;;  %v4828_v40 = vpack.c.bf16 %v4796_v21, %v4796_v21  ;;  %v4829_v12 = vpack.c.bf16 %v4797_v31, %v4797_v31  ;;  %v4704_v37 = vadd.f32 %v10648_v13, %v9395_v3 }
 0xefc   : > { %v4890_v43 = vmul.f32 %v4858_v17, %v10625_v60  ;;  %v4705_v10 = vadd.f32 %v10649_v32, %v9395_v3  ;;  %v4934_v38 = vunpack.c.l.bf16 %v4908_v41 }
 0xefd   : > { %4995 = vadd.xlane.f32.xlu2 %v4994_v34  ;;  %4980 = vadd.xlane.f32.xlu1 %v4979_v49  ;;  %v4997_v34 = vsel %vm1216_vm1, %v4931_v1, 0.0  ;;  %v4857_v49 = vunpack.c.l.bf16 %v4825_v50  ;;  %v10651_v1 = vld [vmem:[#allocation66_spill] sm:$0xff]  ;;  %v5009_v17 = vsel %vm1216_vm1, %v4935_v35, 0.0  ;;  %v4861_v21 = vunpack.c.l.bf16 %v4829_v12 }
 0xefe   : > { %4983 = vadd.xlane.f32.xlu0 %v4982_v53  ;;  %v4933_v53 = vunpack.c.h.bf16 %v4907_v33  ;;  %v10650_v33 = vld [vmem:[#allocation65_spill] sm:$0xff]  ;;  %v4703_v50 = vadd.f32 %v10651_v1, %v9395_v3  ;;  %v4910_v26 = vpack.c.bf16 %v4891_v61, %v4890_v43  ;;  %v4800_v31 = vmax.f32 %v4704_v37, 0.0 }
 0xeff   : > { %v4889_v59 = vmul.f32 %v4857_v49, %v10625_v60  ;;  %v4702_v23 = vadd.f32 %v10650_v33, %v9395_v3 }
 0xf00   : > { %v5003_v4 = vsel %vm1216_vm1, %v4933_v53, 0.0  ;;  %v4799_v13 = vmax.f32 %v4703_v50, 0.0  ;;  %v4938_v32 = vunpack.c.l.bf16 %v4910_v26  ;;  %v4893_v53 = vmul.f32 %v4861_v21, %v10625_v60 }
 0xf01   : > { %v4909_v41 = vpack.c.bf16 %v4889_v59, %v4888_v8  ;;  %v4798_v49 = vmax.f32 %v4702_v23, 0.0  ;;  %v4832_v33 = vpack.c.bf16 %v4800_v31, %v4800_v31  ;;  %v4939_v21 = vunpack.c.h.bf16 %v4910_v26 }
 0xf02   : > { %v4831_v12 = vpack.c.bf16 %v4799_v13, %v4799_v13  ;;  %v5018_v37 = vsel %vm1216_vm1, %v4938_v32, 0.0 }
 0xf03   : > { %v4936_v43 = vunpack.c.l.bf16 %v4909_v41  ;;  %v4937_v61 = vunpack.c.h.bf16 %v4909_v41  ;;  %v5021_v13 = vsel %vm1216_vm1, %v4939_v21, 0.0 }
 0xf04   : > { %v4863_v50 = vunpack.c.l.bf16 %v4831_v12 }
 0xf05   : > { %5001 = vadd.xlane.f32.xlu2 %v5000_v25  ;;  %4989 = vadd.xlane.f32.xlu1 %v4988_v62  ;;  %v4860_v25 = vunpack.c.l.bf16 %v4828_v40  ;;  %v4801_v62 = vmax.f32 %v4705_v10, 0.0  ;;  %v4830_v40 = vpack.c.bf16 %v4798_v49, %v4798_v49  ;;  %v5012_v59 = vsel %vm1216_vm1, %v4936_v43, 0.0 }
 0xf06   : > { %4998 = vadd.xlane.f32.xlu0 %v4997_v34  ;;  %v5006_v34 = vsel %vm1216_vm1, %v4934_v38, 0.0  ;;  %v4864_v38 = vunpack.c.l.bf16 %v4832_v33  ;;  %v5015_v23 = vsel %vm1216_vm1, %v4937_v61, 0.0 }
 0xf07   : > { %v4892_v3 = vmul.f32 %v4860_v25, %v10625_v60  ;;  %v4833_v35 = vpack.c.bf16 %v4801_v62, %v4801_v62  ;;  %v4862_v1 = vunpack.c.l.bf16 %v4830_v40  ;;  %v4929_v40 = vunpack.c.h.bf16 %v9458_v47 }
 0xf09   : > { %v4911_v10 = vpack.c.bf16 %v4893_v53, %v4892_v3  ;;  %v4865_v8 = vunpack.c.l.bf16 %v4833_v35  ;;  %v4894_v62 = vmul.f32 %v4862_v1, %v10625_v60  ;;  %v10652_v1 = vld [vmem:[#allocation72_spill] sm:$0xff] }
 0xf0b   : > { %v4897_v25 = vmul.f32 %v4865_v8, %v10625_v60  ;;  %v4940_v31 = vunpack.c.l.bf16 %v4911_v10 }
 0xf0d   : > { %5010 = vadd.xlane.f32.xlu2 %v5009_v17  ;;  %5004 = vadd.xlane.f32.xlu1 %v5003_v4  ;;  %v4941_v4 = vunpack.c.h.bf16 %v4911_v10  ;;  %v4896_v17 = vmul.f32 %v4864_v38, %v10625_v60  ;;  %v5024_v32 = vsel %vm1216_vm1, %v4940_v31, 0.0 }
 0xf0e   : > { %5007 = vadd.xlane.f32.xlu0 %v5006_v34  ;;  %v4895_v34 = vmul.f32 %v4863_v50, %v10625_v60 }
 0xf0f   : > { %v5027_v41 = vsel %vm1216_vm1, %v4941_v4, 0.0  ;;  %v4913_v49 = vpack.c.bf16 %v4897_v25, %v4896_v17 }
 0xf10   : > { %v4912_v3 = vpack.c.bf16 %v4895_v34, %v4894_v62 }
 0xf11   : > { %v4944_v53 = vunpack.c.l.bf16 %v4913_v49  ;;  %v4945_v61 = vunpack.c.h.bf16 %v4913_v49 }
 0xf12   : > { %v4942_v33 = vunpack.c.l.bf16 %v4912_v3  ;;  %v4943_v35 = vunpack.c.h.bf16 %v4912_v3 }
 0xf13   : > { %v5036_v26 = vsel %vm1216_vm1, %v4944_v53, 0.0  ;;  %v5039_v12 = vsel %vm1216_vm1, %v4945_v61, 0.0 }
 0xf14   : > { %v5030_v43 = vsel %vm1216_vm1, %v4942_v33, 0.0  ;;  %v5033_v60 = vsel %vm1216_vm1, %v4943_v35, 0.0 }
 0xf15   : > { %5019 = vadd.xlane.f32.xlu2 %v5018_v37  ;;  %5013 = vadd.xlane.f32.xlu1 %v5012_v59  ;;  %v4991_v37 = vsel %vm1216_vm1, %v4929_v40, 0.0 }
 0xf16   : > { %5016 = vadd.xlane.f32.xlu0 %v5015_v23 }
 0xf1d   : > { %5028 = vadd.xlane.f32.xlu2 %v5027_v41  ;;  %5022 = vadd.xlane.f32.xlu1 %v5021_v13 }
 0xf1e   : > { %5025 = vadd.xlane.f32.xlu0 %v5024_v32 }
 0xf25   : > { %5037 = vadd.xlane.f32.xlu2 %v5036_v26  ;;  %5031 = vadd.xlane.f32.xlu1 %v5030_v43 }
 0xf26   : > { %5034 = vadd.xlane.f32.xlu0 %v5033_v60 }
 0xf2d   : > { %5040 = vadd.xlane.f32.xlu1 %v5039_v12 }
 0xf2e   : > { %4992 = vadd.xlane.f32.xlu0 %v4991_v37 }
 0xf50   : > { %v4960_v10 = vpop.xlane.xlu2 %4959  ;;  %v4951_v38 = vpop.xlane.xlu1 %4950 }
 0xf51   : > { %v4948_v8 = vpop.xlane.xlu0 %4947  ;;  %v5043_v59 = vadd.f32 %v4951_v38, %v10347_v55 }
 0xf52   : > { %v5042_v23 = vadd.f32 %v4948_v8, %v10347_v55 }
 0xf53   : > { %v5107_v50 = vperm.slane %v5043_v59, %v10652_v1 }
 0xf54   : > { %v5106_v4 = vperm.slane %v5042_v23, %v10349_v30 }
 0xf56   : > { %v5108_v17 = vsel %vm1386_vm2, %v5107_v50, %v5106_v4  ;;  %v10653_v4 = vld [vmem:[#allocation73_spill] sm:$0xff] }
 0xf58   : > { %v4969_v47 = vpop.xlane.xlu2 %4968  ;;  %v4954_v25 = vpop.xlane.xlu1 %4953 }
 0xf59   : > { %v4957_v21 = vpop.xlane.xlu0 %4956  ;;  %v5044_v40 = vadd.f32 %v4954_v25, %v10347_v55 }
 0xf5a   : > { %v5045_v23 = vadd.f32 %v4957_v21, %v10347_v55 }
 0xf5b   : > { %v5109_v2 = vperm.slane %v5044_v40, %v10653_v4  ;;  %v10654_v40 = vld [vmem:[#allocation75_spill] sm:$0xff] }
 0xf5c   : > { %v5111_v20 = vperm.slane %v5045_v23, %v10501_v46  ;;  %v10655_v23 = vld [vmem:[#allocation76_spill] sm:$0xff] }
 0xf5d   : > { %v5110_v21 = vsel %vm1390_vm3, %v5109_v2, %v5108_v17 }
 0xf60   : > { %v9508_v31 = vpop.xlane.xlu2 %4977  ;;  %v4963_v62 = vpop.xlane.xlu1 %4962 }
 0xf61   : > { %v4966_v34 = vpop.xlane.xlu0 %4965 }
 0xf68   : > { %v9510_v41 = vpop.xlane.xlu2 %4986  ;;  %v4972_v49 = vpop.xlane.xlu1 %4971 }
 0xf69   : > { %v4975_v13 = vpop.xlane.xlu0 %4974 }
 0xf70   : > { %v4996_v32 = vpop.xlane.xlu2 %4995  ;;  %v9512_v3 = vpop.xlane.xlu1 %4980 }
 0xf71   : > { %v9514_v53 = vpop.xlane.xlu0 %4983  ;;  %v5058_v60 = vadd.f32 %v4996_v32, %v10347_v55 }
 0xf73   : > { %v5137_v50 = vperm.slane %v5058_v60, %v10349_v30 }
 0xf78   : > { %v5002_v33 = vpop.xlane.xlu2 %5001  ;;  %v9516_v35 = vpop.xlane.xlu1 %4989 }
 0xf79   : > { %v4999_v26 = vpop.xlane.xlu0 %4998  ;;  %v5060_v12 = vadd.f32 %v5002_v33, %v10347_v55 }
 0xf7a   : > { %v5059_v43 = vadd.f32 %v4999_v26, %v10347_v55 }
 0xf7b   : > { %v5140_v26 = vperm.slane %v5060_v12, %v10653_v4 }
 0xf7c   : > { %v5138_v8 = vperm.slane %v5059_v43, %v10652_v1  ;;  %v5047_v1 = vadd.f32 %v4963_v62, %v10347_v55  ;;  %v5112_v62 = vsel %vm1394_vm4, %v5111_v20, %v5110_v21  ;;  %v5049_v20 = vadd.f32 %v4969_v47, %v10347_v55  ;;  %v10662_v47 = vld [vmem:[#allocation79_spill] sm:$0xff] }
 0xf7e   : > { %v5139_v25 = vsel %vm1386_vm2, %v5138_v8, %v5137_v50  ;;  %vm10658_vm2 = vmmov %vm10657_vm0 }
 0xf7f   : > { %v5141_v60 = vsel %vm1390_vm3, %v5140_v26, %v5139_v25  ;;  %v10656_v26 = vld [vmem:[#allocation77_spill] sm:$0xff]  ;;  %vm10660_vm3 = vcmask 458112  }
 0xf80   : > { %v5011_v61 = vpop.xlane.xlu2 %5010  ;;  %v5005_v37 = vpop.xlane.xlu1 %5004 }
 0xf81   : > { %v5008_v38 = vpop.xlane.xlu0 %5007  ;;  %v5061_v59 = vadd.f32 %v5005_v37, %v10347_v55  ;;  %v5046_v37 = vadd.f32 %v4960_v10, %v10347_v55  ;;  %v5063_v8 = vadd.f32 %v5011_v61, %v10347_v55  ;;  %v5115_v10 = vperm.slane %v5047_v1, %v10655_v23 }
 0xf82   : > { %v5062_v32 = vadd.f32 %v5008_v38, %v10347_v55 }
 0xf83   : > { %v5142_v33 = vperm.slane %v5061_v59, %v10501_v46  ;;  %v5048_v46 = vadd.f32 %v4966_v34, %v10347_v55  ;;  %v5113_v17 = vperm.slane %v5046_v37, %v10654_v40  ;;  %v5146_v25 = vperm.slane %v5063_v8, %v10655_v23 }
 0xf84   : > { %v5144_v63 = vperm.slane %v5062_v32, %v10654_v40  ;;  %v5050_v34 = vadd.f32 %v4972_v49, %v10347_v55 }
 0xf85   : > { %v5143_v38 = vsel %vm1394_vm4, %v5142_v33, %v5141_v60  ;;  %v5114_v61 = vsel %vm1398_vm5, %v5113_v17, %v5112_v62  ;;  %v5117_v33 = vperm.slane %v5048_v46, %v10656_v26  ;;  %v10659_v60 = vld [vmem:[#allocation78_spill] sm:$0xff]  ;;  %vm10661_vm4 = vmmov %vm10660_vm3 }
 0xf86   : > { %v5145_v50 = vsel %vm1398_vm5, %v5144_v63, %v5143_v38  ;;  %v5116_v1 = vsel %vm10657_vm0, %v5115_v10, %v5114_v61  ;;  %v5051_v38 = vadd.f32 %v4975_v13, %v10347_v55  ;;  %v5121_v46 = vperm.slane %v5050_v34, %v10662_v47 }
 0xf87   : > { %v5147_v21 = vsel %vm10658_vm2, %v5146_v25, %v5145_v50  ;;  %v5118_v49 = vsel %vm10661_vm4, %v5117_v33, %v5116_v1  ;;  %v5119_v23 = vperm.slane %v5049_v20, %v10659_v60  ;;  %vm10663_vm5 = vcmask 523712   ;;  %v10668_v33 = vld [vmem:[#allocation81_spill] sm:$0xff] }
 0xf88   : > { %v5020_v43 = vpop.xlane.xlu2 %5019  ;;  %v5014_v12 = vpop.xlane.xlu1 %5013  ;;  %vm10665_vm10 = vmmov %vm10663_vm5  ;;  %vm10678_vm0 = vcmask 851712  }
 0xf89   : > { %v5017_v4 = vpop.xlane.xlu0 %5016  ;;  %v5064_v59 = vadd.f32 %v5014_v12, %v10347_v55  ;;  %v5066_v40 = vadd.f32 %v5020_v43, %v10347_v55  ;;  %v5120_v50 = vsel %vm10665_vm10, %v5119_v23, %v5118_v49  ;;  %v5055_v23 = vadd.f32 %v9510_v41, %v10347_v55  ;;  %vm10679_vm2 = vmmov %vm10678_vm0 }
 0xf8a   : > { %v5065_v2 = vadd.f32 %v5017_v4, %v10347_v55  ;;  %v5122_v25 = vsel %vm10666_vm11, %v5121_v46, %v5120_v50  ;;  %vm10686_vm11 = vcmask 1048512  }
 0xf8b   : > { %v5148_v32 = vperm.slane %v5064_v59, %v10656_v26  ;;  %v5152_v43 = vperm.slane %v5066_v40, %v10662_v47  ;;  %v5053_v26 = vadd.f32 %v9512_v3, %v10347_v55 }
 0xf8c   : > { %v5150_v37 = vperm.slane %v5065_v2, %v10659_v60  ;;  %v10664_v2 = vld [vmem:[#allocation80_spill] sm:$0xff] }
 0xf8d   : > { %v5149_v63 = vsel %vm10660_vm3, %v5148_v32, %v5147_v21  ;;  %v5123_v13 = vperm.slane %v5051_v38, %v10664_v2  ;;  %v5052_v32 = vadd.f32 %v9508_v31, %v10347_v55  ;;  %v5054_v21 = vadd.f32 %v9514_v53, %v10347_v55 }
 0xf8e   : > { %v5151_v10 = vsel %vm10663_vm5, %v5150_v37, %v5149_v63  ;;  %v10671_v63 = vld [vmem:[#allocation82_spill] sm:$0xff]  ;;  %vm10681_vm3 = vcmask 917312   ;;  %vm10684_vm5 = vcmask 982912  }
 0xf8f   : > { %v5153_v61 = vsel %vm10667_vm12, %v5152_v43, %v5151_v10  ;;  %v5124_v3 = vsel %vm10670_vm6, %v5123_v13, %v5122_v25  ;;  %v5127_v40 = vperm.slane %v5053_v26, %v10671_v63  ;;  %vm10682_vm4 = vmmov %vm10681_vm3  ;;  %vm10689_vm6 = vcmp.ge.s32.totalorder %v10349_v30, 16 }
 0xf90   : > { %v5023_v12 = vpop.xlane.xlu1 %5022  ;;  %v5029_v59 = vpop.xlane.xlu2 %5028  ;;  %vm10685_vm10 = vmmov %vm10684_vm5 }
 0xf91   : > { %v5026_v4 = vpop.xlane.xlu0 %5025  ;;  %v5067_v8 = vadd.f32 %v5023_v12, %v10347_v55  ;;  %v5069_v1 = vadd.f32 %v5029_v59, %v10347_v55  ;;  %v10673_v59 = vld [vmem:[#allocation84_spill] sm:$0xff]  ;;  %vm10687_vm12 = vmmov %vm10686_vm11 }
 0xf92   : > { %v5068_v62 = vadd.f32 %v5026_v4, %v10347_v55  ;;  %v5125_v4 = vperm.slane %v5052_v32, %v10668_v33  ;;  %v5129_v46 = vperm.slane %v5054_v21, %v10673_v59  ;;  %v10680_v32 = vld [vmem:[#allocation83_spill] sm:$0xff] }
 0xf93   : > { %v5154_v17 = vperm.slane %v5067_v8, %v10664_v2  ;;  %v5158_v8 = vperm.slane %v5069_v1, %v10671_v63 }
 0xf94   : > { %v5156_v34 = vperm.slane %v5068_v62, %v10668_v33  ;;  %v5126_v53 = vsel %vm10674_vm8, %v5125_v4, %v5124_v3  ;;  %v5056_v62 = vadd.f32 %v9516_v35, %v10347_v55 }
 0xf95   : > { %v5155_v20 = vsel %vm10669_vm14, %v5154_v17, %v5153_v61  ;;  %v5128_v10 = vsel %vm10675_vm13, %v5127_v40, %v5126_v53  ;;  %v10677_v17 = vld [vmem:[#allocation85_spill] sm:$0xff]  ;;  %vm10688_vm14 = vcmask 1041409  }
 0xf96   : > { %v5157_v38 = vsel %vm10672_vm7, %v5156_v34, %v5155_v20  ;;  %v5130_v26 = vsel %vm10679_vm2, %v5129_v46, %v5128_v10  ;;  %v5133_v25 = vperm.slane %v5056_v62, %v10680_v32  ;;  %v5131_v35 = vperm.slane %v5055_v23, %v10677_v17 }
 0xf97   : > { %v5159_v2 = vsel %vm10676_vm15, %v5158_v8, %v5157_v38  ;;  %vm10690_vm7 = vcmask 1041408  }
 0xf98   : > { %v5032_v60 = vpop.xlane.xlu1 %5031  ;;  %v5038_v47 = vpop.xlane.xlu2 %5037  ;;  %v5132_v21 = vsel %vm10682_vm4, %v5131_v35, %v5130_v26  ;;  %vm10691_vm8 = vmmov %vm10690_vm7  ;;  %v10697_v26 = vld [vmem:[#allocation94_spill] sm:$0xff] }
 0xf99   : > { %v5035_v37 = vpop.xlane.xlu0 %5034  ;;  %v5070_v31 = vadd.f32 %v5032_v60, %v10347_v55  ;;  %v5072_v13 = vadd.f32 %v5038_v47, %v10347_v55  ;;  %v10683_v60 = vld [vmem:[#allocation86_spill] sm:$0xff]  ;;  %v5134_v63 = vsel %vm10684_vm5, %v5133_v25, %v5132_v21  ;;  %v10699_v25 = vld [vmem:[#allocation93_spill] sm:$0xff] }
 0xf9a   : > { %v5071_v12 = vadd.f32 %v5035_v37, %v10347_v55  ;;  %v10702_v35 = vld [vmem:[#allocation98_spill] sm:$0xff] }
 0xf9b   : > { %v5160_v49 = vperm.slane %v5070_v31, %v10673_v59  ;;  %v5164_v1 = vperm.slane %v5072_v13, %v10680_v32  ;;  %v10696_v13 = vld [vmem:[#allocation91_spill] sm:$0xff]  ;;  %v10698_v32 = vld [vmem:[#allocation100_spill] sm:$0xff] }
 0xf9c   : > { %v5162_v43 = vperm.slane %v5071_v12, %v10677_v17  ;;  %v10693_v17 = vld [vmem:[#allocation89_spill] sm:$0xff] }
 0xf9d   : > { %v5161_v50 = vsel %vm10678_vm0, %v5160_v49, %v5159_v2  ;;  %v10692_v2 = vld [vmem:[#allocation90_spill] sm:$0xff] }
 0xf9e   : > { %v5163_v41 = vsel %vm10681_vm3, %v5162_v43, %v5161_v50  ;;  %v10694_v43 = vld [vmem:[#allocation88_spill] sm:$0xff]  ;;  %vm10719_vm3 = vmmov %vm10688_vm14 }
 0xf9f   : > { %v5165_v40 = vsel %vm10685_vm10, %v5164_v1, %v5163_v41  ;;  %v10695_v50 = vld [vmem:[#allocation96_spill] sm:$0xff]  ;;  %v10703_v41 = vld [vmem:[#allocation102_spill] sm:$0xff] }
 0xfa0   : > { %v5041_v61 = vpop.xlane.xlu1 %5040 }
 0xfa1   : > { %v4993_v33 = vpop.xlane.xlu0 %4992  ;;  %v5073_v34 = vadd.f32 %v5041_v61, %v10347_v55  ;;  %v10700_v61 = vld [vmem:[#allocation97_spill] sm:$0xff] }
 0xfa2   : > { %v5057_v20 = vadd.f32 %v4993_v33, %v10347_v55  ;;  %v10701_v33 = vld [vmem:[#allocation92_spill] sm:$0xff] }
 0xfa3   : > { %v5166_v37 = vperm.slane %v5073_v34, %v10683_v60 }
 0xfa4   : > { %v5135_v3 = vperm.slane %v5057_v20, %v10683_v60 }
 0xfa5   : > { %v5167_v12 = vsel %vm10687_vm12, %v5166_v37, %v5165_v40  ;;  %v10705_v40 = vld [vmem:[#allocation95_spill] sm:$0xff] }
 0xfa6   : > { %v5136_v31 = vsel %vm10686_vm11, %v5135_v3, %v5134_v63  ;;  %v10704_v63 = vld [vmem:[#allocation99_spill] sm:$0xff] }
 0xfa7   : > { %v5168_v4 = vsel %vm10688_vm14, %v5167_v12, %v5136_v31 }
 0xfa8   : > { %v5170_v55 = vsel %vm10689_vm6, -1e+30, %v5168_v4 }
 0xfa9   : > { %v5171_v38 = vsel %vm10690_vm7, %v5170_v55, -inf }
 0xfaa   : > { %5172 = vmax.xlane.f32.xlu2 %v5171_v38 }
0x101d   : > { %v5173_v8 = vpop.xlane.xlu2 %5172 }
0x101e   : > { %v5174_v59 = vsub.f32 %v5170_v55, %v5173_v8 }
0x1020   : > { %v5175_v49 = vmul.f32 1.442695, %v5174_v59 }
0x1022   : > { %6698 = vpow2.f32 %v5175_v49 }
0x1028   : > { %v6699_v47 = vpop.eup %6698 }
0x1029   : > { %v5177_v53 = vsel %vm10691_vm8, %v6699_v47, 0.0 }
0x102a   : > { %5178 = vadd.xlane.f32.xlu0 %v5177_v53 }
0x109d   : > { %v5179_v46 = vpop.xlane.xlu0 %5178 }
0x109e   : > { %6700 = vrcp.f32 %v5179_v46 }
0x10a4   : > { %v6701_v62 = vpop.eup %6700 }
0x10a5   : > { %v5181_v23 = vmul.f32 %v6701_v62, %v6699_v47 }
0x10a7   : > { %v9617_v10 = vperm.slane %v5181_v23, 0  ;;  %v9619_v30 = vperm.slane %v5181_v23, 1  ;;  %6249 = vst [vmem:[%s7023_s26 + $0x6] sm:$0x3] %v5181_v23 }
0x10a9   : > { %5284 = vperm.xlu0 %6592, %v9619_v30   ;;  %5193 = vperm.xlu2 %6591, %v9617_v10  }
0x10aa   : > { %5187 = vperm.xlu1 %6590, %v9617_v10  }
0x10b1   : > { %6599 = vset.pattern.permute.xlu0 %v10692_v2  ;;  %6594 = vset.pattern.permute.xlu2 %v10693_v17 }
0x10b2   : > { %6593 = vset.pattern.permute.xlu1 %v10694_v43 }
0x10b9   : > { %5308 = vperm.xlu0 %6599, %v9619_v30   ;;  %5199 = vperm.xlu2 %6594, %v9617_v10  }
0x10ba   : > { %5290 = vperm.xlu1 %6593, %v9619_v30  }
0x10c1   : > { %6604 = vset.pattern.permute.xlu0 %v10695_v50  ;;  %6596 = vset.pattern.permute.xlu2 %v10696_v13 }
0x10c2   : > { %6595 = vset.pattern.permute.xlu1 %v10693_v17 }
0x10c9   : > { %5229 = vperm.xlu0 %6604, %v9617_v10   ;;  %5205 = vperm.xlu2 %6596, %v9617_v10  }
0x10ca   : > { %5296 = vperm.xlu1 %6595, %v9619_v30  }
0x10d1   : > { %6609 = vset.pattern.permute.xlu0 %v10697_v26  ;;  %6598 = vset.pattern.permute.xlu2 %v10692_v2  ;;  %v10707_v2 = vld [vmem:[#allocation22_spill] sm:$0xff] }
0x10d2   : > { %6597 = vset.pattern.permute.xlu1 %v10696_v13 }
0x10d9   : > { %5338 = vperm.xlu0 %6609, %v9619_v30   ;;  %5211 = vperm.xlu2 %6598, %v9617_v10  }
0x10da   : > { %5302 = vperm.xlu1 %6597, %v9619_v30  }
0x10e1   : > { %6614 = vset.pattern.permute.xlu0 %v10698_v32  ;;  %6601 = vset.pattern.permute.xlu2 %v10699_v25 }
0x10e2   : > { %6600 = vset.pattern.permute.xlu1 %v10699_v25 }
0x10e9   : > { %5259 = vperm.xlu0 %6614, %v9617_v10   ;;  %5314 = vperm.xlu2 %6601, %v9619_v30  }
0x10ea   : > { %5217 = vperm.xlu1 %6600, %v9617_v10  }
0x10f1   : > { %6619 = vset.pattern.permute.xlu0 %v10700_v61  ;;  %6603 = vset.pattern.permute.xlu2 %v10701_v33 }
0x10f2   : > { %6602 = vset.pattern.permute.xlu1 %v10701_v33 }
0x10f9   : > { %5368 = vperm.xlu0 %6619, %v9619_v30   ;;  %5320 = vperm.xlu2 %6603, %v9619_v30  }
0x10fa   : > { %5223 = vperm.xlu1 %6602, %v9617_v10  }
0x1101   : > { %6606 = vset.pattern.permute.xlu2 %v10702_v35  ;;  %6622 = vset.pattern.permute.xlu0 %v10703_v41 }
0x1102   : > { %6605 = vset.pattern.permute.xlu1 %v10695_v50  ;;  %v10709_v50 = vld [vmem:[#allocation23_spill] sm:$0xff] }
0x1103   : > { %v5194_v34 = vpop.permute.xlu2 %5193 }
0x1104   : > { %v5377_v20 = vmul.f32 %v10560_v5, %v5194_v34  ;;  %v10706_v5 = vld [vmem:[#allocation101_spill] sm:$0xff] }
0x1106   : > { %v5409_v60 = vsel %vm1216_vm1, %v5377_v20, 0.0 }
0x1109   : > { %5235 = vperm.xlu2 %6606, %v9617_v10  }
0x110a   : > { %5326 = vperm.xlu1 %6605, %v9619_v30  }
0x1111   : > { %6608 = vset.pattern.permute.xlu2 %v10697_v26 }
0x1112   : > { %6607 = vset.pattern.permute.xlu1 %v10702_v35 }
0x1119   : > { %5241 = vperm.xlu2 %6608, %v9617_v10  }
0x111a   : > { %5332 = vperm.xlu1 %6607, %v9619_v30  }
0x111b   : > { %v5285_v46 = vpop.permute.xlu0 %5284 }
0x111c   : > { %v5188_v1 = vpop.permute.xlu1 %5187 }
0x111d   : > { %v5376_v21 = vmul.f32 %v10561_v11, %v5188_v1  ;;  %v5200_v11 = vpop.permute.xlu2 %5199 }
0x111f   : > { %v5408_v37 = vsel %vm1216_vm1, %v5376_v21, 0.0 }
0x1120   : > { %v9668_v3 = vadd.f32 %v5409_v60, %v5408_v37  ;;  %v10711_v60 = vld [vmem:[#allocation25_spill] sm:$0xff] }
0x1121   : > { %6611 = vset.pattern.permute.xlu2 %v10704_v63 }
0x1122   : > { %6610 = vset.pattern.permute.xlu1 %v10704_v63 }
0x1125   : > { %v5206_v31 = vpop.permute.xlu2 %5205 }
0x1129   : > { %5344 = vperm.xlu2 %6611, %v9619_v30  }
0x112a   : > { %5247 = vperm.xlu1 %6610, %v9617_v10  }
0x112b   : > { %v5309_v17 = vpop.permute.xlu0 %5308 }
0x112c   : > { %v5291_v12 = vpop.permute.xlu1 %5290  ;;  %v5396_v37 = vmul.f32 %v10711_v60, %v5309_v17 }
0x1131   : > { %6613 = vset.pattern.permute.xlu2 %v10705_v40 }
0x1132   : > { %6612 = vset.pattern.permute.xlu1 %v10705_v40 }
0x1133   : > { %v5212_v4 = vpop.permute.xlu2 %5211 }
0x1139   : > { %5350 = vperm.xlu2 %6613, %v9619_v30  }
0x113a   : > { %5253 = vperm.xlu1 %6612, %v9617_v10  }
0x113b   : > { %v5230_v1 = vpop.permute.xlu0 %5229 }
0x113c   : > { %v5297_v55 = vpop.permute.xlu1 %5296 }
0x113d   : > { %v5394_v13 = vmul.f32 %v10709_v50, %v5297_v55  ;;  %v10712_v55 = vld [vmem:[#allocation26_spill] sm:$0xff] }
0x1141   : > { %6616 = vset.pattern.permute.xlu2 %v10706_v5 }
0x1142   : > { %6615 = vset.pattern.permute.xlu1 %v10698_v32 }
0x1143   : > { %v5315_v38 = vpop.permute.xlu2 %5314 }
0x1149   : > { %5265 = vperm.xlu2 %6616, %v9617_v10  }
0x114a   : > { %5356 = vperm.xlu1 %6615, %v9619_v30  }
0x114c   : > { %v5303_v8 = vpop.permute.xlu1 %5302 }
0x1151   : > { %6618 = vset.pattern.permute.xlu2 %v10700_v61  ;;  %v10710_v61 = vld [vmem:[#allocation24_spill] sm:$0xff] }
0x1152   : > { %6617 = vset.pattern.permute.xlu1 %v10706_v5  ;;  %v5395_v33 = vmul.f32 %v10710_v61, %v5303_v8 }
0x1153   : > { %v5321_v59 = vpop.permute.xlu2 %5320 }
0x1154   : > { %v5450_v20 = vsel %vm1216_vm1, %v5395_v33, 0.0 }
0x1159   : > { %5271 = vperm.xlu2 %6618, %v9617_v10  }
0x115a   : > { %5362 = vperm.xlu1 %6617, %v9619_v30  }
0x115c   : > { %v5218_v49 = vpop.permute.xlu1 %5217 }
0x1161   : > { %6621 = vset.pattern.permute.xlu2 %v10703_v41 }
0x1162   : > { %6620 = vset.pattern.permute.xlu1 %v10703_v41  ;;  %v5448_v41 = vsel %vm1216_vm1, %v5394_v13, 0.0  ;;  %v5339_v13 = vpop.permute.xlu0 %5338 }
0x1163   : > { %v9690_v47 = vpop.permute.xlu2 %5235 }
0x1169   : > { %5374 = vperm.xlu2 %6621, %v9619_v30   ;;  %v5393_v30 = vmul.f32 %v10707_v2, %v5291_v12  ;;  %v5452_v12 = vsel %vm1216_vm1, %v5396_v37, 0.0  ;;  %v10713_v2 = vld [vmem:[#allocation27_spill] sm:$0xff] }
0x116a   : > { %5277 = vperm.xlu1 %6620, %v9617_v10   ;;  %v10708_v10 = vld [vmem:[#allocation21_spill] sm:$0xff]  ;;  %v5398_v8 = vmul.f32 %v10713_v2, %v5321_v59 }
0x116b   : > { %v5392_v43 = vmul.f32 %v10708_v10, %v5285_v46  ;;  %v5446_v25 = vsel %vm1216_vm1, %v5393_v30, 0.0  ;;  %v5397_v46 = vmul.f32 %v10712_v55, %v5315_v38  ;;  %v5378_v10 = vmul.f32 %v10562_v39, %v5200_v11  ;;  %v6761_v38 = vld [vmem:[%s9820_s10] ss:$0 sm:$0xff] }
0x116c   : > { %v5224_v53 = vpop.permute.xlu1 %5223  ;;  %v5456_v61 = vsel %vm1216_vm1, %v5398_v8, 0.0  ;;  %v5492_v59 = vadd.f32 %v6761_v38, %v9341_v14 }
0x116d   : > { %v5445_v35 = vsel %vm1216_vm1, %v5392_v43, 0.0  ;;  %v5379_v43 = vmul.f32 %v10563_v56, %v5206_v31  ;;  %v5454_v17 = vsel %vm1216_vm1, %v5397_v46, 0.0  ;;  %v5381_v31 = vmul.f32 %v10565_v9, %v5218_v49  ;;  %v5260_v9 = vpop.permute.xlu0 %5259 }
0x116e   : > { %v5447_v34 = vadd.f32 %v5446_v25, %v5445_v35  ;;  %v5380_v25 = vmul.f32 %v10564_v7, %v5212_v4  ;;  %v5382_v35 = vmul.f32 %v10566_v57, %v5224_v53  ;;  %v5383_v57 = vmul.f32 %v10567_v15, %v5230_v1 }
0x116f   : > { %v5413_v7 = vsel %vm1216_vm1, %v5379_v43, 0.0  ;;  %v5417_v37 = vsel %vm1216_vm1, %v5381_v31, 0.0 }
0x1170   : > { %v5449_v21 = vadd.f32 %v5448_v41, %v5447_v34  ;;  %v6235_v41 = vmul.f32 -1.442695, %v5492_v59  ;;  %v10715_v59 = vld [vmem:[#allocation34_spill] sm:$0xff] }
0x1172   : > { %v5451_v63 = vadd.f32 %v5450_v20, %v5449_v21  ;;  %v10714_v21 = vld [vmem:[#allocation30_spill] sm:$0xff]  ;;  %6702 = vpow2.f32 %v6235_v41 }
0x1173   : > { %v9692_v62 = vpop.permute.xlu2 %5241  ;;  %v5401_v60 = vmul.f32 %v10714_v21, %v5339_v13  ;;  %v5421_v13 = vsel %vm1216_vm1, %v5383_v57, 0.0 }
0x1174   : > { %v5453_v30 = vadd.f32 %v5452_v12, %v5451_v63  ;;  %v5419_v12 = vsel %vm1216_vm1, %v5382_v35, 0.0 }
0x1175   : > { %v5462_v53 = vsel %vm1216_vm1, %v5401_v60, 0.0 }
0x1176   : > { %v5455_v39 = vadd.f32 %v5454_v17, %v5453_v30 }
0x1178   : > { %v6703_v17 = vpop.eup %6702 }
0x117c   : > { %v5327_v23 = vpop.permute.xlu1 %5326 }
0x117d   : > { %v5399_v50 = vmul.f32 %v10426_v28, %v5327_v23  ;;  %v5411_v28 = vsel %vm1216_vm1, %v5378_v10, 0.0  ;;  %v5457_v23 = vadd.f32 %v5456_v61, %v5455_v39 }
0x117f   : > { %v5458_v4 = vsel %vm1216_vm1, %v5399_v50, 0.0  ;;  %v5384_v50 = vmul.f32 %v10568_v45, %v9690_v47 }
0x1180   : > { %v5459_v20 = vadd.f32 %v5458_v4, %v5457_v23 }
0x1181   : > { %v5423_v61 = vsel %vm1216_vm1, %v5384_v50, 0.0 }
0x1183   : > { %v5345_v26 = vpop.permute.xlu2 %5344 }
0x1184   : > { %v5402_v2 = vmul.f32 %v10432_v54, %v5345_v26  ;;  %v5369_v54 = vpop.permute.xlu0 %5368 }
0x1185   : > { %v5406_v38 = vmul.f32 %v10437_v27, %v5369_v54 }
0x1186   : > { %v5464_v15 = vsel %vm1216_vm1, %v5402_v2, 0.0 }
0x118c   : > { %v5333_v32 = vpop.permute.xlu1 %5332 }
0x118d   : > { %v5400_v33 = vmul.f32 %v10427_v16, %v5333_v32  ;;  %v5412_v16 = vadd.f32 %v5411_v28, %v9668_v3  ;;  %v5415_v32 = vsel %vm1216_vm1, %v5380_v25, 0.0  ;;  %v5385_v25 = vmul.f32 %v10570_v19, %v9692_v62 }
0x118e   : > { %v5498_v28 = vadd.f32 1.0, %v6703_v17 }
0x118f   : > { %v5460_v14 = vsel %vm1216_vm1, %v5400_v33, 0.0  ;;  %v5414_v34 = vadd.f32 %v5413_v7, %v5412_v16  ;;  %v5425_v19 = vsel %vm1216_vm1, %v5385_v25, 0.0 }
0x1190   : > { %v5461_v49 = vadd.f32 %v5460_v14, %v5459_v20  ;;  %6704 = vrcp.f32 %v5498_v28  ;;  %vm5504_vm15 = vweird.f32 %v5498_v28 }
0x1191   : > { %v5416_v63 = vadd.f32 %v5415_v32, %v5414_v34  ;;  %v5472_v32 = vsel %vm1216_vm1, %v5406_v38, 0.0 }
0x1192   : > { %v5463_v10 = vadd.f32 %v5462_v53, %v5461_v49 }
0x1193   : > { %v5351_v40 = vpop.permute.xlu2 %5350  ;;  %v5418_v3 = vadd.f32 %v5417_v37, %v5416_v63  ;;  %v10718_v37 = vld [vmem:[#allocation19_spill] sm:$0xff] }
0x1194   : > { %v5403_v8 = vmul.f32 %v10433_v0, %v5351_v40  ;;  %v5465_v0 = vadd.f32 %v5464_v15, %v5463_v10 }
0x1195   : > { %v5420_v30 = vadd.f32 %v5419_v12, %v5418_v3 }
0x1196   : > { %v5466_v1 = vsel %vm1216_vm1, %v5403_v8, 0.0  ;;  %v6705_v49 = vpop.eup %6704 }
0x1197   : > { %v5422_v26 = vadd.f32 %v5421_v13, %v5420_v30  ;;  %v5467_v45 = vadd.f32 %v5466_v1, %v5465_v0  ;;  %vm5505_vm13 = vweird.f32 %v6705_v49 }
0x1198   : > { %vm5506_vm0 = vmor %vm5504_vm15, %vm5505_vm13 }
0x1199   : > { %v5424_v7 = vadd.f32 %v5423_v61, %v5422_v26  ;;  %v5510_v26 = vand.u32 2147483648, %v5498_v28 }
0x119b   : > { %v5426_v16 = vadd.f32 %v5425_v19, %v5424_v7  ;;  %v10728_v7 = vld [vmem:[#allocation126_spill] sm:$0xff] }
0x119c   : > { %v5248_v5 = vpop.permute.xlu1 %5247 }
0x119d   : > { %v5386_v40 = vmul.f32 %v10571_v51, %v5248_v5 }
0x119f   : > { %v5427_v51 = vsel %vm1216_vm1, %v5386_v40, 0.0 }
0x11a0   : > { %v5428_v35 = vadd.f32 %v5427_v51, %v5426_v16  ;;  %v10730_v51 = vld [vmem:[#allocation128_spill] sm:$0xff] }
0x11a3   : > { %v9717_v11 = vpop.permute.xlu2 %5265 }
0x11ac   : > { %v5254_v56 = vpop.permute.xlu1 %5253 }
0x11ad   : > { %v5387_v62 = vmul.f32 %v10573_v52, %v5254_v56  ;;  %v10716_v56 = vld [vmem:[#allocation17_spill] sm:$0xff] }
0x11ae   : > { %v5388_v14 = vmul.f32 %v10716_v56, %v5260_v9 }
0x11af   : > { %v5429_v27 = vsel %vm1216_vm1, %v5387_v62, 0.0 }
0x11b0   : > { %v5430_v34 = vadd.f32 %v5429_v27, %v5428_v35  ;;  %v5431_v21 = vsel %vm1216_vm1, %v5388_v14, 0.0  ;;  %v10733_v27 = vld [vmem:[#allocation71_spill] sm:$0xff]  ;;  %v10735_v14 = vld [vmem:[#allocation29_spill] sm:$0xff] }
0x11b2   : > { %v5432_v12 = vadd.f32 %v5431_v21, %v5430_v34  ;;  %v10736_v34 = vld [vmem:[#allocation141_spill] sm:$0xff] }
0x11b3   : > { %v5272_v55 = vpop.permute.xlu2 %5271 }
0x11b4   : > { %v5390_v63 = vmul.f32 %v10718_v37, %v5272_v55 }
0x11b6   : > { %v5435_v53 = vsel %vm1216_vm1, %v5390_v63, 0.0 }
0x11bc   : > { %v5357_v46 = vpop.permute.xlu1 %5356 }
0x11bd   : > { %v5404_v43 = vmul.f32 %v10434_v36, %v5357_v46  ;;  %v5500_v46 = vmul.f32 %v6705_v49, %v5498_v28 }
0x11bf   : > { %v5468_v36 = vsel %vm1216_vm1, %v5404_v43, 0.0  ;;  %v5501_v43 = vsub.f32 1.0, %v5500_v46 }
0x11c0   : > { %v5469_v31 = vadd.f32 %v5468_v36, %v5467_v45  ;;  %v5508_v36 = vand.u32 2147483647, %v5498_v28  ;;  %v5511_v45 = vor.u32 1.1754944e-38, %v5510_v26  ;;  %v10721_v28 = vld [vmem:[#allocation118_spill] sm:$0xff] }
0x11c1   : > { %v5502_v25 = vmul.f32 %v6705_v49, %v5501_v43 }
0x11c2   : > { %vm5509_vm2 = vcmp.eq.f32.partialorder %v5508_v36, 8.507059e+37 }
0x11c3   : > { %v5375_v47 = vpop.permute.xlu2 %5374  ;;  %v5503_v54 = vadd.f32 %v6705_v49, %v5502_v25 }
0x11c4   : > { %v5407_v5 = vmul.f32 %v10572_v42, %v5375_v47  ;;  %v10717_v42 = vld [vmem:[#allocation18_spill] sm:$0xff] }
0x11c5   : > { %v5389_v60 = vmul.f32 %v10717_v42, %v9717_v11  ;;  %v5507_v61 = vsel %vm5506_vm0, %v6705_v49, %v5503_v54 }
0x11c6   : > { %v5474_v41 = vsel %vm1216_vm1, %v5407_v5, 0.0  ;;  %v5512_v19 = vsel %vm5509_vm2, %v5511_v45, %v5507_v61  ;;  %v10731_v5 = vld [vmem:[#allocation70_spill] sm:$0xff] }
0x11c7   : > { %v5433_v57 = vsel %vm1216_vm1, %v5389_v60, 0.0  ;;  %v10737_v60 = vld [vmem:[#allocation140_spill] sm:$0xff] }
0x11c8   : > { %v5434_v9 = vadd.f32 %v5433_v57, %v5432_v12 }
0x11ca   : > { %v5436_v10 = vadd.f32 %v5435_v53, %v5434_v9 }
0x11cc   : > { %v5363_v33 = vpop.permute.xlu1 %5362 }
0x11cd   : > { %v5405_v39 = vmul.f32 %v10715_v59, %v5363_v33 }
0x11cf   : > { %v5470_v4 = vsel %vm1216_vm1, %v5405_v39, 0.0  ;;  %v10720_v39 = vld [vmem:[#allocation116_spill] sm:$0xff] }
0x11d0   : > { %v5471_v23 = vadd.f32 %v5470_v4, %v5469_v31  ;;  %v10729_v31 = vld [vmem:[#allocation127_spill] sm:$0xff] }
0x11d2   : > { %v5473_v52 = vadd.f32 %v5472_v32, %v5471_v23  ;;  %v10732_v23 = vld [vmem:[#allocation28_spill] sm:$0xff] }
0x11d4   : > { %v5475_v20 = vadd.f32 %v5474_v41, %v5473_v52  ;;  %v10734_v52 = vld [vmem:[#allocation31_spill] sm:$0xff] }
0x11d6   : > { %v5476_v3 = vrot.slane %v5475_v20, 4 }
0x11d8   : > { %v5477_v2 = vadd.f32 %v5476_v3, %v5475_v20 }
0x11da   : > { %v5478_v11 = vrot.slane %v5477_v2, 2 }
0x11dc   : > { %v5278_v8 = vpop.permute.xlu1 %5277  ;;  %v5479_v15 = vadd.f32 %v5478_v11, %v5477_v2 }
0x11dd   : > { %v5391_v30 = vmul.f32 %v10577_v58, %v5278_v8 }
0x11de   : > { %v5480_v0 = vrot.slane %v5479_v15, 1 }
0x11df   : > { %v5437_v50 = vsel %vm1216_vm1, %v5391_v30, 0.0 }
0x11e0   : > { %v5438_v13 = vadd.f32 %v5437_v50, %v5436_v10  ;;  %v5481_v47 = vadd.f32 %v5480_v0, %v5479_v15 }
0x11e2   : > { %v5439_v55 = vrot.slane %v5438_v13, 4 }
0x11e4   : > { %v5440_v1 = vadd.f32 %v5439_v55, %v5438_v13 }
0x11e6   : > { %v5441_v17 = vrot.slane %v5440_v1, 2 }
0x11e8   : > { %v5442_v40 = vadd.f32 %v5441_v17, %v5440_v1 }
0x11ea   : > { %v5443_v58 = vrot.slane %v5442_v40, 1 }
0x11ec   : > { %v5444_v33 = vadd.f32 %v5443_v58, %v5442_v40 }
0x11ee   : > { %v5516_v38 = vsel %vm10719_vm3, %v5481_v47, %v5444_v33  ;;  %v10738_v33 = vld [vmem:[#allocation142_spill] sm:$0xff] }
0x11ef   : > { %v5518_v62 = vmul.f32 %v5516_v38, %v5512_v19  ;;  %v10739_v19 = vld [vmem:[#allocation139_spill] sm:$0xff] }
0x11f1   : > { %v5521_v59 = vpack.c.bf16 %v5518_v62, %v5518_v62 }
0x11f3   : > { %6237 = vmatmul.msk.bf16.vlgmr.msrb.gmra.mxu0 %vm1216_vm1, %v5521_v59  ;;  %6238 = vmatmul.msk.bf16.vlgmr.msrb.gmra.mxu1 %vm1216_vm1, %v5521_v59 }
0x11f4   : > { %5613 = vmatpush.bf16.msrb.mxu0 %v10439_v24  ;;  %5626 = vmatpush.bf16.msrb.mxu1 %v10440_v29  ;;  %v10722_v24 = vld [vmem:[#allocation120_spill] sm:$0xff] }
0x11f5   : > { %v6762_v29 = vld [vmem:[%s6983_s30 + $0x3] sm:$0x1] }
0x1203   : > { %6239 = vmatmul.msk.bf16.vlgmr.msra.gmra.mxu0 %vm1216_vm1, %v5521_v59  ;;  %6240 = vmatmul.msk.bf16.vlgmr.msra.gmra.mxu1 %vm1216_vm1, %v5521_v59 }
0x1204   : > { %5658 = vmatpush.bf16.msra.mxu0 %v10441_v22  ;;  %5671 = vmatpush.bf16.msra.mxu1 %v10579_v18  ;;  %v10723_v22 = vld [vmem:[#allocation121_spill] sm:$0xff]  ;;  %v10724_v18 = vld [vmem:[#allocation122_spill] sm:$0xff] }
0x1208   : > { %5659 = vmatpush.bf16.msra.mxu0 %v10580_v6  ;;  %5672 = vmatpush.bf16.msra.mxu1 %v10581_v48  ;;  %v10725_v6 = vld [vmem:[#allocation123_spill] sm:$0xff]  ;;  %v10726_v48 = vld [vmem:[#allocation124_spill] sm:$0xff] }
0x120c   : > { %5660 = vmatpush.bf16.msra.mxu0 %v10582_v44  ;;  %5673 = vmatpush.bf16.msra.mxu1 %v10720_v39  ;;  %v10727_v44 = vld [vmem:[#allocation125_spill] sm:$0xff] }
0x1210   : > { %5661 = vmatpush.bf16.msra.mxu0 %v10721_v28  ;;  %5674 = vmatpush.bf16.msra.mxu1 %v10722_v24 }
0x1213   : > { %6243 = vmatmul.msk.bf16.vlgmr.msrb.gmra.mxu0 %vm2028_vm9, %v6762_v29  ;;  %6244 = vmatmul.msk.bf16.vlgmr.msrb.gmra.mxu1 %vm2028_vm9, %v6762_v29 }
0x1214   : > { %5662 = vmatpush.bf16.msra.mxu0 %v10723_v22  ;;  %5675 = vmatpush.bf16.msra.mxu1 %v10724_v18 }
0x1218   : > { %5663 = vmatpush.bf16.msra.mxu0 %v10725_v6  ;;  %5676 = vmatpush.bf16.msra.mxu1 %v10726_v48 }
0x121c   : > { %5664 = vmatpush.bf16.msra.mxu0 %v10727_v44  ;;  %5677 = vmatpush.bf16.msra.mxu1 %v10728_v7 }
0x1220   : > { %5665 = vmatpush.bf16.msra.mxu0 %v10729_v31  ;;  %5678 = vmatpush.bf16.msra.mxu1 %v10730_v51 }
0x1223   : > { %5666 = vmatmul.bf16.vlgmr.msra.gmra.mxu0 %v10731_v5  ;;  %5679 = vmatmul.bf16.vlgmr.msra.gmra.mxu1 %v10731_v5  ;;  %v4636_v5 = vld [vmem:[#allocation3] sm:$0x3] }
0x1270   : > { %v5534_v4 = vpop.f32.mrf.mxu0  ;;  %v5547_v16 = vpop.f32.mrf.mxu1 }
0x1271   : > { %v5603_v32 = vadd.f32 %v10732_v23, %v5547_v16  ;;  %v5590_v35 = vadd.f32 %v10733_v27, %v5534_v4 }
0x1273   : > { %v5685_v56 = vadd.f32 %v10734_v52, %v5603_v32  ;;  %v5684_v41 = vadd.f32 %v10735_v14, %v5590_v35 }
0x1275   : > { %v5689_v20 = vadd.f32 %v5685_v56, %v10736_v34  ;;  %v5688_v37 = vadd.f32 %v5684_v41, %v10737_v60 }
0x1277   : > { %v6246_v63 = vmul.f32 -1.442695, %v5689_v20  ;;  %v6245_v49 = vmul.f32 -1.442695, %v5688_v37 }
0x1278   : > { %v5536_v21 = vpop.f32.mrf.mxu0  ;;  %v5549_v42 = vpop.f32.mrf.mxu1 }
0x1279   : > { %6706 = vpow2.f32 %v6246_v63 }
0x127a   : > { %6708 = vpow2.f32 %v6245_v49 }
0x127f   : > { %v6707_v46 = vpop.eup %6706 }
0x1280   : > { %v5560_v12 = vpop.f32.mrf.mxu0  ;;  %v5573_v3 = vpop.f32.mrf.mxu1  ;;  %v5714_v2 = vadd.f32 1.0, %v6707_v46 }
0x1281   : > { %v6709_v57 = vpop.eup %6708 }
0x1282   : > { %v5695_v8 = vadd.f32 1.0, %v6709_v57  ;;  %6710 = vrcp.f32 %v5714_v2  ;;  %v5726_v47 = vand.u32 2147483648, %v5714_v2  ;;  %vm5720_vm9 = vweird.f32 %v5714_v2 }
0x1283   : > { %v5724_v39 = vand.u32 2147483647, %v5714_v2 }
0x1284   : > { %6712 = vrcp.f32 %v5695_v8  ;;  %v5707_v28 = vand.u32 2147483648, %v5695_v8  ;;  %vm5701_vm10 = vweird.f32 %v5695_v8  ;;  %v5705_v29 = vand.u32 2147483647, %v5695_v8 }
0x1285   : > { %v5727_v18 = vor.u32 1.1754944e-38, %v5726_v47  ;;  %vm5725_vm12 = vcmp.eq.f32.partialorder %v5724_v39, 8.507059e+37 }
0x1286   : > { %v5708_v7 = vor.u32 1.1754944e-38, %v5707_v28  ;;  %vm5706_vm14 = vcmp.eq.f32.partialorder %v5705_v29, 8.507059e+37 }
0x1288   : > { %v5562_v53 = vpop.f32.mrf.mxu0  ;;  %v5575_v9 = vpop.f32.mrf.mxu1 }
0x1289   : > { %v6711_v43 = vpop.eup %6710 }
0x128a   : > { %v6713_v50 = vpop.eup %6712  ;;  %v5716_v11 = vmul.f32 %v6711_v43, %v5714_v2  ;;  %vm5721_vm1 = vweird.f32 %v6711_v43 }
0x128b   : > { %v5697_v13 = vmul.f32 %v6713_v50, %v5695_v8  ;;  %vm5702_vm4 = vweird.f32 %v6713_v50  ;;  %vm5722_vm5 = vmor %vm5720_vm9, %vm5721_vm1 }
0x128c   : > { %v5717_v15 = vsub.f32 1.0, %v5716_v11  ;;  %vm5703_vm11 = vmor %vm5701_vm10, %vm5702_vm4 }
0x128d   : > { %v5698_v1 = vsub.f32 1.0, %v5697_v13 }
0x128e   : > { %v5718_v17 = vmul.f32 %v6711_v43, %v5717_v15 }
0x128f   : > { %v5699_v40 = vmul.f32 %v6713_v50, %v5698_v1 }
0x1290   : > { %v5615_v30 = vpop.f32.mrf.mxu0  ;;  %v5628_v10 = vpop.f32.mrf.mxu1  ;;  %v5719_v45 = vadd.f32 %v6711_v43, %v5718_v17 }
0x1291   : > { %v5616_v54 = vadd.f32 %v5615_v30, %v5560_v12  ;;  %v5629_v26 = vadd.f32 %v5628_v10, %v5573_v3  ;;  %v5700_v59 = vadd.f32 %v6713_v50, %v5699_v40 }
0x1292   : > { %v5723_v22 = vsel %vm5722_vm5, %v6711_v43, %v5719_v45 }
0x1293   : > { %v5704_v6 = vsel %vm5703_vm11, %v6713_v50, %v5700_v59  ;;  %v5728_v31 = vsel %vm5725_vm12, %v5727_v18, %v5723_v22 }
0x1294   : > { %v5709_v4 = vsel %vm5706_vm14, %v5708_v7, %v5704_v6  ;;  %v5750_v16 = vmul.f32 %v5728_v31, %v4636_v5 }
0x1298   : > { %v5617_v55 = vpop.f32.mrf.mxu0  ;;  %v5630_v25 = vpop.f32.mrf.mxu1 }
0x12a0   : > { %v5667_v0 = vpop.f32.mrf.mxu0  ;;  %v5680_v36 = vpop.f32.mrf.mxu1 }
0x12a1   : > { %v5686_v58 = vadd.f32 %v5667_v0, %v5616_v54  ;;  %v5687_v61 = vadd.f32 %v5680_v36, %v5629_v26 }
0x12a3   : > { %v5690_v38 = vadd.f32 %v5686_v58, %v10738_v33  ;;  %v5691_v62 = vadd.f32 %v5687_v61, %v10739_v19 }
0x12a5   : > { %6714 = vtanh.f32 %v5690_v38  ;;  %v6247_v24 = vmul.f32 -1.442695, %v5691_v62 }
0x12a7   : > { %6716 = vpow2.f32 %v6247_v24 }
0x12a8   : > { %v5669_v48 = vpop.f32.mrf.mxu0  ;;  %v5682_v44 = vpop.f32.mrf.mxu1 }
0x12ab   : > { %v6715_v51 = vpop.eup %6714 }
0x12ac   : > { %v5751_v23 = vmul.f32 %v6715_v51, %v5709_v4 }
0x12ad   : > { %v6717_v32 = vpop.eup %6716 }
0x12ae   : > { %v5752_v27 = vadd.f32 %v5751_v23, %v5750_v16  ;;  %v5734_v35 = vadd.f32 1.0, %v6717_v32 }
0x12b0   : > { %5761 = vst [vmem:[#allocation3] sm:$0x3] %v5752_v27  ;;  %6718 = vrcp.f32 %v5734_v35  ;;  %v5746_v41 = vand.u32 2147483648, %v5734_v35  ;;  %v5744_v20 = vand.u32 2147483647, %v5734_v35  ;;  %vm5740_vm7 = vweird.f32 %v5734_v35 }
0x12b1   : > { %6720 = vtanh.f32 %v5752_v27 }
0x12b2   : > { %v5747_v42 = vor.u32 1.1754944e-38, %v5746_v41  ;;  %vm5745_vm13 = vcmp.eq.f32.partialorder %v5744_v20, 8.507059e+37 }
0x12b6   : > { %v6719_v52 = vpop.eup %6718 }
0x12b7   : > { %v5736_v56 = vmul.f32 %v6719_v52, %v5734_v35  ;;  %vm5741_vm6 = vweird.f32 %v6719_v52  ;;  %v6721_v37 = vpop.eup %6720 }
0x12b8   : > { %vm5742_vm8 = vmor %vm5740_vm7, %vm5741_vm6 }
0x12b9   : > { %v5737_v14 = vsub.f32 1.0, %v5736_v56 }
0x12bb   : > { %v5738_v34 = vmul.f32 %v6719_v52, %v5737_v14 }
0x12bd   : > { %v5739_v21 = vadd.f32 %v6719_v52, %v5738_v34 }
0x12bf   : > { %v5743_v60 = vsel %vm5742_vm8, %v6719_v52, %v5739_v21 }
0x12c0   : > { %v5748_v63 = vsel %vm5745_vm13, %v5747_v42, %v5743_v60 }
0x12c1   : > { %v5754_v49 = vmul.f32 %v6721_v37, %v5748_v63 }
0x12c3   : > { %v5755_v12 = vpack.c.bf16 %v5754_v49, %v5754_v49  ;;  %5760 = vst [vmem:[#allocation2] sm:$0x3] %v5754_v49 }
0x12c5   : > { %6248 = vst [vmem:[%s6989_s17 + $0x3] sm:$0x1] %v5755_v12 }
0x12c6 PF: > { %s29_s25 = sadd.s32 1, %s6785_s25   ;;  %s10740_s23 = smov %s6781_s24 }
0x12c7   : > { %p26_p6 = scmp.ge.s32.totalorder %s29_s25, 4   ;;  %s10741_s24 = smov %s10743_s8 }
0x12c9   :  { %28 = sbr.rel (!%p26_p6) target bundleno = 3 (0x3), region = 147 }

</bundles_post_ra>
